<compile_context>
chip_gen: v7x
topology: tpu7x:2x2x1
jax: 0.10.0
libtpu: 0.0.40
codegen_flags: <defaults>
</compile_context>

<pallas_src>
import functools

import jax
import jax.numpy as jnp
from jax import lax
from jax.experimental import pallas as pl
from jax.experimental.pallas import tpu as pltpu

_VMEM = pl.BlockSpec(memory_space=pltpu.MemorySpace.VMEM)   # whole-array block in VMEM
_VMEM_LIMIT = 32 * 1024 * 1024                              # safe on v5e / v6e / v7x


def _round_up(x, m):
    return (x + m - 1) // m * m


def _pick_tile(n, candidates):
    for c in candidates:
        if n % c == 0:
            return c
    return n


# --------------------------------------------------------------------------------------
# Fused Pallas kernel: tiled matmul (K reduction) + BatchNorm(+residual)(+ReLU) epilogue
# --------------------------------------------------------------------------------------
def _mm_bn_kernel(x_ref, w_ref, g_ref, b_ref, *rest, eps, relu, n_rows, has_residual):
    if has_residual:
        r_ref, o_ref, acc_ref = rest
    else:
        o_ref, acc_ref = rest

    k = pl.program_id(1)

    @pl.when(k == 0)
    def _():
        acc_ref[...] = jnp.zeros_like(acc_ref)

    acc_ref[...] += jnp.dot(x_ref[...], w_ref[...],
                            preferred_element_type=jnp.float32)

    @pl.when(k == pl.num_programs(1) - 1)
    def _():
        acc = acc_ref[...]
        inv_m = 1.0 / n_rows
        mean = jnp.sum(acc, axis=0, keepdims=True) * inv_m            # one-pass stats
        ex2 = jnp.sum(acc * acc, axis=0, keepdims=True) * inv_m
        var = jnp.maximum(ex2 - mean * mean, 0.0)                     # biased (train-mode BN)
        y = (acc - mean) * (g_ref[...] * lax.rsqrt(var + eps)) + b_ref[...]
        if has_residual:
            y = y + r_ref[...]
        if relu:
            y = jnp.maximum(y, 0.0)
        o_ref[...] = y


def fused_matmul_bn(patches, wmat, gamma, beta, residual=None, relu=True, eps=1e-5):
    """(M,Kp)bf16 @ (Kp,Cout)bf16 -> f32 acc -> BN(+res)(+ReLU) -> (M,Cout) f32.

    Grid = (Cout//tn, Kp//tk); full M resident per step so per-channel batch stats are
    computed exactly in the accumulator finalize (no extra HBM round trip for BN).
    """
    M, Kp = patches.shape
    Cout = wmat.shape[1]
    tn = _pick_tile(Cout, (256, 128))
    tk = _pick_tile(Kp, (512, 384, 256, 128))
    grid = (Cout // tn, Kp // tk)

    in_specs = [
        pl.BlockSpec((M, tk), lambda j, k: (0, k)),      # activations (im2col patches)
        pl.BlockSpec((tk, tn), lambda j, k: (k, j)),     # packed conv weights
        pl.BlockSpec((1, tn), lambda j, k: (0, j)),      # bn gamma
        pl.BlockSpec((1, tn), lambda j, k: (0, j)),      # bn beta
    ]
    args = [patches, wmat, gamma, beta]
    if residual is not None:
        in_specs.append(pl.BlockSpec((M, tn), lambda j, k: (0, j)))
        args.append(residual)

    kern = functools.partial(_mm_bn_kernel, eps=eps, relu=relu, n_rows=M,
                             has_residual=residual is not None)
    return pl.pallas_call(
        kern,
        out_shape=jax.ShapeDtypeStruct((M, Cout), jnp.float32),
        grid_spec=pltpu.PrefetchScalarGridSpec(
            num_scalar_prefetch=0,
            grid=grid,
            in_specs=in_specs,
            out_specs=pl.BlockSpec((M, tn), lambda j, k: (0, j)),
            scratch_shapes=[pltpu.VMEM((M, tn), jnp.float32)]),
        compiler_params=pltpu.CompilerParams(
            dimension_semantics=("parallel", "arbitrary"),
            vmem_limit_bytes=_VMEM_LIMIT),
    )(*args)


# --------------------------------------------------------------------------------------
# Fused Pallas kernel: encoder.fc (ReLU, Linear, ReLU) + all heads in one concatenated,
# lane-padded matmul (lane-dense stores, single dispatch instead of N tiny ones).
# --------------------------------------------------------------------------------------
def _fc_heads_kernel(x_ref, w1_ref, b1_ref, w2_ref, b2_ref, o_ref):
    feats = jnp.maximum(x_ref[...], 0.0)                         # encoder.fc ReLU
    h = jnp.dot(feats.astype(jnp.bfloat16), w1_ref[...],
                preferred_element_type=jnp.float32) + b1_ref[...]
    h = jnp.maximum(h, 0.0)                                      # encoder.fc ReLU
    y = jnp.dot(h.astype(jnp.bfloat16), w2_ref[...],
                preferred_element_type=jnp.float32) + b2_ref[...]
    o_ref[...] = y


def pallas_fc_heads(feats, fc_w, fc_b, heads_w, heads_b):
    B = feats.shape[0]
    Np = heads_w.shape[1]
    return pl.pallas_call(
        _fc_heads_kernel,
        out_shape=jax.ShapeDtypeStruct((B, Np), jnp.float32),
        in_specs=[_VMEM] * 5,
        out_specs=_VMEM,
        compiler_params=pltpu.CompilerParams(vmem_limit_bytes=_VMEM_LIMIT),
    )(feats, fc_w.astype(jnp.bfloat16), fc_b,
      heads_w.astype(jnp.bfloat16), heads_b)


# --------------------------------------------------------------------------------------
# Glue: im2col, conv+bn helper, maxpool, basic block
# --------------------------------------------------------------------------------------
def im2col(x, kh, kw, stride, pad):
    """x:(B,H,W,C) f32 -> bf16 patches (B*Ho*Wo, kh*kw*C), patch order (kh, kw, C)."""
    x = x.astype(jnp.bfloat16)                          # bf16 operands: halves HBM traffic
    if pad:
        x = jnp.pad(x, ((0, 0), (pad, pad), (pad, pad), (0, 0)))
    B, H, W, C = x.shape
    Ho = (H - kh) // stride + 1
    Wo = (W - kw) // stride + 1
    cols = []
    for i in range(kh):
        for j in range(kw):
            cols.append(x[:, i:i + (Ho - 1) * stride + 1:stride,
                          j:j + (Wo - 1) * stride + 1:stride, :])
    patches = jnp.concatenate(cols, axis=-1)
    return patches.reshape(B * Ho * Wo, kh * kw * C), Ho, Wo


def conv_bn(x, w, gamma, beta, stride, pad, relu=True, residual=None):
    """Conv2d(bias=False)+BatchNorm2d(+residual)(+ReLU) as ONE fused Pallas call."""
    Cout, Cin, kh, kw = w.shape
    B = x.shape[0]
    patches, Ho, Wo = im2col(x, kh, kw, stride, pad)
    M, K = patches.shape
    wmat = jnp.transpose(w, (2, 3, 1, 0)).reshape(kh * kw * Cin, Cout).astype(jnp.bfloat16)
    Kp = _round_up(K, 128)                              # lane-aligned K (27/147/576 -> x128)
    if Kp != K:
        patches = jnp.pad(patches, ((0, 0), (0, Kp - K)))
        wmat = jnp.pad(wmat, ((0, Kp - K), (0, 0)))
    res2d = None if residual is None else residual.reshape(M, Cout)
    y = fused_matmul_bn(patches, wmat, gamma, beta, residual=res2d, relu=relu)
    return y.reshape(B, Ho, Wo, Cout)


def maxpool3x3s2(x):
    # TODO(synk): 3x3/s2 max-pool left as lax.reduce_window glue rather than a Pallas kernel.
    return lax.reduce_window(x, -jnp.inf, lax.max,
                             (1, 3, 3, 1), (1, 2, 2, 1),
                             [(0, 0), (1, 1), (1, 1), (0, 0)])


def basic_block(x, p, prefix, stride, downsample):
    identity = x
    out = conv_bn(x, p[prefix + 'conv1_w'], p[prefix + 'bn1_g'], p[prefix + 'bn1_b'],
                  stride=stride, pad=1, relu=True)
    if downsample:
        identity = conv_bn(x, p[prefix + 'ds_w'], p[prefix + 'ds_g'], p[prefix + 'ds_b'],
                           stride=stride, pad=0, relu=False)
    out = conv_bn(out, p[prefix + 'conv2_w'], p[prefix + 'bn2_g'], p[prefix + 'bn2_b'],
                  stride=1, pad=1, relu=True, residual=identity)
    return out


# --------------------------------------------------------------------------------------
# Model: parameters + forward
# --------------------------------------------------------------------------------------
_LAYER_CFG = [(64, 64, 1), (64, 128, 2), (128, 256, 2), (256, 512, 2)]   # resnet18 layers 1..4


def init_params(key, discrete_cardinality, cont_cardinality, f_size):
    params = {}
    keys = iter(jax.random.split(key, 256))

    def conv_w(name, cout, cin, k):
        scale = 1.0 / (cin * k * k) ** 0.5
        params[name] = (jax.random.normal(next(keys), (cout, cin, k, k), jnp.float32) * scale)

    def bn_p(name, c):
        params[name + '_g'] = jnp.ones((1, c), jnp.float32)
        params[name + '_b'] = jnp.zeros((1, c), jnp.float32)

    def linear_p(name, cin, cout):
        scale = 1.0 / cin ** 0.5
        params[name + '_w'] = (jax.random.normal(next(keys), (cin, cout), jnp.float32) * scale)
        params[name + '_b'] = (jax.random.normal(next(keys), (1, cout), jnp.float32) * scale)

    conv_w('conv1_w', 64, 3, 7)
    bn_p('bn1', 64)
    for li, (cin, cout, stride) in enumerate(_LAYER_CFG):
        for bi in range(2):
            prefix = f'l{li}b{bi}_'
            in_c = cin if bi == 0 else cout
            conv_w(prefix + 'conv1_w', cout, in_c, 3)
            bn_p(prefix + 'bn1', cout)
            conv_w(prefix + 'conv2_w', cout, cout, 3)
            bn_p(prefix + 'bn2', cout)
            if bi == 0 and (stride != 1 or cin != cout):
                conv_w(prefix + 'ds_w', cout, cin, 1)
                bn_p(prefix + 'ds', cout)
    linear_p('fc', 512, f_size)                       # encoder.fc = Sequential(ReLU, Linear, ReLU)
    for i, d in enumerate(discrete_cardinality):
        linear_p(f'head{i}', f_size, d)
    linear_p('cont', f_size, cont_cardinality)
    return params


def celeba_regressor_forward(params, x_nchw, discrete_cardinality):
    x = jnp.transpose(x_nchw, (0, 2, 3, 1)).astype(jnp.float32)     # NCHW -> NHWC
    x = conv_bn(x, params['conv1_w'], params['bn1_g'], params['bn1_b'],
                stride=2, pad=3, relu=True)
    x = maxpool3x3s2(x)
    for li, (cin, cout, stride) in enumerate(_LAYER_CFG):
        for bi in range(2):
            s = stride if bi == 0 else 1
            ds = (bi == 0) and (s != 1 or cin != cout)
            x = basic_block(x, params, f'l{li}b{bi}_', s, ds)

    feats = jnp.mean(x, axis=(1, 2))                                 # global average pool -> (B, 512)

    # Concatenate every head (discrete + continuous) into one lane-padded matrix; single
    # fused Pallas call for ReLU -> Linear(512,f) -> ReLU -> heads.
    nheads = len(discrete_cardinality)
    head_ws = [params[f'head{i}_w'] for i in range(nheads)] + [params['cont_w']]
    head_bs = [params[f'head{i}_b'] for i in range(nheads)] + [params['cont_b']]
    wcat = jnp.concatenate(head_ws, axis=1)
    bcat = jnp.concatenate(head_bs, axis=1)
    total = wcat.shape[1]
    Np = _round_up(total, 128)                                       # lane-dense output stores
    if Np != total:
        wcat = jnp.pad(wcat, ((0, 0), (0, Np - total)))
        bcat = jnp.pad(bcat, ((0, 0), (0, Np - total)))
    out = pallas_fc_heads(feats, params['fc_w'], params['fc_b'], wcat, bcat)

    d_features = []
    off = 0
    for d in discrete_cardinality:
        d_features.append(out[:, off:off + d])
        off += d
    # continuous head slice (out[:, off:off+cont]) is computed in the fused matmul but,
    # exactly like the PyTorch forward, not returned.
    return d_features


# --------------------------------------------------------------------------------------
if __name__ == "__main__":
    discrete_cardinality = [3, 5, 7]
    cont_cardinality = 2
    f_size = 32
    B, C, H, W = 2, 3, 32, 32                                        # small resnet18-compatible input

    root = jax.random.PRNGKey(0)
    k_params, k_x = jax.random.split(root)
    params = init_params(k_params, discrete_cardinality, cont_cardinality, f_size)
    x = jax.random.normal(k_x, (B, C, H, W), jnp.float32)

    fwd = jax.jit(lambda p, xx: celeba_regressor_forward(p, xx, discrete_cardinality))
    d_features = fwd(params, x)
    d_features = jax.block_until_ready(d_features)

    assert len(d_features) == len(discrete_cardinality)
    for out, d in zip(d_features, discrete_cardinality):
        assert out.shape == (B, d), (out.shape, d)
        assert jnp.all(jnp.isfinite(out))
    print("KERNEL_OK")
</pallas_src>

<mosaic_0001>
module attributes {stable_mosaic.version = 11 : i64} {
  func.func @_mm_bn_kernel(%arg0: i32, %arg1: i32, %arg2: memref<512x256xbf16, #tpu.memory_space<vmem>>, %arg3: memref<256x64xbf16, #tpu.memory_space<vmem>>, %arg4: memref<1x64xf32, #tpu.memory_space<vmem>>, %arg5: memref<1x64xf32, #tpu.memory_space<vmem>>, %arg6: memref<512x64xf32, #tpu.memory_space<vmem>>, %arg7: memref<512x64xf32, #tpu.memory_space<vmem>>) attributes {dimension_semantics = [#tpu.dimension_semantics<parallel>, #tpu.dimension_semantics<arbitrary>], iteration_bounds = array<i64: 1, 1>, scalar_prefetch = 0 : i64, scratch_operands = 1 : i64, tpu.core_type = #tpu.core_type<tc>, window_params = [{transform_indices = @transform_0, window_bounds = array<i64: 512, 256>}, {transform_indices = @transform_1, window_bounds = array<i64: 256, 64>}, {transform_indices = @transform_2, window_bounds = array<i64: 1, 64>}, {transform_indices = @transform_3, window_bounds = array<i64: 1, 64>}, {transform_indices = @transform_4, window_bounds = array<i64: 512, 64>}]} {
    %c0_i32 = arith.constant 0 : i32
    %0 = arith.cmpi eq, %arg1, %c0_i32 : i32
    %1 = arith.extui %0 : i1 to i32
    %c0_i32_0 = arith.constant 0 : i32
    %2 = arith.cmpi ne, %1, %c0_i32_0 : i32
    scf.if %2 {
      %cst_10 = arith.constant 0.000000e+00 : f32
      %12 = vector.broadcast %cst_10 : f32 to vector<512x64xf32>
      %c0_11 = arith.constant 0 : index
      %c0_12 = arith.constant 0 : index
      %13 = vector.load %arg7[%c0_11, %c0_12] : memref<512x64xf32, #tpu.memory_space<vmem>>, vector<512x64xf32>
      tpu.vector_store %arg7[%c0_11, %c0_12], %12 {strides = array<i32>} : memref<512x64xf32, #tpu.memory_space<vmem>>, vector<512x64xf32>,
    } else {
    }
    %c0 = arith.constant 0 : index
    %c0_1 = arith.constant 0 : index
    %3 = vector.load %arg7[%c0, %c0_1] : memref<512x64xf32, #tpu.memory_space<vmem>>, vector<512x64xf32>
    %c0_2 = arith.constant 0 : index
    %c0_3 = arith.constant 0 : index
    %4 = vector.load %arg2[%c0_2, %c0_3] : memref<512x256xbf16, #tpu.memory_space<vmem>>, vector<512x256xbf16>
    %c0_4 = arith.constant 0 : index
    %c0_5 = arith.constant 0 : index
    %5 = vector.load %arg3[%c0_4, %c0_5] : memref<256x64xbf16, #tpu.memory_space<vmem>>, vector<256x64xbf16>
    %cst = arith.constant dense<0.000000e+00> : vector<512x64xf32>
    %6 = tpu.matmul %4, %5, %cst {dimension_numbers = #tpu.dot_dimension_numbers<[1], [0], [0], [1], [0, 0, 1, 1], [], []>} : vector<512x256xbf16>, vector<256x64xbf16>, vector<512x64xf32> -> vector<512x64xf32>
    %7 = arith.addf %3, %6 : vector<512x64xf32>
    %c0_6 = arith.constant 0 : index
    %c0_7 = arith.constant 0 : index
    %8 = vector.load %arg7[%c0_6, %c0_7] : memref<512x64xf32, #tpu.memory_space<vmem>>, vector<512x64xf32>
    tpu.vector_store %arg7[%c0_6, %c0_7], %7 {strides = array<i32>} : memref<512x64xf32, #tpu.memory_space<vmem>>, vector<512x64xf32>,
    %c0_i32_8 = arith.constant 0 : i32
    %9 = arith.cmpi eq, %arg1, %c0_i32_8 : i32
    %10 = arith.extui %9 : i1 to i32
    %c0_i32_9 = arith.constant 0 : i32
    %11 = arith.cmpi ne, %10, %c0_i32_9 : i32
    scf.if %11 {
      %c0_10 = arith.constant 0 : index
      %c0_11 = arith.constant 0 : index
      %12 = vector.load %arg7[%c0_10, %c0_11] : memref<512x64xf32, #tpu.memory_space<vmem>>, vector<512x64xf32>
      %cst_12 = arith.constant dense<0.000000e+00> : vector<64xf32>
      %13 = vector.multi_reduction <add>, %12, %cst_12 [0] : vector<512x64xf32> to vector<64xf32>
      %14 = vector.shape_cast %13 : vector<64xf32> to vector<1x64xf32>
      %cst_13 = arith.constant 0.001953125 : f32
      %15 = vector.broadcast %cst_13 : f32 to vector<1x64xf32>
      %16 = arith.mulf %14, %15 : vector<1x64xf32>
      %17 = arith.mulf %12, %12 : vector<512x64xf32>
      %cst_14 = arith.constant dense<0.000000e+00> : vector<64xf32>
      %18 = vector.multi_reduction <add>, %17, %cst_14 [0] : vector<512x64xf32> to vector<64xf32>
      %19 = vector.shape_cast %18 : vector<64xf32> to vector<1x64xf32>
      %cst_15 = arith.constant 0.001953125 : f32
      %20 = vector.broadcast %cst_15 : f32 to vector<1x64xf32>
      %21 = arith.mulf %19, %20 : vector<1x64xf32>
      %22 = arith.mulf %16, %16 : vector<1x64xf32>
      %23 = arith.subf %21, %22 : vector<1x64xf32>
      %cst_16 = arith.constant 0.000000e+00 : f32
      %24 = vector.broadcast %cst_16 : f32 to vector<1x64xf32>
      %25 = arith.maximumf %23, %24 : vector<1x64xf32>
      %26 = vector.broadcast %16 : vector<1x64xf32> to vector<512x64xf32>
      %27 = arith.subf %12, %26 : vector<512x64xf32>
      %c0_17 = arith.constant 0 : index
      %c0_18 = arith.constant 0 : index
      %28 = vector.load %arg4[%c0_17, %c0_18] : memref<1x64xf32, #tpu.memory_space<vmem>>, vector<1x64xf32>
      %cst_19 = arith.constant 9.99999974E-6 : f32
      %29 = vector.broadcast %cst_19 : f32 to vector<1x64xf32>
      %30 = arith.addf %25, %29 : vector<1x64xf32>
      %31 = math.rsqrt %30 : vector<1x64xf32>
      %32 = arith.mulf %28, %31 : vector<1x64xf32>
      %33 = vector.broadcast %32 : vector<1x64xf32> to vector<512x64xf32>
      %34 = arith.mulf %27, %33 : vector<512x64xf32>
      %c0_20 = arith.constant 0 : index
      %c0_21 = arith.constant 0 : index
      %35 = vector.load %arg5[%c0_20, %c0_21] : memref<1x64xf32, #tpu.memory_space<vmem>>, vector<1x64xf32>
      %36 = vector.broadcast %35 : vector<1x64xf32> to vector<512x64xf32>
      %37 = arith.addf %34, %36 : vector<512x64xf32>
      %cst_22 = arith.constant 0.000000e+00 : f32
      %38 = vector.broadcast %cst_22 : f32 to vector<512x64xf32>
      %39 = arith.maximumf %37, %38 : vector<512x64xf32>
      %c0_23 = arith.constant 0 : index
      %c0_24 = arith.constant 0 : index
      %40 = vector.load %arg6[%c0_23, %c0_24] : memref<512x64xf32, #tpu.memory_space<vmem>>, vector<512x64xf32>
      tpu.vector_store %arg6[%c0_23, %c0_24], %39 {strides = array<i32>} : memref<512x64xf32, #tpu.memory_space<vmem>>, vector<512x64xf32>,
    } else {
    }
    return
  }
  func.func @transform_0(%arg0: i32, %arg1: i32) -> (i32, i32) {
    %c0_i32 = arith.constant 0 : i32
    %c0_i32_0 = arith.constant 0 : i32
    return %c0_i32, %arg1 : i32, i32
  }
  func.func @transform_1(%arg0: i32, %arg1: i32) -> (i32, i32) {
    %c0_i32 = arith.constant 0 : i32
    return %arg1, %arg0 : i32, i32
  }
  func.func @transform_2(%arg0: i32, %arg1: i32) -> (i32, i32) {
    %c0_i32 = arith.constant 0 : i32
    %c0_i32_0 = arith.constant 0 : i32
    return %c0_i32, %arg0 : i32, i32
  }
  func.func @transform_3(%arg0: i32, %arg1: i32) -> (i32, i32) {
    %c0_i32 = arith.constant 0 : i32
    %c0_i32_0 = arith.constant 0 : i32
    return %c0_i32, %arg0 : i32, i32
  }
  func.func @transform_4(%arg0: i32, %arg1: i32) -> (i32, i32) {
    %c0_i32 = arith.constant 0 : i32
    %c0_i32_0 = arith.constant 0 : i32
    return %c0_i32, %arg0 : i32, i32
  }
}

module attributes {stable_mosaic.version = 11 : i64} {
  func.func @_mm_bn_kernel(%arg0: i32, %arg1: i32, %arg2: memref<128x128xbf16, #tpu.memory_space<vmem>>, %arg3: memref<128x64xbf16, #tpu.memory_space<vmem>>, %arg4: memref<1x64xf32, #tpu.memory_space<vmem>>, %arg5: memref<1x64xf32, #tpu.memory_space<vmem>>, %arg6: memref<128x64xf32, #tpu.memory_space<vmem>>, %arg7: memref<128x64xf32, #tpu.memory_space<vmem>>) attributes {dimension_semantics = [#tpu.dimension_semantics<parallel>, #tpu.dimension_semantics<arbitrary>], iteration_bounds = array<i64: 1, 5>, scalar_prefetch = 0 : i64, scratch_operands = 1 : i64, tpu.core_type = #tpu.core_type<tc>, window_params = [{transform_indices = @transform_0, window_bounds = array<i64: 128, 128>}, {transform_indices = @transform_1, window_bounds = array<i64: 128, 64>}, {transform_indices = @transform_2, window_bounds = array<i64: 1, 64>}, {transform_indices = @transform_3, window_bounds = array<i64: 1, 64>}, {transform_indices = @transform_4, window_bounds = array<i64: 128, 64>}]} {
    %c0_i32 = arith.constant 0 : i32
    %0 = arith.cmpi eq, %arg1, %c0_i32 : i32
    %1 = arith.extui %0 : i1 to i32
    %c0_i32_0 = arith.constant 0 : i32
    %2 = arith.cmpi ne, %1, %c0_i32_0 : i32
    scf.if %2 {
      %cst_9 = arith.constant 0.000000e+00 : f32
      %12 = vector.broadcast %cst_9 : f32 to vector<128x64xf32>
      %c0_10 = arith.constant 0 : index
      %c0_11 = arith.constant 0 : index
      %13 = vector.load %arg7[%c0_10, %c0_11] : memref<128x64xf32, #tpu.memory_space<vmem>>, vector<128x64xf32>
      tpu.vector_store %arg7[%c0_10, %c0_11], %12 {strides = array<i32>} : memref<128x64xf32, #tpu.memory_space<vmem>>, vector<128x64xf32>,
    } else {
    }
    %c0 = arith.constant 0 : index
    %c0_1 = arith.constant 0 : index
    %3 = vector.load %arg7[%c0, %c0_1] : memref<128x64xf32, #tpu.memory_space<vmem>>, vector<128x64xf32>
    %c0_2 = arith.constant 0 : index
    %c0_3 = arith.constant 0 : index
    %4 = vector.load %arg2[%c0_2, %c0_3] : memref<128x128xbf16, #tpu.memory_space<vmem>>, vector<128x128xbf16>
    %c0_4 = arith.constant 0 : index
    %c0_5 = arith.constant 0 : index
    %5 = vector.load %arg3[%c0_4, %c0_5] : memref<128x64xbf16, #tpu.memory_space<vmem>>, vector<128x64xbf16>
    %cst = arith.constant dense<0.000000e+00> : vector<128x64xf32>
    %6 = tpu.matmul %4, %5, %cst {dimension_numbers = #tpu.dot_dimension_numbers<[1], [0], [0], [1], [0, 0, 1, 1], [], []>} : vector<128x128xbf16>, vector<128x64xbf16>, vector<128x64xf32> -> vector<128x64xf32>
    %7 = arith.addf %3, %6 : vector<128x64xf32>
    %c0_6 = arith.constant 0 : index
    %c0_7 = arith.constant 0 : index
    %8 = vector.load %arg7[%c0_6, %c0_7] : memref<128x64xf32, #tpu.memory_space<vmem>>, vector<128x64xf32>
    tpu.vector_store %arg7[%c0_6, %c0_7], %7 {strides = array<i32>} : memref<128x64xf32, #tpu.memory_space<vmem>>, vector<128x64xf32>,
    %c4_i32 = arith.constant 4 : i32
    %9 = arith.cmpi eq, %arg1, %c4_i32 : i32
    %10 = arith.extui %9 : i1 to i32
    %c0_i32_8 = arith.constant 0 : i32
    %11 = arith.cmpi ne, %10, %c0_i32_8 : i32
    scf.if %11 {
      %c0_9 = arith.constant 0 : index
      %c0_10 = arith.constant 0 : index
      %12 = vector.load %arg7[%c0_9, %c0_10] : memref<128x64xf32, #tpu.memory_space<vmem>>, vector<128x64xf32>
      %cst_11 = arith.constant dense<0.000000e+00> : vector<64xf32>
      %13 = vector.multi_reduction <add>, %12, %cst_11 [0] : vector<128x64xf32> to vector<64xf32>
      %14 = vector.shape_cast %13 : vector<64xf32> to vector<1x64xf32>
      %cst_12 = arith.constant 7.812500e-03 : f32
      %15 = vector.broadcast %cst_12 : f32 to vector<1x64xf32>
      %16 = arith.mulf %14, %15 : vector<1x64xf32>
      %17 = arith.mulf %12, %12 : vector<128x64xf32>
      %cst_13 = arith.constant dense<0.000000e+00> : vector<64xf32>
      %18 = vector.multi_reduction <add>, %17, %cst_13 [0] : vector<128x64xf32> to vector<64xf32>
      %19 = vector.shape_cast %18 : vector<64xf32> to vector<1x64xf32>
      %cst_14 = arith.constant 7.812500e-03 : f32
      %20 = vector.broadcast %cst_14 : f32 to vector<1x64xf32>
      %21 = arith.mulf %19, %20 : vector<1x64xf32>
      %22 = arith.mulf %16, %16 : vector<1x64xf32>
      %23 = arith.subf %21, %22 : vector<1x64xf32>
      %cst_15 = arith.constant 0.000000e+00 : f32
      %24 = vector.broadcast %cst_15 : f32 to vector<1x64xf32>
      %25 = arith.maximumf %23, %24 : vector<1x64xf32>
      %26 = vector.broadcast %16 : vector<1x64xf32> to vector<128x64xf32>
      %27 = arith.subf %12, %26 : vector<128x64xf32>
      %c0_16 = arith.constant 0 : index
      %c0_17 = arith.constant 0 : index
      %28 = vector.load %arg4[%c0_16, %c0_17] : memref<1x64xf32, #tpu.memory_space<vmem>>, vector<1x64xf32>
      %cst_18 = arith.constant 9.99999974E-6 : f32
      %29 = vector.broadcast %cst_18 : f32 to vector<1x64xf32>
      %30 = arith.addf %25, %29 : vector<1x64xf32>
      %31 = math.rsqrt %30 : vector<1x64xf32>
      %32 = arith.mulf %28, %31 : vector<1x64xf32>
      %33 = vector.broadcast %32 : vector<1x64xf32> to vector<128x64xf32>
      %34 = arith.mulf %27, %33 : vector<128x64xf32>
      %c0_19 = arith.constant 0 : index
      %c0_20 = arith.constant 0 : index
      %35 = vector.load %arg5[%c0_19, %c0_20] : memref<1x64xf32, #tpu.memory_space<vmem>>, vector<1x64xf32>
      %36 = vector.broadcast %35 : vector<1x64xf32> to vector<128x64xf32>
      %37 = arith.addf %34, %36 : vector<128x64xf32>
      %cst_21 = arith.constant 0.000000e+00 : f32
      %38 = vector.broadcast %cst_21 : f32 to vector<128x64xf32>
      %39 = arith.maximumf %37, %38 : vector<128x64xf32>
      %c0_22 = arith.constant 0 : index
      %c0_23 = arith.constant 0 : index
      %40 = vector.load %arg6[%c0_22, %c0_23] : memref<128x64xf32, #tpu.memory_space<vmem>>, vector<128x64xf32>
      tpu.vector_store %arg6[%c0_22, %c0_23], %39 {strides = array<i32>} : memref<128x64xf32, #tpu.memory_space<vmem>>, vector<128x64xf32>,
    } else {
    }
    return
  }
  func.func @transform_0(%arg0: i32, %arg1: i32) -> (i32, i32) {
    %c0_i32 = arith.constant 0 : i32
    %c0_i32_0 = arith.constant 0 : i32
    return %c0_i32, %arg1 : i32, i32
  }
  func.func @transform_1(%arg0: i32, %arg1: i32) -> (i32, i32) {
    %c0_i32 = arith.constant 0 : i32
    return %arg1, %arg0 : i32, i32
  }
  func.func @transform_2(%arg0: i32, %arg1: i32) -> (i32, i32) {
    %c0_i32 = arith.constant 0 : i32
    %c0_i32_0 = arith.constant 0 : i32
    return %c0_i32, %arg0 : i32, i32
  }
  func.func @transform_3(%arg0: i32, %arg1: i32) -> (i32, i32) {
    %c0_i32 = arith.constant 0 : i32
    %c0_i32_0 = arith.constant 0 : i32
    return %c0_i32, %arg0 : i32, i32
  }
  func.func @transform_4(%arg0: i32, %arg1: i32) -> (i32, i32) {
    %c0_i32 = arith.constant 0 : i32
    %c0_i32_0 = arith.constant 0 : i32
    return %c0_i32, %arg0 : i32, i32
  }
}

module attributes {stable_mosaic.version = 11 : i64} {
  func.func @_mm_bn_kernel(%arg0: i32, %arg1: i32, %arg2: memref<128x128xbf16, #tpu.memory_space<vmem>>, %arg3: memref<128x64xbf16, #tpu.memory_space<vmem>>, %arg4: memref<1x64xf32, #tpu.memory_space<vmem>>, %arg5: memref<1x64xf32, #tpu.memory_space<vmem>>, %arg6: memref<128x64xf32, #tpu.memory_space<vmem>>, %arg7: memref<128x64xf32, #tpu.memory_space<vmem>>, %arg8: memref<128x64xf32, #tpu.memory_space<vmem>>) attributes {dimension_semantics = [#tpu.dimension_semantics<parallel>, #tpu.dimension_semantics<arbitrary>], iteration_bounds = array<i64: 1, 5>, scalar_prefetch = 0 : i64, scratch_operands = 1 : i64, tpu.core_type = #tpu.core_type<tc>, window_params = [{transform_indices = @transform_0, window_bounds = array<i64: 128, 128>}, {transform_indices = @transform_1, window_bounds = array<i64: 128, 64>}, {transform_indices = @transform_2, window_bounds = array<i64: 1, 64>}, {transform_indices = @transform_3, window_bounds = array<i64: 1, 64>}, {transform_indices = @transform_4, window_bounds = array<i64: 128, 64>}, {transform_indices = @transform_5, window_bounds = array<i64: 128, 64>}]} {
    %c0_i32 = arith.constant 0 : i32
    %0 = arith.cmpi eq, %arg1, %c0_i32 : i32
    %1 = arith.extui %0 : i1 to i32
    %c0_i32_0 = arith.constant 0 : i32
    %2 = arith.cmpi ne, %1, %c0_i32_0 : i32
    scf.if %2 {
      %cst_9 = arith.constant 0.000000e+00 : f32
      %12 = vector.broadcast %cst_9 : f32 to vector<128x64xf32>
      %c0_10 = arith.constant 0 : index
      %c0_11 = arith.constant 0 : index
      %13 = vector.load %arg8[%c0_10, %c0_11] : memref<128x64xf32, #tpu.memory_space<vmem>>, vector<128x64xf32>
      tpu.vector_store %arg8[%c0_10, %c0_11], %12 {strides = array<i32>} : memref<128x64xf32, #tpu.memory_space<vmem>>, vector<128x64xf32>,
    } else {
    }
    %c0 = arith.constant 0 : index
    %c0_1 = arith.constant 0 : index
    %3 = vector.load %arg8[%c0, %c0_1] : memref<128x64xf32, #tpu.memory_space<vmem>>, vector<128x64xf32>
    %c0_2 = arith.constant 0 : index
    %c0_3 = arith.constant 0 : index
    %4 = vector.load %arg2[%c0_2, %c0_3] : memref<128x128xbf16, #tpu.memory_space<vmem>>, vector<128x128xbf16>
    %c0_4 = arith.constant 0 : index
    %c0_5 = arith.constant 0 : index
    %5 = vector.load %arg3[%c0_4, %c0_5] : memref<128x64xbf16, #tpu.memory_space<vmem>>, vector<128x64xbf16>
    %cst = arith.constant dense<0.000000e+00> : vector<128x64xf32>
    %6 = tpu.matmul %4, %5, %cst {dimension_numbers = #tpu.dot_dimension_numbers<[1], [0], [0], [1], [0, 0, 1, 1], [], []>} : vector<128x128xbf16>, vector<128x64xbf16>, vector<128x64xf32> -> vector<128x64xf32>
    %7 = arith.addf %3, %6 : vector<128x64xf32>
    %c0_6 = arith.constant 0 : index
    %c0_7 = arith.constant 0 : index
    %8 = vector.load %arg8[%c0_6, %c0_7] : memref<128x64xf32, #tpu.memory_space<vmem>>, vector<128x64xf32>
    tpu.vector_store %arg8[%c0_6, %c0_7], %7 {strides = array<i32>} : memref<128x64xf32, #tpu.memory_space<vmem>>, vector<128x64xf32>,
    %c4_i32 = arith.constant 4 : i32
    %9 = arith.cmpi eq, %arg1, %c4_i32 : i32
    %10 = arith.extui %9 : i1 to i32
    %c0_i32_8 = arith.constant 0 : i32
    %11 = arith.cmpi ne, %10, %c0_i32_8 : i32
    scf.if %11 {
      %c0_9 = arith.constant 0 : index
      %c0_10 = arith.constant 0 : index
      %12 = vector.load %arg8[%c0_9, %c0_10] : memref<128x64xf32, #tpu.memory_space<vmem>>, vector<128x64xf32>
      %cst_11 = arith.constant dense<0.000000e+00> : vector<64xf32>
      %13 = vector.multi_reduction <add>, %12, %cst_11 [0] : vector<128x64xf32> to vector<64xf32>
      %14 = vector.shape_cast %13 : vector<64xf32> to vector<1x64xf32>
      %cst_12 = arith.constant 7.812500e-03 : f32
      %15 = vector.broadcast %cst_12 : f32 to vector<1x64xf32>
      %16 = arith.mulf %14, %15 : vector<1x64xf32>
      %17 = arith.mulf %12, %12 : vector<128x64xf32>
      %cst_13 = arith.constant dense<0.000000e+00> : vector<64xf32>
      %18 = vector.multi_reduction <add>, %17, %cst_13 [0] : vector<128x64xf32> to vector<64xf32>
      %19 = vector.shape_cast %18 : vector<64xf32> to vector<1x64xf32>
      %cst_14 = arith.constant 7.812500e-03 : f32
      %20 = vector.broadcast %cst_14 : f32 to vector<1x64xf32>
      %21 = arith.mulf %19, %20 : vector<1x64xf32>
      %22 = arith.mulf %16, %16 : vector<1x64xf32>
      %23 = arith.subf %21, %22 : vector<1x64xf32>
      %cst_15 = arith.constant 0.000000e+00 : f32
      %24 = vector.broadcast %cst_15 : f32 to vector<1x64xf32>
      %25 = arith.maximumf %23, %24 : vector<1x64xf32>
      %26 = vector.broadcast %16 : vector<1x64xf32> to vector<128x64xf32>
      %27 = arith.subf %12, %26 : vector<128x64xf32>
      %c0_16 = arith.constant 0 : index
      %c0_17 = arith.constant 0 : index
      %28 = vector.load %arg4[%c0_16, %c0_17] : memref<1x64xf32, #tpu.memory_space<vmem>>, vector<1x64xf32>
      %cst_18 = arith.constant 9.99999974E-6 : f32
      %29 = vector.broadcast %cst_18 : f32 to vector<1x64xf32>
      %30 = arith.addf %25, %29 : vector<1x64xf32>
      %31 = math.rsqrt %30 : vector<1x64xf32>
      %32 = arith.mulf %28, %31 : vector<1x64xf32>
      %33 = vector.broadcast %32 : vector<1x64xf32> to vector<128x64xf32>
      %34 = arith.mulf %27, %33 : vector<128x64xf32>
      %c0_19 = arith.constant 0 : index
      %c0_20 = arith.constant 0 : index
      %35 = vector.load %arg5[%c0_19, %c0_20] : memref<1x64xf32, #tpu.memory_space<vmem>>, vector<1x64xf32>
      %36 = vector.broadcast %35 : vector<1x64xf32> to vector<128x64xf32>
      %37 = arith.addf %34, %36 : vector<128x64xf32>
      %c0_21 = arith.constant 0 : index
      %c0_22 = arith.constant 0 : index
      %38 = vector.load %arg6[%c0_21, %c0_22] : memref<128x64xf32, #tpu.memory_space<vmem>>, vector<128x64xf32>
      %39 = arith.addf %37, %38 : vector<128x64xf32>
      %cst_23 = arith.constant 0.000000e+00 : f32
      %40 = vector.broadcast %cst_23 : f32 to vector<128x64xf32>
      %41 = arith.maximumf %39, %40 : vector<128x64xf32>
      %c0_24 = arith.constant 0 : index
      %c0_25 = arith.constant 0 : index
      %42 = vector.load %arg7[%c0_24, %c0_25] : memref<128x64xf32, #tpu.memory_space<vmem>>, vector<128x64xf32>
      tpu.vector_store %arg7[%c0_24, %c0_25], %41 {strides = array<i32>} : memref<128x64xf32, #tpu.memory_space<vmem>>, vector<128x64xf32>,
    } else {
    }
    return
  }
  func.func @transform_0(%arg0: i32, %arg1: i32) -> (i32, i32) {
    %c0_i32 = arith.constant 0 : i32
    %c0_i32_0 = arith.constant 0 : i32
    return %c0_i32, %arg1 : i32, i32
  }
  func.func @transform_1(%arg0: i32, %arg1: i32) -> (i32, i32) {
    %c0_i32 = arith.constant 0 : i32
    return %arg1, %arg0 : i32, i32
  }
  func.func @transform_2(%arg0: i32, %arg1: i32) -> (i32, i32) {
    %c0_i32 = arith.constant 0 : i32
    %c0_i32_0 = arith.constant 0 : i32
    return %c0_i32, %arg0 : i32, i32
  }
  func.func @transform_3(%arg0: i32, %arg1: i32) -> (i32, i32) {
    %c0_i32 = arith.constant 0 : i32
    %c0_i32_0 = arith.constant 0 : i32
    return %c0_i32, %arg0 : i32, i32
  }
  func.func @transform_4(%arg0: i32, %arg1: i32) -> (i32, i32) {
    %c0_i32 = arith.constant 0 : i32
    %c0_i32_0 = arith.constant 0 : i32
    return %c0_i32, %arg0 : i32, i32
  }
  func.func @transform_5(%arg0: i32, %arg1: i32) -> (i32, i32) {
    %c0_i32 = arith.constant 0 : i32
    %c0_i32_0 = arith.constant 0 : i32
    return %c0_i32, %arg0 : i32, i32
  }
}

module attributes {stable_mosaic.version = 11 : i64} {
  func.func @_mm_bn_kernel(%arg0: i32, %arg1: i32, %arg2: memref<32x128xbf16, #tpu.memory_space<vmem>>, %arg3: memref<128x128xbf16, #tpu.memory_space<vmem>>, %arg4: memref<1x128xf32, #tpu.memory_space<vmem>>, %arg5: memref<1x128xf32, #tpu.memory_space<vmem>>, %arg6: memref<32x128xf32, #tpu.memory_space<vmem>>, %arg7: memref<32x128xf32, #tpu.memory_space<vmem>>) attributes {dimension_semantics = [#tpu.dimension_semantics<parallel>, #tpu.dimension_semantics<arbitrary>], iteration_bounds = array<i64: 1, 5>, scalar_prefetch = 0 : i64, scratch_operands = 1 : i64, tpu.core_type = #tpu.core_type<tc>, window_params = [{transform_indices = @transform_0, window_bounds = array<i64: 32, 128>}, {transform_indices = @transform_1, window_bounds = array<i64: 128, 128>}, {transform_indices = @transform_2, window_bounds = array<i64: 1, 128>}, {transform_indices = @transform_3, window_bounds = array<i64: 1, 128>}, {transform_indices = @transform_4, window_bounds = array<i64: 32, 128>}]} {
    %c0_i32 = arith.constant 0 : i32
    %0 = arith.cmpi eq, %arg1, %c0_i32 : i32
    %1 = arith.extui %0 : i1 to i32
    %c0_i32_0 = arith.constant 0 : i32
    %2 = arith.cmpi ne, %1, %c0_i32_0 : i32
    scf.if %2 {
      %cst_9 = arith.constant 0.000000e+00 : f32
      %12 = vector.broadcast %cst_9 : f32 to vector<32x128xf32>
      %c0_10 = arith.constant 0 : index
      %c0_11 = arith.constant 0 : index
      %13 = vector.load %arg7[%c0_10, %c0_11] : memref<32x128xf32, #tpu.memory_space<vmem>>, vector<32x128xf32>
      tpu.vector_store %arg7[%c0_10, %c0_11], %12 {strides = array<i32>} : memref<32x128xf32, #tpu.memory_space<vmem>>, vector<32x128xf32>,
    } else {
    }
    %c0 = arith.constant 0 : index
    %c0_1 = arith.constant 0 : index
    %3 = vector.load %arg7[%c0, %c0_1] : memref<32x128xf32, #tpu.memory_space<vmem>>, vector<32x128xf32>
    %c0_2 = arith.constant 0 : index
    %c0_3 = arith.constant 0 : index
    %4 = vector.load %arg2[%c0_2, %c0_3] : memref<32x128xbf16, #tpu.memory_space<vmem>>, vector<32x128xbf16>
    %c0_4 = arith.constant 0 : index
    %c0_5 = arith.constant 0 : index
    %5 = vector.load %arg3[%c0_4, %c0_5] : memref<128x128xbf16, #tpu.memory_space<vmem>>, vector<128x128xbf16>
    %cst = arith.constant dense<0.000000e+00> : vector<32x128xf32>
    %6 = tpu.matmul %4, %5, %cst {dimension_numbers = #tpu.dot_dimension_numbers<[1], [0], [0], [1], [0, 0, 1, 1], [], []>} : vector<32x128xbf16>, vector<128x128xbf16>, vector<32x128xf32> -> vector<32x128xf32>
    %7 = arith.addf %3, %6 : vector<32x128xf32>
    %c0_6 = arith.constant 0 : index
    %c0_7 = arith.constant 0 : index
    %8 = vector.load %arg7[%c0_6, %c0_7] : memref<32x128xf32, #tpu.memory_space<vmem>>, vector<32x128xf32>
    tpu.vector_store %arg7[%c0_6, %c0_7], %7 {strides = array<i32>} : memref<32x128xf32, #tpu.memory_space<vmem>>, vector<32x128xf32>,
    %c4_i32 = arith.constant 4 : i32
    %9 = arith.cmpi eq, %arg1, %c4_i32 : i32
    %10 = arith.extui %9 : i1 to i32
    %c0_i32_8 = arith.constant 0 : i32
    %11 = arith.cmpi ne, %10, %c0_i32_8 : i32
    scf.if %11 {
      %c0_9 = arith.constant 0 : index
      %c0_10 = arith.constant 0 : index
      %12 = vector.load %arg7[%c0_9, %c0_10] : memref<32x128xf32, #tpu.memory_space<vmem>>, vector<32x128xf32>
      %cst_11 = arith.constant dense<0.000000e+00> : vector<128xf32>
      %13 = vector.multi_reduction <add>, %12, %cst_11 [0] : vector<32x128xf32> to vector<128xf32>
      %14 = vector.shape_cast %13 : vector<128xf32> to vector<1x128xf32>
      %cst_12 = arith.constant 3.125000e-02 : f32
      %15 = vector.broadcast %cst_12 : f32 to vector<1x128xf32>
      %16 = arith.mulf %14, %15 : vector<1x128xf32>
      %17 = arith.mulf %12, %12 : vector<32x128xf32>
      %cst_13 = arith.constant dense<0.000000e+00> : vector<128xf32>
      %18 = vector.multi_reduction <add>, %17, %cst_13 [0] : vector<32x128xf32> to vector<128xf32>
      %19 = vector.shape_cast %18 : vector<128xf32> to vector<1x128xf32>
      %cst_14 = arith.constant 3.125000e-02 : f32
      %20 = vector.broadcast %cst_14 : f32 to vector<1x128xf32>
      %21 = arith.mulf %19, %20 : vector<1x128xf32>
      %22 = arith.mulf %16, %16 : vector<1x128xf32>
      %23 = arith.subf %21, %22 : vector<1x128xf32>
      %cst_15 = arith.constant 0.000000e+00 : f32
      %24 = vector.broadcast %cst_15 : f32 to vector<1x128xf32>
      %25 = arith.maximumf %23, %24 : vector<1x128xf32>
      %26 = vector.broadcast %16 : vector<1x128xf32> to vector<32x128xf32>
      %27 = arith.subf %12, %26 : vector<32x128xf32>
      %c0_16 = arith.constant 0 : index
      %c0_17 = arith.constant 0 : index
      %28 = vector.load %arg4[%c0_16, %c0_17] : memref<1x128xf32, #tpu.memory_space<vmem>>, vector<1x128xf32>
      %cst_18 = arith.constant 9.99999974E-6 : f32
      %29 = vector.broadcast %cst_18 : f32 to vector<1x128xf32>
      %30 = arith.addf %25, %29 : vector<1x128xf32>
      %31 = math.rsqrt %30 : vector<1x128xf32>
      %32 = arith.mulf %28, %31 : vector<1x128xf32>
      %33 = vector.broadcast %32 : vector<1x128xf32> to vector<32x128xf32>
      %34 = arith.mulf %27, %33 : vector<32x128xf32>
      %c0_19 = arith.constant 0 : index
      %c0_20 = arith.constant 0 : index
      %35 = vector.load %arg5[%c0_19, %c0_20] : memref<1x128xf32, #tpu.memory_space<vmem>>, vector<1x128xf32>
      %36 = vector.broadcast %35 : vector<1x128xf32> to vector<32x128xf32>
      %37 = arith.addf %34, %36 : vector<32x128xf32>
      %cst_21 = arith.constant 0.000000e+00 : f32
      %38 = vector.broadcast %cst_21 : f32 to vector<32x128xf32>
      %39 = arith.maximumf %37, %38 : vector<32x128xf32>
      %c0_22 = arith.constant 0 : index
      %c0_23 = arith.constant 0 : index
      %40 = vector.load %arg6[%c0_22, %c0_23] : memref<32x128xf32, #tpu.memory_space<vmem>>, vector<32x128xf32>
      tpu.vector_store %arg6[%c0_22, %c0_23], %39 {strides = array<i32>} : memref<32x128xf32, #tpu.memory_space<vmem>>, vector<32x128xf32>,
    } else {
    }
    return
  }
  func.func @transform_0(%arg0: i32, %arg1: i32) -> (i32, i32) {
    %c0_i32 = arith.constant 0 : i32
    %c0_i32_0 = arith.constant 0 : i32
    return %c0_i32, %arg1 : i32, i32
  }
  func.func @transform_1(%arg0: i32, %arg1: i32) -> (i32, i32) {
    %c0_i32 = arith.constant 0 : i32
    return %arg1, %arg0 : i32, i32
  }
  func.func @transform_2(%arg0: i32, %arg1: i32) -> (i32, i32) {
    %c0_i32 = arith.constant 0 : i32
    %c0_i32_0 = arith.constant 0 : i32
    return %c0_i32, %arg0 : i32, i32
  }
  func.func @transform_3(%arg0: i32, %arg1: i32) -> (i32, i32) {
    %c0_i32 = arith.constant 0 : i32
    %c0_i32_0 = arith.constant 0 : i32
    return %c0_i32, %arg0 : i32, i32
  }
  func.func @transform_4(%arg0: i32, %arg1: i32) -> (i32, i32) {
    %c0_i32 = arith.constant 0 : i32
    %c0_i32_0 = arith.constant 0 : i32
    return %c0_i32, %arg0 : i32, i32
  }
}

module attributes {stable_mosaic.version = 11 : i64} {
  func.func @_mm_bn_kernel(%arg0: i32, %arg1: i32, %arg2: memref<32x128xbf16, #tpu.memory_space<vmem>>, %arg3: memref<128x128xbf16, #tpu.memory_space<vmem>>, %arg4: memref<1x128xf32, #tpu.memory_space<vmem>>, %arg5: memref<1x128xf32, #tpu.memory_space<vmem>>, %arg6: memref<32x128xf32, #tpu.memory_space<vmem>>, %arg7: memref<32x128xf32, #tpu.memory_space<vmem>>) attributes {dimension_semantics = [#tpu.dimension_semantics<parallel>, #tpu.dimension_semantics<arbitrary>], iteration_bounds = array<i64: 1, 1>, scalar_prefetch = 0 : i64, scratch_operands = 1 : i64, tpu.core_type = #tpu.core_type<tc>, window_params = [{transform_indices = @transform_0, window_bounds = array<i64: 32, 128>}, {transform_indices = @transform_1, window_bounds = array<i64: 128, 128>}, {transform_indices = @transform_2, window_bounds = array<i64: 1, 128>}, {transform_indices = @transform_3, window_bounds = array<i64: 1, 128>}, {transform_indices = @transform_4, window_bounds = array<i64: 32, 128>}]} {
    %c0_i32 = arith.constant 0 : i32
    %0 = arith.cmpi eq, %arg1, %c0_i32 : i32
    %1 = arith.extui %0 : i1 to i32
    %c0_i32_0 = arith.constant 0 : i32
    %2 = arith.cmpi ne, %1, %c0_i32_0 : i32
    scf.if %2 {
      %cst_10 = arith.constant 0.000000e+00 : f32
      %12 = vector.broadcast %cst_10 : f32 to vector<32x128xf32>
      %c0_11 = arith.constant 0 : index
      %c0_12 = arith.constant 0 : index
      %13 = vector.load %arg7[%c0_11, %c0_12] : memref<32x128xf32, #tpu.memory_space<vmem>>, vector<32x128xf32>
      tpu.vector_store %arg7[%c0_11, %c0_12], %12 {strides = array<i32>} : memref<32x128xf32, #tpu.memory_space<vmem>>, vector<32x128xf32>,
    } else {
    }
    %c0 = arith.constant 0 : index
    %c0_1 = arith.constant 0 : index
    %3 = vector.load %arg7[%c0, %c0_1] : memref<32x128xf32, #tpu.memory_space<vmem>>, vector<32x128xf32>
    %c0_2 = arith.constant 0 : index
    %c0_3 = arith.constant 0 : index
    %4 = vector.load %arg2[%c0_2, %c0_3] : memref<32x128xbf16, #tpu.memory_space<vmem>>, vector<32x128xbf16>
    %c0_4 = arith.constant 0 : index
    %c0_5 = arith.constant 0 : index
    %5 = vector.load %arg3[%c0_4, %c0_5] : memref<128x128xbf16, #tpu.memory_space<vmem>>, vector<128x128xbf16>
    %cst = arith.constant dense<0.000000e+00> : vector<32x128xf32>
    %6 = tpu.matmul %4, %5, %cst {dimension_numbers = #tpu.dot_dimension_numbers<[1], [0], [0], [1], [0, 0, 1, 1], [], []>} : vector<32x128xbf16>, vector<128x128xbf16>, vector<32x128xf32> -> vector<32x128xf32>
    %7 = arith.addf %3, %6 : vector<32x128xf32>
    %c0_6 = arith.constant 0 : index
    %c0_7 = arith.constant 0 : index
    %8 = vector.load %arg7[%c0_6, %c0_7] : memref<32x128xf32, #tpu.memory_space<vmem>>, vector<32x128xf32>
    tpu.vector_store %arg7[%c0_6, %c0_7], %7 {strides = array<i32>} : memref<32x128xf32, #tpu.memory_space<vmem>>, vector<32x128xf32>,
    %c0_i32_8 = arith.constant 0 : i32
    %9 = arith.cmpi eq, %arg1, %c0_i32_8 : i32
    %10 = arith.extui %9 : i1 to i32
    %c0_i32_9 = arith.constant 0 : i32
    %11 = arith.cmpi ne, %10, %c0_i32_9 : i32
    scf.if %11 {
      %c0_10 = arith.constant 0 : index
      %c0_11 = arith.constant 0 : index
      %12 = vector.load %arg7[%c0_10, %c0_11] : memref<32x128xf32, #tpu.memory_space<vmem>>, vector<32x128xf32>
      %cst_12 = arith.constant dense<0.000000e+00> : vector<128xf32>
      %13 = vector.multi_reduction <add>, %12, %cst_12 [0] : vector<32x128xf32> to vector<128xf32>
      %14 = vector.shape_cast %13 : vector<128xf32> to vector<1x128xf32>
      %cst_13 = arith.constant 3.125000e-02 : f32
      %15 = vector.broadcast %cst_13 : f32 to vector<1x128xf32>
      %16 = arith.mulf %14, %15 : vector<1x128xf32>
      %17 = arith.mulf %12, %12 : vector<32x128xf32>
      %cst_14 = arith.constant dense<0.000000e+00> : vector<128xf32>
      %18 = vector.multi_reduction <add>, %17, %cst_14 [0] : vector<32x128xf32> to vector<128xf32>
      %19 = vector.shape_cast %18 : vector<128xf32> to vector<1x128xf32>
      %cst_15 = arith.constant 3.125000e-02 : f32
      %20 = vector.broadcast %cst_15 : f32 to vector<1x128xf32>
      %21 = arith.mulf %19, %20 : vector<1x128xf32>
      %22 = arith.mulf %16, %16 : vector<1x128xf32>
      %23 = arith.subf %21, %22 : vector<1x128xf32>
      %cst_16 = arith.constant 0.000000e+00 : f32
      %24 = vector.broadcast %cst_16 : f32 to vector<1x128xf32>
      %25 = arith.maximumf %23, %24 : vector<1x128xf32>
      %26 = vector.broadcast %16 : vector<1x128xf32> to vector<32x128xf32>
      %27 = arith.subf %12, %26 : vector<32x128xf32>
      %c0_17 = arith.constant 0 : index
      %c0_18 = arith.constant 0 : index
      %28 = vector.load %arg4[%c0_17, %c0_18] : memref<1x128xf32, #tpu.memory_space<vmem>>, vector<1x128xf32>
      %cst_19 = arith.constant 9.99999974E-6 : f32
      %29 = vector.broadcast %cst_19 : f32 to vector<1x128xf32>
      %30 = arith.addf %25, %29 : vector<1x128xf32>
      %31 = math.rsqrt %30 : vector<1x128xf32>
      %32 = arith.mulf %28, %31 : vector<1x128xf32>
      %33 = vector.broadcast %32 : vector<1x128xf32> to vector<32x128xf32>
      %34 = arith.mulf %27, %33 : vector<32x128xf32>
      %c0_20 = arith.constant 0 : index
      %c0_21 = arith.constant 0 : index
      %35 = vector.load %arg5[%c0_20, %c0_21] : memref<1x128xf32, #tpu.memory_space<vmem>>, vector<1x128xf32>
      %36 = vector.broadcast %35 : vector<1x128xf32> to vector<32x128xf32>
      %37 = arith.addf %34, %36 : vector<32x128xf32>
      %c0_22 = arith.constant 0 : index
      %c0_23 = arith.constant 0 : index
      %38 = vector.load %arg6[%c0_22, %c0_23] : memref<32x128xf32, #tpu.memory_space<vmem>>, vector<32x128xf32>
      tpu.vector_store %arg6[%c0_22, %c0_23], %37 {strides = array<i32>} : memref<32x128xf32, #tpu.memory_space<vmem>>, vector<32x128xf32>,
    } else {
    }
    return
  }
  func.func @transform_0(%arg0: i32, %arg1: i32) -> (i32, i32) {
    %c0_i32 = arith.constant 0 : i32
    %c0_i32_0 = arith.constant 0 : i32
    return %c0_i32, %arg1 : i32, i32
  }
  func.func @transform_1(%arg0: i32, %arg1: i32) -> (i32, i32) {
    %c0_i32 = arith.constant 0 : i32
    return %arg1, %arg0 : i32, i32
  }
  func.func @transform_2(%arg0: i32, %arg1: i32) -> (i32, i32) {
    %c0_i32 = arith.constant 0 : i32
    %c0_i32_0 = arith.constant 0 : i32
    return %c0_i32, %arg0 : i32, i32
  }
  func.func @transform_3(%arg0: i32, %arg1: i32) -> (i32, i32) {
    %c0_i32 = arith.constant 0 : i32
    %c0_i32_0 = arith.constant 0 : i32
    return %c0_i32, %arg0 : i32, i32
  }
  func.func @transform_4(%arg0: i32, %arg1: i32) -> (i32, i32) {
    %c0_i32 = arith.constant 0 : i32
    %c0_i32_0 = arith.constant 0 : i32
    return %c0_i32, %arg0 : i32, i32
  }
}

module attributes {stable_mosaic.version = 11 : i64} {
  func.func @_mm_bn_kernel(%arg0: i32, %arg1: i32, %arg2: memref<32x384xbf16, #tpu.memory_space<vmem>>, %arg3: memref<384x128xbf16, #tpu.memory_space<vmem>>, %arg4: memref<1x128xf32, #tpu.memory_space<vmem>>, %arg5: memref<1x128xf32, #tpu.memory_space<vmem>>, %arg6: memref<32x128xf32, #tpu.memory_space<vmem>>, %arg7: memref<32x128xf32, #tpu.memory_space<vmem>>, %arg8: memref<32x128xf32, #tpu.memory_space<vmem>>) attributes {dimension_semantics = [#tpu.dimension_semantics<parallel>, #tpu.dimension_semantics<arbitrary>], iteration_bounds = array<i64: 1, 3>, scalar_prefetch = 0 : i64, scratch_operands = 1 : i64, tpu.core_type = #tpu.core_type<tc>, window_params = [{transform_indices = @transform_0, window_bounds = array<i64: 32, 384>}, {transform_indices = @transform_1, window_bounds = array<i64: 384, 128>}, {transform_indices = @transform_2, window_bounds = array<i64: 1, 128>}, {transform_indices = @transform_3, window_bounds = array<i64: 1, 128>}, {transform_indices = @transform_4, window_bounds = array<i64: 32, 128>}, {transform_indices = @transform_5, window_bounds = array<i64: 32, 128>}]} {
    %c0_i32 = arith.constant 0 : i32
    %0 = arith.cmpi eq, %arg1, %c0_i32 : i32
    %1 = arith.extui %0 : i1 to i32
    %c0_i32_0 = arith.constant 0 : i32
    %2 = arith.cmpi ne, %1, %c0_i32_0 : i32
    scf.if %2 {
      %cst_9 = arith.constant 0.000000e+00 : f32
      %12 = vector.broadcast %cst_9 : f32 to vector<32x128xf32>
      %c0_10 = arith.constant 0 : index
      %c0_11 = arith.constant 0 : index
      %13 = vector.load %arg8[%c0_10, %c0_11] : memref<32x128xf32, #tpu.memory_space<vmem>>, vector<32x128xf32>
      tpu.vector_store %arg8[%c0_10, %c0_11], %12 {strides = array<i32>} : memref<32x128xf32, #tpu.memory_space<vmem>>, vector<32x128xf32>,
    } else {
    }
    %c0 = arith.constant 0 : index
    %c0_1 = arith.constant 0 : index
    %3 = vector.load %arg8[%c0, %c0_1] : memref<32x128xf32, #tpu.memory_space<vmem>>, vector<32x128xf32>
    %c0_2 = arith.constant 0 : index
    %c0_3 = arith.constant 0 : index
    %4 = vector.load %arg2[%c0_2, %c0_3] : memref<32x384xbf16, #tpu.memory_space<vmem>>, vector<32x384xbf16>
    %c0_4 = arith.constant 0 : index
    %c0_5 = arith.constant 0 : index
    %5 = vector.load %arg3[%c0_4, %c0_5] : memref<384x128xbf16, #tpu.memory_space<vmem>>, vector<384x128xbf16>
    %cst = arith.constant dense<0.000000e+00> : vector<32x128xf32>
    %6 = tpu.matmul %4, %5, %cst {dimension_numbers = #tpu.dot_dimension_numbers<[1], [0], [0], [1], [0, 0, 1, 1], [], []>} : vector<32x384xbf16>, vector<384x128xbf16>, vector<32x128xf32> -> vector<32x128xf32>
    %7 = arith.addf %3, %6 : vector<32x128xf32>
    %c0_6 = arith.constant 0 : index
    %c0_7 = arith.constant 0 : index
    %8 = vector.load %arg8[%c0_6, %c0_7] : memref<32x128xf32, #tpu.memory_space<vmem>>, vector<32x128xf32>
    tpu.vector_store %arg8[%c0_6, %c0_7], %7 {strides = array<i32>} : memref<32x128xf32, #tpu.memory_space<vmem>>, vector<32x128xf32>,
    %c2_i32 = arith.constant 2 : i32
    %9 = arith.cmpi eq, %arg1, %c2_i32 : i32
    %10 = arith.extui %9 : i1 to i32
    %c0_i32_8 = arith.constant 0 : i32
    %11 = arith.cmpi ne, %10, %c0_i32_8 : i32
    scf.if %11 {
      %c0_9 = arith.constant 0 : index
      %c0_10 = arith.constant 0 : index
      %12 = vector.load %arg8[%c0_9, %c0_10] : memref<32x128xf32, #tpu.memory_space<vmem>>, vector<32x128xf32>
      %cst_11 = arith.constant dense<0.000000e+00> : vector<128xf32>
      %13 = vector.multi_reduction <add>, %12, %cst_11 [0] : vector<32x128xf32> to vector<128xf32>
      %14 = vector.shape_cast %13 : vector<128xf32> to vector<1x128xf32>
      %cst_12 = arith.constant 3.125000e-02 : f32
      %15 = vector.broadcast %cst_12 : f32 to vector<1x128xf32>
      %16 = arith.mulf %14, %15 : vector<1x128xf32>
      %17 = arith.mulf %12, %12 : vector<32x128xf32>
      %cst_13 = arith.constant dense<0.000000e+00> : vector<128xf32>
      %18 = vector.multi_reduction <add>, %17, %cst_13 [0] : vector<32x128xf32> to vector<128xf32>
      %19 = vector.shape_cast %18 : vector<128xf32> to vector<1x128xf32>
      %cst_14 = arith.constant 3.125000e-02 : f32
      %20 = vector.broadcast %cst_14 : f32 to vector<1x128xf32>
      %21 = arith.mulf %19, %20 : vector<1x128xf32>
      %22 = arith.mulf %16, %16 : vector<1x128xf32>
      %23 = arith.subf %21, %22 : vector<1x128xf32>
      %cst_15 = arith.constant 0.000000e+00 : f32
      %24 = vector.broadcast %cst_15 : f32 to vector<1x128xf32>
      %25 = arith.maximumf %23, %24 : vector<1x128xf32>
      %26 = vector.broadcast %16 : vector<1x128xf32> to vector<32x128xf32>
      %27 = arith.subf %12, %26 : vector<32x128xf32>
      %c0_16 = arith.constant 0 : index
      %c0_17 = arith.constant 0 : index
      %28 = vector.load %arg4[%c0_16, %c0_17] : memref<1x128xf32, #tpu.memory_space<vmem>>, vector<1x128xf32>
      %cst_18 = arith.constant 9.99999974E-6 : f32
      %29 = vector.broadcast %cst_18 : f32 to vector<1x128xf32>
      %30 = arith.addf %25, %29 : vector<1x128xf32>
      %31 = math.rsqrt %30 : vector<1x128xf32>
      %32 = arith.mulf %28, %31 : vector<1x128xf32>
      %33 = vector.broadcast %32 : vector<1x128xf32> to vector<32x128xf32>
      %34 = arith.mulf %27, %33 : vector<32x128xf32>
      %c0_19 = arith.constant 0 : index
      %c0_20 = arith.constant 0 : index
      %35 = vector.load %arg5[%c0_19, %c0_20] : memref<1x128xf32, #tpu.memory_space<vmem>>, vector<1x128xf32>
      %36 = vector.broadcast %35 : vector<1x128xf32> to vector<32x128xf32>
      %37 = arith.addf %34, %36 : vector<32x128xf32>
      %c0_21 = arith.constant 0 : index
      %c0_22 = arith.constant 0 : index
      %38 = vector.load %arg6[%c0_21, %c0_22] : memref<32x128xf32, #tpu.memory_space<vmem>>, vector<32x128xf32>
      %39 = arith.addf %37, %38 : vector<32x128xf32>
      %cst_23 = arith.constant 0.000000e+00 : f32
      %40 = vector.broadcast %cst_23 : f32 to vector<32x128xf32>
      %41 = arith.maximumf %39, %40 : vector<32x128xf32>
      %c0_24 = arith.constant 0 : index
      %c0_25 = arith.constant 0 : index
      %42 = vector.load %arg7[%c0_24, %c0_25] : memref<32x128xf32, #tpu.memory_space<vmem>>, vector<32x128xf32>
      tpu.vector_store %arg7[%c0_24, %c0_25], %41 {strides = array<i32>} : memref<32x128xf32, #tpu.memory_space<vmem>>, vector<32x128xf32>,
    } else {
    }
    return
  }
  func.func @transform_0(%arg0: i32, %arg1: i32) -> (i32, i32) {
    %c0_i32 = arith.constant 0 : i32
    %c0_i32_0 = arith.constant 0 : i32
    return %c0_i32, %arg1 : i32, i32
  }
  func.func @transform_1(%arg0: i32, %arg1: i32) -> (i32, i32) {
    %c0_i32 = arith.constant 0 : i32
    return %arg1, %arg0 : i32, i32
  }
  func.func @transform_2(%arg0: i32, %arg1: i32) -> (i32, i32) {
    %c0_i32 = arith.constant 0 : i32
    %c0_i32_0 = arith.constant 0 : i32
    return %c0_i32, %arg0 : i32, i32
  }
  func.func @transform_3(%arg0: i32, %arg1: i32) -> (i32, i32) {
    %c0_i32 = arith.constant 0 : i32
    %c0_i32_0 = arith.constant 0 : i32
    return %c0_i32, %arg0 : i32, i32
  }
  func.func @transform_4(%arg0: i32, %arg1: i32) -> (i32, i32) {
    %c0_i32 = arith.constant 0 : i32
    %c0_i32_0 = arith.constant 0 : i32
    return %c0_i32, %arg0 : i32, i32
  }
  func.func @transform_5(%arg0: i32, %arg1: i32) -> (i32, i32) {
    %c0_i32 = arith.constant 0 : i32
    %c0_i32_0 = arith.constant 0 : i32
    return %c0_i32, %arg0 : i32, i32
  }
}

module attributes {stable_mosaic.version = 11 : i64} {
  func.func @_mm_bn_kernel(%arg0: i32, %arg1: i32, %arg2: memref<32x384xbf16, #tpu.memory_space<vmem>>, %arg3: memref<384x128xbf16, #tpu.memory_space<vmem>>, %arg4: memref<1x128xf32, #tpu.memory_space<vmem>>, %arg5: memref<1x128xf32, #tpu.memory_space<vmem>>, %arg6: memref<32x128xf32, #tpu.memory_space<vmem>>, %arg7: memref<32x128xf32, #tpu.memory_space<vmem>>) attributes {dimension_semantics = [#tpu.dimension_semantics<parallel>, #tpu.dimension_semantics<arbitrary>], iteration_bounds = array<i64: 1, 3>, scalar_prefetch = 0 : i64, scratch_operands = 1 : i64, tpu.core_type = #tpu.core_type<tc>, window_params = [{transform_indices = @transform_0, window_bounds = array<i64: 32, 384>}, {transform_indices = @transform_1, window_bounds = array<i64: 384, 128>}, {transform_indices = @transform_2, window_bounds = array<i64: 1, 128>}, {transform_indices = @transform_3, window_bounds = array<i64: 1, 128>}, {transform_indices = @transform_4, window_bounds = array<i64: 32, 128>}]} {
    %c0_i32 = arith.constant 0 : i32
    %0 = arith.cmpi eq, %arg1, %c0_i32 : i32
    %1 = arith.extui %0 : i1 to i32
    %c0_i32_0 = arith.constant 0 : i32
    %2 = arith.cmpi ne, %1, %c0_i32_0 : i32
    scf.if %2 {
      %cst_9 = arith.constant 0.000000e+00 : f32
      %12 = vector.broadcast %cst_9 : f32 to vector<32x128xf32>
      %c0_10 = arith.constant 0 : index
      %c0_11 = arith.constant 0 : index
      %13 = vector.load %arg7[%c0_10, %c0_11] : memref<32x128xf32, #tpu.memory_space<vmem>>, vector<32x128xf32>
      tpu.vector_store %arg7[%c0_10, %c0_11], %12 {strides = array<i32>} : memref<32x128xf32, #tpu.memory_space<vmem>>, vector<32x128xf32>,
    } else {
    }
    %c0 = arith.constant 0 : index
    %c0_1 = arith.constant 0 : index
    %3 = vector.load %arg7[%c0, %c0_1] : memref<32x128xf32, #tpu.memory_space<vmem>>, vector<32x128xf32>
    %c0_2 = arith.constant 0 : index
    %c0_3 = arith.constant 0 : index
    %4 = vector.load %arg2[%c0_2, %c0_3] : memref<32x384xbf16, #tpu.memory_space<vmem>>, vector<32x384xbf16>
    %c0_4 = arith.constant 0 : index
    %c0_5 = arith.constant 0 : index
    %5 = vector.load %arg3[%c0_4, %c0_5] : memref<384x128xbf16, #tpu.memory_space<vmem>>, vector<384x128xbf16>
    %cst = arith.constant dense<0.000000e+00> : vector<32x128xf32>
    %6 = tpu.matmul %4, %5, %cst {dimension_numbers = #tpu.dot_dimension_numbers<[1], [0], [0], [1], [0, 0, 1, 1], [], []>} : vector<32x384xbf16>, vector<384x128xbf16>, vector<32x128xf32> -> vector<32x128xf32>
    %7 = arith.addf %3, %6 : vector<32x128xf32>
    %c0_6 = arith.constant 0 : index
    %c0_7 = arith.constant 0 : index
    %8 = vector.load %arg7[%c0_6, %c0_7] : memref<32x128xf32, #tpu.memory_space<vmem>>, vector<32x128xf32>
    tpu.vector_store %arg7[%c0_6, %c0_7], %7 {strides = array<i32>} : memref<32x128xf32, #tpu.memory_space<vmem>>, vector<32x128xf32>,
    %c2_i32 = arith.constant 2 : i32
    %9 = arith.cmpi eq, %arg1, %c2_i32 : i32
    %10 = arith.extui %9 : i1 to i32
    %c0_i32_8 = arith.constant 0 : i32
    %11 = arith.cmpi ne, %10, %c0_i32_8 : i32
    scf.if %11 {
      %c0_9 = arith.constant 0 : index
      %c0_10 = arith.constant 0 : index
      %12 = vector.load %arg7[%c0_9, %c0_10] : memref<32x128xf32, #tpu.memory_space<vmem>>, vector<32x128xf32>
      %cst_11 = arith.constant dense<0.000000e+00> : vector<128xf32>
      %13 = vector.multi_reduction <add>, %12, %cst_11 [0] : vector<32x128xf32> to vector<128xf32>
      %14 = vector.shape_cast %13 : vector<128xf32> to vector<1x128xf32>
      %cst_12 = arith.constant 3.125000e-02 : f32
      %15 = vector.broadcast %cst_12 : f32 to vector<1x128xf32>
      %16 = arith.mulf %14, %15 : vector<1x128xf32>
      %17 = arith.mulf %12, %12 : vector<32x128xf32>
      %cst_13 = arith.constant dense<0.000000e+00> : vector<128xf32>
      %18 = vector.multi_reduction <add>, %17, %cst_13 [0] : vector<32x128xf32> to vector<128xf32>
      %19 = vector.shape_cast %18 : vector<128xf32> to vector<1x128xf32>
      %cst_14 = arith.constant 3.125000e-02 : f32
      %20 = vector.broadcast %cst_14 : f32 to vector<1x128xf32>
      %21 = arith.mulf %19, %20 : vector<1x128xf32>
      %22 = arith.mulf %16, %16 : vector<1x128xf32>
      %23 = arith.subf %21, %22 : vector<1x128xf32>
      %cst_15 = arith.constant 0.000000e+00 : f32
      %24 = vector.broadcast %cst_15 : f32 to vector<1x128xf32>
      %25 = arith.maximumf %23, %24 : vector<1x128xf32>
      %26 = vector.broadcast %16 : vector<1x128xf32> to vector<32x128xf32>
      %27 = arith.subf %12, %26 : vector<32x128xf32>
      %c0_16 = arith.constant 0 : index
      %c0_17 = arith.constant 0 : index
      %28 = vector.load %arg4[%c0_16, %c0_17] : memref<1x128xf32, #tpu.memory_space<vmem>>, vector<1x128xf32>
      %cst_18 = arith.constant 9.99999974E-6 : f32
      %29 = vector.broadcast %cst_18 : f32 to vector<1x128xf32>
      %30 = arith.addf %25, %29 : vector<1x128xf32>
      %31 = math.rsqrt %30 : vector<1x128xf32>
      %32 = arith.mulf %28, %31 : vector<1x128xf32>
      %33 = vector.broadcast %32 : vector<1x128xf32> to vector<32x128xf32>
      %34 = arith.mulf %27, %33 : vector<32x128xf32>
      %c0_19 = arith.constant 0 : index
      %c0_20 = arith.constant 0 : index
      %35 = vector.load %arg5[%c0_19, %c0_20] : memref<1x128xf32, #tpu.memory_space<vmem>>, vector<1x128xf32>
      %36 = vector.broadcast %35 : vector<1x128xf32> to vector<32x128xf32>
      %37 = arith.addf %34, %36 : vector<32x128xf32>
      %cst_21 = arith.constant 0.000000e+00 : f32
      %38 = vector.broadcast %cst_21 : f32 to vector<32x128xf32>
      %39 = arith.maximumf %37, %38 : vector<32x128xf32>
      %c0_22 = arith.constant 0 : index
      %c0_23 = arith.constant 0 : index
      %40 = vector.load %arg6[%c0_22, %c0_23] : memref<32x128xf32, #tpu.memory_space<vmem>>, vector<32x128xf32>
      tpu.vector_store %arg6[%c0_22, %c0_23], %39 {strides = array<i32>} : memref<32x128xf32, #tpu.memory_space<vmem>>, vector<32x128xf32>,
    } else {
    }
    return
  }
  func.func @transform_0(%arg0: i32, %arg1: i32) -> (i32, i32) {
    %c0_i32 = arith.constant 0 : i32
    %c0_i32_0 = arith.constant 0 : i32
    return %c0_i32, %arg1 : i32, i32
  }
  func.func @transform_1(%arg0: i32, %arg1: i32) -> (i32, i32) {
    %c0_i32 = arith.constant 0 : i32
    return %arg1, %arg0 : i32, i32
  }
  func.func @transform_2(%arg0: i32, %arg1: i32) -> (i32, i32) {
    %c0_i32 = arith.constant 0 : i32
    %c0_i32_0 = arith.constant 0 : i32
    return %c0_i32, %arg0 : i32, i32
  }
  func.func @transform_3(%arg0: i32, %arg1: i32) -> (i32, i32) {
    %c0_i32 = arith.constant 0 : i32
    %c0_i32_0 = arith.constant 0 : i32
    return %c0_i32, %arg0 : i32, i32
  }
  func.func @transform_4(%arg0: i32, %arg1: i32) -> (i32, i32) {
    %c0_i32 = arith.constant 0 : i32
    %c0_i32_0 = arith.constant 0 : i32
    return %c0_i32, %arg0 : i32, i32
  }
}

module attributes {stable_mosaic.version = 11 : i64} {
  func.func @_mm_bn_kernel(%arg0: i32, %arg1: i32, %arg2: memref<8x384xbf16, #tpu.memory_space<vmem>>, %arg3: memref<384x256xbf16, #tpu.memory_space<vmem>>, %arg4: memref<1x256xf32, #tpu.memory_space<vmem>>, %arg5: memref<1x256xf32, #tpu.memory_space<vmem>>, %arg6: memref<8x256xf32, #tpu.memory_space<vmem>>, %arg7: memref<8x256xf32, #tpu.memory_space<vmem>>) attributes {dimension_semantics = [#tpu.dimension_semantics<parallel>, #tpu.dimension_semantics<arbitrary>], iteration_bounds = array<i64: 1, 3>, scalar_prefetch = 0 : i64, scratch_operands = 1 : i64, tpu.core_type = #tpu.core_type<tc>, window_params = [{transform_indices = @transform_0, window_bounds = array<i64: 8, 384>}, {transform_indices = @transform_1, window_bounds = array<i64: 384, 256>}, {transform_indices = @transform_2, window_bounds = array<i64: 1, 256>}, {transform_indices = @transform_3, window_bounds = array<i64: 1, 256>}, {transform_indices = @transform_4, window_bounds = array<i64: 8, 256>}]} {
    %c0_i32 = arith.constant 0 : i32
    %0 = arith.cmpi eq, %arg1, %c0_i32 : i32
    %1 = arith.extui %0 : i1 to i32
    %c0_i32_0 = arith.constant 0 : i32
    %2 = arith.cmpi ne, %1, %c0_i32_0 : i32
    scf.if %2 {
      %cst_9 = arith.constant 0.000000e+00 : f32
      %12 = vector.broadcast %cst_9 : f32 to vector<8x256xf32>
      %c0_10 = arith.constant 0 : index
      %c0_11 = arith.constant 0 : index
      %13 = vector.load %arg7[%c0_10, %c0_11] : memref<8x256xf32, #tpu.memory_space<vmem>>, vector<8x256xf32>
      tpu.vector_store %arg7[%c0_10, %c0_11], %12 {strides = array<i32>} : memref<8x256xf32, #tpu.memory_space<vmem>>, vector<8x256xf32>,
    } else {
    }
    %c0 = arith.constant 0 : index
    %c0_1 = arith.constant 0 : index
    %3 = vector.load %arg7[%c0, %c0_1] : memref<8x256xf32, #tpu.memory_space<vmem>>, vector<8x256xf32>
    %c0_2 = arith.constant 0 : index
    %c0_3 = arith.constant 0 : index
    %4 = vector.load %arg2[%c0_2, %c0_3] : memref<8x384xbf16, #tpu.memory_space<vmem>>, vector<8x384xbf16>
    %c0_4 = arith.constant 0 : index
    %c0_5 = arith.constant 0 : index
    %5 = vector.load %arg3[%c0_4, %c0_5] : memref<384x256xbf16, #tpu.memory_space<vmem>>, vector<384x256xbf16>
    %cst = arith.constant dense<0.000000e+00> : vector<8x256xf32>
    %6 = tpu.matmul %4, %5, %cst {dimension_numbers = #tpu.dot_dimension_numbers<[1], [0], [0], [1], [0, 0, 1, 1], [], []>} : vector<8x384xbf16>, vector<384x256xbf16>, vector<8x256xf32> -> vector<8x256xf32>
    %7 = arith.addf %3, %6 : vector<8x256xf32>
    %c0_6 = arith.constant 0 : index
    %c0_7 = arith.constant 0 : index
    %8 = vector.load %arg7[%c0_6, %c0_7] : memref<8x256xf32, #tpu.memory_space<vmem>>, vector<8x256xf32>
    tpu.vector_store %arg7[%c0_6, %c0_7], %7 {strides = array<i32>} : memref<8x256xf32, #tpu.memory_space<vmem>>, vector<8x256xf32>,
    %c2_i32 = arith.constant 2 : i32
    %9 = arith.cmpi eq, %arg1, %c2_i32 : i32
    %10 = arith.extui %9 : i1 to i32
    %c0_i32_8 = arith.constant 0 : i32
    %11 = arith.cmpi ne, %10, %c0_i32_8 : i32
    scf.if %11 {
      %c0_9 = arith.constant 0 : index
      %c0_10 = arith.constant 0 : index
      %12 = vector.load %arg7[%c0_9, %c0_10] : memref<8x256xf32, #tpu.memory_space<vmem>>, vector<8x256xf32>
      %cst_11 = arith.constant dense<0.000000e+00> : vector<256xf32>
      %13 = vector.multi_reduction <add>, %12, %cst_11 [0] : vector<8x256xf32> to vector<256xf32>
      %14 = vector.shape_cast %13 : vector<256xf32> to vector<1x256xf32>
      %cst_12 = arith.constant 1.250000e-01 : f32
      %15 = vector.broadcast %cst_12 : f32 to vector<1x256xf32>
      %16 = arith.mulf %14, %15 : vector<1x256xf32>
      %17 = arith.mulf %12, %12 : vector<8x256xf32>
      %cst_13 = arith.constant dense<0.000000e+00> : vector<256xf32>
      %18 = vector.multi_reduction <add>, %17, %cst_13 [0] : vector<8x256xf32> to vector<256xf32>
      %19 = vector.shape_cast %18 : vector<256xf32> to vector<1x256xf32>
      %cst_14 = arith.constant 1.250000e-01 : f32
      %20 = vector.broadcast %cst_14 : f32 to vector<1x256xf32>
      %21 = arith.mulf %19, %20 : vector<1x256xf32>
      %22 = arith.mulf %16, %16 : vector<1x256xf32>
      %23 = arith.subf %21, %22 : vector<1x256xf32>
      %cst_15 = arith.constant 0.000000e+00 : f32
      %24 = vector.broadcast %cst_15 : f32 to vector<1x256xf32>
      %25 = arith.maximumf %23, %24 : vector<1x256xf32>
      %26 = vector.broadcast %16 : vector<1x256xf32> to vector<8x256xf32>
      %27 = arith.subf %12, %26 : vector<8x256xf32>
      %c0_16 = arith.constant 0 : index
      %c0_17 = arith.constant 0 : index
      %28 = vector.load %arg4[%c0_16, %c0_17] : memref<1x256xf32, #tpu.memory_space<vmem>>, vector<1x256xf32>
      %cst_18 = arith.constant 9.99999974E-6 : f32
      %29 = vector.broadcast %cst_18 : f32 to vector<1x256xf32>
      %30 = arith.addf %25, %29 : vector<1x256xf32>
      %31 = math.rsqrt %30 : vector<1x256xf32>
      %32 = arith.mulf %28, %31 : vector<1x256xf32>
      %33 = vector.broadcast %32 : vector<1x256xf32> to vector<8x256xf32>
      %34 = arith.mulf %27, %33 : vector<8x256xf32>
      %c0_19 = arith.constant 0 : index
      %c0_20 = arith.constant 0 : index
      %35 = vector.load %arg5[%c0_19, %c0_20] : memref<1x256xf32, #tpu.memory_space<vmem>>, vector<1x256xf32>
      %36 = vector.broadcast %35 : vector<1x256xf32> to vector<8x256xf32>
      %37 = arith.addf %34, %36 : vector<8x256xf32>
      %cst_21 = arith.constant 0.000000e+00 : f32
      %38 = vector.broadcast %cst_21 : f32 to vector<8x256xf32>
      %39 = arith.maximumf %37, %38 : vector<8x256xf32>
      %c0_22 = arith.constant 0 : index
      %c0_23 = arith.constant 0 : index
      %40 = vector.load %arg6[%c0_22, %c0_23] : memref<8x256xf32, #tpu.memory_space<vmem>>, vector<8x256xf32>
      tpu.vector_store %arg6[%c0_22, %c0_23], %39 {strides = array<i32>} : memref<8x256xf32, #tpu.memory_space<vmem>>, vector<8x256xf32>,
    } else {
    }
    return
  }
  func.func @transform_0(%arg0: i32, %arg1: i32) -> (i32, i32) {
    %c0_i32 = arith.constant 0 : i32
    %c0_i32_0 = arith.constant 0 : i32
    return %c0_i32, %arg1 : i32, i32
  }
  func.func @transform_1(%arg0: i32, %arg1: i32) -> (i32, i32) {
    %c0_i32 = arith.constant 0 : i32
    return %arg1, %arg0 : i32, i32
  }
  func.func @transform_2(%arg0: i32, %arg1: i32) -> (i32, i32) {
    %c0_i32 = arith.constant 0 : i32
    %c0_i32_0 = arith.constant 0 : i32
    return %c0_i32, %arg0 : i32, i32
  }
  func.func @transform_3(%arg0: i32, %arg1: i32) -> (i32, i32) {
    %c0_i32 = arith.constant 0 : i32
    %c0_i32_0 = arith.constant 0 : i32
    return %c0_i32, %arg0 : i32, i32
  }
  func.func @transform_4(%arg0: i32, %arg1: i32) -> (i32, i32) {
    %c0_i32 = arith.constant 0 : i32
    %c0_i32_0 = arith.constant 0 : i32
    return %c0_i32, %arg0 : i32, i32
  }
}

module attributes {stable_mosaic.version = 11 : i64} {
  func.func @_mm_bn_kernel(%arg0: i32, %arg1: i32, %arg2: memref<8x128xbf16, #tpu.memory_space<vmem>>, %arg3: memref<128x256xbf16, #tpu.memory_space<vmem>>, %arg4: memref<1x256xf32, #tpu.memory_space<vmem>>, %arg5: memref<1x256xf32, #tpu.memory_space<vmem>>, %arg6: memref<8x256xf32, #tpu.memory_space<vmem>>, %arg7: memref<8x256xf32, #tpu.memory_space<vmem>>) attributes {dimension_semantics = [#tpu.dimension_semantics<parallel>, #tpu.dimension_semantics<arbitrary>], iteration_bounds = array<i64: 1, 1>, scalar_prefetch = 0 : i64, scratch_operands = 1 : i64, tpu.core_type = #tpu.core_type<tc>, window_params = [{transform_indices = @transform_0, window_bounds = array<i64: 8, 128>}, {transform_indices = @transform_1, window_bounds = array<i64: 128, 256>}, {transform_indices = @transform_2, window_bounds = array<i64: 1, 256>}, {transform_indices = @transform_3, window_bounds = array<i64: 1, 256>}, {transform_indices = @transform_4, window_bounds = array<i64: 8, 256>}]} {
    %c0_i32 = arith.constant 0 : i32
    %0 = arith.cmpi eq, %arg1, %c0_i32 : i32
    %1 = arith.extui %0 : i1 to i32
    %c0_i32_0 = arith.constant 0 : i32
    %2 = arith.cmpi ne, %1, %c0_i32_0 : i32
    scf.if %2 {
      %cst_10 = arith.constant 0.000000e+00 : f32
      %12 = vector.broadcast %cst_10 : f32 to vector<8x256xf32>
      %c0_11 = arith.constant 0 : index
      %c0_12 = arith.constant 0 : index
      %13 = vector.load %arg7[%c0_11, %c0_12] : memref<8x256xf32, #tpu.memory_space<vmem>>, vector<8x256xf32>
      tpu.vector_store %arg7[%c0_11, %c0_12], %12 {strides = array<i32>} : memref<8x256xf32, #tpu.memory_space<vmem>>, vector<8x256xf32>,
    } else {
    }
    %c0 = arith.constant 0 : index
    %c0_1 = arith.constant 0 : index
    %3 = vector.load %arg7[%c0, %c0_1] : memref<8x256xf32, #tpu.memory_space<vmem>>, vector<8x256xf32>
    %c0_2 = arith.constant 0 : index
    %c0_3 = arith.constant 0 : index
    %4 = vector.load %arg2[%c0_2, %c0_3] : memref<8x128xbf16, #tpu.memory_space<vmem>>, vector<8x128xbf16>
    %c0_4 = arith.constant 0 : index
    %c0_5 = arith.constant 0 : index
    %5 = vector.load %arg3[%c0_4, %c0_5] : memref<128x256xbf16, #tpu.memory_space<vmem>>, vector<128x256xbf16>
    %cst = arith.constant dense<0.000000e+00> : vector<8x256xf32>
    %6 = tpu.matmul %4, %5, %cst {dimension_numbers = #tpu.dot_dimension_numbers<[1], [0], [0], [1], [0, 0, 1, 1], [], []>} : vector<8x128xbf16>, vector<128x256xbf16>, vector<8x256xf32> -> vector<8x256xf32>
    %7 = arith.addf %3, %6 : vector<8x256xf32>
    %c0_6 = arith.constant 0 : index
    %c0_7 = arith.constant 0 : index
    %8 = vector.load %arg7[%c0_6, %c0_7] : memref<8x256xf32, #tpu.memory_space<vmem>>, vector<8x256xf32>
    tpu.vector_store %arg7[%c0_6, %c0_7], %7 {strides = array<i32>} : memref<8x256xf32, #tpu.memory_space<vmem>>, vector<8x256xf32>,
    %c0_i32_8 = arith.constant 0 : i32
    %9 = arith.cmpi eq, %arg1, %c0_i32_8 : i32
    %10 = arith.extui %9 : i1 to i32
    %c0_i32_9 = arith.constant 0 : i32
    %11 = arith.cmpi ne, %10, %c0_i32_9 : i32
    scf.if %11 {
      %c0_10 = arith.constant 0 : index
      %c0_11 = arith.constant 0 : index
      %12 = vector.load %arg7[%c0_10, %c0_11] : memref<8x256xf32, #tpu.memory_space<vmem>>, vector<8x256xf32>
      %cst_12 = arith.constant dense<0.000000e+00> : vector<256xf32>
      %13 = vector.multi_reduction <add>, %12, %cst_12 [0] : vector<8x256xf32> to vector<256xf32>
      %14 = vector.shape_cast %13 : vector<256xf32> to vector<1x256xf32>
      %cst_13 = arith.constant 1.250000e-01 : f32
      %15 = vector.broadcast %cst_13 : f32 to vector<1x256xf32>
      %16 = arith.mulf %14, %15 : vector<1x256xf32>
      %17 = arith.mulf %12, %12 : vector<8x256xf32>
      %cst_14 = arith.constant dense<0.000000e+00> : vector<256xf32>
      %18 = vector.multi_reduction <add>, %17, %cst_14 [0] : vector<8x256xf32> to vector<256xf32>
      %19 = vector.shape_cast %18 : vector<256xf32> to vector<1x256xf32>
      %cst_15 = arith.constant 1.250000e-01 : f32
      %20 = vector.broadcast %cst_15 : f32 to vector<1x256xf32>
      %21 = arith.mulf %19, %20 : vector<1x256xf32>
      %22 = arith.mulf %16, %16 : vector<1x256xf32>
      %23 = arith.subf %21, %22 : vector<1x256xf32>
      %cst_16 = arith.constant 0.000000e+00 : f32
      %24 = vector.broadcast %cst_16 : f32 to vector<1x256xf32>
      %25 = arith.maximumf %23, %24 : vector<1x256xf32>
      %26 = vector.broadcast %16 : vector<1x256xf32> to vector<8x256xf32>
      %27 = arith.subf %12, %26 : vector<8x256xf32>
      %c0_17 = arith.constant 0 : index
      %c0_18 = arith.constant 0 : index
      %28 = vector.load %arg4[%c0_17, %c0_18] : memref<1x256xf32, #tpu.memory_space<vmem>>, vector<1x256xf32>
      %cst_19 = arith.constant 9.99999974E-6 : f32
      %29 = vector.broadcast %cst_19 : f32 to vector<1x256xf32>
      %30 = arith.addf %25, %29 : vector<1x256xf32>
      %31 = math.rsqrt %30 : vector<1x256xf32>
      %32 = arith.mulf %28, %31 : vector<1x256xf32>
      %33 = vector.broadcast %32 : vector<1x256xf32> to vector<8x256xf32>
      %34 = arith.mulf %27, %33 : vector<8x256xf32>
      %c0_20 = arith.constant 0 : index
      %c0_21 = arith.constant 0 : index
      %35 = vector.load %arg5[%c0_20, %c0_21] : memref<1x256xf32, #tpu.memory_space<vmem>>, vector<1x256xf32>
      %36 = vector.broadcast %35 : vector<1x256xf32> to vector<8x256xf32>
      %37 = arith.addf %34, %36 : vector<8x256xf32>
      %c0_22 = arith.constant 0 : index
      %c0_23 = arith.constant 0 : index
      %38 = vector.load %arg6[%c0_22, %c0_23] : memref<8x256xf32, #tpu.memory_space<vmem>>, vector<8x256xf32>
      tpu.vector_store %arg6[%c0_22, %c0_23], %37 {strides = array<i32>} : memref<8x256xf32, #tpu.memory_space<vmem>>, vector<8x256xf32>,
    } else {
    }
    return
  }
  func.func @transform_0(%arg0: i32, %arg1: i32) -> (i32, i32) {
    %c0_i32 = arith.constant 0 : i32
    %c0_i32_0 = arith.constant 0 : i32
    return %c0_i32, %arg1 : i32, i32
  }
  func.func @transform_1(%arg0: i32, %arg1: i32) -> (i32, i32) {
    %c0_i32 = arith.constant 0 : i32
    return %arg1, %arg0 : i32, i32
  }
  func.func @transform_2(%arg0: i32, %arg1: i32) -> (i32, i32) {
    %c0_i32 = arith.constant 0 : i32
    %c0_i32_0 = arith.constant 0 : i32
    return %c0_i32, %arg0 : i32, i32
  }
  func.func @transform_3(%arg0: i32, %arg1: i32) -> (i32, i32) {
    %c0_i32 = arith.constant 0 : i32
    %c0_i32_0 = arith.constant 0 : i32
    return %c0_i32, %arg0 : i32, i32
  }
  func.func @transform_4(%arg0: i32, %arg1: i32) -> (i32, i32) {
    %c0_i32 = arith.constant 0 : i32
    %c0_i32_0 = arith.constant 0 : i32
    return %c0_i32, %arg0 : i32, i32
  }
}

module attributes {stable_mosaic.version = 11 : i64} {
  func.func @_mm_bn_kernel(%arg0: i32, %arg1: i32, %arg2: memref<8x384xbf16, #tpu.memory_space<vmem>>, %arg3: memref<384x256xbf16, #tpu.memory_space<vmem>>, %arg4: memref<1x256xf32, #tpu.memory_space<vmem>>, %arg5: memref<1x256xf32, #tpu.memory_space<vmem>>, %arg6: memref<8x256xf32, #tpu.memory_space<vmem>>, %arg7: memref<8x256xf32, #tpu.memory_space<vmem>>, %arg8: memref<8x256xf32, #tpu.memory_space<vmem>>) attributes {dimension_semantics = [#tpu.dimension_semantics<parallel>, #tpu.dimension_semantics<arbitrary>], iteration_bounds = array<i64: 1, 6>, scalar_prefetch = 0 : i64, scratch_operands = 1 : i64, tpu.core_type = #tpu.core_type<tc>, window_params = [{transform_indices = @transform_0, window_bounds = array<i64: 8, 384>}, {transform_indices = @transform_1, window_bounds = array<i64: 384, 256>}, {transform_indices = @transform_2, window_bounds = array<i64: 1, 256>}, {transform_indices = @transform_3, window_bounds = array<i64: 1, 256>}, {transform_indices = @transform_4, window_bounds = array<i64: 8, 256>}, {transform_indices = @transform_5, window_bounds = array<i64: 8, 256>}]} {
    %c0_i32 = arith.constant 0 : i32
    %0 = arith.cmpi eq, %arg1, %c0_i32 : i32
    %1 = arith.extui %0 : i1 to i32
    %c0_i32_0 = arith.constant 0 : i32
    %2 = arith.cmpi ne, %1, %c0_i32_0 : i32
    scf.if %2 {
      %cst_9 = arith.constant 0.000000e+00 : f32
      %12 = vector.broadcast %cst_9 : f32 to vector<8x256xf32>
      %c0_10 = arith.constant 0 : index
      %c0_11 = arith.constant 0 : index
      %13 = vector.load %arg8[%c0_10, %c0_11] : memref<8x256xf32, #tpu.memory_space<vmem>>, vector<8x256xf32>
      tpu.vector_store %arg8[%c0_10, %c0_11], %12 {strides = array<i32>} : memref<8x256xf32, #tpu.memory_space<vmem>>, vector<8x256xf32>,
    } else {
    }
    %c0 = arith.constant 0 : index
    %c0_1 = arith.constant 0 : index
    %3 = vector.load %arg8[%c0, %c0_1] : memref<8x256xf32, #tpu.memory_space<vmem>>, vector<8x256xf32>
    %c0_2 = arith.constant 0 : index
    %c0_3 = arith.constant 0 : index
    %4 = vector.load %arg2[%c0_2, %c0_3] : memref<8x384xbf16, #tpu.memory_space<vmem>>, vector<8x384xbf16>
    %c0_4 = arith.constant 0 : index
    %c0_5 = arith.constant 0 : index
    %5 = vector.load %arg3[%c0_4, %c0_5] : memref<384x256xbf16, #tpu.memory_space<vmem>>, vector<384x256xbf16>
    %cst = arith.constant dense<0.000000e+00> : vector<8x256xf32>
    %6 = tpu.matmul %4, %5, %cst {dimension_numbers = #tpu.dot_dimension_numbers<[1], [0], [0], [1], [0, 0, 1, 1], [], []>} : vector<8x384xbf16>, vector<384x256xbf16>, vector<8x256xf32> -> vector<8x256xf32>
    %7 = arith.addf %3, %6 : vector<8x256xf32>
    %c0_6 = arith.constant 0 : index
    %c0_7 = arith.constant 0 : index
    %8 = vector.load %arg8[%c0_6, %c0_7] : memref<8x256xf32, #tpu.memory_space<vmem>>, vector<8x256xf32>
    tpu.vector_store %arg8[%c0_6, %c0_7], %7 {strides = array<i32>} : memref<8x256xf32, #tpu.memory_space<vmem>>, vector<8x256xf32>,
    %c5_i32 = arith.constant 5 : i32
    %9 = arith.cmpi eq, %arg1, %c5_i32 : i32
    %10 = arith.extui %9 : i1 to i32
    %c0_i32_8 = arith.constant 0 : i32
    %11 = arith.cmpi ne, %10, %c0_i32_8 : i32
    scf.if %11 {
      %c0_9 = arith.constant 0 : index
      %c0_10 = arith.constant 0 : index
      %12 = vector.load %arg8[%c0_9, %c0_10] : memref<8x256xf32, #tpu.memory_space<vmem>>, vector<8x256xf32>
      %cst_11 = arith.constant dense<0.000000e+00> : vector<256xf32>
      %13 = vector.multi_reduction <add>, %12, %cst_11 [0] : vector<8x256xf32> to vector<256xf32>
      %14 = vector.shape_cast %13 : vector<256xf32> to vector<1x256xf32>
      %cst_12 = arith.constant 1.250000e-01 : f32
      %15 = vector.broadcast %cst_12 : f32 to vector<1x256xf32>
      %16 = arith.mulf %14, %15 : vector<1x256xf32>
      %17 = arith.mulf %12, %12 : vector<8x256xf32>
      %cst_13 = arith.constant dense<0.000000e+00> : vector<256xf32>
      %18 = vector.multi_reduction <add>, %17, %cst_13 [0] : vector<8x256xf32> to vector<256xf32>
      %19 = vector.shape_cast %18 : vector<256xf32> to vector<1x256xf32>
      %cst_14 = arith.constant 1.250000e-01 : f32
      %20 = vector.broadcast %cst_14 : f32 to vector<1x256xf32>
      %21 = arith.mulf %19, %20 : vector<1x256xf32>
      %22 = arith.mulf %16, %16 : vector<1x256xf32>
      %23 = arith.subf %21, %22 : vector<1x256xf32>
      %cst_15 = arith.constant 0.000000e+00 : f32
      %24 = vector.broadcast %cst_15 : f32 to vector<1x256xf32>
      %25 = arith.maximumf %23, %24 : vector<1x256xf32>
      %26 = vector.broadcast %16 : vector<1x256xf32> to vector<8x256xf32>
      %27 = arith.subf %12, %26 : vector<8x256xf32>
      %c0_16 = arith.constant 0 : index
      %c0_17 = arith.constant 0 : index
      %28 = vector.load %arg4[%c0_16, %c0_17] : memref<1x256xf32, #tpu.memory_space<vmem>>, vector<1x256xf32>
      %cst_18 = arith.constant 9.99999974E-6 : f32
      %29 = vector.broadcast %cst_18 : f32 to vector<1x256xf32>
      %30 = arith.addf %25, %29 : vector<1x256xf32>
      %31 = math.rsqrt %30 : vector<1x256xf32>
      %32 = arith.mulf %28, %31 : vector<1x256xf32>
      %33 = vector.broadcast %32 : vector<1x256xf32> to vector<8x256xf32>
      %34 = arith.mulf %27, %33 : vector<8x256xf32>
      %c0_19 = arith.constant 0 : index
      %c0_20 = arith.constant 0 : index
      %35 = vector.load %arg5[%c0_19, %c0_20] : memref<1x256xf32, #tpu.memory_space<vmem>>, vector<1x256xf32>
      %36 = vector.broadcast %35 : vector<1x256xf32> to vector<8x256xf32>
      %37 = arith.addf %34, %36 : vector<8x256xf32>
      %c0_21 = arith.constant 0 : index
      %c0_22 = arith.constant 0 : index
      %38 = vector.load %arg6[%c0_21, %c0_22] : memref<8x256xf32, #tpu.memory_space<vmem>>, vector<8x256xf32>
      %39 = arith.addf %37, %38 : vector<8x256xf32>
      %cst_23 = arith.constant 0.000000e+00 : f32
      %40 = vector.broadcast %cst_23 : f32 to vector<8x256xf32>
      %41 = arith.maximumf %39, %40 : vector<8x256xf32>
      %c0_24 = arith.constant 0 : index
      %c0_25 = arith.constant 0 : index
      %42 = vector.load %arg7[%c0_24, %c0_25] : memref<8x256xf32, #tpu.memory_space<vmem>>, vector<8x256xf32>
      tpu.vector_store %arg7[%c0_24, %c0_25], %41 {strides = array<i32>} : memref<8x256xf32, #tpu.memory_space<vmem>>, vector<8x256xf32>,
    } else {
    }
    return
  }
  func.func @transform_0(%arg0: i32, %arg1: i32) -> (i32, i32) {
    %c0_i32 = arith.constant 0 : i32
    %c0_i32_0 = arith.constant 0 : i32
    return %c0_i32, %arg1 : i32, i32
  }
  func.func @transform_1(%arg0: i32, %arg1: i32) -> (i32, i32) {
    %c0_i32 = arith.constant 0 : i32
    return %arg1, %arg0 : i32, i32
  }
  func.func @transform_2(%arg0: i32, %arg1: i32) -> (i32, i32) {
    %c0_i32 = arith.constant 0 : i32
    %c0_i32_0 = arith.constant 0 : i32
    return %c0_i32, %arg0 : i32, i32
  }
  func.func @transform_3(%arg0: i32, %arg1: i32) -> (i32, i32) {
    %c0_i32 = arith.constant 0 : i32
    %c0_i32_0 = arith.constant 0 : i32
    return %c0_i32, %arg0 : i32, i32
  }
  func.func @transform_4(%arg0: i32, %arg1: i32) -> (i32, i32) {
    %c0_i32 = arith.constant 0 : i32
    %c0_i32_0 = arith.constant 0 : i32
    return %c0_i32, %arg0 : i32, i32
  }
  func.func @transform_5(%arg0: i32, %arg1: i32) -> (i32, i32) {
    %c0_i32 = arith.constant 0 : i32
    %c0_i32_0 = arith.constant 0 : i32
    return %c0_i32, %arg0 : i32, i32
  }
}

module attributes {stable_mosaic.version = 11 : i64} {
  func.func @_mm_bn_kernel(%arg0: i32, %arg1: i32, %arg2: memref<8x384xbf16, #tpu.memory_space<vmem>>, %arg3: memref<384x256xbf16, #tpu.memory_space<vmem>>, %arg4: memref<1x256xf32, #tpu.memory_space<vmem>>, %arg5: memref<1x256xf32, #tpu.memory_space<vmem>>, %arg6: memref<8x256xf32, #tpu.memory_space<vmem>>, %arg7: memref<8x256xf32, #tpu.memory_space<vmem>>) attributes {dimension_semantics = [#tpu.dimension_semantics<parallel>, #tpu.dimension_semantics<arbitrary>], iteration_bounds = array<i64: 1, 6>, scalar_prefetch = 0 : i64, scratch_operands = 1 : i64, tpu.core_type = #tpu.core_type<tc>, window_params = [{transform_indices = @transform_0, window_bounds = array<i64: 8, 384>}, {transform_indices = @transform_1, window_bounds = array<i64: 384, 256>}, {transform_indices = @transform_2, window_bounds = array<i64: 1, 256>}, {transform_indices = @transform_3, window_bounds = array<i64: 1, 256>}, {transform_indices = @transform_4, window_bounds = array<i64: 8, 256>}]} {
    %c0_i32 = arith.constant 0 : i32
    %0 = arith.cmpi eq, %arg1, %c0_i32 : i32
    %1 = arith.extui %0 : i1 to i32
    %c0_i32_0 = arith.constant 0 : i32
    %2 = arith.cmpi ne, %1, %c0_i32_0 : i32
    scf.if %2 {
      %cst_9 = arith.constant 0.000000e+00 : f32
      %12 = vector.broadcast %cst_9 : f32 to vector<8x256xf32>
      %c0_10 = arith.constant 0 : index
      %c0_11 = arith.constant 0 : index
      %13 = vector.load %arg7[%c0_10, %c0_11] : memref<8x256xf32, #tpu.memory_space<vmem>>, vector<8x256xf32>
      tpu.vector_store %arg7[%c0_10, %c0_11], %12 {strides = array<i32>} : memref<8x256xf32, #tpu.memory_space<vmem>>, vector<8x256xf32>,
    } else {
    }
    %c0 = arith.constant 0 : index
    %c0_1 = arith.constant 0 : index
    %3 = vector.load %arg7[%c0, %c0_1] : memref<8x256xf32, #tpu.memory_space<vmem>>, vector<8x256xf32>
    %c0_2 = arith.constant 0 : index
    %c0_3 = arith.constant 0 : index
    %4 = vector.load %arg2[%c0_2, %c0_3] : memref<8x384xbf16, #tpu.memory_space<vmem>>, vector<8x384xbf16>
    %c0_4 = arith.constant 0 : index
    %c0_5 = arith.constant 0 : index
    %5 = vector.load %arg3[%c0_4, %c0_5] : memref<384x256xbf16, #tpu.memory_space<vmem>>, vector<384x256xbf16>
    %cst = arith.constant dense<0.000000e+00> : vector<8x256xf32>
    %6 = tpu.matmul %4, %5, %cst {dimension_numbers = #tpu.dot_dimension_numbers<[1], [0], [0], [1], [0, 0, 1, 1], [], []>} : vector<8x384xbf16>, vector<384x256xbf16>, vector<8x256xf32> -> vector<8x256xf32>
    %7 = arith.addf %3, %6 : vector<8x256xf32>
    %c0_6 = arith.constant 0 : index
    %c0_7 = arith.constant 0 : index
    %8 = vector.load %arg7[%c0_6, %c0_7] : memref<8x256xf32, #tpu.memory_space<vmem>>, vector<8x256xf32>
    tpu.vector_store %arg7[%c0_6, %c0_7], %7 {strides = array<i32>} : memref<8x256xf32, #tpu.memory_space<vmem>>, vector<8x256xf32>,
    %c5_i32 = arith.constant 5 : i32
    %9 = arith.cmpi eq, %arg1, %c5_i32 : i32
    %10 = arith.extui %9 : i1 to i32
    %c0_i32_8 = arith.constant 0 : i32
    %11 = arith.cmpi ne, %10, %c0_i32_8 : i32
    scf.if %11 {
      %c0_9 = arith.constant 0 : index
      %c0_10 = arith.constant 0 : index
      %12 = vector.load %arg7[%c0_9, %c0_10] : memref<8x256xf32, #tpu.memory_space<vmem>>, vector<8x256xf32>
      %cst_11 = arith.constant dense<0.000000e+00> : vector<256xf32>
      %13 = vector.multi_reduction <add>, %12, %cst_11 [0] : vector<8x256xf32> to vector<256xf32>
      %14 = vector.shape_cast %13 : vector<256xf32> to vector<1x256xf32>
      %cst_12 = arith.constant 1.250000e-01 : f32
      %15 = vector.broadcast %cst_12 : f32 to vector<1x256xf32>
      %16 = arith.mulf %14, %15 : vector<1x256xf32>
      %17 = arith.mulf %12, %12 : vector<8x256xf32>
      %cst_13 = arith.constant dense<0.000000e+00> : vector<256xf32>
      %18 = vector.multi_reduction <add>, %17, %cst_13 [0] : vector<8x256xf32> to vector<256xf32>
      %19 = vector.shape_cast %18 : vector<256xf32> to vector<1x256xf32>
      %cst_14 = arith.constant 1.250000e-01 : f32
      %20 = vector.broadcast %cst_14 : f32 to vector<1x256xf32>
      %21 = arith.mulf %19, %20 : vector<1x256xf32>
      %22 = arith.mulf %16, %16 : vector<1x256xf32>
      %23 = arith.subf %21, %22 : vector<1x256xf32>
      %cst_15 = arith.constant 0.000000e+00 : f32
      %24 = vector.broadcast %cst_15 : f32 to vector<1x256xf32>
      %25 = arith.maximumf %23, %24 : vector<1x256xf32>
      %26 = vector.broadcast %16 : vector<1x256xf32> to vector<8x256xf32>
      %27 = arith.subf %12, %26 : vector<8x256xf32>
      %c0_16 = arith.constant 0 : index
      %c0_17 = arith.constant 0 : index
      %28 = vector.load %arg4[%c0_16, %c0_17] : memref<1x256xf32, #tpu.memory_space<vmem>>, vector<1x256xf32>
      %cst_18 = arith.constant 9.99999974E-6 : f32
      %29 = vector.broadcast %cst_18 : f32 to vector<1x256xf32>
      %30 = arith.addf %25, %29 : vector<1x256xf32>
      %31 = math.rsqrt %30 : vector<1x256xf32>
      %32 = arith.mulf %28, %31 : vector<1x256xf32>
      %33 = vector.broadcast %32 : vector<1x256xf32> to vector<8x256xf32>
      %34 = arith.mulf %27, %33 : vector<8x256xf32>
      %c0_19 = arith.constant 0 : index
      %c0_20 = arith.constant 0 : index
      %35 = vector.load %arg5[%c0_19, %c0_20] : memref<1x256xf32, #tpu.memory_space<vmem>>, vector<1x256xf32>
      %36 = vector.broadcast %35 : vector<1x256xf32> to vector<8x256xf32>
      %37 = arith.addf %34, %36 : vector<8x256xf32>
      %cst_21 = arith.constant 0.000000e+00 : f32
      %38 = vector.broadcast %cst_21 : f32 to vector<8x256xf32>
      %39 = arith.maximumf %37, %38 : vector<8x256xf32>
      %c0_22 = arith.constant 0 : index
      %c0_23 = arith.constant 0 : index
      %40 = vector.load %arg6[%c0_22, %c0_23] : memref<8x256xf32, #tpu.memory_space<vmem>>, vector<8x256xf32>
      tpu.vector_store %arg6[%c0_22, %c0_23], %39 {strides = array<i32>} : memref<8x256xf32, #tpu.memory_space<vmem>>, vector<8x256xf32>,
    } else {
    }
    return
  }
  func.func @transform_0(%arg0: i32, %arg1: i32) -> (i32, i32) {
    %c0_i32 = arith.constant 0 : i32
    %c0_i32_0 = arith.constant 0 : i32
    return %c0_i32, %arg1 : i32, i32
  }
  func.func @transform_1(%arg0: i32, %arg1: i32) -> (i32, i32) {
    %c0_i32 = arith.constant 0 : i32
    return %arg1, %arg0 : i32, i32
  }
  func.func @transform_2(%arg0: i32, %arg1: i32) -> (i32, i32) {
    %c0_i32 = arith.constant 0 : i32
    %c0_i32_0 = arith.constant 0 : i32
    return %c0_i32, %arg0 : i32, i32
  }
  func.func @transform_3(%arg0: i32, %arg1: i32) -> (i32, i32) {
    %c0_i32 = arith.constant 0 : i32
    %c0_i32_0 = arith.constant 0 : i32
    return %c0_i32, %arg0 : i32, i32
  }
  func.func @transform_4(%arg0: i32, %arg1: i32) -> (i32, i32) {
    %c0_i32 = arith.constant 0 : i32
    %c0_i32_0 = arith.constant 0 : i32
    return %c0_i32, %arg0 : i32, i32
  }
}

module attributes {stable_mosaic.version = 11 : i64} {
  func.func @_mm_bn_kernel(%arg0: i32, %arg1: i32, %arg2: memref<2x384xbf16, #tpu.memory_space<vmem>>, %arg3: memref<384x256xbf16, #tpu.memory_space<vmem>>, %arg4: memref<1x256xf32, #tpu.memory_space<vmem>>, %arg5: memref<1x256xf32, #tpu.memory_space<vmem>>, %arg6: memref<2x256xf32, #tpu.memory_space<vmem>>, %arg7: memref<2x256xf32, #tpu.memory_space<vmem>>) attributes {dimension_semantics = [#tpu.dimension_semantics<parallel>, #tpu.dimension_semantics<arbitrary>], iteration_bounds = array<i64: 2, 6>, scalar_prefetch = 0 : i64, scratch_operands = 1 : i64, tpu.core_type = #tpu.core_type<tc>, window_params = [{transform_indices = @transform_0, window_bounds = array<i64: 2, 384>}, {transform_indices = @transform_1, window_bounds = array<i64: 384, 256>}, {transform_indices = @transform_2, window_bounds = array<i64: 1, 256>}, {transform_indices = @transform_3, window_bounds = array<i64: 1, 256>}, {transform_indices = @transform_4, window_bounds = array<i64: 2, 256>}]} {
    %c0_i32 = arith.constant 0 : i32
    %0 = arith.cmpi eq, %arg1, %c0_i32 : i32
    %1 = arith.extui %0 : i1 to i32
    %c0_i32_0 = arith.constant 0 : i32
    %2 = arith.cmpi ne, %1, %c0_i32_0 : i32
    scf.if %2 {
      %cst_9 = arith.constant 0.000000e+00 : f32
      %12 = vector.broadcast %cst_9 : f32 to vector<2x256xf32>
      %c0_10 = arith.constant 0 : index
      %c0_11 = arith.constant 0 : index
      %13 = vector.load %arg7[%c0_10, %c0_11] : memref<2x256xf32, #tpu.memory_space<vmem>>, vector<2x256xf32>
      tpu.vector_store %arg7[%c0_10, %c0_11], %12 {strides = array<i32>} : memref<2x256xf32, #tpu.memory_space<vmem>>, vector<2x256xf32>,
    } else {
    }
    %c0 = arith.constant 0 : index
    %c0_1 = arith.constant 0 : index
    %3 = vector.load %arg7[%c0, %c0_1] : memref<2x256xf32, #tpu.memory_space<vmem>>, vector<2x256xf32>
    %c0_2 = arith.constant 0 : index
    %c0_3 = arith.constant 0 : index
    %4 = vector.load %arg2[%c0_2, %c0_3] : memref<2x384xbf16, #tpu.memory_space<vmem>>, vector<2x384xbf16>
    %c0_4 = arith.constant 0 : index
    %c0_5 = arith.constant 0 : index
    %5 = vector.load %arg3[%c0_4, %c0_5] : memref<384x256xbf16, #tpu.memory_space<vmem>>, vector<384x256xbf16>
    %cst = arith.constant dense<0.000000e+00> : vector<2x256xf32>
    %6 = tpu.matmul %4, %5, %cst {dimension_numbers = #tpu.dot_dimension_numbers<[1], [0], [0], [1], [0, 0, 1, 1], [], []>} : vector<2x384xbf16>, vector<384x256xbf16>, vector<2x256xf32> -> vector<2x256xf32>
    %7 = arith.addf %3, %6 : vector<2x256xf32>
    %c0_6 = arith.constant 0 : index
    %c0_7 = arith.constant 0 : index
    %8 = vector.load %arg7[%c0_6, %c0_7] : memref<2x256xf32, #tpu.memory_space<vmem>>, vector<2x256xf32>
    tpu.vector_store %arg7[%c0_6, %c0_7], %7 {strides = array<i32>} : memref<2x256xf32, #tpu.memory_space<vmem>>, vector<2x256xf32>,
    %c5_i32 = arith.constant 5 : i32
    %9 = arith.cmpi eq, %arg1, %c5_i32 : i32
    %10 = arith.extui %9 : i1 to i32
    %c0_i32_8 = arith.constant 0 : i32
    %11 = arith.cmpi ne, %10, %c0_i32_8 : i32
    scf.if %11 {
      %c0_9 = arith.constant 0 : index
      %c0_10 = arith.constant 0 : index
      %12 = vector.load %arg7[%c0_9, %c0_10] : memref<2x256xf32, #tpu.memory_space<vmem>>, vector<2x256xf32>
      %cst_11 = arith.constant dense<0.000000e+00> : vector<256xf32>
      %13 = vector.multi_reduction <add>, %12, %cst_11 [0] : vector<2x256xf32> to vector<256xf32>
      %14 = vector.shape_cast %13 : vector<256xf32> to vector<1x256xf32>
      %cst_12 = arith.constant 5.000000e-01 : f32
      %15 = vector.broadcast %cst_12 : f32 to vector<1x256xf32>
      %16 = arith.mulf %14, %15 : vector<1x256xf32>
      %17 = arith.mulf %12, %12 : vector<2x256xf32>
      %cst_13 = arith.constant dense<0.000000e+00> : vector<256xf32>
      %18 = vector.multi_reduction <add>, %17, %cst_13 [0] : vector<2x256xf32> to vector<256xf32>
      %19 = vector.shape_cast %18 : vector<256xf32> to vector<1x256xf32>
      %cst_14 = arith.constant 5.000000e-01 : f32
      %20 = vector.broadcast %cst_14 : f32 to vector<1x256xf32>
      %21 = arith.mulf %19, %20 : vector<1x256xf32>
      %22 = arith.mulf %16, %16 : vector<1x256xf32>
      %23 = arith.subf %21, %22 : vector<1x256xf32>
      %cst_15 = arith.constant 0.000000e+00 : f32
      %24 = vector.broadcast %cst_15 : f32 to vector<1x256xf32>
      %25 = arith.maximumf %23, %24 : vector<1x256xf32>
      %26 = vector.broadcast %16 : vector<1x256xf32> to vector<2x256xf32>
      %27 = arith.subf %12, %26 : vector<2x256xf32>
      %c0_16 = arith.constant 0 : index
      %c0_17 = arith.constant 0 : index
      %28 = vector.load %arg4[%c0_16, %c0_17] : memref<1x256xf32, #tpu.memory_space<vmem>>, vector<1x256xf32>
      %cst_18 = arith.constant 9.99999974E-6 : f32
      %29 = vector.broadcast %cst_18 : f32 to vector<1x256xf32>
      %30 = arith.addf %25, %29 : vector<1x256xf32>
      %31 = math.rsqrt %30 : vector<1x256xf32>
      %32 = arith.mulf %28, %31 : vector<1x256xf32>
      %33 = vector.broadcast %32 : vector<1x256xf32> to vector<2x256xf32>
      %34 = arith.mulf %27, %33 : vector<2x256xf32>
      %c0_19 = arith.constant 0 : index
      %c0_20 = arith.constant 0 : index
      %35 = vector.load %arg5[%c0_19, %c0_20] : memref<1x256xf32, #tpu.memory_space<vmem>>, vector<1x256xf32>
      %36 = vector.broadcast %35 : vector<1x256xf32> to vector<2x256xf32>
      %37 = arith.addf %34, %36 : vector<2x256xf32>
      %cst_21 = arith.constant 0.000000e+00 : f32
      %38 = vector.broadcast %cst_21 : f32 to vector<2x256xf32>
      %39 = arith.maximumf %37, %38 : vector<2x256xf32>
      %c0_22 = arith.constant 0 : index
      %c0_23 = arith.constant 0 : index
      %40 = vector.load %arg6[%c0_22, %c0_23] : memref<2x256xf32, #tpu.memory_space<vmem>>, vector<2x256xf32>
      tpu.vector_store %arg6[%c0_22, %c0_23], %39 {strides = array<i32>} : memref<2x256xf32, #tpu.memory_space<vmem>>, vector<2x256xf32>,
    } else {
    }
    return
  }
  func.func @transform_0(%arg0: i32, %arg1: i32) -> (i32, i32) {
    %c0_i32 = arith.constant 0 : i32
    %c0_i32_0 = arith.constant 0 : i32
    return %c0_i32, %arg1 : i32, i32
  }
  func.func @transform_1(%arg0: i32, %arg1: i32) -> (i32, i32) {
    %c0_i32 = arith.constant 0 : i32
    return %arg1, %arg0 : i32, i32
  }
  func.func @transform_2(%arg0: i32, %arg1: i32) -> (i32, i32) {
    %c0_i32 = arith.constant 0 : i32
    %c0_i32_0 = arith.constant 0 : i32
    return %c0_i32, %arg0 : i32, i32
  }
  func.func @transform_3(%arg0: i32, %arg1: i32) -> (i32, i32) {
    %c0_i32 = arith.constant 0 : i32
    %c0_i32_0 = arith.constant 0 : i32
    return %c0_i32, %arg0 : i32, i32
  }
  func.func @transform_4(%arg0: i32, %arg1: i32) -> (i32, i32) {
    %c0_i32 = arith.constant 0 : i32
    %c0_i32_0 = arith.constant 0 : i32
    return %c0_i32, %arg0 : i32, i32
  }
}

module attributes {stable_mosaic.version = 11 : i64} {
  func.func @_mm_bn_kernel(%arg0: i32, %arg1: i32, %arg2: memref<2x256xbf16, #tpu.memory_space<vmem>>, %arg3: memref<256x256xbf16, #tpu.memory_space<vmem>>, %arg4: memref<1x256xf32, #tpu.memory_space<vmem>>, %arg5: memref<1x256xf32, #tpu.memory_space<vmem>>, %arg6: memref<2x256xf32, #tpu.memory_space<vmem>>, %arg7: memref<2x256xf32, #tpu.memory_space<vmem>>) attributes {dimension_semantics = [#tpu.dimension_semantics<parallel>, #tpu.dimension_semantics<arbitrary>], iteration_bounds = array<i64: 2, 1>, scalar_prefetch = 0 : i64, scratch_operands = 1 : i64, tpu.core_type = #tpu.core_type<tc>, window_params = [{transform_indices = @transform_0, window_bounds = array<i64: 2, 256>}, {transform_indices = @transform_1, window_bounds = array<i64: 256, 256>}, {transform_indices = @transform_2, window_bounds = array<i64: 1, 256>}, {transform_indices = @transform_3, window_bounds = array<i64: 1, 256>}, {transform_indices = @transform_4, window_bounds = array<i64: 2, 256>}]} {
    %c0_i32 = arith.constant 0 : i32
    %0 = arith.cmpi eq, %arg1, %c0_i32 : i32
    %1 = arith.extui %0 : i1 to i32
    %c0_i32_0 = arith.constant 0 : i32
    %2 = arith.cmpi ne, %1, %c0_i32_0 : i32
    scf.if %2 {
      %cst_10 = arith.constant 0.000000e+00 : f32
      %12 = vector.broadcast %cst_10 : f32 to vector<2x256xf32>
      %c0_11 = arith.constant 0 : index
      %c0_12 = arith.constant 0 : index
      %13 = vector.load %arg7[%c0_11, %c0_12] : memref<2x256xf32, #tpu.memory_space<vmem>>, vector<2x256xf32>
      tpu.vector_store %arg7[%c0_11, %c0_12], %12 {strides = array<i32>} : memref<2x256xf32, #tpu.memory_space<vmem>>, vector<2x256xf32>,
    } else {
    }
    %c0 = arith.constant 0 : index
    %c0_1 = arith.constant 0 : index
    %3 = vector.load %arg7[%c0, %c0_1] : memref<2x256xf32, #tpu.memory_space<vmem>>, vector<2x256xf32>
    %c0_2 = arith.constant 0 : index
    %c0_3 = arith.constant 0 : index
    %4 = vector.load %arg2[%c0_2, %c0_3] : memref<2x256xbf16, #tpu.memory_space<vmem>>, vector<2x256xbf16>
    %c0_4 = arith.constant 0 : index
    %c0_5 = arith.constant 0 : index
    %5 = vector.load %arg3[%c0_4, %c0_5] : memref<256x256xbf16, #tpu.memory_space<vmem>>, vector<256x256xbf16>
    %cst = arith.constant dense<0.000000e+00> : vector<2x256xf32>
    %6 = tpu.matmul %4, %5, %cst {dimension_numbers = #tpu.dot_dimension_numbers<[1], [0], [0], [1], [0, 0, 1, 1], [], []>} : vector<2x256xbf16>, vector<256x256xbf16>, vector<2x256xf32> -> vector<2x256xf32>
    %7 = arith.addf %3, %6 : vector<2x256xf32>
    %c0_6 = arith.constant 0 : index
    %c0_7 = arith.constant 0 : index
    %8 = vector.load %arg7[%c0_6, %c0_7] : memref<2x256xf32, #tpu.memory_space<vmem>>, vector<2x256xf32>
    tpu.vector_store %arg7[%c0_6, %c0_7], %7 {strides = array<i32>} : memref<2x256xf32, #tpu.memory_space<vmem>>, vector<2x256xf32>,
    %c0_i32_8 = arith.constant 0 : i32
    %9 = arith.cmpi eq, %arg1, %c0_i32_8 : i32
    %10 = arith.extui %9 : i1 to i32
    %c0_i32_9 = arith.constant 0 : i32
    %11 = arith.cmpi ne, %10, %c0_i32_9 : i32
    scf.if %11 {
      %c0_10 = arith.constant 0 : index
      %c0_11 = arith.constant 0 : index
      %12 = vector.load %arg7[%c0_10, %c0_11] : memref<2x256xf32, #tpu.memory_space<vmem>>, vector<2x256xf32>
      %cst_12 = arith.constant dense<0.000000e+00> : vector<256xf32>
      %13 = vector.multi_reduction <add>, %12, %cst_12 [0] : vector<2x256xf32> to vector<256xf32>
      %14 = vector.shape_cast %13 : vector<256xf32> to vector<1x256xf32>
      %cst_13 = arith.constant 5.000000e-01 : f32
      %15 = vector.broadcast %cst_13 : f32 to vector<1x256xf32>
      %16 = arith.mulf %14, %15 : vector<1x256xf32>
      %17 = arith.mulf %12, %12 : vector<2x256xf32>
      %cst_14 = arith.constant dense<0.000000e+00> : vector<256xf32>
      %18 = vector.multi_reduction <add>, %17, %cst_14 [0] : vector<2x256xf32> to vector<256xf32>
      %19 = vector.shape_cast %18 : vector<256xf32> to vector<1x256xf32>
      %cst_15 = arith.constant 5.000000e-01 : f32
      %20 = vector.broadcast %cst_15 : f32 to vector<1x256xf32>
      %21 = arith.mulf %19, %20 : vector<1x256xf32>
      %22 = arith.mulf %16, %16 : vector<1x256xf32>
      %23 = arith.subf %21, %22 : vector<1x256xf32>
      %cst_16 = arith.constant 0.000000e+00 : f32
      %24 = vector.broadcast %cst_16 : f32 to vector<1x256xf32>
      %25 = arith.maximumf %23, %24 : vector<1x256xf32>
      %26 = vector.broadcast %16 : vector<1x256xf32> to vector<2x256xf32>
      %27 = arith.subf %12, %26 : vector<2x256xf32>
      %c0_17 = arith.constant 0 : index
      %c0_18 = arith.constant 0 : index
      %28 = vector.load %arg4[%c0_17, %c0_18] : memref<1x256xf32, #tpu.memory_space<vmem>>, vector<1x256xf32>
      %cst_19 = arith.constant 9.99999974E-6 : f32
      %29 = vector.broadcast %cst_19 : f32 to vector<1x256xf32>
      %30 = arith.addf %25, %29 : vector<1x256xf32>
      %31 = math.rsqrt %30 : vector<1x256xf32>
      %32 = arith.mulf %28, %31 : vector<1x256xf32>
      %33 = vector.broadcast %32 : vector<1x256xf32> to vector<2x256xf32>
      %34 = arith.mulf %27, %33 : vector<2x256xf32>
      %c0_20 = arith.constant 0 : index
      %c0_21 = arith.constant 0 : index
      %35 = vector.load %arg5[%c0_20, %c0_21] : memref<1x256xf32, #tpu.memory_space<vmem>>, vector<1x256xf32>
      %36 = vector.broadcast %35 : vector<1x256xf32> to vector<2x256xf32>
      %37 = arith.addf %34, %36 : vector<2x256xf32>
      %c0_22 = arith.constant 0 : index
      %c0_23 = arith.constant 0 : index
      %38 = vector.load %arg6[%c0_22, %c0_23] : memref<2x256xf32, #tpu.memory_space<vmem>>, vector<2x256xf32>
      tpu.vector_store %arg6[%c0_22, %c0_23], %37 {strides = array<i32>} : memref<2x256xf32, #tpu.memory_space<vmem>>, vector<2x256xf32>,
    } else {
    }
    return
  }
  func.func @transform_0(%arg0: i32, %arg1: i32) -> (i32, i32) {
    %c0_i32 = arith.constant 0 : i32
    %c0_i32_0 = arith.constant 0 : i32
    return %c0_i32, %arg1 : i32, i32
  }
  func.func @transform_1(%arg0: i32, %arg1: i32) -> (i32, i32) {
    %c0_i32 = arith.constant 0 : i32
    return %arg1, %arg0 : i32, i32
  }
  func.func @transform_2(%arg0: i32, %arg1: i32) -> (i32, i32) {
    %c0_i32 = arith.constant 0 : i32
    %c0_i32_0 = arith.constant 0 : i32
    return %c0_i32, %arg0 : i32, i32
  }
  func.func @transform_3(%arg0: i32, %arg1: i32) -> (i32, i32) {
    %c0_i32 = arith.constant 0 : i32
    %c0_i32_0 = arith.constant 0 : i32
    return %c0_i32, %arg0 : i32, i32
  }
  func.func @transform_4(%arg0: i32, %arg1: i32) -> (i32, i32) {
    %c0_i32 = arith.constant 0 : i32
    %c0_i32_0 = arith.constant 0 : i32
    return %c0_i32, %arg0 : i32, i32
  }
}

module attributes {stable_mosaic.version = 11 : i64} {
  func.func @_mm_bn_kernel(%arg0: i32, %arg1: i32, %arg2: memref<2x512xbf16, #tpu.memory_space<vmem>>, %arg3: memref<512x256xbf16, #tpu.memory_space<vmem>>, %arg4: memref<1x256xf32, #tpu.memory_space<vmem>>, %arg5: memref<1x256xf32, #tpu.memory_space<vmem>>, %arg6: memref<2x256xf32, #tpu.memory_space<vmem>>, %arg7: memref<2x256xf32, #tpu.memory_space<vmem>>, %arg8: memref<2x256xf32, #tpu.memory_space<vmem>>) attributes {dimension_semantics = [#tpu.dimension_semantics<parallel>, #tpu.dimension_semantics<arbitrary>], iteration_bounds = array<i64: 2, 9>, scalar_prefetch = 0 : i64, scratch_operands = 1 : i64, tpu.core_type = #tpu.core_type<tc>, window_params = [{transform_indices = @transform_0, window_bounds = array<i64: 2, 512>}, {transform_indices = @transform_1, window_bounds = array<i64: 512, 256>}, {transform_indices = @transform_2, window_bounds = array<i64: 1, 256>}, {transform_indices = @transform_3, window_bounds = array<i64: 1, 256>}, {transform_indices = @transform_4, window_bounds = array<i64: 2, 256>}, {transform_indices = @transform_5, window_bounds = array<i64: 2, 256>}]} {
    %c0_i32 = arith.constant 0 : i32
    %0 = arith.cmpi eq, %arg1, %c0_i32 : i32
    %1 = arith.extui %0 : i1 to i32
    %c0_i32_0 = arith.constant 0 : i32
    %2 = arith.cmpi ne, %1, %c0_i32_0 : i32
    scf.if %2 {
      %cst_9 = arith.constant 0.000000e+00 : f32
      %12 = vector.broadcast %cst_9 : f32 to vector<2x256xf32>
      %c0_10 = arith.constant 0 : index
      %c0_11 = arith.constant 0 : index
      %13 = vector.load %arg8[%c0_10, %c0_11] : memref<2x256xf32, #tpu.memory_space<vmem>>, vector<2x256xf32>
      tpu.vector_store %arg8[%c0_10, %c0_11], %12 {strides = array<i32>} : memref<2x256xf32, #tpu.memory_space<vmem>>, vector<2x256xf32>,
    } else {
    }
    %c0 = arith.constant 0 : index
    %c0_1 = arith.constant 0 : index
    %3 = vector.load %arg8[%c0, %c0_1] : memref<2x256xf32, #tpu.memory_space<vmem>>, vector<2x256xf32>
    %c0_2 = arith.constant 0 : index
    %c0_3 = arith.constant 0 : index
    %4 = vector.load %arg2[%c0_2, %c0_3] : memref<2x512xbf16, #tpu.memory_space<vmem>>, vector<2x512xbf16>
    %c0_4 = arith.constant 0 : index
    %c0_5 = arith.constant 0 : index
    %5 = vector.load %arg3[%c0_4, %c0_5] : memref<512x256xbf16, #tpu.memory_space<vmem>>, vector<512x256xbf16>
    %cst = arith.constant dense<0.000000e+00> : vector<2x256xf32>
    %6 = tpu.matmul %4, %5, %cst {dimension_numbers = #tpu.dot_dimension_numbers<[1], [0], [0], [1], [0, 0, 1, 1], [], []>} : vector<2x512xbf16>, vector<512x256xbf16>, vector<2x256xf32> -> vector<2x256xf32>
    %7 = arith.addf %3, %6 : vector<2x256xf32>
    %c0_6 = arith.constant 0 : index
    %c0_7 = arith.constant 0 : index
    %8 = vector.load %arg8[%c0_6, %c0_7] : memref<2x256xf32, #tpu.memory_space<vmem>>, vector<2x256xf32>
    tpu.vector_store %arg8[%c0_6, %c0_7], %7 {strides = array<i32>} : memref<2x256xf32, #tpu.memory_space<vmem>>, vector<2x256xf32>,
    %c8_i32 = arith.constant 8 : i32
    %9 = arith.cmpi eq, %arg1, %c8_i32 : i32
    %10 = arith.extui %9 : i1 to i32
    %c0_i32_8 = arith.constant 0 : i32
    %11 = arith.cmpi ne, %10, %c0_i32_8 : i32
    scf.if %11 {
      %c0_9 = arith.constant 0 : index
      %c0_10 = arith.constant 0 : index
      %12 = vector.load %arg8[%c0_9, %c0_10] : memref<2x256xf32, #tpu.memory_space<vmem>>, vector<2x256xf32>
      %cst_11 = arith.constant dense<0.000000e+00> : vector<256xf32>
      %13 = vector.multi_reduction <add>, %12, %cst_11 [0] : vector<2x256xf32> to vector<256xf32>
      %14 = vector.shape_cast %13 : vector<256xf32> to vector<1x256xf32>
      %cst_12 = arith.constant 5.000000e-01 : f32
      %15 = vector.broadcast %cst_12 : f32 to vector<1x256xf32>
      %16 = arith.mulf %14, %15 : vector<1x256xf32>
      %17 = arith.mulf %12, %12 : vector<2x256xf32>
      %cst_13 = arith.constant dense<0.000000e+00> : vector<256xf32>
      %18 = vector.multi_reduction <add>, %17, %cst_13 [0] : vector<2x256xf32> to vector<256xf32>
      %19 = vector.shape_cast %18 : vector<256xf32> to vector<1x256xf32>
      %cst_14 = arith.constant 5.000000e-01 : f32
      %20 = vector.broadcast %cst_14 : f32 to vector<1x256xf32>
      %21 = arith.mulf %19, %20 : vector<1x256xf32>
      %22 = arith.mulf %16, %16 : vector<1x256xf32>
      %23 = arith.subf %21, %22 : vector<1x256xf32>
      %cst_15 = arith.constant 0.000000e+00 : f32
      %24 = vector.broadcast %cst_15 : f32 to vector<1x256xf32>
      %25 = arith.maximumf %23, %24 : vector<1x256xf32>
      %26 = vector.broadcast %16 : vector<1x256xf32> to vector<2x256xf32>
      %27 = arith.subf %12, %26 : vector<2x256xf32>
      %c0_16 = arith.constant 0 : index
      %c0_17 = arith.constant 0 : index
      %28 = vector.load %arg4[%c0_16, %c0_17] : memref<1x256xf32, #tpu.memory_space<vmem>>, vector<1x256xf32>
      %cst_18 = arith.constant 9.99999974E-6 : f32
      %29 = vector.broadcast %cst_18 : f32 to vector<1x256xf32>
      %30 = arith.addf %25, %29 : vector<1x256xf32>
      %31 = math.rsqrt %30 : vector<1x256xf32>
      %32 = arith.mulf %28, %31 : vector<1x256xf32>
      %33 = vector.broadcast %32 : vector<1x256xf32> to vector<2x256xf32>
      %34 = arith.mulf %27, %33 : vector<2x256xf32>
      %c0_19 = arith.constant 0 : index
      %c0_20 = arith.constant 0 : index
      %35 = vector.load %arg5[%c0_19, %c0_20] : memref<1x256xf32, #tpu.memory_space<vmem>>, vector<1x256xf32>
      %36 = vector.broadcast %35 : vector<1x256xf32> to vector<2x256xf32>
      %37 = arith.addf %34, %36 : vector<2x256xf32>
      %c0_21 = arith.constant 0 : index
      %c0_22 = arith.constant 0 : index
      %38 = vector.load %arg6[%c0_21, %c0_22] : memref<2x256xf32, #tpu.memory_space<vmem>>, vector<2x256xf32>
      %39 = arith.addf %37, %38 : vector<2x256xf32>
      %cst_23 = arith.constant 0.000000e+00 : f32
      %40 = vector.broadcast %cst_23 : f32 to vector<2x256xf32>
      %41 = arith.maximumf %39, %40 : vector<2x256xf32>
      %c0_24 = arith.constant 0 : index
      %c0_25 = arith.constant 0 : index
      %42 = vector.load %arg7[%c0_24, %c0_25] : memref<2x256xf32, #tpu.memory_space<vmem>>, vector<2x256xf32>
      tpu.vector_store %arg7[%c0_24, %c0_25], %41 {strides = array<i32>} : memref<2x256xf32, #tpu.memory_space<vmem>>, vector<2x256xf32>,
    } else {
    }
    return
  }
  func.func @transform_0(%arg0: i32, %arg1: i32) -> (i32, i32) {
    %c0_i32 = arith.constant 0 : i32
    %c0_i32_0 = arith.constant 0 : i32
    return %c0_i32, %arg1 : i32, i32
  }
  func.func @transform_1(%arg0: i32, %arg1: i32) -> (i32, i32) {
    %c0_i32 = arith.constant 0 : i32
    return %arg1, %arg0 : i32, i32
  }
  func.func @transform_2(%arg0: i32, %arg1: i32) -> (i32, i32) {
    %c0_i32 = arith.constant 0 : i32
    %c0_i32_0 = arith.constant 0 : i32
    return %c0_i32, %arg0 : i32, i32
  }
  func.func @transform_3(%arg0: i32, %arg1: i32) -> (i32, i32) {
    %c0_i32 = arith.constant 0 : i32
    %c0_i32_0 = arith.constant 0 : i32
    return %c0_i32, %arg0 : i32, i32
  }
  func.func @transform_4(%arg0: i32, %arg1: i32) -> (i32, i32) {
    %c0_i32 = arith.constant 0 : i32
    %c0_i32_0 = arith.constant 0 : i32
    return %c0_i32, %arg0 : i32, i32
  }
  func.func @transform_5(%arg0: i32, %arg1: i32) -> (i32, i32) {
    %c0_i32 = arith.constant 0 : i32
    %c0_i32_0 = arith.constant 0 : i32
    return %c0_i32, %arg0 : i32, i32
  }
}

module attributes {stable_mosaic.version = 11 : i64} {
  func.func @_mm_bn_kernel(%arg0: i32, %arg1: i32, %arg2: memref<2x512xbf16, #tpu.memory_space<vmem>>, %arg3: memref<512x256xbf16, #tpu.memory_space<vmem>>, %arg4: memref<1x256xf32, #tpu.memory_space<vmem>>, %arg5: memref<1x256xf32, #tpu.memory_space<vmem>>, %arg6: memref<2x256xf32, #tpu.memory_space<vmem>>, %arg7: memref<2x256xf32, #tpu.memory_space<vmem>>) attributes {dimension_semantics = [#tpu.dimension_semantics<parallel>, #tpu.dimension_semantics<arbitrary>], iteration_bounds = array<i64: 2, 9>, scalar_prefetch = 0 : i64, scratch_operands = 1 : i64, tpu.core_type = #tpu.core_type<tc>, window_params = [{transform_indices = @transform_0, window_bounds = array<i64: 2, 512>}, {transform_indices = @transform_1, window_bounds = array<i64: 512, 256>}, {transform_indices = @transform_2, window_bounds = array<i64: 1, 256>}, {transform_indices = @transform_3, window_bounds = array<i64: 1, 256>}, {transform_indices = @transform_4, window_bounds = array<i64: 2, 256>}]} {
    %c0_i32 = arith.constant 0 : i32
    %0 = arith.cmpi eq, %arg1, %c0_i32 : i32
    %1 = arith.extui %0 : i1 to i32
    %c0_i32_0 = arith.constant 0 : i32
    %2 = arith.cmpi ne, %1, %c0_i32_0 : i32
    scf.if %2 {
      %cst_9 = arith.constant 0.000000e+00 : f32
      %12 = vector.broadcast %cst_9 : f32 to vector<2x256xf32>
      %c0_10 = arith.constant 0 : index
      %c0_11 = arith.constant 0 : index
      %13 = vector.load %arg7[%c0_10, %c0_11] : memref<2x256xf32, #tpu.memory_space<vmem>>, vector<2x256xf32>
      tpu.vector_store %arg7[%c0_10, %c0_11], %12 {strides = array<i32>} : memref<2x256xf32, #tpu.memory_space<vmem>>, vector<2x256xf32>,
    } else {
    }
    %c0 = arith.constant 0 : index
    %c0_1 = arith.constant 0 : index
    %3 = vector.load %arg7[%c0, %c0_1] : memref<2x256xf32, #tpu.memory_space<vmem>>, vector<2x256xf32>
    %c0_2 = arith.constant 0 : index
    %c0_3 = arith.constant 0 : index
    %4 = vector.load %arg2[%c0_2, %c0_3] : memref<2x512xbf16, #tpu.memory_space<vmem>>, vector<2x512xbf16>
    %c0_4 = arith.constant 0 : index
    %c0_5 = arith.constant 0 : index
    %5 = vector.load %arg3[%c0_4, %c0_5] : memref<512x256xbf16, #tpu.memory_space<vmem>>, vector<512x256xbf16>
    %cst = arith.constant dense<0.000000e+00> : vector<2x256xf32>
    %6 = tpu.matmul %4, %5, %cst {dimension_numbers = #tpu.dot_dimension_numbers<[1], [0], [0], [1], [0, 0, 1, 1], [], []>} : vector<2x512xbf16>, vector<512x256xbf16>, vector<2x256xf32> -> vector<2x256xf32>
    %7 = arith.addf %3, %6 : vector<2x256xf32>
    %c0_6 = arith.constant 0 : index
    %c0_7 = arith.constant 0 : index
    %8 = vector.load %arg7[%c0_6, %c0_7] : memref<2x256xf32, #tpu.memory_space<vmem>>, vector<2x256xf32>
    tpu.vector_store %arg7[%c0_6, %c0_7], %7 {strides = array<i32>} : memref<2x256xf32, #tpu.memory_space<vmem>>, vector<2x256xf32>,
    %c8_i32 = arith.constant 8 : i32
    %9 = arith.cmpi eq, %arg1, %c8_i32 : i32
    %10 = arith.extui %9 : i1 to i32
    %c0_i32_8 = arith.constant 0 : i32
    %11 = arith.cmpi ne, %10, %c0_i32_8 : i32
    scf.if %11 {
      %c0_9 = arith.constant 0 : index
      %c0_10 = arith.constant 0 : index
      %12 = vector.load %arg7[%c0_9, %c0_10] : memref<2x256xf32, #tpu.memory_space<vmem>>, vector<2x256xf32>
      %cst_11 = arith.constant dense<0.000000e+00> : vector<256xf32>
      %13 = vector.multi_reduction <add>, %12, %cst_11 [0] : vector<2x256xf32> to vector<256xf32>
      %14 = vector.shape_cast %13 : vector<256xf32> to vector<1x256xf32>
      %cst_12 = arith.constant 5.000000e-01 : f32
      %15 = vector.broadcast %cst_12 : f32 to vector<1x256xf32>
      %16 = arith.mulf %14, %15 : vector<1x256xf32>
      %17 = arith.mulf %12, %12 : vector<2x256xf32>
      %cst_13 = arith.constant dense<0.000000e+00> : vector<256xf32>
      %18 = vector.multi_reduction <add>, %17, %cst_13 [0] : vector<2x256xf32> to vector<256xf32>
      %19 = vector.shape_cast %18 : vector<256xf32> to vector<1x256xf32>
      %cst_14 = arith.constant 5.000000e-01 : f32
      %20 = vector.broadcast %cst_14 : f32 to vector<1x256xf32>
      %21 = arith.mulf %19, %20 : vector<1x256xf32>
      %22 = arith.mulf %16, %16 : vector<1x256xf32>
      %23 = arith.subf %21, %22 : vector<1x256xf32>
      %cst_15 = arith.constant 0.000000e+00 : f32
      %24 = vector.broadcast %cst_15 : f32 to vector<1x256xf32>
      %25 = arith.maximumf %23, %24 : vector<1x256xf32>
      %26 = vector.broadcast %16 : vector<1x256xf32> to vector<2x256xf32>
      %27 = arith.subf %12, %26 : vector<2x256xf32>
      %c0_16 = arith.constant 0 : index
      %c0_17 = arith.constant 0 : index
      %28 = vector.load %arg4[%c0_16, %c0_17] : memref<1x256xf32, #tpu.memory_space<vmem>>, vector<1x256xf32>
      %cst_18 = arith.constant 9.99999974E-6 : f32
      %29 = vector.broadcast %cst_18 : f32 to vector<1x256xf32>
      %30 = arith.addf %25, %29 : vector<1x256xf32>
      %31 = math.rsqrt %30 : vector<1x256xf32>
      %32 = arith.mulf %28, %31 : vector<1x256xf32>
      %33 = vector.broadcast %32 : vector<1x256xf32> to vector<2x256xf32>
      %34 = arith.mulf %27, %33 : vector<2x256xf32>
      %c0_19 = arith.constant 0 : index
      %c0_20 = arith.constant 0 : index
      %35 = vector.load %arg5[%c0_19, %c0_20] : memref<1x256xf32, #tpu.memory_space<vmem>>, vector<1x256xf32>
      %36 = vector.broadcast %35 : vector<1x256xf32> to vector<2x256xf32>
      %37 = arith.addf %34, %36 : vector<2x256xf32>
      %cst_21 = arith.constant 0.000000e+00 : f32
      %38 = vector.broadcast %cst_21 : f32 to vector<2x256xf32>
      %39 = arith.maximumf %37, %38 : vector<2x256xf32>
      %c0_22 = arith.constant 0 : index
      %c0_23 = arith.constant 0 : index
      %40 = vector.load %arg6[%c0_22, %c0_23] : memref<2x256xf32, #tpu.memory_space<vmem>>, vector<2x256xf32>
      tpu.vector_store %arg6[%c0_22, %c0_23], %39 {strides = array<i32>} : memref<2x256xf32, #tpu.memory_space<vmem>>, vector<2x256xf32>,
    } else {
    }
    return
  }
  func.func @transform_0(%arg0: i32, %arg1: i32) -> (i32, i32) {
    %c0_i32 = arith.constant 0 : i32
    %c0_i32_0 = arith.constant 0 : i32
    return %c0_i32, %arg1 : i32, i32
  }
  func.func @transform_1(%arg0: i32, %arg1: i32) -> (i32, i32) {
    %c0_i32 = arith.constant 0 : i32
    return %arg1, %arg0 : i32, i32
  }
  func.func @transform_2(%arg0: i32, %arg1: i32) -> (i32, i32) {
    %c0_i32 = arith.constant 0 : i32
    %c0_i32_0 = arith.constant 0 : i32
    return %c0_i32, %arg0 : i32, i32
  }
  func.func @transform_3(%arg0: i32, %arg1: i32) -> (i32, i32) {
    %c0_i32 = arith.constant 0 : i32
    %c0_i32_0 = arith.constant 0 : i32
    return %c0_i32, %arg0 : i32, i32
  }
  func.func @transform_4(%arg0: i32, %arg1: i32) -> (i32, i32) {
    %c0_i32 = arith.constant 0 : i32
    %c0_i32_0 = arith.constant 0 : i32
    return %c0_i32, %arg0 : i32, i32
  }
}

module attributes {stable_mosaic.version = 11 : i64} {
  func.func @_fc_heads_kernel(%arg0: memref<2x512xf32, #tpu.memory_space<vmem>>, %arg1: memref<512x32xbf16, #tpu.memory_space<vmem>>, %arg2: memref<1x32xf32, #tpu.memory_space<vmem>>, %arg3: memref<32x128xbf16, #tpu.memory_space<vmem>>, %arg4: memref<1x128xf32, #tpu.memory_space<vmem>>, %arg5: memref<2x128xf32, #tpu.memory_space<vmem>>) attributes {dimension_semantics = [], scalar_prefetch = 0 : i64, scratch_operands = 0 : i64, tpu.core_type = #tpu.core_type<tc>} {
    %c0 = arith.constant 0 : index
    %c0_0 = arith.constant 0 : index
    %0 = vector.load %arg0[%c0, %c0_0] : memref<2x512xf32, #tpu.memory_space<vmem>>, vector<2x512xf32>
    %cst = arith.constant 0.000000e+00 : f32
    %1 = vector.broadcast %cst : f32 to vector<2x512xf32>
    %2 = arith.maximumf %0, %1 : vector<2x512xf32>
    %3 = arith.truncf %2 : vector<2x512xf32> to vector<2x512xbf16>
    %c0_1 = arith.constant 0 : index
    %c0_2 = arith.constant 0 : index
    %4 = vector.load %arg1[%c0_1, %c0_2] : memref<512x32xbf16, #tpu.memory_space<vmem>>, vector<512x32xbf16>
    %cst_3 = arith.constant dense<0.000000e+00> : vector<2x32xf32>
    %5 = tpu.matmul %3, %4, %cst_3 {dimension_numbers = #tpu.dot_dimension_numbers<[1], [0], [0], [1], [0, 0, 1, 1], [], []>} : vector<2x512xbf16>, vector<512x32xbf16>, vector<2x32xf32> -> vector<2x32xf32>
    %c0_4 = arith.constant 0 : index
    %c0_5 = arith.constant 0 : index
    %6 = vector.load %arg2[%c0_4, %c0_5] : memref<1x32xf32, #tpu.memory_space<vmem>>, vector<1x32xf32>
    %7 = vector.broadcast %6 : vector<1x32xf32> to vector<2x32xf32>
    %8 = arith.addf %5, %7 : vector<2x32xf32>
    %cst_6 = arith.constant 0.000000e+00 : f32
    %9 = vector.broadcast %cst_6 : f32 to vector<2x32xf32>
    %10 = arith.maximumf %8, %9 : vector<2x32xf32>
    %11 = arith.truncf %10 : vector<2x32xf32> to vector<2x32xbf16>
    %c0_7 = arith.constant 0 : index
    %c0_8 = arith.constant 0 : index
    %12 = vector.load %arg3[%c0_7, %c0_8] : memref<32x128xbf16, #tpu.memory_space<vmem>>, vector<32x128xbf16>
    %cst_9 = arith.constant dense<0.000000e+00> : vector<2x128xf32>
    %13 = tpu.matmul %11, %12, %cst_9 {dimension_numbers = #tpu.dot_dimension_numbers<[1], [0], [0], [1], [0, 0, 1, 1], [], []>} : vector<2x32xbf16>, vector<32x128xbf16>, vector<2x128xf32> -> vector<2x128xf32>
    %c0_10 = arith.constant 0 : index
    %c0_11 = arith.constant 0 : index
    %14 = vector.load %arg4[%c0_10, %c0_11] : memref<1x128xf32, #tpu.memory_space<vmem>>, vector<1x128xf32>
    %15 = vector.broadcast %14 : vector<1x128xf32> to vector<2x128xf32>
    %16 = arith.addf %13, %15 : vector<2x128xf32>
    %c0_12 = arith.constant 0 : index
    %c0_13 = arith.constant 0 : index
    %17 = vector.load %arg5[%c0_12, %c0_13] : memref<2x128xf32, #tpu.memory_space<vmem>>, vector<2x128xf32>
    tpu.vector_store %arg5[%c0_12, %c0_13], %16 {strides = array<i32>} : memref<2x128xf32, #tpu.memory_space<vmem>>, vector<2x128xf32>,
    return
  }
}

</mosaic_0001>

<bundles_post_ra>
// kernel: _lambda_.22
= control target key start
LH: loop header
LB: loop body
LE: loop exit
PB: predicated region body
PF: predicated region fallthrough
CT: control target
= control target key end

     0   :  { %s1204_s15 = smov 0   ;;  %s1206_s16 = smov 0   ;;  %s1559_s0 = inlined_call_operand.vmem [shape: bf16[128,640], index: 0, kind: input, shape index: {}]   ;;  %s1560_s1 = inlined_call_operand.vmem [shape: bf16[640,64], index: 1, kind: input, shape index: {}]   ;;  %s1561_s2 = inlined_call_operand.vmem [shape: f32[1,64], index: 2, kind: input, shape index: {}]   ;;  %s1562_s3 = inlined_call_operand.vmem [shape: f32[1,64], index: 3, kind: input, shape index: {}]   ;;  %s1563_s4 = inlined_call_operand.vmem [shape: f32[128,64], index: 4, kind: output, shape index: {}]  }
   0x1   :  { %s1208_s17 = smov 0   ;;  %s1210_s18 = smov 0  }
   0x2   :  { %s1212_s19 = smov 0  }
   0x3 LB: > { %s23_s20 = sadd.s32 1, %s1172_s18  ;;  %p40_p1 = scmp.ne.s32.totalorder %s1164_s16, %s1160_s15  ;;  %s1176_s19 = sphi %s1212_s19, %s14_s19   ;;  %s1172_s18 = sphi %s1210_s18, %s1567_s18   ;;  %s1168_s17 = sphi %s1208_s17, %s1566_s17   ;;  %s1164_s16 = sphi %s1206_s16, %s1565_s16   ;;  %s1160_s15 = sphi %s1204_s15, %s1564_s15  }
   0x4   : > { %p24_p0 = scmp.ge.s32.totalorder %s23_s20, 5  ;;  %p41_p2 = scmp.eq.s32.totalorder %s1176_s19, 0 }
   0x5   : > { %s33_s22 = sadd.s32 1, %s1164_s16  ;;  %p986_p5 = scmp.ge.s32.totalorder %s1176_s19, 5 }
   0x6   : > { %s1569_s20 = smov (%p24_p0, %s23_s20), 0  ;;  %p42_p3 = por %p41_p2, %p40_p1 }
   0x7   : > { %s30_s21 = ssub.s32 %s1172_s18, %s1569_s20  ;;  %184 = sbr.rel (%p986_p5) target bundleno = 28 (0x1c), region = 24 }
   0x8   : > { %p31_p4 = scmp.eq.s32.totalorder %s30_s21, 0 }
   0xa   : > { %s1239_s23 = scalar_select %p31_p4, %s1164_s16, %s33_s22  }
   0xe   : > { %187 = sbr.rel (!%p42_p3) target bundleno = 28 (0x1c), region = 28  ;;  %s189_s24 = sand.u32 (%p42_p3), 1, %s1164_s16  }
   0xf   : > { %s988_s25 = sshll.u32 (%p42_p3), %s1172_s18, 2  ;;  %s987_s26 = sshll.u32 (%p42_p3), %s189_s24, 6 }
  0x10   : > { %s1247_s29 = scalar_lea.vmem (%p42_p3), %s1559_s0, %s988_s25  ;;  %s191_s30 = scalar_lea.vmem (%p42_p3), [#allocation3], %s987_s26 }
  0x11   : > { %v209_v0 = vld [vmem:[%s1247_s29] sm:$0xf] (%p42_p3)  ;;  %v211_v1 = vld [vmem:[%s1247_s29 + $0x14] sm:$0xf] (%p42_p3)  ;;  %v213_v2 = vld [vmem:[%s1247_s29 + $0x28] sm:$0xf] (%p42_p3) }
  0x12   : > { %210 = vst [vmem:[%s191_s30] sm:$0xf] (%p42_p3), %v209_v0  ;;  %212 = vst [vmem:[%s191_s30 + $0x4] sm:$0xf] (%p42_p3), %v211_v1  ;;  %v215_v3 = vld [vmem:[%s1247_s29 + $0x3c] sm:$0xf] (%p42_p3) }
  0x13   : > { %v217_v4 = vld [vmem:[%s1247_s29 + $0x50] sm:$0xf] (%p42_p3)  ;;  %214 = vst [vmem:[%s191_s30 + $0x8] sm:$0xf] (%p42_p3), %v213_v2  ;;  %216 = vst [vmem:[%s191_s30 + $0xc] sm:$0xf] (%p42_p3), %v215_v3 }
  0x14   : > { %218 = vst [vmem:[%s191_s30 + $0x10] sm:$0xf] (%p42_p3), %v217_v4  ;;  %v219_v5 = vld [vmem:[%s1247_s29 + $0x64] sm:$0xf] (%p42_p3)  ;;  %v221_v6 = vld [vmem:[%s1247_s29 + $0x78] sm:$0xf] (%p42_p3) }
  0x15   : > { %v223_v7 = vld [vmem:[%s1247_s29 + $0x8c] sm:$0xf]  ;;  %220 = vst [vmem:[%s191_s30 + $0x14] sm:$0xf] %v219_v5  ;;  %222 = vst [vmem:[%s191_s30 + $0x18] sm:$0xf] %v221_v6 }
  0x16   : > { %224 = vst [vmem:[%s191_s30 + $0x1c] sm:$0xf] %v223_v7  ;;  %v225_v8 = vld [vmem:[%s1247_s29 + $0xa0] sm:$0xf]  ;;  %v227_v9 = vld [vmem:[%s1247_s29 + $0xb4] sm:$0xf] }
  0x17   : > { %v229_v10 = vld [vmem:[%s1247_s29 + $0xc8] sm:$0xf]  ;;  %226 = vst [vmem:[%s191_s30 + $0x20] sm:$0xf] %v225_v8  ;;  %228 = vst [vmem:[%s191_s30 + $0x24] sm:$0xf] %v227_v9 }
  0x18   : > { %230 = vst [vmem:[%s191_s30 + $0x28] sm:$0xf] %v229_v10  ;;  %v231_v11 = vld [vmem:[%s1247_s29 + $0xdc] sm:$0xf]  ;;  %v233_v12 = vld [vmem:[%s1247_s29 + $0xf0] sm:$0xf] }
  0x19   : > { %v235_v13 = vld [vmem:[%s1247_s29 + $0x104] sm:$0xf]  ;;  %232 = vst [vmem:[%s191_s30 + $0x2c] sm:$0xf] %v231_v11  ;;  %234 = vst [vmem:[%s191_s30 + $0x30] sm:$0xf] %v233_v12 }
  0x1a   : > { %236 = vst [vmem:[%s191_s30 + $0x34] sm:$0xf] %v235_v13  ;;  %v237_v14 = vld [vmem:[%s1247_s29 + $0x118] sm:$0xf]  ;;  %v239_v15 = vld [vmem:[%s1247_s29 + $0x12c] sm:$0xf] }
  0x1b   : > { %238 = vst [vmem:[%s191_s30 + $0x38] sm:$0xf] %v237_v14  ;;  %240 = vst [vmem:[%s191_s30 + $0x3c] sm:$0xf] %v239_v15 }
  0x1c PF: > { %p989_p6 = scmp.ge.s32.totalorder %s1176_s19, 1  ;;  %p306_p7 = scmp.lt.s32.totalorder %s1176_s19, 6 }
  0x1e   : > { %p307_p8 = pnand %p989_p6, %p306_p7 }
  0x1f   : > { %s313_s5 = sand.u32 (!%p307_p8), 1, %s1160_s15   ;;  %s991_s6 = sshll.u32 (!%p307_p8), %s1168_s17, 4 }
  0x20   : > { %310 = sbr.rel (%p307_p8) target bundleno = 392 (0x188), region = 73  ;;  %s990_s7 = sshll.u32 (!%p307_p8), %s313_s5, 6 }
  0x21   : > { %p352_p9 = scmp.lt.s32.totalorder (!%p307_p8), %s991_s6, 79  ;;  %s1274_s12 = scalar_lea.vmem (!%p307_p8), [#allocation3], %s990_s7 }
  0x22   : > { %p993_p10 = scmp.ne.s32.totalorder (!%p307_p8), %s1168_s17, 0 }
  0x27   : > { %s1571_s6 = smov (!%p352_p9, %s991_s6), 79  ;;  %374 = sbr.rel (%p993_p10) target bundleno = 49 (0x31), region = 81 }
  0x28   : > { %s992_s8 = sshll.u32 %s1571_s6, 2  ;;  %vm375_vm0 = vcmask (!%p993_p10), 523264   ;;  %v1178_v16 = vmov (!%p993_p10), 0.0  }
  0x29   : > { %s1272_s11 = scalar_lea.vmem %s1560_s1, %s992_s8  ;;  %376 = vst.msk [vmem:[#allocation2] sm:$0xff] (!%p993_p10), %vm375_vm0, %v1178_v16  ;;  %377 = vst.msk [vmem:[#allocation2 + $0x8] sm:$0xff] (!%p993_p10), %vm375_vm0, %v1178_v16 }
  0x2a   : > { %378 = vst.msk [vmem:[#allocation2 + $0x10] sm:$0xff] (!%p993_p10), %vm375_vm0, %v1178_v16  ;;  %379 = vst.msk [vmem:[#allocation2 + $0x18] sm:$0xff] (!%p993_p10), %vm375_vm0, %v1178_v16 }
  0x2b   : > { %380 = vst.msk [vmem:[#allocation2 + $0x20] sm:$0xff] (!%p993_p10), %vm375_vm0, %v1178_v16  ;;  %381 = vst.msk [vmem:[#allocation2 + $0x28] sm:$0xff] (!%p993_p10), %vm375_vm0, %v1178_v16 }
  0x2c   : > { %382 = vst.msk [vmem:[#allocation2 + $0x30] sm:$0xff] (!%p993_p10), %vm375_vm0, %v1178_v16  ;;  %383 = vst.msk [vmem:[#allocation2 + $0x38] sm:$0xff] (!%p993_p10), %vm375_vm0, %v1178_v16 }
  0x2d   : > { %384 = vst.msk [vmem:[#allocation2 + $0x40] sm:$0xff] (!%p993_p10), %vm375_vm0, %v1178_v16  ;;  %385 = vst.msk [vmem:[#allocation2 + $0x48] sm:$0xff] (!%p993_p10), %vm375_vm0, %v1178_v16 }
  0x2e   : > { %386 = vst.msk [vmem:[#allocation2 + $0x50] sm:$0xff] %vm375_vm0, %v1178_v16  ;;  %387 = vst.msk [vmem:[#allocation2 + $0x58] sm:$0xff] %vm375_vm0, %v1178_v16 }
  0x2f   : > { %388 = vst.msk [vmem:[#allocation2 + $0x60] sm:$0xff] %vm375_vm0, %v1178_v16  ;;  %389 = vst.msk [vmem:[#allocation2 + $0x68] sm:$0xff] %vm375_vm0, %v1178_v16 }
  0x30   : > { %390 = vst.msk [vmem:[#allocation2 + $0x70] sm:$0xff] %vm375_vm0, %v1178_v16  ;;  %391 = vst.msk [vmem:[#allocation2 + $0x78] sm:$0xff] %vm375_vm0, %v1178_v16 }
  0x31 PF: > { %v1120_v17 = vld [vmem:[%s1272_s11] sm:$0xff]   ;;  %v1121_v18 = vld [vmem:[%s1272_s11 + $0x8] sm:$0xff]   ;;  %v1122_v19 = vld [vmem:[%s1272_s11 + $0x10] sm:$0xff]   ;;  %vm649_vm1 = vcmask 523264   ;;  %p1010_p11 = scmp.ne.s32.totalorder %s1168_s17, 4 }
  0x32   : > { %1031 = vmatprep.subr.bf16.mxu0 %v1120_v17  ;;  %1063 = vmatprep.subr.bf16.mxu1 %v1120_v17  ;;  %v1123_v20 = vld [vmem:[%s1272_s11 + $0x18] sm:$0xff]   ;;  %v1128_v21 = vld [vmem:[%s1274_s12] sm:$0xff]   ;;  %v1125_v24 = vld [vmem:[%s1272_s11 + $0x28] sm:$0xff]  }
  0x33   : > { %1032 = vmatpush3.bf16.msra.mxu0 %v1120_v17  ;;  %1071 = vmatpush3.bf16.msra.mxu1 %v1120_v17  ;;  %v1129_v22 = vld [vmem:[%s1274_s12 + $0x20] sm:$0xff]   ;;  %v1126_v25 = vld [vmem:[%s1272_s11 + $0x30] sm:$0xff]   ;;  %v1127_v26 = vld [vmem:[%s1272_s11 + $0x38] sm:$0xff]  }
  0x34   : > { %1033 = vmatprep.subr.bf16.mxu0 %v1121_v18  ;;  %1064 = vmatprep.subr.bf16.mxu1 %v1121_v18  ;;  %v1124_v23 = vld [vmem:[%s1272_s11 + $0x20] sm:$0xff]   ;;  %v1130_v27 = vld [vmem:[%s1274_s12 + $0x8] sm:$0xff]   ;;  %v1132_v29 = vld [vmem:[%s1274_s12 + $0x10] sm:$0xff]  }
  0x35   : > { %1047 = vmatprep.mubr.bf16.mxu0 %v1128_v21  ;;  %1055 = vmatprep.mubr.bf16.mxu1 %v1129_v22  ;;  %v1131_v28 = vld [vmem:[%s1274_s12 + $0x28] sm:$0xff]   ;;  %v1133_v30 = vld [vmem:[%s1274_s12 + $0x30] sm:$0xff]   ;;  %v1134_v31 = vld [vmem:[%s1274_s12 + $0x18] sm:$0xff]  }
  0x36   : > { %v1135_v32 = vld [vmem:[%s1274_s12 + $0x38] sm:$0xff]   ;;  %v394_v33 = vld [vmem:[#allocation2 + $0x10] sm:$0xff]  ;;  %v392_v35 = vld [vmem:[#allocation2] sm:$0xff] }
  0x37   : > { %1034 = vmatpush3.bf16.msra.mxu0 %v1121_v18  ;;  %1072 = vmatpush3.bf16.msra.mxu1 %v1121_v18  ;;  %v402_v34 = vld [vmem:[#allocation2 + $0x50] sm:$0xff]  ;;  %v400_v36 = vld [vmem:[#allocation2 + $0x40] sm:$0xff]  ;;  %v395_v39 = vld [vmem:[#allocation2 + $0x18] sm:$0xff] }
  0x38   : > { %1035 = vmatprep.subr.bf16.mxu0 %v1122_v19  ;;  %1065 = vmatprep.subr.bf16.mxu1 %v1122_v19  ;;  %v403_v40 = vld [vmem:[#allocation2 + $0x58] sm:$0xff]  ;;  %v393_v45 = vld [vmem:[#allocation2 + $0x8] sm:$0xff]  ;;  %v398_v57 = vld [vmem:[#allocation2 + $0x30] sm:$0xff] }
  0x39   : > { %v401_v46 = vld [vmem:[#allocation2 + $0x48] sm:$0xff]  ;;  %v406_v58 = vld [vmem:[#allocation2 + $0x70] sm:$0xff]  ;;  %v396_v59 = vld [vmem:[#allocation2 + $0x20] sm:$0xff] }
  0x3a   : > { %v404_v60 = vld [vmem:[#allocation2 + $0x60] sm:$0xff]  ;;  %v399_v63 = vld [vmem:[#allocation2 + $0x38] sm:$0xff]  ;;  %v397_v5 = vld [vmem:[#allocation2 + $0x28] sm:$0xff] }
  0x3b   : > { %1036 = vmatpush3.bf16.msra.mxu0 %v1122_v19  ;;  %1073 = vmatpush3.bf16.msra.mxu1 %v1122_v19  ;;  %v407_v0 = vld [vmem:[#allocation2 + $0x78] sm:$0xff]  ;;  %v405_v6 = vld [vmem:[#allocation2 + $0x68] sm:$0xff] }
  0x3c   : > { %1037 = vmatprep.subr.bf16.mxu0 %v1123_v20  ;;  %1066 = vmatprep.subr.bf16.mxu1 %v1123_v20 }
  0x3f   : > { %1038 = vmatpush3.bf16.msra.mxu0 %v1123_v20  ;;  %1074 = vmatpush3.bf16.msra.mxu1 %v1123_v20 }
  0x40   : > { %1039 = vmatprep.subr.bf16.mxu0 %v1124_v23  ;;  %1067 = vmatprep.subr.bf16.mxu1 %v1124_v23 }
  0x43   : > { %1040 = vmatpush3.bf16.msra.mxu0 %v1124_v23  ;;  %1075 = vmatpush3.bf16.msra.mxu1 %v1124_v23 }
  0x44   : > { %1041 = vmatprep.subr.bf16.mxu0 %v1125_v24  ;;  %1068 = vmatprep.subr.bf16.mxu1 %v1125_v24 }
  0x47   : > { %1042 = vmatpush3.bf16.msra.mxu0 %v1125_v24  ;;  %1076 = vmatpush3.bf16.msra.mxu1 %v1125_v24 }
  0x48   : > { %1043 = vmatprep.subr.bf16.mxu0 %v1126_v25  ;;  %1069 = vmatprep.subr.bf16.mxu1 %v1126_v25 }
  0x4b   : > { %1044 = vmatpush3.bf16.msra.mxu0 %v1126_v25  ;;  %1077 = vmatpush3.bf16.msra.mxu1 %v1126_v25 }
  0x4c   : > { %1045 = vmatprep.subr.bf16.mxu0 %v1127_v26  ;;  %1070 = vmatprep.subr.bf16.mxu1 %v1127_v26 }
  0x4f   : > { %1046 = vmatpush3.bf16.msra.mxu0 %v1127_v26  ;;  %1078 = vmatpush3.bf16.msra.mxu1 %v1127_v26 }
  0x52   : > { %1048 = vmatmul.mubr.bf16.vlgmr.msra.gmra.mrb[0].mxu0 %v1130_v27  ;;  %1056 = vmatmul.mubr.bf16.vlgmr.msra.gmra.mrb[0].mxu1 %v1131_v28 }
  0x53   : > { %1051 = vmatprep.mubr.bf16.mxu0 %v1132_v29  ;;  %1059 = vmatprep.mubr.bf16.mxu1 %v1133_v30 }
  0x5a   : > { %1052 = vmatmul.mubr.bf16.gmra.mrb[4].mxu0 %v1134_v31  ;;  %1060 = vmatmul.mubr.bf16.gmra.mrb[4].mxu1 %v1135_v32 }
 0x125   : > { %v1049_v37 = vpop.f32.mrb[0].mxu0  ;;  %v1057_v38 = vpop.f32.mrb[0].mxu1 }
 0x126   : > { %v635_v41 = vadd.f32 %v1049_v37, %v394_v33  ;;  %v643_v42 = vadd.f32 %v1057_v38, %v402_v34  ;;  %v570_v43 = vpop.f32.mrb[1].mxu0  ;;  %v602_v44 = vpop.f32.mrb[1].mxu1 }
 0x127   : > { %v633_v47 = vadd.f32 %v570_v43, %v392_v35  ;;  %v641_v48 = vadd.f32 %v602_v44, %v400_v36  ;;  %v1050_v49 = vpop.f32.mrb[2].mxu0  ;;  %v1058_v50 = vpop.f32.mrb[2].mxu1 }
 0x128   : > { %652 = vst.msk [vmem:[#allocation2 + $0x10] sm:$0xff] %vm649_vm1, %v635_v41  ;;  %660 = vst.msk [vmem:[#allocation2 + $0x50] sm:$0xff] %vm649_vm1, %v643_v42  ;;  %v636_v51 = vadd.f32 %v1050_v49, %v395_v39  ;;  %v644_v52 = vadd.f32 %v1058_v50, %v403_v40  ;;  %v573_v53 = vpop.f32.mrb[3].mxu0  ;;  %v605_v54 = vpop.f32.mrb[3].mxu1 }
 0x129   : > { %650 = vst.msk [vmem:[#allocation2] sm:$0xff] %vm649_vm1, %v633_v47  ;;  %658 = vst.msk [vmem:[#allocation2 + $0x40] sm:$0xff] %vm649_vm1, %v641_v48  ;;  %v634_v55 = vadd.f32 %v573_v53, %v393_v45  ;;  %v642_v56 = vadd.f32 %v605_v54, %v401_v46 }
 0x12a   : > { %653 = vst.msk [vmem:[#allocation2 + $0x18] sm:$0xff] %vm649_vm1, %v636_v51  ;;  %661 = vst.msk [vmem:[#allocation2 + $0x58] sm:$0xff] %vm649_vm1, %v644_v52 }
 0x12b   : > { %651 = vst.msk [vmem:[#allocation2 + $0x8] sm:$0xff] %vm649_vm1, %v634_v55  ;;  %659 = vst.msk [vmem:[#allocation2 + $0x48] sm:$0xff] %vm649_vm1, %v642_v56 }
 0x12d   : > { %v1053_v61 = vpop.f32.mrb[4].mxu0  ;;  %v1061_v62 = vpop.f32.mrb[4].mxu1  ;;  %669 = sbr.rel (%p1010_p11) target bundleno = 392 (0x188), region = 85 }
 0x12e   : > { %v639_v1 = vadd.f32 %v1053_v61, %v398_v57  ;;  %v647_v2 = vadd.f32 %v1061_v62, %v406_v58  ;;  %v586_v3 = vpop.f32.mrb[5].mxu0  ;;  %v618_v4 = vpop.f32.mrb[5].mxu1 }
 0x12f   : > { %v637_v7 = vadd.f32 %v586_v3, %v396_v59  ;;  %v645_v8 = vadd.f32 %v618_v4, %v404_v60  ;;  %v1054_v9 = vpop.f32.mrb[6].mxu0  ;;  %v1062_v10 = vpop.f32.mrb[6].mxu1  ;;  %v1330_v19 = vld [vmem:[#allocation2 + $0x10] sm:$0xff] (!%p1010_p11) }
 0x130   : > { %656 = vst.msk [vmem:[#allocation2 + $0x30] sm:$0xff] %vm649_vm1, %v639_v1  ;;  %664 = vst.msk [vmem:[#allocation2 + $0x70] sm:$0xff] %vm649_vm1, %v647_v2  ;;  %v640_v11 = vadd.f32 %v1054_v9, %v399_v63  ;;  %v648_v12 = vadd.f32 %v1062_v10, %v407_v0  ;;  %v589_v13 = vpop.f32.mrb[7].mxu0  ;;  %v621_v14 = vpop.f32.mrb[7].mxu1  ;;  %v1326_v17 = vld [vmem:[#allocation2] sm:$0xff] (!%p1010_p11)  ;;  %v689_v23 = vsel (!%p1010_p11), %vm649_vm1, %v1330_v19, 0.0  ;;  %v726_v34 = vmul.f32 (!%p1010_p11), %v1330_v19, %v1330_v19 }
 0x131   : > { %654 = vst.msk [vmem:[#allocation2 + $0x20] sm:$0xff] %vm649_vm1, %v637_v7  ;;  %662 = vst.msk [vmem:[#allocation2 + $0x60] sm:$0xff] %vm649_vm1, %v645_v8  ;;  %v638_v15 = vadd.f32 %v589_v13, %v397_v5  ;;  %v646_v16 = vadd.f32 %v621_v14, %v405_v6  ;;  %v1332_v20 = vld [vmem:[#allocation2 + $0x18] sm:$0xff] (!%p1010_p11)  ;;  %v686_v21 = vsel (!%p1010_p11), %vm649_vm1, %v1326_v17, 0.0  ;;  %v724_v32 = vmul.f32 (!%p1010_p11), %v1326_v17, %v1326_v17  ;;  %v1366_v41 = vld [vmem:[#allocation2 + $0x40] sm:$0xff] (!%p1010_p11) }
 0x132   : > { %657 = vst.msk [vmem:[#allocation2 + $0x38] sm:$0xff] %vm649_vm1, %v640_v11  ;;  %665 = vst.msk [vmem:[#allocation2 + $0x78] sm:$0xff] %vm649_vm1, %v648_v12  ;;  %v1328_v18 = vld [vmem:[#allocation2 + $0x8] sm:$0xff] (!%p1010_p11)  ;;  %v691_v26 = vsel (!%p1010_p11), %vm649_vm1, %v1332_v20, 0.0  ;;  %v727_v38 = vmul.f32 (!%p1010_p11), %v1332_v20, %v1332_v20  ;;  %v743_v45 = vsel (!%p1010_p11), %vm649_vm1, %v726_v34, 0.0  ;;  %v701_v52 = vsel (!%p1010_p11), %vm649_vm1, %v1366_v41, 0.0 }
 0x133   : > { %655 = vst.msk [vmem:[#allocation2 + $0x28] sm:$0xff] %vm649_vm1, %v638_v15  ;;  %663 = vst.msk [vmem:[#allocation2 + $0x68] sm:$0xff] %vm649_vm1, %v646_v16  ;;  %v687_v22 = vsel (!%p1010_p11), %vm649_vm1, %v1328_v18, 0.0  ;;  %v725_v33 = vmul.f32 (!%p1010_p11), %v1328_v18, %v1328_v18  ;;  %v740_v43 = vsel (!%p1010_p11), %vm649_vm1, %v724_v32, 0.0  ;;  %v1373_v48 = vld [vmem:[#allocation2 + $0x48] sm:$0xff] (!%p1010_p11)  ;;  %v1380_v54 = vld [vmem:[#allocation2 + $0x50] sm:$0xff] (!%p1010_p11)  ;;  %v732_v4 = vmul.f32 (!%p1010_p11), %v1366_v41, %v1366_v41 }
 0x134   : > { %v688_v25 = vadd.f32 %v687_v22, %v686_v21  ;;  %v745_v51 = vsel %vm649_vm1, %v727_v38, 0.0  ;;  %v703_v58 = vsel %vm649_vm1, %v1373_v48, 0.0  ;;  %v1387_v60 = vld [vmem:[#allocation2 + $0x58] sm:$0xff]  ;;  %v705_v0 = vsel %vm649_vm1, %v1380_v54, 0.0 }
 0x135   : > { %v741_v44 = vsel %vm649_vm1, %v725_v33, 0.0  ;;  %v707_v6 = vsel %vm649_vm1, %v1387_v60, 0.0  ;;  %v733_v10 = vmul.f32 %v1373_v48, %v1373_v48  ;;  %v734_v16 = vmul.f32 %v1380_v54, %v1380_v54 }
 0x136   : > { %v690_v28 = vadd.f32 %v689_v23, %v688_v25  ;;  %v742_v47 = vadd.f32 %v741_v44, %v740_v43  ;;  %v755_v21 = vsel %vm649_vm1, %v732_v4, 0.0 }
 0x137   : > { %v1348_v30 = vld [vmem:[#allocation2 + $0x30] sm:$0xff] }
 0x138   : > { %v1340_v24 = vld [vmem:[#allocation2 + $0x20] sm:$0xff]  ;;  %v692_v31 = vadd.f32 %v691_v26, %v690_v28  ;;  %v697_v39 = vsel %vm649_vm1, %v1348_v30, 0.0  ;;  %v744_v53 = vadd.f32 %v743_v45, %v742_v47  ;;  %v730_v56 = vmul.f32 %v1348_v30, %v1348_v30  ;;  %v1408_v14 = vld [vmem:[#allocation2 + $0x70] sm:$0xff] }
 0x139   : > { %v693_v29 = vsel %vm649_vm1, %v1340_v24, 0.0  ;;  %v1358_v36 = vld [vmem:[#allocation2 + $0x38] sm:$0xff]  ;;  %v728_v40 = vmul.f32 %v1340_v24, %v1340_v24  ;;  %v1394_v2 = vld [vmem:[#allocation2 + $0x60] sm:$0xff]  ;;  %v735_v28 = vmul.f32 %v1387_v60, %v1387_v60  ;;  %v738_v45 = vmul.f32 %v1408_v14, %v1408_v14 }
 0x13a   : > { %v1344_v27 = vld [vmem:[#allocation2 + $0x28] sm:$0xff]  ;;  %v694_v37 = vadd.f32 %v693_v29, %v692_v31  ;;  %v699_v46 = vsel %vm649_vm1, %v1358_v36, 0.0  ;;  %v746_v59 = vadd.f32 %v745_v51, %v744_v53  ;;  %v731_v62 = vmul.f32 %v1358_v36, %v1358_v36  ;;  %v1415_v25 = vld [vmem:[#allocation2 + $0x78] sm:$0xff] }
 0x13b   : > { %v695_v35 = vsel %vm649_vm1, %v1344_v27, 0.0  ;;  %v729_v50 = vmul.f32 %v1344_v27, %v1344_v27  ;;  %v747_v57 = vsel %vm649_vm1, %v728_v40, 0.0  ;;  %v751_v5 = vsel %vm649_vm1, %v730_v56, 0.0  ;;  %v1401_v8 = vld [vmem:[#allocation2 + $0x68] sm:$0xff] }
 0x13c   : > { %v696_v42 = vadd.f32 %v695_v35, %v694_v37  ;;  %v748_v1 = vadd.f32 %v747_v57, %v746_v59  ;;  %v753_v11 = vsel %vm649_vm1, %v731_v62, 0.0  ;;  %v709_v12 = vsel %vm649_vm1, %v1394_v2, 0.0 }
 0x13d   : > { %v749_v63 = vsel %vm649_vm1, %v729_v50, 0.0  ;;  %v711_v22 = vsel %vm649_vm1, %v1401_v8, 0.0  ;;  %v757_v29 = vsel %vm649_vm1, %v733_v10, 0.0  ;;  %v713_v31 = vsel %vm649_vm1, %v1408_v14, 0.0 }
 0x13e   : > { %v698_v49 = vadd.f32 %v697_v39, %v696_v42  ;;  %v750_v7 = vadd.f32 %v749_v63, %v748_v1  ;;  %v736_v34 = vmul.f32 %v1394_v2, %v1394_v2  ;;  %v759_v35 = vsel %vm649_vm1, %v734_v16, 0.0 }
 0x13f   : > { %v715_v37 = vsel %vm649_vm1, %v1415_v25, 0.0  ;;  %v737_v40 = vmul.f32 %v1401_v8, %v1401_v8  ;;  %v761_v42 = vsel %vm649_vm1, %v735_v28, 0.0  ;;  %v739_v50 = vmul.f32 %v1415_v25, %v1415_v25 }
 0x140   : > { %v700_v55 = vadd.f32 %v699_v46, %v698_v49  ;;  %v752_v13 = vadd.f32 %v751_v5, %v750_v7  ;;  %v763_v46 = vsel %vm649_vm1, %v736_v34, 0.0  ;;  %v802_v16 = vlaneseq }
 0x141   : > { %v765_v51 = vsel %vm649_vm1, %v737_v40, 0.0 }
 0x142   : > { %v702_v61 = vadd.f32 %v701_v52, %v700_v55  ;;  %v754_v23 = vadd.f32 %v753_v11, %v752_v13  ;;  %v767_v55 = vsel %vm649_vm1, %v738_v45, 0.0 }
 0x144   : > { %v704_v3 = vadd.f32 %v703_v58, %v702_v61  ;;  %v756_v32 = vadd.f32 %v755_v21, %v754_v23  ;;  %v769_v58 = vsel %vm649_vm1, %v739_v50, 0.0  ;;  %v803_v21 = vshrl.u32 %v802_v16, 7 }
 0x146   : > { %v706_v9 = vadd.f32 %v705_v0, %v704_v3  ;;  %v758_v38 = vadd.f32 %v757_v29, %v756_v32  ;;  %v804_v23 = vsub.s32 0, %v803_v21 }
 0x148   : > { %v708_v15 = vadd.f32 %v707_v6, %v706_v9  ;;  %v760_v43 = vadd.f32 %v759_v35, %v758_v38 }
 0x14a   : > { %v710_v26 = vadd.f32 %v709_v12, %v708_v15  ;;  %v762_v47 = vadd.f32 %v761_v42, %v760_v43 }
 0x14c   : > { %v712_v33 = vadd.f32 %v711_v22, %v710_v26  ;;  %v764_v52 = vadd.f32 %v763_v46, %v762_v47  ;;  %v797_v22 = vld [vmem:[%s1561_s2] sm:$0x1] }
 0x14e   : > { %v714_v39 = vadd.f32 %v713_v31, %v712_v33  ;;  %v766_v56 = vadd.f32 %v765_v51, %v764_v52 }
 0x150   : > { %v716_v44 = vadd.f32 %v715_v37, %v714_v39  ;;  %v768_v59 = vadd.f32 %v767_v55, %v766_v56 }
 0x152   : > { %v717_v49 = vrot.slane %v716_v44, 4  ;;  %v770_v62 = vadd.f32 %v769_v58, %v768_v59 }
 0x154   : > { %v718_v53 = vadd.f32 %v717_v49, %v716_v44  ;;  %v771_v0 = vrot.slane %v770_v62, 4 }
 0x156   : > { %v719_v57 = vrot.slane %v718_v53, 2  ;;  %v772_v3 = vadd.f32 %v771_v0, %v770_v62 }
 0x158   : > { %v720_v61 = vadd.f32 %v719_v57, %v718_v53  ;;  %v773_v4 = vrot.slane %v772_v3, 2 }
 0x15a   : > { %v721_v63 = vrot.slane %v720_v61, 1  ;;  %v774_v6 = vadd.f32 %v773_v4, %v772_v3 }
 0x15c   : > { %v722_v1 = vadd.f32 %v721_v63, %v720_v61  ;;  %v775_v7 = vrot.slane %v774_v6, 1 }
 0x15e   : > { %v1438_v5 = vmul.f32 0.0078125, %v722_v1  ;;  %v776_v9 = vadd.f32 %v775_v7, %v774_v6 }
 0x160   : > { %v778_v10 = vmul.f32 %v1438_v5, %v1438_v5  ;;  %v777_v11 = vmul.f32 0.0078125, %v776_v9  ;;  %v781_v28 = vsub.f32 %v1326_v17, %v1438_v5  ;;  %v782_v29 = vsub.f32 %v1328_v18, %v1438_v5 }
 0x161   : > { %v783_v32 = vsub.f32 %v1330_v19, %v1438_v5  ;;  %v784_v33 = vsub.f32 %v1332_v20, %v1438_v5  ;;  %v785_v34 = vsub.f32 %v1340_v24, %v1438_v5  ;;  %v786_v35 = vsub.f32 %v1344_v27, %v1438_v5  ;;  %v1011_v27 = vld [vmem:[%s1562_s3] ss:$0 sm:$0xff] }
 0x162   : > { %v779_v12 = vsub.f32 %v777_v11, %v778_v10  ;;  %v787_v37 = vsub.f32 %v1348_v30, %v1438_v5  ;;  %v788_v17 = vsub.f32 %v1358_v36, %v1438_v5  ;;  %v789_v18 = vsub.f32 %v1366_v41, %v1438_v5 }
 0x163   : > { %v790_v19 = vsub.f32 %v1373_v48, %v1438_v5  ;;  %v791_v20 = vsub.f32 %v1380_v54, %v1438_v5  ;;  %v792_v24 = vsub.f32 %v1387_v60, %v1438_v5  ;;  %v793_v30 = vsub.f32 %v1394_v2, %v1438_v5 }
 0x164   : > { %v780_v13 = vmax.f32 %v779_v12, 0.0  ;;  %v794_v36 = vsub.f32 %v1401_v8, %v1438_v5  ;;  %v795_v41 = vsub.f32 %v1408_v14, %v1438_v5  ;;  %v796_v48 = vsub.f32 %v1415_v25, %v1438_v5 }
 0x166   : > { %v798_v15 = vadd.f32 1e-05, %v780_v13 }
 0x168   : > { %1136 = vrsqrt.f32 %v798_v15 }
 0x172   : > { %v1137_v26 = vpop.eup %1136 }
 0x173   : > { %v800_v31 = vmul.f32 %v1137_v26, %v797_v22 }
 0x175   : > { %v805_v38 = vrot.slane %v800_v31, %v804_v23 }
 0x177   : > { %v807_v54 = vmul.f32 %v805_v38, %v781_v28  ;;  %v808_v39 = vmul.f32 %v805_v38, %v782_v29  ;;  %v809_v40 = vmul.f32 %v805_v38, %v783_v32  ;;  %v810_v60 = vmul.f32 %v805_v38, %v784_v33 }
 0x178   : > { %v811_v42 = vmul.f32 %v805_v38, %v785_v34  ;;  %v812_v43 = vmul.f32 %v805_v38, %v786_v35  ;;  %v813_v44 = vmul.f32 %v805_v38, %v787_v37  ;;  %v814_v45 = vmul.f32 %v805_v38, %v788_v17 }
 0x179   : > { %v830_v46 = vadd.f32 %v1011_v27, %v807_v54  ;;  %v831_v47 = vadd.f32 %v1011_v27, %v808_v39  ;;  %v832_v2 = vadd.f32 %v1011_v27, %v809_v40  ;;  %v833_v49 = vadd.f32 %v1011_v27, %v810_v60 }
 0x17a   : > { %v834_v50 = vadd.f32 %v1011_v27, %v811_v42  ;;  %v835_v8 = vadd.f32 %v1011_v27, %v812_v43  ;;  %v836_v51 = vadd.f32 %v1011_v27, %v813_v44  ;;  %v837_v52 = vadd.f32 %v1011_v27, %v814_v45 }
 0x17b   : > { %v846_v14 = vmax.f32 %v830_v46, 0.0  ;;  %v847_v53 = vmax.f32 %v831_v47, 0.0  ;;  %v848_v55 = vmax.f32 %v832_v2, 0.0  ;;  %v849_v25 = vmax.f32 %v833_v49, 0.0 }
 0x17c   : > { %v850_v56 = vmax.f32 %v834_v50, 0.0  ;;  %v851_v57 = vmax.f32 %v835_v8, 0.0  ;;  %v852_v58 = vmax.f32 %v836_v51, 0.0  ;;  %v853_v59 = vmax.f32 %v837_v52, 0.0 }
 0x17d   : > { %862 = vst.msk [vmem:[%s1563_s4] sm:$0xff] %vm649_vm1, %v846_v14  ;;  %863 = vst.msk [vmem:[%s1563_s4 + $0x8] sm:$0xff] %vm649_vm1, %v847_v53  ;;  %v815_v61 = vmul.f32 %v805_v38, %v789_v18  ;;  %v816_v62 = vmul.f32 %v805_v38, %v790_v19  ;;  %v817_v63 = vmul.f32 %v805_v38, %v791_v20 }
 0x17e   : > { %864 = vst.msk [vmem:[%s1563_s4 + $0x10] sm:$0xff] %vm649_vm1, %v848_v55  ;;  %865 = vst.msk [vmem:[%s1563_s4 + $0x18] sm:$0xff] %vm649_vm1, %v849_v25  ;;  %v818_v0 = vmul.f32 %v805_v38, %v792_v24  ;;  %v819_v1 = vmul.f32 %v805_v38, %v793_v30  ;;  %v820_v3 = vmul.f32 %v805_v38, %v794_v36 }
 0x17f   : > { %866 = vst.msk [vmem:[%s1563_s4 + $0x20] sm:$0xff] %vm649_vm1, %v850_v56  ;;  %867 = vst.msk [vmem:[%s1563_s4 + $0x28] sm:$0xff] %vm649_vm1, %v851_v57  ;;  %v821_v4 = vmul.f32 %v805_v38, %v795_v41  ;;  %v822_v5 = vmul.f32 %v805_v38, %v796_v48  ;;  %v838_v6 = vadd.f32 %v1011_v27, %v815_v61 }
 0x180   : > { %868 = vst.msk [vmem:[%s1563_s4 + $0x30] sm:$0xff] %vm649_vm1, %v852_v58  ;;  %869 = vst.msk [vmem:[%s1563_s4 + $0x38] sm:$0xff] %vm649_vm1, %v853_v59  ;;  %v839_v7 = vadd.f32 %v1011_v27, %v816_v62  ;;  %v840_v9 = vadd.f32 %v1011_v27, %v817_v63  ;;  %v841_v10 = vadd.f32 %v1011_v27, %v818_v0 }
 0x181   : > { %v842_v11 = vadd.f32 %v1011_v27, %v819_v1  ;;  %v843_v12 = vadd.f32 %v1011_v27, %v820_v3  ;;  %v844_v13 = vadd.f32 %v1011_v27, %v821_v4  ;;  %v845_v15 = vadd.f32 %v1011_v27, %v822_v5 }
 0x182   : > { %v854_v16 = vmax.f32 %v838_v6, 0.0  ;;  %v855_v21 = vmax.f32 %v839_v7, 0.0  ;;  %v856_v22 = vmax.f32 %v840_v9, 0.0  ;;  %v857_v23 = vmax.f32 %v841_v10, 0.0 }
 0x183   : > { %v858_v26 = vmax.f32 %v842_v11, 0.0  ;;  %v859_v28 = vmax.f32 %v843_v12, 0.0  ;;  %v860_v29 = vmax.f32 %v844_v13, 0.0  ;;  %v861_v31 = vmax.f32 %v845_v15, 0.0 }
 0x184   : > { %870 = vst.msk [vmem:[%s1563_s4 + $0x40] sm:$0xff] %vm649_vm1, %v854_v16  ;;  %871 = vst.msk [vmem:[%s1563_s4 + $0x48] sm:$0xff] %vm649_vm1, %v855_v21 }
 0x185   : > { %872 = vst.msk [vmem:[%s1563_s4 + $0x50] sm:$0xff] %vm649_vm1, %v856_v22  ;;  %873 = vst.msk [vmem:[%s1563_s4 + $0x58] sm:$0xff] %vm649_vm1, %v857_v23 }
 0x186   : > { %874 = vst.msk [vmem:[%s1563_s4 + $0x60] sm:$0xff] %vm649_vm1, %v858_v26  ;;  %875 = vst.msk [vmem:[%s1563_s4 + $0x68] sm:$0xff] %vm649_vm1, %v859_v28 }
 0x187   : > { %876 = vst.msk [vmem:[%s1563_s4 + $0x70] sm:$0xff] %vm649_vm1, %v860_v29  ;;  %877 = vst.msk [vmem:[%s1563_s4 + $0x78] sm:$0xff] %vm649_vm1, %v861_v31 }
 0x188 PF: > { %s14_s19 = sadd.s32 1, %s1176_s19   ;;  %s1564_s15 = smov %s1164_s16 }
 0x189   : > { %p11_p12 = scmp.ge.s32.totalorder %s14_s19, 7   ;;  %s1565_s16 = smov %s1239_s23 }
 0x18a   : > { %s1566_s17 = smov %s1172_s18  ;;  %s1567_s18 = smov %s1569_s20 }
 0x18b   :  { %13 = sbr.rel (!%p11_p12) target bundleno = 3 (0x3), region = 129 }

// kernel: _lambda_.21
= control target key start
LH: loop header
LB: loop body
LE: loop exit
PB: predicated region body
PF: predicated region fallthrough
CT: control target
= control target key end

     0   :  { %v2064_v0 = vmov 0   ;;  %vm22_vm0 = vcmask 523264   ;;  %v2065_v23 = vmov 0.0   ;;  %s4089_s1 = inlined_call_operand.vmem [shape: bf16[256,64], index: 1, kind: input, shape index: {}]   ;;  %s4090_s0 = inlined_call_operand.vmem [shape: bf16[512,256], index: 0, kind: input, shape index: {}]   ;;  %s4091_s2 = inlined_call_operand.vmem [shape: f32[1,64], index: 2, kind: input, shape index: {}]   ;;  %s4092_s3 = inlined_call_operand.vmem [shape: f32[1,64], index: 3, kind: input, shape index: {}]   ;;  %s4093_s4 = inlined_call_operand.vmem [shape: f32[512,64], index: 4, kind: output, shape index: {}]  }
   0x1   :  { %663 = vmatprep.subr.bf16.mxu0 %v2064_v0  ;;  %v1939_v1 = vld [vmem:[%s4089_s1] sm:$0xff]   ;;  %1905 = vmatprep.subr.bf16.mxu1 %v2064_v0  ;;  %v1940_v2 = vld [vmem:[%s4089_s1 + $0x8] sm:$0xff]   ;;  %v1941_v3 = vld [vmem:[%s4089_s1 + $0x10] sm:$0xff]   ;;  %23 = vst.msk [vmem:[#allocation2] sm:$0xff] %vm22_vm0, %v2065_v23 }
   0x2   :  { %664 = vmatpush1.bf16.msra.mxu0 %v1939_v1  ;;  %1921 = vmatpush1.bf16.msra.mxu1 %v1939_v1  ;;  %v1942_v4 = vld [vmem:[%s4089_s1 + $0x18] sm:$0xff]   ;;  %v1943_v5 = vld [vmem:[%s4089_s1 + $0x20] sm:$0xff]   ;;  %v1944_v7 = vld [vmem:[%s4089_s1 + $0x28] sm:$0xff]   ;;  %24 = vst.msk [vmem:[#allocation2 + $0x8] sm:$0xff] %vm22_vm0, %v2065_v23 }
   0x3   :  { %665 = vmatprep.subr.bf16.mxu0 %v2064_v0  ;;  %1906 = vmatprep.subr.bf16.mxu1 %v2064_v0  ;;  %v1957_v6 = vld [vmem:[%s4090_s0 + $0x4] ss:$8 sps:$4 sm:$0xff]   ;;  %v1945_v8 = vld [vmem:[%s4089_s1 + $0x30] sm:$0xff]   ;;  %v1946_v9 = vld [vmem:[%s4089_s1 + $0x38] sm:$0xff]   ;;  %25 = vst.msk [vmem:[#allocation2 + $0x10] sm:$0xff] %vm22_vm0, %v2065_v23 }
   0x4   :  { %695 = vmatprep.mubr.bf16.mxu0 %v1957_v6  ;;  %v1981_v10 = vld [vmem:[%s4090_s0 + $0x104] ss:$8 sps:$4 sm:$0xff]   ;;  %v1949_v13 = vld [vmem:[%s4089_s1 + $0x50] sm:$0xff]   ;;  %v1950_v14 = vld [vmem:[%s4089_s1 + $0x58] sm:$0xff]   ;;  %26 = vst.msk [vmem:[#allocation2 + $0x18] sm:$0xff] %vm22_vm0, %v2065_v23 }
   0x5   :  { %823 = vmatprep.mubr.bf16.mxu1 %v1981_v10  ;;  %v1947_v11 = vld [vmem:[%s4089_s1 + $0x40] sm:$0xff]   ;;  %v1948_v12 = vld [vmem:[%s4089_s1 + $0x48] sm:$0xff]   ;;  %v1953_v17 = vld [vmem:[%s4089_s1 + $0x70] sm:$0xff]   ;;  %27 = vst.msk [vmem:[#allocation2 + $0x20] sm:$0xff] %vm22_vm0, %v2065_v23 }
   0x6   :  { %666 = vmatpush1.bf16.msra.mxu0 %v1940_v2  ;;  %1922 = vmatpush1.bf16.msra.mxu1 %v1940_v2  ;;  %v1951_v15 = vld [vmem:[%s4089_s1 + $0x60] sm:$0xff]   ;;  %v1952_v16 = vld [vmem:[%s4089_s1 + $0x68] sm:$0xff]   ;;  %v1954_v18 = vld [vmem:[%s4089_s1 + $0x78] sm:$0xff]   ;;  %28 = vst.msk [vmem:[#allocation2 + $0x28] sm:$0xff] %vm22_vm0, %v2065_v23 }
   0x7   :  { %667 = vmatprep.subr.bf16.mxu0 %v2064_v0  ;;  %1907 = vmatprep.subr.bf16.mxu1 %v2064_v0  ;;  %v2180_v19 = vld [vmem:[%s4090_s0] ss:$8 sps:$4 sm:$0xff]   ;;  %v2190_v21 = vld [vmem:[%s4090_s0 + $0x14] ss:$8 sps:$4 sm:$0xff]   ;;  %29 = vst.msk [vmem:[#allocation2 + $0x30] sm:$0xff] %vm22_vm0, %v2065_v23  ;;  %30 = vst.msk [vmem:[#allocation2 + $0x38] sm:$0xff] %vm22_vm0, %v2065_v23 }
   0x8   :  { %v2185_v20 = vld [vmem:[%s4090_s0 + $0x100] ss:$8 sps:$4 sm:$0xff]   ;;  %v2195_v22 = vld [vmem:[%s4090_s0 + $0x114] ss:$8 sps:$4 sm:$0xff]   ;;  %31 = vst.msk [vmem:[#allocation2 + $0x40] sm:$0xff] %vm22_vm0, %v2065_v23  ;;  %32 = vst.msk [vmem:[#allocation2 + $0x48] sm:$0xff] %vm22_vm0, %v2065_v23 }
   0x9   :  { %33 = vst.msk [vmem:[#allocation2 + $0x50] sm:$0xff] %vm22_vm0, %v2065_v23  ;;  %34 = vst.msk [vmem:[#allocation2 + $0x58] sm:$0xff] %vm22_vm0, %v2065_v23  ;;  %v1960_v24 = vld [vmem:[%s4090_s0 + $0x10] ss:$8 sps:$4 sm:$0xff]   ;;  %v1961_v26 = vld [vmem:[%s4090_s0 + $0x24] ss:$8 sps:$4 sm:$0xff]  }
   0xa   :  { %668 = vmatpush1.bf16.msra.mxu0 %v1941_v3  ;;  %1923 = vmatpush1.bf16.msra.mxu1 %v1941_v3  ;;  %35 = vst.msk [vmem:[#allocation2 + $0x60] sm:$0xff] %vm22_vm0, %v2065_v23  ;;  %36 = vst.msk [vmem:[#allocation2 + $0x68] sm:$0xff] %vm22_vm0, %v2065_v23  ;;  %v1987_v25 = vld [vmem:[%s4090_s0 + $0x110] ss:$8 sps:$4 sm:$0xff]   ;;  %v1991_v27 = vld [vmem:[%s4090_s0 + $0x124] ss:$8 sps:$4 sm:$0xff]  }
   0xb   :  { %669 = vmatprep.subr.bf16.mxu0 %v2064_v0  ;;  %1908 = vmatprep.subr.bf16.mxu1 %v2064_v0  ;;  %37 = vst.msk [vmem:[#allocation2 + $0x70] sm:$0xff] %vm22_vm0, %v2065_v23  ;;  %38 = vst.msk [vmem:[#allocation2 + $0x78] sm:$0xff] %vm22_vm0, %v2065_v23  ;;  %v1963_v28 = vld [vmem:[%s4090_s0 + $0x20] ss:$8 sps:$4 sm:$0xff]   ;;  %v1964_v30 = vld [vmem:[%s4090_s0 + $0x34] ss:$8 sps:$4 sm:$0xff]  }
   0xc   :  { %39 = vst.msk [vmem:[#allocation2 + $0x80] sm:$0xff] %vm22_vm0, %v2065_v23  ;;  %40 = vst.msk [vmem:[#allocation2 + $0x88] sm:$0xff] %vm22_vm0, %v2065_v23  ;;  %v1993_v29 = vld [vmem:[%s4090_s0 + $0x120] ss:$8 sps:$4 sm:$0xff]   ;;  %v1997_v31 = vld [vmem:[%s4090_s0 + $0x134] ss:$8 sps:$4 sm:$0xff]  }
   0xd   :  { %41 = vst.msk [vmem:[#allocation2 + $0x90] sm:$0xff] %vm22_vm0, %v2065_v23  ;;  %42 = vst.msk [vmem:[#allocation2 + $0x98] sm:$0xff] %vm22_vm0, %v2065_v23  ;;  %v1966_v32 = vld [vmem:[%s4090_s0 + $0x30] ss:$8 sps:$4 sm:$0xff]   ;;  %v1967_v34 = vld [vmem:[%s4090_s0 + $0x44] ss:$8 sps:$4 sm:$0xff]  }
   0xe   :  { %670 = vmatpush1.bf16.msra.mxu0 %v1942_v4  ;;  %1924 = vmatpush1.bf16.msra.mxu1 %v1942_v4  ;;  %43 = vst.msk [vmem:[#allocation2 + $0xa0] sm:$0xff] %vm22_vm0, %v2065_v23  ;;  %44 = vst.msk [vmem:[#allocation2 + $0xa8] sm:$0xff] %vm22_vm0, %v2065_v23  ;;  %v1999_v33 = vld [vmem:[%s4090_s0 + $0x130] ss:$8 sps:$4 sm:$0xff]   ;;  %v2003_v35 = vld [vmem:[%s4090_s0 + $0x144] ss:$8 sps:$4 sm:$0xff]  }
   0xf   :  { %671 = vmatprep.subr.bf16.mxu0 %v2064_v0  ;;  %1909 = vmatprep.subr.bf16.mxu1 %v2064_v0  ;;  %45 = vst.msk [vmem:[#allocation2 + $0xb0] sm:$0xff] %vm22_vm0, %v2065_v23  ;;  %46 = vst.msk [vmem:[#allocation2 + $0xb8] sm:$0xff] %vm22_vm0, %v2065_v23  ;;  %v1969_v36 = vld [vmem:[%s4090_s0 + $0x40] ss:$8 sps:$4 sm:$0xff]   ;;  %v1970_v38 = vld [vmem:[%s4090_s0 + $0x54] ss:$8 sps:$4 sm:$0xff]  }
  0x10   :  { %47 = vst.msk [vmem:[#allocation2 + $0xc0] sm:$0xff] %vm22_vm0, %v2065_v23  ;;  %48 = vst.msk [vmem:[#allocation2 + $0xc8] sm:$0xff] %vm22_vm0, %v2065_v23  ;;  %v2005_v37 = vld [vmem:[%s4090_s0 + $0x140] ss:$8 sps:$4 sm:$0xff]   ;;  %v2009_v39 = vld [vmem:[%s4090_s0 + $0x154] ss:$8 sps:$4 sm:$0xff]  }
  0x11   :  { %49 = vst.msk [vmem:[#allocation2 + $0xd0] sm:$0xff] %vm22_vm0, %v2065_v23  ;;  %50 = vst.msk [vmem:[#allocation2 + $0xd8] sm:$0xff] %vm22_vm0, %v2065_v23  ;;  %v1972_v40 = vld [vmem:[%s4090_s0 + $0x50] ss:$8 sps:$4 sm:$0xff]   ;;  %v1973_v42 = vld [vmem:[%s4090_s0 + $0x64] ss:$8 sps:$4 sm:$0xff]  }
  0x12   :  { %672 = vmatpush1.bf16.msra.mxu0 %v1943_v5  ;;  %1925 = vmatpush1.bf16.msra.mxu1 %v1943_v5  ;;  %51 = vst.msk [vmem:[#allocation2 + $0xe0] sm:$0xff] %vm22_vm0, %v2065_v23  ;;  %52 = vst.msk [vmem:[#allocation2 + $0xe8] sm:$0xff] %vm22_vm0, %v2065_v23  ;;  %v2011_v41 = vld [vmem:[%s4090_s0 + $0x150] ss:$8 sps:$4 sm:$0xff]   ;;  %v2015_v43 = vld [vmem:[%s4090_s0 + $0x164] ss:$8 sps:$4 sm:$0xff]  }
  0x13   :  { %673 = vmatprep.subr.bf16.mxu0 %v2064_v0  ;;  %1910 = vmatprep.subr.bf16.mxu1 %v2064_v0  ;;  %53 = vst.msk [vmem:[#allocation2 + $0xf0] sm:$0xff] %vm22_vm0, %v2065_v23  ;;  %54 = vst.msk [vmem:[#allocation2 + $0xf8] sm:$0xff] %vm22_vm0, %v2065_v23  ;;  %v1975_v44 = vld [vmem:[%s4090_s0 + $0x60] ss:$8 sps:$4 sm:$0xff]   ;;  %v1976_v46 = vld [vmem:[%s4090_s0 + $0x74] ss:$8 sps:$4 sm:$0xff]  }
  0x14   :  { %55 = vst.msk [vmem:[#allocation2 + $0x100] sm:$0xff] %vm22_vm0, %v2065_v23  ;;  %56 = vst.msk [vmem:[#allocation2 + $0x108] sm:$0xff] %vm22_vm0, %v2065_v23  ;;  %v2017_v45 = vld [vmem:[%s4090_s0 + $0x160] ss:$8 sps:$4 sm:$0xff]   ;;  %v2021_v47 = vld [vmem:[%s4090_s0 + $0x174] ss:$8 sps:$4 sm:$0xff]  }
  0x15   :  { %57 = vst.msk [vmem:[#allocation2 + $0x110] sm:$0xff] %vm22_vm0, %v2065_v23  ;;  %58 = vst.msk [vmem:[#allocation2 + $0x118] sm:$0xff] %vm22_vm0, %v2065_v23  ;;  %v1978_v48 = vld [vmem:[%s4090_s0 + $0x70] ss:$8 sps:$4 sm:$0xff]   ;;  %v1982_v50 = vld [vmem:[%s4090_s0 + $0x84] ss:$8 sps:$4 sm:$0xff]  }
  0x16   :  { %674 = vmatpush1.bf16.msra.mxu0 %v1944_v7  ;;  %1926 = vmatpush1.bf16.msra.mxu1 %v1944_v7  ;;  %59 = vst.msk [vmem:[#allocation2 + $0x120] sm:$0xff] %vm22_vm0, %v2065_v23  ;;  %60 = vst.msk [vmem:[#allocation2 + $0x128] sm:$0xff] %vm22_vm0, %v2065_v23  ;;  %v2023_v49 = vld [vmem:[%s4090_s0 + $0x170] ss:$8 sps:$4 sm:$0xff]   ;;  %v2027_v51 = vld [vmem:[%s4090_s0 + $0x184] ss:$8 sps:$4 sm:$0xff]  }
  0x17   :  { %675 = vmatprep.subr.bf16.mxu0 %v2064_v0  ;;  %1911 = vmatprep.subr.bf16.mxu1 %v2064_v0  ;;  %61 = vst.msk [vmem:[#allocation2 + $0x130] sm:$0xff] %vm22_vm0, %v2065_v23  ;;  %62 = vst.msk [vmem:[#allocation2 + $0x138] sm:$0xff] %vm22_vm0, %v2065_v23  ;;  %v1984_v52 = vld [vmem:[%s4090_s0 + $0x80] ss:$8 sps:$4 sm:$0xff]   ;;  %v1988_v54 = vld [vmem:[%s4090_s0 + $0x94] ss:$8 sps:$4 sm:$0xff]  }
  0x18   :  { %63 = vst.msk [vmem:[#allocation2 + $0x140] sm:$0xff] %vm22_vm0, %v2065_v23  ;;  %64 = vst.msk [vmem:[#allocation2 + $0x148] sm:$0xff] %vm22_vm0, %v2065_v23  ;;  %v2029_v53 = vld [vmem:[%s4090_s0 + $0x180] ss:$8 sps:$4 sm:$0xff]   ;;  %v2030_v55 = vld [vmem:[%s4090_s0 + $0x194] ss:$8 sps:$4 sm:$0xff]  }
  0x19   :  { %65 = vst.msk [vmem:[#allocation2 + $0x150] sm:$0xff] %vm22_vm0, %v2065_v23  ;;  %66 = vst.msk [vmem:[#allocation2 + $0x158] sm:$0xff] %vm22_vm0, %v2065_v23  ;;  %v1990_v56 = vld [vmem:[%s4090_s0 + $0x90] ss:$8 sps:$4 sm:$0xff]   ;;  %v1994_v58 = vld [vmem:[%s4090_s0 + $0xa4] ss:$8 sps:$4 sm:$0xff]  }
  0x1a   :  { %676 = vmatpush1.bf16.msra.mxu0 %v1945_v8  ;;  %1927 = vmatpush1.bf16.msra.mxu1 %v1945_v8  ;;  %67 = vst.msk [vmem:[#allocation2 + $0x160] sm:$0xff] %vm22_vm0, %v2065_v23  ;;  %68 = vst.msk [vmem:[#allocation2 + $0x168] sm:$0xff] %vm22_vm0, %v2065_v23  ;;  %v2032_v57 = vld [vmem:[%s4090_s0 + $0x190] ss:$8 sps:$4 sm:$0xff]   ;;  %v2033_v59 = vld [vmem:[%s4090_s0 + $0x1a4] ss:$8 sps:$4 sm:$0xff]  }
  0x1b   :  { %677 = vmatprep.subr.bf16.mxu0 %v2064_v0  ;;  %1912 = vmatprep.subr.bf16.mxu1 %v2064_v0  ;;  %69 = vst.msk [vmem:[#allocation2 + $0x170] sm:$0xff] %vm22_vm0, %v2065_v23  ;;  %70 = vst.msk [vmem:[#allocation2 + $0x178] sm:$0xff] %vm22_vm0, %v2065_v23  ;;  %v1996_v60 = vld [vmem:[%s4090_s0 + $0xa0] ss:$8 sps:$4 sm:$0xff]   ;;  %v2000_v62 = vld [vmem:[%s4090_s0 + $0xb4] ss:$8 sps:$4 sm:$0xff]  }
  0x1c   :  { %71 = vst.msk [vmem:[#allocation2 + $0x180] sm:$0xff] %vm22_vm0, %v2065_v23  ;;  %72 = vst.msk [vmem:[#allocation2 + $0x188] sm:$0xff] %vm22_vm0, %v2065_v23  ;;  %v2035_v61 = vld [vmem:[%s4090_s0 + $0x1a0] ss:$8 sps:$4 sm:$0xff]   ;;  %v2036_v63 = vld [vmem:[%s4090_s0 + $0x1b4] ss:$8 sps:$4 sm:$0xff]  }
  0x1d   :  { %73 = vst.msk [vmem:[#allocation2 + $0x190] sm:$0xff] %vm22_vm0, %v2065_v23  ;;  %74 = vst.msk [vmem:[#allocation2 + $0x198] sm:$0xff] %vm22_vm0, %v2065_v23  ;;  %v2038_v1 = vld [vmem:[%s4090_s0 + $0x1b0] ss:$8 sps:$4 sm:$0xff]   ;;  %v2006_v2 = vld [vmem:[%s4090_s0 + $0xc4] ss:$8 sps:$4 sm:$0xff]  }
  0x1e   :  { %678 = vmatpush1.bf16.msra.mxu0 %v1946_v9  ;;  %1928 = vmatpush1.bf16.msra.mxu1 %v1946_v9  ;;  %75 = vst.msk [vmem:[#allocation2 + $0x1a0] sm:$0xff] %vm22_vm0, %v2065_v23  ;;  %76 = vst.msk [vmem:[#allocation2 + $0x1a8] sm:$0xff] %vm22_vm0, %v2065_v23  ;;  %v2039_v3 = vld [vmem:[%s4090_s0 + $0x1c4] ss:$8 sps:$4 sm:$0xff]   ;;  %v2008_v4 = vld [vmem:[%s4090_s0 + $0xc0] ss:$8 sps:$4 sm:$0xff]  }
  0x1f   :  { %679 = vmatprep.subr.bf16.mxu0 %v2064_v0  ;;  %1913 = vmatprep.subr.bf16.mxu1 %v2064_v0  ;;  %77 = vst.msk [vmem:[#allocation2 + $0x1b0] sm:$0xff] %vm22_vm0, %v2065_v23  ;;  %78 = vst.msk [vmem:[#allocation2 + $0x1b8] sm:$0xff] %vm22_vm0, %v2065_v23  ;;  %v2041_v5 = vld [vmem:[%s4090_s0 + $0x1c0] ss:$8 sps:$4 sm:$0xff]   ;;  %v2012_v6 = vld [vmem:[%s4090_s0 + $0xd4] ss:$8 sps:$4 sm:$0xff]  }
  0x20   :  { %79 = vst.msk [vmem:[#allocation2 + $0x1c0] sm:$0xff] %vm22_vm0, %v2065_v23  ;;  %80 = vst.msk [vmem:[#allocation2 + $0x1c8] sm:$0xff] %vm22_vm0, %v2065_v23  ;;  %v2042_v7 = vld [vmem:[%s4090_s0 + $0x1d4] ss:$8 sps:$4 sm:$0xff]   ;;  %v2014_v8 = vld [vmem:[%s4090_s0 + $0xd0] ss:$8 sps:$4 sm:$0xff]  }
  0x21   :  { %81 = vst.msk [vmem:[#allocation2 + $0x1d0] sm:$0xff] %vm22_vm0, %v2065_v23  ;;  %82 = vst.msk [vmem:[#allocation2 + $0x1d8] sm:$0xff] %vm22_vm0, %v2065_v23  ;;  %v2044_v9 = vld [vmem:[%s4090_s0 + $0x1d0] ss:$8 sps:$4 sm:$0xff]   ;;  %v2018_v10 = vld [vmem:[%s4090_s0 + $0xe4] ss:$8 sps:$4 sm:$0xff]  }
  0x22   :  { %680 = vmatpush1.bf16.msra.mxu0 %v1947_v11  ;;  %1929 = vmatpush1.bf16.msra.mxu1 %v1947_v11  ;;  %83 = vst.msk [vmem:[#allocation2 + $0x1e0] sm:$0xff] %vm22_vm0, %v2065_v23  ;;  %84 = vst.msk [vmem:[#allocation2 + $0x1e8] sm:$0xff] %vm22_vm0, %v2065_v23  ;;  %v2045_v11 = vld [vmem:[%s4090_s0 + $0x1e4] ss:$8 sps:$4 sm:$0xff]  }
  0x23   :  { %681 = vmatprep.subr.bf16.mxu0 %v2064_v0  ;;  %1914 = vmatprep.subr.bf16.mxu1 %v2064_v0  ;;  %85 = vst.msk [vmem:[#allocation2 + $0x1f0] sm:$0xff] %vm22_vm0, %v2065_v23  ;;  %86 = vst.msk [vmem:[#allocation2 + $0x1f8] sm:$0xff] %vm22_vm0, %v2065_v23  ;;  %v120_v23 = vld [vmem:[#allocation2 + $0x108] sm:$0xff] }
  0x26   :  { %682 = vmatpush1.bf16.msra.mxu0 %v1948_v12  ;;  %1930 = vmatpush1.bf16.msra.mxu1 %v1948_v12  ;;  %v2020_v12 = vld [vmem:[%s4090_s0 + $0xe0] ss:$8 sps:$4 sm:$0xff]  }
  0x27   :  { %683 = vmatprep.subr.bf16.mxu0 %v2064_v0  ;;  %1915 = vmatprep.subr.bf16.mxu1 %v2064_v0 }
  0x2a   :  { %684 = vmatpush1.bf16.msra.mxu0 %v1949_v13  ;;  %1931 = vmatpush1.bf16.msra.mxu1 %v1949_v13  ;;  %v2047_v13 = vld [vmem:[%s4090_s0 + $0x1e0] ss:$8 sps:$4 sm:$0xff]  }
  0x2b   :  { %685 = vmatprep.subr.bf16.mxu0 %v2064_v0  ;;  %1916 = vmatprep.subr.bf16.mxu1 %v2064_v0 }
  0x2e   :  { %686 = vmatpush1.bf16.msra.mxu0 %v1950_v14  ;;  %1932 = vmatpush1.bf16.msra.mxu1 %v1950_v14  ;;  %v2024_v14 = vld [vmem:[%s4090_s0 + $0xf4] ss:$8 sps:$4 sm:$0xff]  }
  0x2f   :  { %687 = vmatprep.subr.bf16.mxu0 %v2064_v0  ;;  %1917 = vmatprep.subr.bf16.mxu1 %v2064_v0 }
  0x32   :  { %688 = vmatpush1.bf16.msra.mxu0 %v1951_v15  ;;  %1933 = vmatpush1.bf16.msra.mxu1 %v1951_v15  ;;  %v2048_v15 = vld [vmem:[%s4090_s0 + $0x1f4] ss:$8 sps:$4 sm:$0xff]  }
  0x33   :  { %689 = vmatprep.subr.bf16.mxu0 %v2064_v0  ;;  %1918 = vmatprep.subr.bf16.mxu1 %v2064_v0 }
  0x36   :  { %690 = vmatpush1.bf16.msra.mxu0 %v1952_v16  ;;  %1934 = vmatpush1.bf16.msra.mxu1 %v1952_v16  ;;  %v2026_v16 = vld [vmem:[%s4090_s0 + $0xf0] ss:$8 sps:$4 sm:$0xff]  }
  0x37   :  { %691 = vmatprep.subr.bf16.mxu0 %v2064_v0  ;;  %1919 = vmatprep.subr.bf16.mxu1 %v2064_v0 }
  0x3a   :  { %692 = vmatpush1.bf16.msra.mxu0 %v1953_v17  ;;  %1935 = vmatpush1.bf16.msra.mxu1 %v1953_v17  ;;  %v2050_v17 = vld [vmem:[%s4090_s0 + $0x1f0] ss:$8 sps:$4 sm:$0xff]  }
  0x3b   :  { %693 = vmatprep.subr.bf16.mxu0 %v2064_v0  ;;  %1920 = vmatprep.subr.bf16.mxu1 %v2064_v0  ;;  %v2002_v0 = vld [vmem:[%s4090_s0 + $0xb0] ss:$8 sps:$4 sm:$0xff]  }
  0x3e   :  { %694 = vmatpush1.bf16.msra.mxu0 %v1954_v18  ;;  %1936 = vmatpush1.bf16.msra.mxu1 %v1954_v18  ;;  %v87_v18 = vld [vmem:[#allocation2] sm:$0xff] }
  0x41   :  { %696 = vmatmul.mubr.bf16.vlgmr.msra.gmra.mrb[0].mxu0 %v2180_v19  ;;  %824 = vmatmul.mubr.bf16.vlgmr.msra.gmra.mrb[0].mxu1 %v2185_v20  ;;  %v119_v19 = vld [vmem:[#allocation2 + $0x100] sm:$0xff] }
  0x42   :  { %703 = vmatprep.mubr.bf16.mxu0 %v2190_v21  ;;  %831 = vmatprep.mubr.bf16.mxu1 %v2195_v22  ;;  %v88_v21 = vld [vmem:[#allocation2 + $0x8] sm:$0xff] }
  0x49   :  { %704 = vmatmul.mubr.bf16.gmra.mrb[4].mxu0 %v1960_v24  ;;  %832 = vmatmul.mubr.bf16.gmra.mrb[4].mxu1 %v1987_v25 }
  0x4a   :  { %711 = vmatprep.mubr.bf16.mxu0 %v1961_v26  ;;  %839 = vmatprep.mubr.bf16.mxu1 %v1991_v27 }
  0x51   :  { %712 = vmatmul.mubr.bf16.gmra.mrb[8].mxu0 %v1963_v28  ;;  %840 = vmatmul.mubr.bf16.gmra.mrb[8].mxu1 %v1993_v29 }
  0x52   :  { %719 = vmatprep.mubr.bf16.mxu0 %v1964_v30  ;;  %847 = vmatprep.mubr.bf16.mxu1 %v1997_v31 }
  0x59   :  { %720 = vmatmul.mubr.bf16.gmra.mrb[12].mxu0 %v1966_v32  ;;  %848 = vmatmul.mubr.bf16.gmra.mrb[12].mxu1 %v1999_v33 }
  0x5a   :  { %727 = vmatprep.mubr.bf16.mxu0 %v1967_v34  ;;  %855 = vmatprep.mubr.bf16.mxu1 %v2003_v35  ;;  %v89_v34 = vld [vmem:[#allocation2 + $0x10] sm:$0xff] }
  0x5b   :  { %v121_v35 = vld [vmem:[#allocation2 + $0x110] sm:$0xff] }
  0x61   :  { %728 = vmatmul.mubr.bf16.gmra.mrb[16].mxu0 %v1969_v36  ;;  %856 = vmatmul.mubr.bf16.gmra.mrb[16].mxu1 %v2005_v37  ;;  %v90_v37 = vld [vmem:[#allocation2 + $0x18] sm:$0xff] }
  0x62   :  { %735 = vmatprep.mubr.bf16.mxu0 %v1970_v38  ;;  %863 = vmatprep.mubr.bf16.mxu1 %v2009_v39 }
  0x69   :  { %736 = vmatmul.mubr.bf16.gmra.mrb[20].mxu0 %v1972_v40  ;;  %864 = vmatmul.mubr.bf16.gmra.mrb[20].mxu1 %v2011_v41 }
  0x6a   :  { %743 = vmatprep.mubr.bf16.mxu0 %v1973_v42  ;;  %871 = vmatprep.mubr.bf16.mxu1 %v2015_v43  ;;  %v122_v43 = vld [vmem:[#allocation2 + $0x118] sm:$0xff] }
  0x71   :  { %744 = vmatmul.mubr.bf16.gmra.mrb[24].mxu0 %v1975_v44  ;;  %872 = vmatmul.mubr.bf16.gmra.mrb[24].mxu1 %v2017_v45 }
  0x72   :  { %751 = vmatprep.mubr.bf16.mxu0 %v1976_v46  ;;  %879 = vmatprep.mubr.bf16.mxu1 %v2021_v47 }
  0x79   :  { %752 = vmatmul.mubr.bf16.gmra.mrb[28].mxu0 %v1978_v48  ;;  %880 = vmatmul.mubr.bf16.gmra.mrb[28].mxu1 %v2023_v49 }
  0x7a   :  { %759 = vmatprep.mubr.bf16.mxu0 %v1982_v50  ;;  %887 = vmatprep.mubr.bf16.mxu1 %v2027_v51  ;;  %v91_v50 = vld [vmem:[#allocation2 + $0x20] sm:$0xff] }
  0x7b   :  { %v123_v51 = vld [vmem:[#allocation2 + $0x120] sm:$0xff] }
  0x81   :  { %760 = vmatmul.mubr.bf16.gmra.mrb[32].mxu0 %v1984_v52  ;;  %888 = vmatmul.mubr.bf16.gmra.mrb[32].mxu1 %v2029_v53  ;;  %v92_v53 = vld [vmem:[#allocation2 + $0x28] sm:$0xff] }
  0x82   :  { %767 = vmatprep.mubr.bf16.mxu0 %v1988_v54  ;;  %895 = vmatprep.mubr.bf16.mxu1 %v2030_v55 }
  0x89   :  { %768 = vmatmul.mubr.bf16.gmra.mrb[36].mxu0 %v1990_v56  ;;  %896 = vmatmul.mubr.bf16.gmra.mrb[36].mxu1 %v2032_v57 }
  0x8a   :  { %775 = vmatprep.mubr.bf16.mxu0 %v1994_v58  ;;  %903 = vmatprep.mubr.bf16.mxu1 %v2033_v59  ;;  %v124_v59 = vld [vmem:[#allocation2 + $0x128] sm:$0xff] }
  0x91   :  { %776 = vmatmul.mubr.bf16.gmra.mrb[40].mxu0 %v1996_v60  ;;  %904 = vmatmul.mubr.bf16.gmra.mrb[40].mxu1 %v2035_v61 }
  0x92   :  { %783 = vmatprep.mubr.bf16.mxu0 %v2000_v62  ;;  %911 = vmatprep.mubr.bf16.mxu1 %v2036_v63 }
  0x99   :  { %784 = vmatmul.mubr.bf16.gmra.mrb[44].mxu0 %v2002_v0  ;;  %912 = vmatmul.mubr.bf16.gmra.mrb[44].mxu1 %v2038_v1 }
  0x9a   :  { %791 = vmatprep.mubr.bf16.mxu0 %v2006_v2  ;;  %919 = vmatprep.mubr.bf16.mxu1 %v2039_v3  ;;  %v93_v2 = vld [vmem:[#allocation2 + $0x30] sm:$0xff] }
  0x9b   :  { %v125_v3 = vld [vmem:[#allocation2 + $0x130] sm:$0xff] }
  0xa1   :  { %792 = vmatmul.mubr.bf16.gmra.mrb[48].mxu0 %v2008_v4  ;;  %920 = vmatmul.mubr.bf16.gmra.mrb[48].mxu1 %v2041_v5  ;;  %v94_v5 = vld [vmem:[#allocation2 + $0x38] sm:$0xff] }
  0xa2   :  { %799 = vmatprep.mubr.bf16.mxu0 %v2012_v6  ;;  %927 = vmatprep.mubr.bf16.mxu1 %v2042_v7 }
  0xa9   :  { %800 = vmatmul.mubr.bf16.gmra.mrb[52].mxu0 %v2014_v8  ;;  %928 = vmatmul.mubr.bf16.gmra.mrb[52].mxu1 %v2044_v9 }
  0xaa   :  { %807 = vmatprep.mubr.bf16.mxu0 %v2018_v10  ;;  %935 = vmatprep.mubr.bf16.mxu1 %v2045_v11  ;;  %v126_v11 = vld [vmem:[#allocation2 + $0x138] sm:$0xff] }
  0xb1   :  { %808 = vmatmul.mubr.bf16.gmra.mrb[56].mxu0 %v2020_v12  ;;  %936 = vmatmul.mubr.bf16.gmra.mrb[56].mxu1 %v2047_v13 }
  0xb2   :  { %815 = vmatprep.mubr.bf16.mxu0 %v2024_v14  ;;  %943 = vmatprep.mubr.bf16.mxu1 %v2048_v15 }
  0xb9   :  { %816 = vmatmul.mubr.bf16.gmra.mrb[60].mxu0 %v2026_v16  ;;  %944 = vmatmul.mubr.bf16.gmra.mrb[60].mxu1 %v2050_v17 }
 0x114   :  { %v697_v20 = vpop.f32.mrb[0].mxu0  ;;  %v825_v22 = vpop.f32.mrb[0].mxu1 }
 0x115   :  { %v952_v24 = vadd.f32 %v697_v20, %v87_v18  ;;  %v699_v25 = vpop.f32.mrb[1].mxu0  ;;  %v984_v26 = vadd.f32 %v825_v22, %v119_v19  ;;  %v827_v27 = vpop.f32.mrb[1].mxu1  ;;  %v95_v18 = vld [vmem:[#allocation2 + $0x40] sm:$0xff] }
 0x116   :  { %v700_v28 = vpop.f32.mrb[2].mxu0  ;;  %v828_v29 = vpop.f32.mrb[2].mxu1  ;;  %v127_v19 = vld [vmem:[#allocation2 + $0x140] sm:$0xff]  ;;  %v128_v27 = vld [vmem:[#allocation2 + $0x148] sm:$0xff] }
 0x117   :  { %1017 = vst.msk [vmem:[#allocation2] sm:$0xff] %vm22_vm0, %v952_v24  ;;  %v953_v30 = vadd.f32 %v700_v28, %v88_v21  ;;  %v702_v31 = vpop.f32.mrb[3].mxu0  ;;  %1049 = vst.msk [vmem:[#allocation2 + $0x100] sm:$0xff] %vm22_vm0, %v984_v26  ;;  %v985_v32 = vadd.f32 %v828_v29, %v120_v23  ;;  %v830_v33 = vpop.f32.mrb[3].mxu1  ;;  %v96_v21 = vld [vmem:[#allocation2 + $0x48] sm:$0xff] }
 0x119   :  { %1018 = vst.msk [vmem:[#allocation2 + $0x8] sm:$0xff] %vm22_vm0, %v953_v30  ;;  %1050 = vst.msk [vmem:[#allocation2 + $0x108] sm:$0xff] %vm22_vm0, %v985_v32 }
 0x11c   :  { %v705_v36 = vpop.f32.mrb[4].mxu0  ;;  %v833_v38 = vpop.f32.mrb[4].mxu1 }
 0x11d   :  { %v954_v39 = vadd.f32 %v705_v36, %v89_v34  ;;  %v707_v40 = vpop.f32.mrb[5].mxu0  ;;  %v986_v41 = vadd.f32 %v833_v38, %v121_v35  ;;  %v835_v42 = vpop.f32.mrb[5].mxu1  ;;  %v97_v35 = vld [vmem:[#allocation2 + $0x50] sm:$0xff] }
 0x11e   :  { %v708_v44 = vpop.f32.mrb[6].mxu0  ;;  %v836_v45 = vpop.f32.mrb[6].mxu1  ;;  %v129_v36 = vld [vmem:[#allocation2 + $0x150] sm:$0xff]  ;;  %v98_v40 = vld [vmem:[#allocation2 + $0x58] sm:$0xff] }
 0x11f   :  { %1019 = vst.msk [vmem:[#allocation2 + $0x10] sm:$0xff] %vm22_vm0, %v954_v39  ;;  %v955_v46 = vadd.f32 %v708_v44, %v90_v37  ;;  %v710_v47 = vpop.f32.mrb[7].mxu0  ;;  %1051 = vst.msk [vmem:[#allocation2 + $0x110] sm:$0xff] %vm22_vm0, %v986_v41  ;;  %v838_v48 = vpop.f32.mrb[7].mxu1  ;;  %v987_v49 = vadd.f32 %v836_v45, %v122_v43  ;;  %v1084_v37 = vld [vmem:[#allocation2] sm:$0xff] }
 0x120   :  { %v1085_v34 = vld [vmem:[#allocation2 + $0x8] sm:$0xff]  ;;  %v130_v47 = vld [vmem:[#allocation2 + $0x158] sm:$0xff] }
 0x121   :  { %1020 = vst.msk [vmem:[#allocation2 + $0x18] sm:$0xff] %vm22_vm0, %v955_v46  ;;  %1052 = vst.msk [vmem:[#allocation2 + $0x118] sm:$0xff] %vm22_vm0, %v987_v49  ;;  %v1283_v42 = vmul.f32 %v1085_v34, %v1085_v34 }
 0x124   :  { %v713_v52 = vpop.f32.mrb[8].mxu0  ;;  %v841_v54 = vpop.f32.mrb[8].mxu1 }
 0x125   :  { %v956_v55 = vadd.f32 %v713_v52, %v91_v50  ;;  %v715_v56 = vpop.f32.mrb[9].mxu0  ;;  %v988_v57 = vadd.f32 %v841_v54, %v123_v51  ;;  %v843_v58 = vpop.f32.mrb[9].mxu1  ;;  %v1282_v50 = vmul.f32 %v1084_v37, %v1084_v37  ;;  %v1149_v51 = vsel %vm22_vm0, %v1085_v34, 0.0 }
 0x126   :  { %v716_v60 = vpop.f32.mrb[10].mxu0  ;;  %v844_v61 = vpop.f32.mrb[10].mxu1  ;;  %v1086_v38 = vld [vmem:[#allocation2 + $0x10] sm:$0xff]  ;;  %v1148_v58 = vsel %vm22_vm0, %v1084_v37, 0.0 }
 0x127   :  { %1021 = vst.msk [vmem:[#allocation2 + $0x20] sm:$0xff] %vm22_vm0, %v956_v55  ;;  %v957_v62 = vadd.f32 %v716_v60, %v92_v53  ;;  %v718_v63 = vpop.f32.mrb[11].mxu0  ;;  %1053 = vst.msk [vmem:[#allocation2 + $0x120] sm:$0xff] %vm22_vm0, %v988_v57  ;;  %v846_v0 = vpop.f32.mrb[11].mxu1  ;;  %v989_v1 = vadd.f32 %v844_v61, %v124_v59  ;;  %v1284_v52 = vmul.f32 %v1086_v38, %v1086_v38  ;;  %v1347_v59 = vsel %vm22_vm0, %v1283_v42, 0.0 }
 0x128   :  { %v1087_v56 = vld [vmem:[#allocation2 + $0x18] sm:$0xff]  ;;  %v1151_v60 = vsel %vm22_vm0, %v1086_v38, 0.0  ;;  %v1150_v61 = vadd.f32 %v1149_v51, %v1148_v58  ;;  %v99_v63 = vld [vmem:[#allocation2 + $0x60] sm:$0xff] }
 0x129   :  { %1022 = vst.msk [vmem:[#allocation2 + $0x28] sm:$0xff] %vm22_vm0, %v957_v62  ;;  %1054 = vst.msk [vmem:[#allocation2 + $0x128] sm:$0xff] %vm22_vm0, %v989_v1  ;;  %v131_v0 = vld [vmem:[#allocation2 + $0x160] sm:$0xff]  ;;  %v1346_v1 = vsel %vm22_vm0, %v1282_v50, 0.0 }
 0x12c   :  { %v721_v4 = vpop.f32.mrb[12].mxu0  ;;  %v849_v6 = vpop.f32.mrb[12].mxu1 }
 0x12d   :  { %v958_v7 = vadd.f32 %v721_v4, %v93_v2  ;;  %v723_v8 = vpop.f32.mrb[13].mxu0  ;;  %v990_v9 = vadd.f32 %v849_v6, %v125_v3  ;;  %v851_v10 = vpop.f32.mrb[13].mxu1  ;;  %v1349_v2 = vsel %vm22_vm0, %v1284_v52, 0.0  ;;  %v1285_v3 = vmul.f32 %v1087_v56, %v1087_v56 }
 0x12e   :  { %v724_v12 = vpop.f32.mrb[14].mxu0  ;;  %v852_v13 = vpop.f32.mrb[14].mxu1  ;;  %v1088_v62 = vld [vmem:[#allocation2 + $0x20] sm:$0xff]  ;;  %v1348_v4 = vadd.f32 %v1347_v59, %v1346_v1 }
 0x12f   :  { %1023 = vst.msk [vmem:[#allocation2 + $0x30] sm:$0xff] %vm22_vm0, %v958_v7  ;;  %v959_v14 = vadd.f32 %v724_v12, %v94_v5  ;;  %v726_v15 = vpop.f32.mrb[15].mxu0  ;;  %1055 = vst.msk [vmem:[#allocation2 + $0x130] sm:$0xff] %vm22_vm0, %v990_v9  ;;  %v854_v16 = vpop.f32.mrb[15].mxu1  ;;  %v991_v17 = vadd.f32 %v852_v13, %v126_v11  ;;  %v1152_v5 = vadd.f32 %v1151_v60, %v1150_v61  ;;  %v100_v7 = vld [vmem:[#allocation2 + $0x68] sm:$0xff]  ;;  %v1153_v9 = vsel %vm22_vm0, %v1087_v56, 0.0 }
 0x130   :  { %v1286_v10 = vmul.f32 %v1088_v62, %v1088_v62  ;;  %v132_v15 = vld [vmem:[#allocation2 + $0x168] sm:$0xff]  ;;  %v1350_v16 = vadd.f32 %v1349_v2, %v1348_v4  ;;  %v135_v1 = vld [vmem:[#allocation2 + $0x180] sm:$0xff] }
 0x131   :  { %1024 = vst.msk [vmem:[#allocation2 + $0x38] sm:$0xff] %vm22_vm0, %v959_v14  ;;  %1056 = vst.msk [vmem:[#allocation2 + $0x138] sm:$0xff] %vm22_vm0, %v991_v17  ;;  %v1089_v17 = vld [vmem:[#allocation2 + $0x28] sm:$0xff] }
 0x132   :  { %v1157_v34 = vsel %vm22_vm0, %v1089_v17, 0.0 }
 0x134   :  { %v729_v20 = vpop.f32.mrb[16].mxu0  ;;  %v857_v22 = vpop.f32.mrb[16].mxu1 }
 0x135   :  { %v960_v23 = vadd.f32 %v729_v20, %v95_v18  ;;  %v731_v24 = vpop.f32.mrb[17].mxu0  ;;  %v992_v25 = vadd.f32 %v857_v22, %v127_v19  ;;  %v859_v26 = vpop.f32.mrb[17].mxu1  ;;  %v1351_v20 = vsel %vm22_vm0, %v1285_v3, 0.0 }
 0x136   :  { %v732_v28 = vpop.f32.mrb[18].mxu0  ;;  %v860_v29 = vpop.f32.mrb[18].mxu1  ;;  %v1090_v26 = vld [vmem:[#allocation2 + $0x30] sm:$0xff] }
 0x137   :  { %1025 = vst.msk [vmem:[#allocation2 + $0x40] sm:$0xff] %vm22_vm0, %v960_v23  ;;  %v961_v30 = vadd.f32 %v732_v28, %v96_v21  ;;  %v734_v31 = vpop.f32.mrb[19].mxu0  ;;  %1057 = vst.msk [vmem:[#allocation2 + $0x140] sm:$0xff] %vm22_vm0, %v992_v25  ;;  %v862_v32 = vpop.f32.mrb[19].mxu1  ;;  %v993_v33 = vadd.f32 %v860_v29, %v128_v27  ;;  %v1155_v21 = vsel %vm22_vm0, %v1088_v62, 0.0  ;;  %v1154_v25 = vadd.f32 %v1153_v9, %v1152_v5 }
 0x138   :  { %v1353_v28 = vsel %vm22_vm0, %v1286_v10, 0.0  ;;  %v1287_v29 = vmul.f32 %v1089_v17, %v1089_v17  ;;  %v101_v32 = vld [vmem:[#allocation2 + $0x70] sm:$0xff]  ;;  %v1091_v37 = vld [vmem:[#allocation2 + $0x38] sm:$0xff]  ;;  %v1159_v42 = vsel %vm22_vm0, %v1090_v26, 0.0 }
 0x139   :  { %1026 = vst.msk [vmem:[#allocation2 + $0x48] sm:$0xff] %vm22_vm0, %v961_v30  ;;  %1058 = vst.msk [vmem:[#allocation2 + $0x148] sm:$0xff] %vm22_vm0, %v993_v33  ;;  %v1352_v30 = vadd.f32 %v1351_v20, %v1350_v16  ;;  %v1156_v31 = vadd.f32 %v1155_v21, %v1154_v25  ;;  %v133_v33 = vld [vmem:[#allocation2 + $0x170] sm:$0xff]  ;;  %v1161_v60 = vsel %vm22_vm0, %v1091_v37, 0.0 }
 0x13c   :  { %v737_v39 = vpop.f32.mrb[20].mxu0  ;;  %v865_v41 = vpop.f32.mrb[20].mxu1 }
 0x13d   :  { %v962_v43 = vadd.f32 %v737_v39, %v97_v35  ;;  %v739_v44 = vpop.f32.mrb[21].mxu0  ;;  %v994_v45 = vadd.f32 %v865_v41, %v129_v36  ;;  %v867_v46 = vpop.f32.mrb[21].mxu1  ;;  %v1288_v35 = vmul.f32 %v1090_v26, %v1090_v26  ;;  %v1354_v36 = vadd.f32 %v1353_v28, %v1352_v30  ;;  %v102_v39 = vld [vmem:[#allocation2 + $0x78] sm:$0xff] }
 0x13e   :  { %v740_v48 = vpop.f32.mrb[22].mxu0  ;;  %v868_v49 = vpop.f32.mrb[22].mxu1  ;;  %v1355_v41 = vsel %vm22_vm0, %v1287_v29, 0.0 }
 0x13f   :  { %1027 = vst.msk [vmem:[#allocation2 + $0x50] sm:$0xff] %vm22_vm0, %v962_v43  ;;  %v963_v53 = vadd.f32 %v740_v48, %v98_v40  ;;  %v742_v54 = vpop.f32.mrb[23].mxu0  ;;  %1059 = vst.msk [vmem:[#allocation2 + $0x150] sm:$0xff] %vm22_vm0, %v994_v45  ;;  %v870_v55 = vpop.f32.mrb[23].mxu1  ;;  %v995_v57 = vadd.f32 %v868_v49, %v130_v47  ;;  %v134_v47 = vld [vmem:[#allocation2 + $0x178] sm:$0xff]  ;;  %v1158_v48 = vadd.f32 %v1157_v34, %v1156_v31  ;;  %v1092_v49 = vld [vmem:[#allocation2 + $0x40] sm:$0xff] }
 0x140   :  { %v1357_v52 = vsel %vm22_vm0, %v1288_v35, 0.0  ;;  %v1290_v61 = vmul.f32 %v1092_v49, %v1092_v49  ;;  %v1163_v3 = vsel %vm22_vm0, %v1092_v49, 0.0 }
 0x141   :  { %1028 = vst.msk [vmem:[#allocation2 + $0x58] sm:$0xff] %vm22_vm0, %v963_v53  ;;  %1060 = vst.msk [vmem:[#allocation2 + $0x158] sm:$0xff] %vm22_vm0, %v995_v57  ;;  %v1289_v53 = vmul.f32 %v1091_v37, %v1091_v37  ;;  %v1356_v57 = vadd.f32 %v1355_v41, %v1354_v36  ;;  %v1160_v58 = vadd.f32 %v1159_v42, %v1158_v48 }
 0x142   :  { %v1361_v9 = vsel %vm22_vm0, %v1290_v61, 0.0 }
 0x143   :  { %v1358_v62 = vadd.f32 %v1357_v52, %v1356_v57  ;;  %v1359_v2 = vsel %vm22_vm0, %v1289_v53, 0.0  ;;  %v1162_v4 = vadd.f32 %v1161_v60, %v1160_v58 }
 0x144   :  { %v745_v6 = vpop.f32.mrb[24].mxu0  ;;  %v873_v8 = vpop.f32.mrb[24].mxu1 }
 0x145   :  { %v964_v11 = vadd.f32 %v745_v6, %v99_v63  ;;  %v747_v12 = vpop.f32.mrb[25].mxu0  ;;  %v996_v13 = vadd.f32 %v873_v8, %v131_v0  ;;  %v875_v14 = vpop.f32.mrb[25].mxu1  ;;  %v1093_v63 = vld [vmem:[#allocation2 + $0x48] sm:$0xff]  ;;  %v103_v0 = vld [vmem:[#allocation2 + $0x80] sm:$0xff]  ;;  %v1360_v16 = vadd.f32 %v1359_v2, %v1358_v62  ;;  %v1164_v17 = vadd.f32 %v1163_v3, %v1162_v4 }
 0x146   :  { %v748_v18 = vpop.f32.mrb[26].mxu0  ;;  %v876_v19 = vpop.f32.mrb[26].mxu1  ;;  %v1094_v5 = vld [vmem:[#allocation2 + $0x50] sm:$0xff]  ;;  %v1291_v10 = vmul.f32 %v1093_v63, %v1093_v63  ;;  %v1165_v20 = vsel %vm22_vm0, %v1093_v63, 0.0 }
 0x147   :  { %1029 = vst.msk [vmem:[#allocation2 + $0x60] sm:$0xff] %vm22_vm0, %v964_v11  ;;  %v965_v22 = vadd.f32 %v748_v18, %v100_v7  ;;  %v750_v23 = vpop.f32.mrb[27].mxu0  ;;  %1061 = vst.msk [vmem:[#allocation2 + $0x160] sm:$0xff] %vm22_vm0, %v996_v13  ;;  %v878_v24 = vpop.f32.mrb[27].mxu1  ;;  %v997_v27 = vadd.f32 %v876_v19, %v132_v15  ;;  %v104_v7 = vld [vmem:[#allocation2 + $0x88] sm:$0xff]  ;;  %v1292_v21 = vmul.f32 %v1094_v5, %v1094_v5  ;;  %v1167_v29 = vsel %vm22_vm0, %v1094_v5, 0.0 }
 0x148   :  { %v136_v15 = vld [vmem:[#allocation2 + $0x188] sm:$0xff]  ;;  %v1362_v25 = vadd.f32 %v1361_v9, %v1360_v16  ;;  %v2556_v26 = vld [vmem:[#allocation2 + $0x58] sm:$0xff]  ;;  %v1363_v28 = vsel %vm22_vm0, %v1291_v10, 0.0  ;;  %v1166_v30 = vadd.f32 %v1165_v20, %v1164_v17 }
 0x149   :  { %1030 = vst.msk [vmem:[#allocation2 + $0x68] sm:$0xff] %vm22_vm0, %v965_v22  ;;  %1062 = vst.msk [vmem:[#allocation2 + $0x168] sm:$0xff] %vm22_vm0, %v997_v27  ;;  %v1365_v34 = vsel %vm22_vm0, %v1292_v21, 0.0  ;;  %v1293_v35 = vmul.f32 %v2556_v26, %v2556_v26  ;;  %v1169_v41 = vsel %vm22_vm0, %v2556_v26, 0.0 }
 0x14a   :  { %v1364_v36 = vadd.f32 %v1363_v28, %v1362_v25  ;;  %v1168_v37 = vadd.f32 %v1167_v29, %v1166_v30 }
 0x14b   :  { %v1367_v52 = vsel %vm22_vm0, %v1293_v35, 0.0  ;;  %v141_v35 = vld [vmem:[#allocation2 + $0x1b0] sm:$0xff] }
 0x14c   :  { %v753_v38 = vpop.f32.mrb[28].mxu0  ;;  %v881_v40 = vpop.f32.mrb[28].mxu1  ;;  %v1366_v48 = vadd.f32 %v1365_v34, %v1364_v36  ;;  %v1170_v57 = vadd.f32 %v1169_v41, %v1168_v37  ;;  %v109_v34 = vld [vmem:[#allocation2 + $0xb0] sm:$0xff]  ;;  %v110_v41 = vld [vmem:[#allocation2 + $0xb8] sm:$0xff] }
 0x14d   :  { %v966_v43 = vadd.f32 %v753_v38, %v101_v32  ;;  %v755_v44 = vpop.f32.mrb[29].mxu0  ;;  %v998_v45 = vadd.f32 %v881_v40, %v133_v33  ;;  %v883_v46 = vpop.f32.mrb[29].mxu1  ;;  %v105_v32 = vld [vmem:[#allocation2 + $0x90] sm:$0xff] }
 0x14e   :  { %v756_v50 = vpop.f32.mrb[30].mxu0  ;;  %v884_v51 = vpop.f32.mrb[30].mxu1  ;;  %v2561_v31 = vld [vmem:[#allocation2 + $0x60] sm:$0xff]  ;;  %v137_v33 = vld [vmem:[#allocation2 + $0x190] sm:$0xff]  ;;  %v1368_v62 = vadd.f32 %v1367_v52, %v1366_v48 }
 0x14f   :  { %1031 = vst.msk [vmem:[#allocation2 + $0x70] sm:$0xff] %vm22_vm0, %v966_v43  ;;  %v967_v54 = vadd.f32 %v756_v50, %v102_v39  ;;  %v758_v55 = vpop.f32.mrb[31].mxu0  ;;  %1063 = vst.msk [vmem:[#allocation2 + $0x170] sm:$0xff] %vm22_vm0, %v998_v45  ;;  %v886_v56 = vpop.f32.mrb[31].mxu1  ;;  %v999_v59 = vadd.f32 %v884_v51, %v134_v47  ;;  %v106_v39 = vld [vmem:[#allocation2 + $0x98] sm:$0xff]  ;;  %v1294_v42 = vmul.f32 %v2561_v31, %v2561_v31  ;;  %v1171_v53 = vsel %vm22_vm0, %v2561_v31, 0.0 }
 0x150   :  { %v138_v47 = vld [vmem:[#allocation2 + $0x198] sm:$0xff]  ;;  %v2571_v49 = vld [vmem:[#allocation2 + $0x68] sm:$0xff]  ;;  %v1172_v63 = vadd.f32 %v1171_v53, %v1170_v57 }
 0x151   :  { %1032 = vst.msk [vmem:[#allocation2 + $0x78] sm:$0xff] %vm22_vm0, %v967_v54  ;;  %1064 = vst.msk [vmem:[#allocation2 + $0x178] sm:$0xff] %vm22_vm0, %v999_v59  ;;  %v1369_v60 = vsel %vm22_vm0, %v1294_v42, 0.0  ;;  %v1295_v61 = vmul.f32 %v2571_v49, %v2571_v49  ;;  %v1173_v2 = vsel %vm22_vm0, %v2571_v49, 0.0 }
 0x152   :  { %v1370_v4 = vadd.f32 %v1369_v60, %v1368_v62  ;;  %v1174_v16 = vadd.f32 %v1173_v2, %v1172_v63 }
 0x153   :  { %v1371_v9 = vsel %vm22_vm0, %v1295_v61, 0.0 }
 0x154   :  { %v761_v6 = vpop.f32.mrb[32].mxu0  ;;  %v889_v8 = vpop.f32.mrb[32].mxu1  ;;  %v1372_v25 = vadd.f32 %v1371_v9, %v1370_v4  ;;  %v111_v4 = vld [vmem:[#allocation2 + $0xc0] sm:$0xff] }
 0x155   :  { %v968_v11 = vadd.f32 %v761_v6, %v103_v0  ;;  %v763_v12 = vpop.f32.mrb[33].mxu0  ;;  %v1000_v13 = vadd.f32 %v889_v8, %v135_v1  ;;  %v891_v14 = vpop.f32.mrb[33].mxu1  ;;  %v107_v0 = vld [vmem:[#allocation2 + $0xa0] sm:$0xff] }
 0x156   :  { %v764_v18 = vpop.f32.mrb[34].mxu0  ;;  %v892_v19 = vpop.f32.mrb[34].mxu1  ;;  %v2578_v58 = vld [vmem:[#allocation2 + $0x70] sm:$0xff]  ;;  %v139_v1 = vld [vmem:[#allocation2 + $0x1a0] sm:$0xff] }
 0x157   :  { %1033 = vst.msk [vmem:[#allocation2 + $0x80] sm:$0xff] %vm22_vm0, %v968_v11  ;;  %v969_v22 = vadd.f32 %v764_v18, %v104_v7  ;;  %v766_v23 = vpop.f32.mrb[35].mxu0  ;;  %1065 = vst.msk [vmem:[#allocation2 + $0x180] sm:$0xff] %vm22_vm0, %v1000_v13  ;;  %v894_v24 = vpop.f32.mrb[35].mxu1  ;;  %v1001_v27 = vadd.f32 %v892_v19, %v136_v15  ;;  %v1296_v3 = vmul.f32 %v2578_v58, %v2578_v58  ;;  %v108_v7 = vld [vmem:[#allocation2 + $0xa8] sm:$0xff]  ;;  %v1175_v10 = vsel %vm22_vm0, %v2578_v58, 0.0 }
 0x158   :  { %v2589_v5 = vld [vmem:[#allocation2 + $0x78] sm:$0xff]  ;;  %v140_v15 = vld [vmem:[#allocation2 + $0x1a8] sm:$0xff] }
 0x159   :  { %1034 = vst.msk [vmem:[#allocation2 + $0x88] sm:$0xff] %vm22_vm0, %v969_v22  ;;  %1066 = vst.msk [vmem:[#allocation2 + $0x188] sm:$0xff] %vm22_vm0, %v1001_v27  ;;  %v1373_v20 = vsel %vm22_vm0, %v1296_v3, 0.0  ;;  %v1297_v21 = vmul.f32 %v2589_v5, %v2589_v5  ;;  %v1176_v27 = vadd.f32 %v1175_v10, %v1174_v16  ;;  %v1177_v29 = vsel %vm22_vm0, %v2589_v5, 0.0 }
 0x15b   :  { %v1375_v36 = vsel %vm22_vm0, %v1297_v21, 0.0  ;;  %v144_v21 = vld [vmem:[#allocation2 + $0x1c8] sm:$0xff] }
 0x15c   :  { %v769_v38 = vpop.f32.mrb[36].mxu0  ;;  %v897_v40 = vpop.f32.mrb[36].mxu1 }
 0x15d   :  { %v970_v43 = vadd.f32 %v769_v38, %v105_v32  ;;  %v771_v44 = vpop.f32.mrb[37].mxu0  ;;  %v1002_v45 = vadd.f32 %v897_v40, %v137_v33  ;;  %v899_v46 = vpop.f32.mrb[37].mxu1  ;;  %v1374_v32 = vadd.f32 %v1373_v20, %v1372_v25  ;;  %v1178_v38 = vadd.f32 %v1177_v29, %v1176_v27 }
 0x15e   :  { %v772_v50 = vpop.f32.mrb[38].mxu0  ;;  %v900_v51 = vpop.f32.mrb[38].mxu1  ;;  %v2594_v17 = vld [vmem:[#allocation2 + $0x80] sm:$0xff] }
 0x15f   :  { %1035 = vst.msk [vmem:[#allocation2 + $0x90] sm:$0xff] %vm22_vm0, %v970_v43  ;;  %v971_v54 = vadd.f32 %v772_v50, %v106_v39  ;;  %v774_v55 = vpop.f32.mrb[39].mxu0  ;;  %1067 = vst.msk [vmem:[#allocation2 + $0x190] sm:$0xff] %vm22_vm0, %v1002_v45  ;;  %v902_v56 = vpop.f32.mrb[39].mxu1  ;;  %v1003_v59 = vadd.f32 %v900_v51, %v138_v47  ;;  %v1298_v30 = vmul.f32 %v2594_v17, %v2594_v17  ;;  %v1179_v37 = vsel %vm22_vm0, %v2594_v17, 0.0  ;;  %v142_v50 = vld [vmem:[#allocation2 + $0x1b8] sm:$0xff] }
 0x160   :  { %v2606_v33 = vld [vmem:[#allocation2 + $0x88] sm:$0xff]  ;;  %v1376_v51 = vadd.f32 %v1375_v36, %v1374_v32  ;;  %v1180_v52 = vadd.f32 %v1179_v37, %v1178_v38 }
 0x161   :  { %1036 = vst.msk [vmem:[#allocation2 + $0x98] sm:$0xff] %vm22_vm0, %v971_v54  ;;  %1068 = vst.msk [vmem:[#allocation2 + $0x198] sm:$0xff] %vm22_vm0, %v1003_v59  ;;  %v1377_v43 = vsel %vm22_vm0, %v1298_v30, 0.0  ;;  %v1299_v44 = vmul.f32 %v2606_v33, %v2606_v33  ;;  %v1181_v55 = vsel %vm22_vm0, %v2606_v33, 0.0 }
 0x162   :  { %v1378_v61 = vadd.f32 %v1377_v43, %v1376_v51  ;;  %v1182_v2 = vadd.f32 %v1181_v55, %v1180_v52  ;;  %v145_v43 = vld [vmem:[#allocation2 + $0x1d0] sm:$0xff] }
 0x164   :  { %v777_v6 = vpop.f32.mrb[40].mxu0  ;;  %v905_v8 = vpop.f32.mrb[40].mxu1 }
 0x165   :  { %v972_v11 = vadd.f32 %v777_v6, %v107_v0  ;;  %v779_v12 = vpop.f32.mrb[41].mxu0  ;;  %v1004_v13 = vadd.f32 %v905_v8, %v139_v1  ;;  %v907_v14 = vpop.f32.mrb[41].mxu1  ;;  %v1379_v0 = vsel %vm22_vm0, %v1299_v44, 0.0  ;;  %v143_v6 = vld [vmem:[#allocation2 + $0x1c0] sm:$0xff] }
 0x166   :  { %v780_v18 = vpop.f32.mrb[42].mxu0  ;;  %v908_v19 = vpop.f32.mrb[42].mxu1  ;;  %v2612_v39 = vld [vmem:[#allocation2 + $0x90] sm:$0xff]  ;;  %v1380_v9 = vadd.f32 %v1379_v0, %v1378_v61  ;;  %v112_v12 = vld [vmem:[#allocation2 + $0xc8] sm:$0xff] }
 0x167   :  { %1037 = vst.msk [vmem:[#allocation2 + $0xa0] sm:$0xff] %vm22_vm0, %v972_v11  ;;  %v973_v22 = vadd.f32 %v780_v18, %v108_v7  ;;  %v782_v23 = vpop.f32.mrb[43].mxu0  ;;  %1069 = vst.msk [vmem:[#allocation2 + $0x1a0] sm:$0xff] %vm22_vm0, %v1004_v13  ;;  %v910_v24 = vpop.f32.mrb[43].mxu1  ;;  %v1005_v28 = vadd.f32 %v908_v19, %v140_v15  ;;  %v1300_v56 = vmul.f32 %v2612_v39, %v2612_v39  ;;  %v1183_v1 = vsel %vm22_vm0, %v2612_v39, 0.0 }
 0x168   :  { %v2623_v62 = vld [vmem:[#allocation2 + $0x98] sm:$0xff]  ;;  %v1184_v10 = vadd.f32 %v1183_v1, %v1182_v2 }
 0x169   :  { %1038 = vst.msk [vmem:[#allocation2 + $0xa8] sm:$0xff] %vm22_vm0, %v973_v22  ;;  %1070 = vst.msk [vmem:[#allocation2 + $0x1a8] sm:$0xff] %vm22_vm0, %v1005_v28  ;;  %v1381_v7 = vsel %vm22_vm0, %v1300_v56, 0.0  ;;  %v1301_v8 = vmul.f32 %v2623_v62, %v2623_v62  ;;  %v1185_v14 = vsel %vm22_vm0, %v2623_v62, 0.0 }
 0x16a   :  { %v1382_v22 = vadd.f32 %v1381_v7, %v1380_v9 }
 0x16b   :  { %v1383_v27 = vsel %vm22_vm0, %v1301_v8, 0.0 }
 0x16c   :  { %v785_v40 = vpop.f32.mrb[44].mxu0  ;;  %v913_v42 = vpop.f32.mrb[44].mxu1 }
 0x16d   :  { %v974_v45 = vadd.f32 %v785_v40, %v109_v34  ;;  %v787_v46 = vpop.f32.mrb[45].mxu0  ;;  %v1006_v47 = vadd.f32 %v913_v42, %v141_v35  ;;  %v915_v48 = vpop.f32.mrb[45].mxu1  ;;  %v1186_v34 = vadd.f32 %v1185_v14, %v1184_v10  ;;  %v1384_v40 = vadd.f32 %v1383_v27, %v1382_v22  ;;  %v113_v42 = vld [vmem:[#allocation2 + $0xd0] sm:$0xff]  ;;  %v116_v22 = vld [vmem:[#allocation2 + $0xe8] sm:$0xff] }
 0x16e   :  { %v788_v53 = vpop.f32.mrb[46].mxu0  ;;  %v916_v54 = vpop.f32.mrb[46].mxu1  ;;  %v2629_v3 = vld [vmem:[#allocation2 + $0xa0] sm:$0xff] }
 0x16f   :  { %1039 = vst.msk [vmem:[#allocation2 + $0xb0] sm:$0xff] %vm22_vm0, %v974_v45  ;;  %v975_v57 = vadd.f32 %v788_v53, %v110_v41  ;;  %v790_v59 = vpop.f32.mrb[47].mxu0  ;;  %1071 = vst.msk [vmem:[#allocation2 + $0x1b0] sm:$0xff] %vm22_vm0, %v1006_v47  ;;  %v918_v60 = vpop.f32.mrb[47].mxu1  ;;  %v1007_v63 = vadd.f32 %v916_v54, %v142_v50  ;;  %v1302_v15 = vmul.f32 %v2629_v3, %v2629_v3  ;;  %v1187_v28 = vsel %vm22_vm0, %v2629_v3, 0.0  ;;  %v114_v50 = vld [vmem:[#allocation2 + $0xd8] sm:$0xff] }
 0x170   :  { %v2639_v23 = vld [vmem:[#allocation2 + $0xa8] sm:$0xff]  ;;  %v1188_v41 = vadd.f32 %v1187_v28, %v1186_v34  ;;  %v146_v59 = vld [vmem:[#allocation2 + $0x1d8] sm:$0xff] }
 0x171   :  { %1040 = vst.msk [vmem:[#allocation2 + $0xb8] sm:$0xff] %vm22_vm0, %v975_v57  ;;  %1072 = vst.msk [vmem:[#allocation2 + $0x1b8] sm:$0xff] %vm22_vm0, %v1007_v63  ;;  %v1385_v37 = vsel %vm22_vm0, %v1302_v15, 0.0  ;;  %v1303_v38 = vmul.f32 %v2639_v23, %v2639_v23  ;;  %v1189_v44 = vsel %vm22_vm0, %v2639_v23, 0.0  ;;  %v115_v15 = vld [vmem:[#allocation2 + $0xe0] sm:$0xff]  ;;  %v148_v34 = vld [vmem:[#allocation2 + $0x1e8] sm:$0xff] }
 0x172   :  { %v1386_v46 = vadd.f32 %v1385_v37, %v1384_v40  ;;  %v1190_v60 = vadd.f32 %v1189_v44, %v1188_v41 }
 0x173   :  { %v1387_v52 = vsel %vm22_vm0, %v1303_v38, 0.0 }
 0x174   :  { %v793_v11 = vpop.f32.mrb[48].mxu0  ;;  %v921_v13 = vpop.f32.mrb[48].mxu1  ;;  %v1388_v8 = vadd.f32 %v1387_v52, %v1386_v46 }
 0x175   :  { %v976_v16 = vadd.f32 %v793_v11, %v111_v4  ;;  %v795_v18 = vpop.f32.mrb[49].mxu0  ;;  %v1008_v19 = vadd.f32 %v921_v13, %v143_v6  ;;  %v923_v20 = vpop.f32.mrb[49].mxu1 }
 0x176   :  { %v796_v24 = vpop.f32.mrb[50].mxu0  ;;  %v924_v25 = vpop.f32.mrb[50].mxu1  ;;  %v2646_v35 = vld [vmem:[#allocation2 + $0xb0] sm:$0xff] }
 0x177   :  { %1041 = vst.msk [vmem:[#allocation2 + $0xc0] sm:$0xff] %vm22_vm0, %v976_v16  ;;  %v977_v29 = vadd.f32 %v796_v24, %v112_v12  ;;  %v798_v30 = vpop.f32.mrb[51].mxu0  ;;  %1073 = vst.msk [vmem:[#allocation2 + $0x1c0] sm:$0xff] %vm22_vm0, %v1008_v19  ;;  %v926_v32 = vpop.f32.mrb[51].mxu1  ;;  %v1009_v36 = vadd.f32 %v924_v25, %v144_v21  ;;  %v1304_v45 = vmul.f32 %v2646_v35, %v2646_v35  ;;  %v1191_v53 = vsel %vm22_vm0, %v2646_v35, 0.0  ;;  %v147_v16 = vld [vmem:[#allocation2 + $0x1e0] sm:$0xff] }
 0x178   :  { %v2657_v47 = vld [vmem:[#allocation2 + $0xb8] sm:$0xff]  ;;  %v1192_v9 = vadd.f32 %v1191_v53, %v1190_v60 }
 0x179   :  { %1042 = vst.msk [vmem:[#allocation2 + $0xc8] sm:$0xff] %vm22_vm0, %v977_v29  ;;  %1074 = vst.msk [vmem:[#allocation2 + $0x1c8] sm:$0xff] %vm22_vm0, %v1009_v36  ;;  %v1389_v1 = vsel %vm22_vm0, %v1304_v45, 0.0  ;;  %v1305_v2 = vmul.f32 %v2657_v47, %v2657_v47  ;;  %v1193_v11 = vsel %vm22_vm0, %v2657_v47, 0.0 }
 0x17a   :  { %v1390_v13 = vadd.f32 %v1389_v1, %v1388_v8  ;;  %v1194_v20 = vadd.f32 %v1193_v11, %v1192_v9  ;;  %v118_v1 = vld [vmem:[#allocation2 + $0xf8] sm:$0xff] }
 0x17b   :  { %v1391_v18 = vsel %vm22_vm0, %v1305_v2, 0.0 }
 0x17c   :  { %v801_v48 = vpop.f32.mrb[52].mxu0  ;;  %v929_v51 = vpop.f32.mrb[52].mxu1  ;;  %v1392_v36 = vadd.f32 %v1391_v18, %v1390_v13 }
 0x17d   :  { %v978_v54 = vadd.f32 %v801_v48, %v113_v42  ;;  %v803_v55 = vpop.f32.mrb[53].mxu0  ;;  %v1010_v56 = vadd.f32 %v929_v51, %v145_v43  ;;  %v931_v57 = vpop.f32.mrb[53].mxu1 }
 0x17e   :  { %v2662_v61 = vld [vmem:[#allocation2 + $0xc0] sm:$0xff]  ;;  %v804_v63 = vpop.f32.mrb[54].mxu0  ;;  %v932_v0 = vpop.f32.mrb[54].mxu1  ;;  %v117_v55 = vld [vmem:[#allocation2 + $0xf0] sm:$0xff] }
 0x17f   :  { %1043 = vst.msk [vmem:[#allocation2 + $0xd0] sm:$0xff] %vm22_vm0, %v978_v54  ;;  %v979_v4 = vadd.f32 %v804_v63, %v114_v50  ;;  %v806_v6 = vpop.f32.mrb[55].mxu0  ;;  %1075 = vst.msk [vmem:[#allocation2 + $0x1d0] sm:$0xff] %vm22_vm0, %v1010_v56  ;;  %v934_v7 = vpop.f32.mrb[55].mxu1  ;;  %v1011_v10 = vadd.f32 %v932_v0, %v146_v59  ;;  %v1306_v12 = vmul.f32 %v2662_v61, %v2662_v61  ;;  %v1195_v19 = vsel %vm22_vm0, %v2662_v61, 0.0  ;;  %v149_v56 = vld [vmem:[#allocation2 + $0x1f0] sm:$0xff] }
 0x180   :  { %v2674_v14 = vld [vmem:[#allocation2 + $0xc8] sm:$0xff]  ;;  %v1196_v37 = vadd.f32 %v1195_v19, %v1194_v20 }
 0x181   :  { %1044 = vst.msk [vmem:[#allocation2 + $0xd8] sm:$0xff] %vm22_vm0, %v979_v4  ;;  %1076 = vst.msk [vmem:[#allocation2 + $0x1d8] sm:$0xff] %vm22_vm0, %v1011_v10  ;;  %v1393_v25 = vsel %vm22_vm0, %v1306_v12, 0.0  ;;  %v1307_v27 = vmul.f32 %v2674_v14, %v2674_v14  ;;  %v1197_v42 = vsel %vm22_vm0, %v2674_v14, 0.0  ;;  %v150_v10 = vld [vmem:[#allocation2 + $0x1f8] sm:$0xff] }
 0x182   :  { %v1394_v48 = vadd.f32 %v1393_v25, %v1392_v36  ;;  %v1198_v54 = vadd.f32 %v1197_v42, %v1196_v37 }
 0x183   :  { %v1395_v52 = vsel %vm22_vm0, %v1307_v27, 0.0 }
 0x184   :  { %v809_v21 = vpop.f32.mrb[56].mxu0  ;;  %v937_v24 = vpop.f32.mrb[56].mxu1  ;;  %v1396_v60 = vadd.f32 %v1395_v52, %v1394_v48 }
 0x185   :  { %v980_v28 = vadd.f32 %v809_v21, %v115_v15  ;;  %v811_v29 = vpop.f32.mrb[57].mxu0  ;;  %v1012_v30 = vadd.f32 %v937_v24, %v147_v16  ;;  %v939_v32 = vpop.f32.mrb[57].mxu1 }
 0x186   :  { %v2683_v38 = vld [vmem:[#allocation2 + $0xd0] sm:$0xff]  ;;  %v812_v40 = vpop.f32.mrb[58].mxu0  ;;  %v940_v41 = vpop.f32.mrb[58].mxu1 }
 0x187   :  { %v1308_v43 = vmul.f32 %v2683_v38, %v2683_v38  ;;  %1045 = vst.msk [vmem:[#allocation2 + $0xe0] sm:$0xff] %vm22_vm0, %v980_v28  ;;  %v981_v44 = vadd.f32 %v812_v40, %v116_v22  ;;  %v814_v45 = vpop.f32.mrb[59].mxu0  ;;  %1077 = vst.msk [vmem:[#allocation2 + $0x1e0] sm:$0xff] %vm22_vm0, %v1012_v30  ;;  %v942_v46 = vpop.f32.mrb[59].mxu1  ;;  %v1013_v51 = vadd.f32 %v940_v41, %v148_v34  ;;  %v1199_v53 = vsel %vm22_vm0, %v2683_v38, 0.0  ;;  %v2722_v40 = vld [vmem:[#allocation2 + $0x100] sm:$0xff] }
 0x188   :  { %v2691_v50 = vld [vmem:[#allocation2 + $0xd8] sm:$0xff]  ;;  %v1200_v63 = vadd.f32 %v1199_v53, %v1198_v54  ;;  %v2730_v45 = vld [vmem:[#allocation2 + $0x108] sm:$0xff]  ;;  %v1314_v52 = vmul.f32 %v2722_v40, %v2722_v40 }
 0x189   :  { %1046 = vst.msk [vmem:[#allocation2 + $0xe8] sm:$0xff] %vm22_vm0, %v981_v44  ;;  %1078 = vst.msk [vmem:[#allocation2 + $0x1e8] sm:$0xff] %vm22_vm0, %v1013_v51  ;;  %v1397_v57 = vsel %vm22_vm0, %v1308_v43, 0.0  ;;  %v1309_v59 = vmul.f32 %v2691_v50, %v2691_v50  ;;  %v1201_v4 = vsel %vm22_vm0, %v2691_v50, 0.0 }
 0x18a   :  { %v1398_v11 = vadd.f32 %v1397_v57, %v1396_v60  ;;  %v1202_v24 = vadd.f32 %v1201_v4, %v1200_v63  ;;  %v1211_v60 = vsel %vm22_vm0, %v2722_v40, 0.0  ;;  %v1315_v63 = vmul.f32 %v2730_v45, %v2730_v45 }
 0x18b   :  { %v1399_v16 = vsel %vm22_vm0, %v1309_v59, 0.0 }
 0x18c   :  { %v817_v0 = vpop.f32.mrb[60].mxu0  ;;  %v945_v2 = vpop.f32.mrb[60].mxu1  ;;  %v1400_v30 = vadd.f32 %v1399_v16, %v1398_v11 }
 0x18d   :  { %v982_v6 = vadd.f32 %v817_v0, %v117_v55  ;;  %v819_v7 = vpop.f32.mrb[61].mxu0  ;;  %v1014_v8 = vadd.f32 %v945_v2, %v149_v56  ;;  %v947_v9 = vpop.f32.mrb[61].mxu1  ;;  %v2741_v56 = vld [vmem:[#allocation2 + $0x110] sm:$0xff] }
 0x18e   :  { %v2703_v12 = vld [vmem:[#allocation2 + $0xe0] sm:$0xff]  ;;  %v820_v13 = vpop.f32.mrb[62].mxu0  ;;  %v948_v15 = vpop.f32.mrb[62].mxu1  ;;  %v1213_v7 = vsel %vm22_vm0, %v2730_v45, 0.0 }
 0x18f   :  { %v1203_v18 = vsel %vm22_vm0, %v2703_v12, 0.0  ;;  %v1310_v19 = vmul.f32 %v2703_v12, %v2703_v12  ;;  %1047 = vst.msk [vmem:[#allocation2 + $0xf0] sm:$0xff] %vm22_vm0, %v982_v6  ;;  %v983_v20 = vadd.f32 %v820_v13, %v118_v1  ;;  %v822_v21 = vpop.f32.mrb[63].mxu0  ;;  %1079 = vst.msk [vmem:[#allocation2 + $0x1f0] sm:$0xff] %vm22_vm0, %v1014_v8  ;;  %v950_v22 = vpop.f32.mrb[63].mxu1  ;;  %v1015_v27 = vadd.f32 %v948_v15, %v150_v10  ;;  %v2748_v1 = vld [vmem:[#allocation2 + $0x118] sm:$0xff] }
 0x190   :  { %v2712_v25 = vld [vmem:[#allocation2 + $0xe8] sm:$0xff]  ;;  %v1204_v32 = vadd.f32 %v1203_v18, %v1202_v24  ;;  %v1409_v6 = vsel %vm22_vm0, %v1314_v52, 0.0  ;;  %v1316_v8 = vmul.f32 %v2741_v56, %v2741_v56  ;;  %v2755_v9 = vld [vmem:[#allocation2 + $0x120] sm:$0xff]  ;;  %v1411_v13 = vsel %vm22_vm0, %v1315_v63, 0.0 }
 0x191   :  { %v1401_v28 = vsel %vm22_vm0, %v1310_v19, 0.0  ;;  %v1311_v29 = vmul.f32 %v2712_v25, %v2712_v25  ;;  %1048 = vst.msk [vmem:[#allocation2 + $0xf8] sm:$0xff] %vm22_vm0, %v983_v20  ;;  %1080 = vst.msk [vmem:[#allocation2 + $0x1f8] sm:$0xff] %vm22_vm0, %v1015_v27  ;;  %v1205_v34 = vsel %vm22_vm0, %v2712_v25, 0.0  ;;  %v1215_v15 = vsel %vm22_vm0, %v2741_v56, 0.0  ;;  %v2762_v18 = vld [vmem:[#allocation2 + $0x128] sm:$0xff] }
 0x192   :  { %v1402_v36 = vadd.f32 %v1401_v28, %v1400_v30  ;;  %v1206_v41 = vadd.f32 %v1205_v34, %v1204_v32  ;;  %v1317_v16 = vmul.f32 %v2748_v1, %v2748_v1  ;;  %v1413_v21 = vsel %vm22_vm0, %v1316_v8, 0.0  ;;  %v2769_v27 = vld [vmem:[#allocation2 + $0x130] sm:$0xff] }
 0x193   :  { %v1403_v37 = vsel %vm22_vm0, %v1311_v29, 0.0  ;;  %v1217_v22 = vsel %vm22_vm0, %v2748_v1, 0.0  ;;  %v1318_v24 = vmul.f32 %v2755_v9, %v2755_v9  ;;  %v1219_v32 = vsel %vm22_vm0, %v2755_v9, 0.0 }
 0x194   :  { %v1404_v46 = vadd.f32 %v1403_v37, %v1402_v36  ;;  %v1415_v30 = vsel %vm22_vm0, %v1317_v16, 0.0  ;;  %v1319_v34 = vmul.f32 %v2762_v18, %v2762_v18  ;;  %v2776_v36 = vld [vmem:[#allocation2 + $0x138] sm:$0xff] }
 0x196   :  { %v2724_v42 = vld [vmem:[#allocation2 + $0xf0] sm:$0xff] }
 0x197   :  { %v1207_v43 = vsel %vm22_vm0, %v2724_v42, 0.0  ;;  %v1312_v44 = vmul.f32 %v2724_v42, %v2724_v42 }
 0x198   :  { %v1208_v48 = vadd.f32 %v1207_v43, %v1206_v41  ;;  %v2732_v51 = vld [vmem:[#allocation2 + $0xf8] sm:$0xff]  ;;  %v1417_v43 = vsel %vm22_vm0, %v1318_v24, 0.0  ;;  %v2811_v24 = vld [vmem:[#allocation2 + $0x160] sm:$0xff] }
 0x199   :  { %v1405_v53 = vsel %vm22_vm0, %v1312_v44, 0.0  ;;  %v1209_v54 = vsel %vm22_vm0, %v2732_v51, 0.0  ;;  %v1313_v55 = vmul.f32 %v2732_v51, %v2732_v51  ;;  %v1221_v44 = vsel %vm22_vm0, %v2762_v18, 0.0  ;;  %4125 = vst [vmem:[#allocation3_spill] sm:$0xff] %v2811_v24 }
 0x19a   :  { %v1406_v57 = vadd.f32 %v1405_v53, %v1404_v46  ;;  %v1210_v59 = vadd.f32 %v1209_v54, %v1208_v48  ;;  %v1320_v46 = vmul.f32 %v2769_v27, %v2769_v27  ;;  %v2783_v48 = vld [vmem:[#allocation2 + $0x140] sm:$0xff]  ;;  %v1419_v54 = vsel %vm22_vm0, %v1319_v34, 0.0 }
 0x19b   :  { %v1407_v0 = vsel %vm22_vm0, %v1313_v55, 0.0  ;;  %v1223_v55 = vsel %vm22_vm0, %v2769_v27, 0.0 }
 0x19c   :  { %v1212_v2 = vadd.f32 %v1211_v60, %v1210_v59  ;;  %v1408_v4 = vadd.f32 %v1407_v0, %v1406_v57  ;;  %v1321_v57 = vmul.f32 %v2776_v36, %v2776_v36  ;;  %v2790_v59 = vld [vmem:[#allocation2 + $0x148] sm:$0xff]  ;;  %v1421_v0 = vsel %vm22_vm0, %v1320_v46, 0.0 }
 0x19e   :  { %v1214_v10 = vadd.f32 %v1213_v7, %v1212_v2  ;;  %v1410_v11 = vadd.f32 %v1409_v6, %v1408_v4  ;;  %v1225_v2 = vsel %vm22_vm0, %v2776_v36, 0.0  ;;  %v1322_v4 = vmul.f32 %v2783_v48, %v2783_v48  ;;  %v2797_v6 = vld [vmem:[#allocation2 + $0x150] sm:$0xff] }
 0x1a0   :  { %v1216_v19 = vadd.f32 %v1215_v15, %v1214_v10  ;;  %v1412_v20 = vadd.f32 %v1411_v13, %v1410_v11  ;;  %v1423_v10 = vsel %vm22_vm0, %v1321_v57, 0.0  ;;  %v1227_v11 = vsel %vm22_vm0, %v2783_v48, 0.0  ;;  %v2804_v15 = vld [vmem:[#allocation2 + $0x158] sm:$0xff] }
 0x1a1   :  { %v1323_v13 = vmul.f32 %v2790_v59, %v2790_v59  ;;  %v1325_v34 = vmul.f32 %v2804_v15, %v2804_v15  ;;  %v1233_v46 = vsel %vm22_vm0, %v2804_v15, 0.0 }
 0x1a2   :  { %v1218_v28 = vadd.f32 %v1217_v22, %v1216_v19  ;;  %v1414_v29 = vadd.f32 %v1413_v21, %v1412_v20  ;;  %v1425_v20 = vsel %vm22_vm0, %v1322_v4, 0.0  ;;  %v1229_v21 = vsel %vm22_vm0, %v2790_v59, 0.0 }
 0x1a3   :  { %v1324_v22 = vmul.f32 %v2797_v6, %v2797_v6  ;;  %v1431_v57 = vsel %vm22_vm0, %v1325_v34, 0.0 }
 0x1a4   :  { %v1220_v37 = vadd.f32 %v1219_v32, %v1218_v28  ;;  %v1416_v41 = vadd.f32 %v1415_v30, %v1414_v29  ;;  %v1427_v30 = vsel %vm22_vm0, %v1323_v13, 0.0  ;;  %v1231_v32 = vsel %vm22_vm0, %v2797_v6, 0.0 }
 0x1a6   :  { %v1222_v52 = vadd.f32 %v1221_v44, %v1220_v37  ;;  %v1418_v53 = vadd.f32 %v1417_v43, %v1416_v41  ;;  %v2818_v37 = vld [vmem:[#allocation2 + $0x168] sm:$0xff]  ;;  %v1429_v44 = vsel %vm22_vm0, %v1324_v22, 0.0 }
 0x1a7   :  { %4126 = vst [vmem:[#allocation4_spill] sm:$0xff] %v2818_v37 }
 0x1a8   :  { %v1224_v60 = vadd.f32 %v1223_v55, %v1222_v52  ;;  %v1420_v63 = vadd.f32 %v1419_v54, %v1418_v53  ;;  %v1326_v52 = vmul.f32 %v2811_v24, %v2811_v24  ;;  %v2825_v53 = vld [vmem:[#allocation2 + $0x170] sm:$0xff] }
 0x1a9   :  { %4127 = vst [vmem:[#allocation5_spill] sm:$0xff] %v2825_v53 }
 0x1aa   :  { %v1226_v7 = vadd.f32 %v1225_v2, %v1224_v60  ;;  %v1422_v8 = vadd.f32 %v1421_v0, %v1420_v63  ;;  %v1235_v60 = vsel %vm22_vm0, %v2811_v24, 0.0  ;;  %v1327_v63 = vmul.f32 %v2818_v37, %v2818_v37  ;;  %v2832_v0 = vld [vmem:[#allocation2 + $0x178] sm:$0xff] }
 0x1ab   :  { %4128 = vst [vmem:[#allocation6_spill] sm:$0xff] %v2832_v0 }
 0x1ac   :  { %v1424_v16 = vadd.f32 %v1423_v10, %v1422_v8  ;;  %v1228_v19 = vadd.f32 %v1227_v11, %v1226_v7  ;;  %v1433_v7 = vsel %vm22_vm0, %v1326_v52, 0.0  ;;  %v1237_v8 = vsel %vm22_vm0, %v2818_v37, 0.0  ;;  %v2839_v11 = vld [vmem:[#allocation2 + $0x180] sm:$0xff] }
 0x1ad   :  { %v1328_v10 = vmul.f32 %v2825_v53, %v2825_v53  ;;  %4129 = vst [vmem:[#allocation7_spill] sm:$0xff] %v2839_v11  ;;  %v1330_v34 = vmul.f32 %v2839_v11, %v2839_v11  ;;  %v1243_v52 = vsel %vm22_vm0, %v2839_v11, 0.0 }
 0x1ae   :  { %v1230_v28 = vadd.f32 %v1229_v21, %v1228_v19  ;;  %v1426_v29 = vadd.f32 %v1425_v20, %v1424_v16  ;;  %v1435_v19 = vsel %vm22_vm0, %v1327_v63, 0.0  ;;  %v1239_v20 = vsel %vm22_vm0, %v2825_v53, 0.0 }
 0x1af   :  { %v1329_v21 = vmul.f32 %v2832_v0, %v2832_v0  ;;  %v1441_v63 = vsel %vm22_vm0, %v1330_v34, 0.0 }
 0x1b0   :  { %v1232_v41 = vadd.f32 %v1231_v32, %v1230_v28  ;;  %v1428_v43 = vadd.f32 %v1427_v30, %v1426_v29  ;;  %v2846_v29 = vld [vmem:[#allocation2 + $0x188] sm:$0xff]  ;;  %v1437_v30 = vsel %vm22_vm0, %v1328_v10, 0.0  ;;  %v1241_v32 = vsel %vm22_vm0, %v2832_v0, 0.0  ;;  %v2867_v10 = vld [vmem:[#allocation2 + $0x1a0] sm:$0xff] }
 0x1b1   :  { %4130 = vst [vmem:[#allocation8_spill] sm:$0xff] %v2846_v29  ;;  %4133 = vst [vmem:[#allocation11_spill] sm:$0xff] %v2867_v10 }
 0x1b2   :  { %v1234_v54 = vadd.f32 %v1233_v46, %v1232_v41  ;;  %v1430_v55 = vadd.f32 %v1429_v44, %v1428_v43  ;;  %v2853_v44 = vld [vmem:[#allocation2 + $0x190] sm:$0xff]  ;;  %v1439_v46 = vsel %vm22_vm0, %v1329_v21, 0.0 }
 0x1b3   :  { %4131 = vst [vmem:[#allocation9_spill] sm:$0xff] %v2853_v44 }
 0x1b4   :  { %v1236_v2 = vadd.f32 %v1235_v60, %v1234_v54  ;;  %v1432_v4 = vadd.f32 %v1431_v57, %v1430_v55  ;;  %v1331_v54 = vmul.f32 %v2846_v29, %v2846_v29  ;;  %v2860_v60 = vld [vmem:[#allocation2 + $0x198] sm:$0xff] }
 0x1b5   :  { %4132 = vst [vmem:[#allocation10_spill] sm:$0xff] %v2860_v60 }
 0x1b6   :  { %v1238_v13 = vadd.f32 %v1237_v8, %v1236_v2  ;;  %v1434_v16 = vadd.f32 %v1433_v7, %v1432_v4  ;;  %v1245_v2 = vsel %vm22_vm0, %v2846_v29, 0.0  ;;  %v1332_v4 = vmul.f32 %v2853_v44, %v2853_v44 }
 0x1b8   :  { %v1240_v22 = vadd.f32 %v1239_v20, %v1238_v13  ;;  %v1436_v28 = vadd.f32 %v1435_v19, %v1434_v16  ;;  %v1443_v13 = vsel %vm22_vm0, %v1331_v54, 0.0  ;;  %v1247_v16 = vsel %vm22_vm0, %v2853_v44, 0.0 }
 0x1b9   :  { %v1333_v19 = vmul.f32 %v2860_v60, %v2860_v60 }
 0x1ba   :  { %v1242_v41 = vadd.f32 %v1241_v32, %v1240_v22  ;;  %v1438_v43 = vadd.f32 %v1437_v30, %v1436_v28  ;;  %v2874_v22 = vld [vmem:[#allocation2 + $0x1a8] sm:$0xff]  ;;  %v1445_v28 = vsel %vm22_vm0, %v1332_v4, 0.0  ;;  %v1249_v30 = vsel %vm22_vm0, %v2860_v60, 0.0 }
 0x1bb   :  { %4134 = vst [vmem:[#allocation12_spill] sm:$0xff] %v2874_v22  ;;  %v1334_v32 = vmul.f32 %v2867_v10, %v2867_v10  ;;  %v1335_v54 = vmul.f32 %v2874_v22, %v2874_v22  ;;  %v1253_v4 = vsel %vm22_vm0, %v2874_v22, 0.0 }
 0x1bc   :  { %v1244_v55 = vadd.f32 %v1243_v52, %v1242_v41  ;;  %v1440_v57 = vadd.f32 %v1439_v46, %v1438_v43  ;;  %v2881_v43 = vld [vmem:[#allocation2 + $0x1b0] sm:$0xff]  ;;  %v1447_v46 = vsel %vm22_vm0, %v1333_v19, 0.0  ;;  %v1251_v52 = vsel %vm22_vm0, %v2867_v10, 0.0 }
 0x1bd   :  { %4135 = vst [vmem:[#allocation13_spill] sm:$0xff] %v2881_v43  ;;  %v1451_v19 = vsel %vm22_vm0, %v1335_v54, 0.0 }
 0x1be   :  { %v1442_v7 = vadd.f32 %v1441_v63, %v1440_v57  ;;  %v1246_v8 = vadd.f32 %v1245_v2, %v1244_v55  ;;  %v2888_v63 = vld [vmem:[#allocation2 + $0x1b8] sm:$0xff]  ;;  %v1449_v2 = vsel %vm22_vm0, %v1334_v32, 0.0  ;;  %v2902_v32 = vld [vmem:[#allocation2 + $0x1c8] sm:$0xff] }
 0x1bf   :  { %4136 = vst [vmem:[#allocation14_spill] sm:$0xff] %v2888_v63  ;;  %4138 = vst [vmem:[#allocation16_spill] sm:$0xff] %v2902_v32 }
 0x1c0   :  { %v1444_v20 = vadd.f32 %v1443_v13, %v1442_v7  ;;  %v1248_v21 = vadd.f32 %v1247_v16, %v1246_v8  ;;  %v1336_v7 = vmul.f32 %v2881_v43, %v2881_v43  ;;  %v2895_v16 = vld [vmem:[#allocation2 + $0x1c0] sm:$0xff] }
 0x1c1   :  { %4137 = vst [vmem:[#allocation15_spill] sm:$0xff] %v2895_v16 }
 0x1c2   :  { %v1446_v34 = vadd.f32 %v1445_v28, %v1444_v20  ;;  %v1250_v41 = vadd.f32 %v1249_v30, %v1248_v21  ;;  %v1255_v20 = vsel %vm22_vm0, %v2881_v43, 0.0  ;;  %v1337_v21 = vmul.f32 %v2888_v63, %v2888_v63 }
 0x1c4   :  { %v1448_v55 = vadd.f32 %v1447_v46, %v1446_v34  ;;  %v1252_v57 = vadd.f32 %v1251_v52, %v1250_v41  ;;  %v1453_v34 = vsel %vm22_vm0, %v1336_v7, 0.0  ;;  %v1257_v41 = vsel %vm22_vm0, %v2888_v63, 0.0 }
 0x1c5   :  { %v1338_v46 = vmul.f32 %v2895_v16, %v2895_v16 }
 0x1c6   :  { %v1450_v8 = vadd.f32 %v1449_v2, %v1448_v55  ;;  %v1254_v13 = vadd.f32 %v1253_v4, %v1252_v57  ;;  %v2909_v55 = vld [vmem:[#allocation2 + $0x1d0] sm:$0xff]  ;;  %v1455_v57 = vsel %vm22_vm0, %v1337_v21, 0.0  ;;  %v1259_v2 = vsel %vm22_vm0, %v2895_v16, 0.0 }
 0x1c7   :  { %4139 = vst [vmem:[#allocation17_spill] sm:$0xff] %v2909_v55  ;;  %v1339_v4 = vmul.f32 %v2902_v32, %v2902_v32 }
 0x1c8   :  { %v1452_v28 = vadd.f32 %v1451_v19, %v1450_v8  ;;  %v1256_v30 = vadd.f32 %v1255_v20, %v1254_v13  ;;  %v2916_v13 = vld [vmem:[#allocation2 + $0x1d8] sm:$0xff]  ;;  %v1457_v19 = vsel %vm22_vm0, %v1338_v46, 0.0  ;;  %v1261_v20 = vsel %vm22_vm0, %v2902_v32, 0.0  ;;  %v2932_v32 = vld [vmem:[#allocation2 + $0x1f0] sm:$0xff] }
 0x1c9   :  { %4140 = vst [vmem:[#allocation18_spill] sm:$0xff] %v2916_v13  ;;  %4143 = vst [vmem:[#allocation21_spill] sm:$0xff] %v2932_v32 }
 0x1ca   :  { %v1454_v52 = vadd.f32 %v1453_v34, %v1452_v28  ;;  %v1258_v54 = vadd.f32 %v1257_v41, %v1256_v30  ;;  %v1340_v28 = vmul.f32 %v2909_v55, %v2909_v55  ;;  %v2923_v34 = vld [vmem:[#allocation2 + $0x1e0] sm:$0xff]  ;;  %v1459_v41 = vsel %vm22_vm0, %v1339_v4, 0.0 }
 0x1cb   :  { %4141 = vst [vmem:[#allocation19_spill] sm:$0xff] %v2923_v34  ;;  %v1342_v4 = vmul.f32 %v2923_v34, %v2923_v34 }
 0x1cc   :  { %v1456_v8 = vadd.f32 %v1455_v57, %v1454_v52  ;;  %v1260_v7 = vadd.f32 %v1259_v2, %v1258_v54  ;;  %v1263_v52 = vsel %vm22_vm0, %v2909_v55, 0.0  ;;  %v1341_v54 = vmul.f32 %v2916_v13, %v2916_v13  ;;  %v2930_v2 = vld [vmem:[#allocation2 + $0x1e8] sm:$0xff]  ;;  %v2946_v55 = vld [vmem:[#allocation2 + $0x1f8] sm:$0xff] }
 0x1cd   :  { %4142 = vst [vmem:[#allocation20_spill] sm:$0xff] %v2930_v2  ;;  %v1461_v16 = vsel %vm22_vm0, %v1340_v28, 0.0 }
 0x1ce   :  { %v1458_v30 = vadd.f32 %v1457_v19, %v1456_v8  ;;  %v1262_v21 = vadd.f32 %v1261_v20, %v1260_v7  ;;  %v1265_v8 = vsel %vm22_vm0, %v2916_v13, 0.0  ;;  %v1463_v20 = vsel %vm22_vm0, %v1341_v54, 0.0 }
 0x1cf   :  { %v1465_v13 = vsel %vm22_vm0, %v1342_v4, 0.0  ;;  %v1271_v54 = vsel %vm22_vm0, %v2932_v32, 0.0  ;;  %v1273_v4 = vsel %vm22_vm0, %v2946_v55, 0.0 }
 0x1d0   :  { %v1460_v57 = vadd.f32 %v1459_v41, %v1458_v30  ;;  %v1264_v46 = vadd.f32 %v1263_v52, %v1262_v21  ;;  %v1267_v30 = vsel %vm22_vm0, %v2923_v34, 0.0  ;;  %v1343_v21 = vmul.f32 %v2930_v2, %v2930_v2  ;;  %v4156_v29 = vld [vmem:[#allocation21_spill] sm:$0xff] }
 0x1d1   :  { %v1344_v41 = vmul.f32 %v2932_v32, %v2932_v32 }
 0x1d2   :  { %v1462_v7 = vadd.f32 %v1461_v16, %v1460_v57  ;;  %v1266_v19 = vadd.f32 %v1265_v8, %v1264_v46  ;;  %v1269_v16 = vsel %vm22_vm0, %v2930_v2, 0.0  ;;  %v1467_v8 = vsel %vm22_vm0, %v1343_v21, 0.0  ;;  %v4154_v0 = vld [vmem:[#allocation19_spill] sm:$0xff] }
 0x1d3   :  { %v1469_v34 = vsel %vm22_vm0, %v1344_v41, 0.0 }
 0x1d4   :  { %v1464_v28 = vadd.f32 %v1463_v20, %v1462_v7  ;;  %v1268_v52 = vadd.f32 %v1267_v30, %v1266_v19  ;;  %v1345_v7 = vmul.f32 %v2946_v55, %v2946_v55  ;;  %v4155_v11 = vld [vmem:[#allocation20_spill] sm:$0xff] }
 0x1d6   :  { %v1466_v57 = vadd.f32 %v1465_v13, %v1464_v28  ;;  %v1270_v46 = vadd.f32 %v1269_v16, %v1268_v52  ;;  %v1471_v2 = vsel %vm22_vm0, %v1345_v7, 0.0  ;;  %v1552_v7 = vlaneseq }
 0x1d8   :  { %v1468_v19 = vadd.f32 %v1467_v8, %v1466_v57  ;;  %v1272_v20 = vadd.f32 %v1271_v54, %v1270_v46 }
 0x1da   :  { %v1470_v30 = vadd.f32 %v1469_v34, %v1468_v19  ;;  %v1274_v63 = vadd.f32 %v1273_v4, %v1272_v20  ;;  %v2971_v20 = vld [vmem:[#allocation2 + $0x8] sm:$0xff]  ;;  %v1547_v4 = vld [vmem:[%s4091_s2] sm:$0x1] }
 0x1dc   :  { %v1275_v43 = vrot.slane %v1274_v63, 4  ;;  %v1472_v32 = vadd.f32 %v1471_v2, %v1470_v30  ;;  %v2964_v2 = vshrl.u32 %v1552_v7, 7  ;;  %v2999_v7 = vld [vmem:[#allocation2 + $0x40] sm:$0xff] }
 0x1de   :  { %v1276_v13 = vadd.f32 %v1275_v43, %v1274_v63  ;;  %v1473_v28 = vrot.slane %v1472_v32, 4  ;;  %v4151_v63 = vld [vmem:[#allocation17_spill] sm:$0xff]  ;;  %v4153_v53 = vsub.s32 0, %v2964_v2 }
 0x1e0   :  { %v1277_v52 = vrot.slane %v1276_v13, 2  ;;  %v1474_v21 = vadd.f32 %v1473_v28, %v1472_v32  ;;  %v2967_v32 = vld [vmem:[#allocation2] sm:$0xff] }
 0x1e1   :  { %v4145_v28 = vld [vmem:[#allocation11_spill] sm:$0xff] }
 0x1e2   :  { %v1278_v16 = vadd.f32 %v1277_v52, %v1276_v13  ;;  %v1475_v41 = vrot.slane %v1474_v21, 2  ;;  %v2979_v13 = vld [vmem:[#allocation2 + $0x18] sm:$0xff]  ;;  %v2983_v52 = vld [vmem:[#allocation2 + $0x20] sm:$0xff] }
 0x1e4   :  { %v1279_v22 = vrot.slane %v1278_v16, 1  ;;  %v1476_v10 = vadd.f32 %v1475_v41, %v1474_v21  ;;  %v3007_v21 = vld [vmem:[#allocation2 + $0x50] sm:$0xff]  ;;  %v4150_v41 = vld [vmem:[#allocation16_spill] sm:$0xff] }
 0x1e6   :  { %v1280_v60 = vadd.f32 %v1279_v22, %v1278_v16  ;;  %v1477_v57 = vrot.slane %v1476_v10, 1  ;;  %v2987_v16 = vld [vmem:[#allocation2 + $0x28] sm:$0xff] }
 0x1e8   :  { %v2960_v54 = vmul.f32 0.001953125, %v1280_v60  ;;  %v1478_v46 = vadd.f32 %v1477_v57, %v1476_v10  ;;  %v2975_v10 = vld [vmem:[#allocation2 + $0x10] sm:$0xff] }
 0x1e9   :  { %v2991_v57 = vld [vmem:[#allocation2 + $0x30] sm:$0xff] }
 0x1ea   :  { %v1479_v8 = vmul.f32 0.001953125, %v1478_v46  ;;  %v1480_v34 = vmul.f32 %v2960_v54, %v2960_v54  ;;  %v4157_v46 = vsub.f32 %v2967_v32, %v2960_v54  ;;  %v4159_v2 = vsub.f32 %v2975_v10, %v2960_v54 }
 0x1eb   :  { %v4160_v44 = vsub.f32 %v2979_v13, %v2960_v54 }
 0x1ec   :  { %v1481_v19 = vsub.f32 %v1479_v8, %v1480_v34  ;;  %v2995_v8 = vld [vmem:[#allocation2 + $0x38] sm:$0xff] }
 0x1ee   :  { %v1482_v43 = vmax.f32 %v1481_v19, 0.0  ;;  %v4146_v19 = vld [vmem:[#allocation12_spill] sm:$0xff] }
 0x1f0   :  { %v1548_v30 = vadd.f32 1e-05, %v1482_v43  ;;  %v3003_v43 = vld [vmem:[#allocation2 + $0x48] sm:$0xff] }
 0x1f2   :  { %2051 = vrsqrt.f32 %v1548_v30 }
 0x1fc   :  { %v2052_v34 = vpop.eup %2051 }
 0x1fd   :  { %v1550_v24 = vmul.f32 %v2052_v34, %v1547_v4  ;;  %v4152_v4 = vld [vmem:[#allocation18_spill] sm:$0xff] }
 0x1ff   :  { %v3114_v37 = vrot.slane %v1550_v24, %v4153_v53  ;;  %v4158_v24 = vsub.f32 %v2971_v20, %v2960_v54 }
 0x201   :  { %v3128_v34 = vmul.f32 %v3114_v37, %v4157_v46  ;;  %v3134_v53 = vmul.f32 %v3114_v37, %v4158_v24  ;;  %v3140_v30 = vmul.f32 %v3114_v37, %v4159_v2  ;;  %v3146_v32 = vmul.f32 %v3114_v37, %v4160_v44 }
 0x202   :  { %v4161_v46 = vsub.f32 %v2983_v52, %v2960_v54  ;;  %v4162_v24 = vsub.f32 %v2987_v16, %v2960_v54  ;;  %v4163_v2 = vsub.f32 %v2991_v57, %v2960_v54  ;;  %v4164_v44 = vsub.f32 %v2995_v8, %v2960_v54 }
 0x204   :  { %v3152_v20 = vmul.f32 %v3114_v37, %v4161_v46  ;;  %v3158_v10 = vmul.f32 %v3114_v37, %v4162_v24  ;;  %v3164_v13 = vmul.f32 %v3114_v37, %v4163_v2  ;;  %v3170_v52 = vmul.f32 %v3114_v37, %v4164_v44 }
 0x205   :  { %v4165_v46 = vsub.f32 %v2999_v7, %v2960_v54  ;;  %v4166_v24 = vsub.f32 %v3003_v43, %v2960_v54  ;;  %v4167_v2 = vsub.f32 %v3007_v21, %v2960_v54  ;;  %v4168_v44 = vsub.f32 %v2556_v26, %v2960_v54 }
 0x207   :  { %v3176_v16 = vmul.f32 %v3114_v37, %v4165_v46  ;;  %v3182_v57 = vmul.f32 %v3114_v37, %v4166_v24  ;;  %v3188_v8 = vmul.f32 %v3114_v37, %v4167_v2  ;;  %v3194_v7 = vmul.f32 %v3114_v37, %v4168_v44 }
 0x208   :  { %v4169_v46 = vsub.f32 %v2561_v31, %v2960_v54  ;;  %v4170_v24 = vsub.f32 %v2571_v49, %v2960_v54  ;;  %v4171_v2 = vsub.f32 %v2578_v58, %v2960_v54  ;;  %v4172_v44 = vsub.f32 %v2589_v5, %v2960_v54 }
 0x20a   :  { %v3200_v43 = vmul.f32 %v3114_v37, %v4169_v46  ;;  %v3206_v21 = vmul.f32 %v3114_v37, %v4170_v24  ;;  %v3212_v26 = vmul.f32 %v3114_v37, %v4171_v2  ;;  %v3218_v31 = vmul.f32 %v3114_v37, %v4172_v44 }
 0x20b   :  { %v4173_v46 = vsub.f32 %v2594_v17, %v2960_v54  ;;  %v4174_v24 = vsub.f32 %v2606_v33, %v2960_v54  ;;  %v4175_v2 = vsub.f32 %v2612_v39, %v2960_v54  ;;  %v4176_v44 = vsub.f32 %v2623_v62, %v2960_v54 }
 0x20d   :  { %v3224_v49 = vmul.f32 %v3114_v37, %v4173_v46  ;;  %v3230_v58 = vmul.f32 %v3114_v37, %v4174_v24  ;;  %v3236_v5 = vmul.f32 %v3114_v37, %v4175_v2  ;;  %v3242_v17 = vmul.f32 %v3114_v37, %v4176_v44 }
 0x20e   :  { %v4177_v46 = vsub.f32 %v2629_v3, %v2960_v54  ;;  %v4178_v24 = vsub.f32 %v2639_v23, %v2960_v54  ;;  %v4179_v2 = vsub.f32 %v2646_v35, %v2960_v54  ;;  %v4180_v44 = vsub.f32 %v2657_v47, %v2960_v54 }
 0x210   :  { %v3248_v33 = vmul.f32 %v3114_v37, %v4177_v46  ;;  %v3254_v39 = vmul.f32 %v3114_v37, %v4178_v24  ;;  %v3260_v62 = vmul.f32 %v3114_v37, %v4179_v2  ;;  %v3266_v3 = vmul.f32 %v3114_v37, %v4180_v44 }
 0x211   :  { %v4181_v46 = vsub.f32 %v2662_v61, %v2960_v54  ;;  %v4182_v24 = vsub.f32 %v2674_v14, %v2960_v54  ;;  %v4183_v2 = vsub.f32 %v2683_v38, %v2960_v54  ;;  %v4184_v44 = vsub.f32 %v2691_v50, %v2960_v54 }
 0x213   :  { %v3272_v23 = vmul.f32 %v3114_v37, %v4181_v46  ;;  %v3278_v35 = vmul.f32 %v3114_v37, %v4182_v24  ;;  %v3284_v47 = vmul.f32 %v3114_v37, %v4183_v2  ;;  %v3290_v61 = vmul.f32 %v3114_v37, %v4184_v44 }
 0x214   :  { %v4185_v46 = vsub.f32 %v2703_v12, %v2960_v54  ;;  %v4186_v24 = vsub.f32 %v2712_v25, %v2960_v54  ;;  %v4187_v2 = vsub.f32 %v2724_v42, %v2960_v54  ;;  %v4188_v44 = vsub.f32 %v2732_v51, %v2960_v54 }
 0x216   :  { %v3296_v14 = vmul.f32 %v3114_v37, %v4185_v46  ;;  %v3302_v38 = vmul.f32 %v3114_v37, %v4186_v24  ;;  %v3308_v50 = vmul.f32 %v3114_v37, %v4187_v2  ;;  %v3314_v12 = vmul.f32 %v3114_v37, %v4188_v44 }
 0x217   :  { %v4189_v46 = vsub.f32 %v2722_v40, %v2960_v54  ;;  %v4190_v24 = vsub.f32 %v2730_v45, %v2960_v54  ;;  %v4191_v2 = vsub.f32 %v2741_v56, %v2960_v54  ;;  %v4192_v44 = vsub.f32 %v2748_v1, %v2960_v54 }
 0x219   :  { %v3320_v25 = vmul.f32 %v3114_v37, %v4189_v46  ;;  %v3326_v42 = vmul.f32 %v3114_v37, %v4190_v24  ;;  %v3332_v51 = vmul.f32 %v3114_v37, %v4191_v2  ;;  %v3338_v40 = vmul.f32 %v3114_v37, %v4192_v44 }
 0x21a   :  { %v4193_v46 = vsub.f32 %v2755_v9, %v2960_v54  ;;  %v4194_v24 = vsub.f32 %v2762_v18, %v2960_v54  ;;  %v4195_v2 = vsub.f32 %v2769_v27, %v2960_v54  ;;  %v4196_v44 = vsub.f32 %v2776_v36, %v2960_v54 }
 0x21c   :  { %v3344_v45 = vmul.f32 %v3114_v37, %v4193_v46  ;;  %v3350_v56 = vmul.f32 %v3114_v37, %v4194_v24  ;;  %v3356_v1 = vmul.f32 %v3114_v37, %v4195_v2  ;;  %v3362_v9 = vmul.f32 %v3114_v37, %v4196_v44 }
 0x21d   :  { %v4197_v46 = vsub.f32 %v2783_v48, %v2960_v54  ;;  %v4198_v24 = vsub.f32 %v2790_v59, %v2960_v54  ;;  %v4199_v2 = vsub.f32 %v2797_v6, %v2960_v54  ;;  %v4201_v44 = vsub.f32 %v2804_v15, %v2960_v54 }
 0x21f   :  { %v3368_v18 = vmul.f32 %v3114_v37, %v4197_v46  ;;  %v3374_v27 = vmul.f32 %v3114_v37, %v4198_v24  ;;  %v3380_v36 = vmul.f32 %v3114_v37, %v4199_v2  ;;  %v3386_v48 = vmul.f32 %v3114_v37, %v4201_v44  ;;  %v4203_v46 = vld [vmem:[#allocation3_spill] sm:$0xff]  ;;  %v4206_v24 = vld [vmem:[#allocation4_spill] sm:$0xff]  ;;  %v4209_v2 = vld [vmem:[#allocation5_spill] sm:$0xff] }
 0x220   :  { %v4204_v22 = vsub.f32 %v4203_v46, %v2960_v54  ;;  %v4207_v60 = vsub.f32 %v4206_v24, %v2960_v54  ;;  %v4212_v44 = vld [vmem:[#allocation6_spill] sm:$0xff] }
 0x221   :  { %4200 = vst [vmem:[#allocation11_spill] sm:$0xff] %v3380_v36  ;;  %4202 = vst [vmem:[#allocation12_spill] sm:$0xff] %v3386_v48  ;;  %v4210_v36 = vsub.f32 %v4209_v2, %v2960_v54  ;;  %v4213_v48 = vsub.f32 %v4212_v44, %v2960_v54 }
 0x222   :  { %v3392_v59 = vmul.f32 %v3114_v37, %v4204_v22  ;;  %v3398_v6 = vmul.f32 %v3114_v37, %v4207_v60  ;;  %v4215_v22 = vld [vmem:[#allocation7_spill] sm:$0xff]  ;;  %v4217_v60 = vld [vmem:[#allocation8_spill] sm:$0xff] }
 0x223   :  { %v3404_v15 = vmul.f32 %v3114_v37, %v4210_v36  ;;  %v3410_v46 = vmul.f32 %v3114_v37, %v4213_v48  ;;  %v4219_v36 = vld [vmem:[#allocation9_spill] sm:$0xff]  ;;  %v4222_v48 = vld [vmem:[#allocation10_spill] sm:$0xff] }
 0x224   :  { %4205 = vst [vmem:[#allocation16_spill] sm:$0xff] %v3392_v59  ;;  %4208 = vst [vmem:[#allocation17_spill] sm:$0xff] %v3398_v6  ;;  %v4216_v59 = vsub.f32 %v4215_v22, %v2960_v54  ;;  %v4218_v6 = vsub.f32 %v4217_v60, %v2960_v54 }
 0x225   :  { %4211 = vst [vmem:[#allocation18_spill] sm:$0xff] %v3404_v15  ;;  %4214 = vst [vmem:[#allocation19_spill] sm:$0xff] %v3410_v46  ;;  %v4220_v15 = vsub.f32 %v4219_v36, %v2960_v54  ;;  %v4223_v46 = vsub.f32 %v4222_v48, %v2960_v54 }
 0x226   :  { %v3416_v24 = vmul.f32 %v3114_v37, %v4216_v59  ;;  %v3422_v2 = vmul.f32 %v3114_v37, %v4218_v6  ;;  %v4225_v59 = vsub.f32 %v4145_v28, %v2960_v54  ;;  %v4226_v6 = vsub.f32 %v4146_v19, %v2960_v54  ;;  %v4233_v19 = vld [vmem:[#allocation15_spill] sm:$0xff] }
 0x227   :  { %v3428_v44 = vmul.f32 %v3114_v37, %v4220_v15  ;;  %v3434_v22 = vmul.f32 %v3114_v37, %v4223_v46  ;;  %v4228_v15 = vld [vmem:[#allocation13_spill] sm:$0xff]  ;;  %v4230_v46 = vld [vmem:[#allocation14_spill] sm:$0xff] }
 0x228   :  { %v3440_v60 = vmul.f32 %v3114_v37, %v4225_v59  ;;  %v3446_v36 = vmul.f32 %v3114_v37, %v4226_v6  ;;  %v3463_v59 = vld [vmem:[%s4092_s3] ss:$0 sm:$0xff]  ;;  %v4234_v6 = vsub.f32 %v4233_v19, %v2960_v54 }
 0x229   :  { %4221 = vst [vmem:[#allocation20_spill] sm:$0xff] %v3428_v44  ;;  %4224 = vst [vmem:[#allocation21_spill] sm:$0xff] %v3434_v22  ;;  %v4229_v44 = vsub.f32 %v4228_v15, %v2960_v54  ;;  %v4231_v22 = vsub.f32 %v4230_v46, %v2960_v54 }
 0x22a   :  { %4227 = vst [vmem:[#allocation3_spill] sm:$0xff] %v3446_v36  ;;  %v3469_v36 = vmul.f32 %v3114_v37, %v4234_v6  ;;  %v4238_v6 = vsub.f32 %v4154_v0, %v2960_v54 }
 0x22b   :  { %v3452_v48 = vmul.f32 %v3114_v37, %v4229_v44  ;;  %v3458_v28 = vmul.f32 %v3114_v37, %v4231_v22  ;;  %v4235_v44 = vsub.f32 %v4150_v41, %v2960_v54  ;;  %v4236_v22 = vsub.f32 %v4151_v63, %v2960_v54 }
 0x22c   :  { %v3493_v41 = vmul.f32 %v3114_v37, %v4238_v6  ;;  %v3515_v6 = vadd.f32 %v3463_v59, %v3128_v34  ;;  %v3547_v34 = vadd.f32 %v3463_v59, %v3176_v16  ;;  %v3575_v16 = vadd.f32 %v3463_v59, %v3218_v31 }
 0x22d   :  { %4232 = vst [vmem:[#allocation4_spill] sm:$0xff] %v3458_v28  ;;  %v3475_v15 = vmul.f32 %v3114_v37, %v4235_v44  ;;  %v3481_v46 = vmul.f32 %v3114_v37, %v4236_v22  ;;  %v4237_v28 = vsub.f32 %v4152_v4, %v2960_v54  ;;  %v4239_v44 = vsub.f32 %v4155_v11, %v2960_v54 }
 0x22e   :  { %v4240_v22 = vsub.f32 %v4156_v29, %v2960_v54  ;;  %v3519_v11 = vadd.f32 %v3463_v59, %v3134_v53  ;;  %v3523_v29 = vadd.f32 %v3463_v59, %v3140_v30  ;;  %v3543_v30 = vadd.f32 %v3463_v59, %v3170_v52 }
 0x22f   :  { %v3487_v19 = vmul.f32 %v3114_v37, %v4237_v28  ;;  %v3499_v63 = vmul.f32 %v3114_v37, %v4239_v44  ;;  %v4241_v28 = vsub.f32 %v2946_v55, %v2960_v54  ;;  %v3527_v44 = vadd.f32 %v3463_v59, %v3146_v32 }
 0x230   :  { %v3505_v4 = vmul.f32 %v3114_v37, %v4240_v22  ;;  %v3535_v55 = vadd.f32 %v3463_v59, %v3158_v10  ;;  %v3539_v54 = vadd.f32 %v3463_v59, %v3164_v13  ;;  %v3551_v53 = vadd.f32 %v3463_v59, %v3182_v57  ;;  %v4246_v22 = vld [vmem:[#allocation16_spill] sm:$0xff] }
 0x231   :  { %v3511_v0 = vmul.f32 %v3114_v37, %v4241_v28  ;;  %v3531_v37 = vadd.f32 %v3463_v59, %v3152_v20  ;;  %v3555_v32 = vadd.f32 %v3463_v59, %v3188_v8  ;;  %v3559_v20 = vadd.f32 %v3463_v59, %v3194_v7  ;;  %v4248_v28 = vld [vmem:[#allocation17_spill] sm:$0xff] }
 0x232   :  { %v3563_v10 = vadd.f32 %v3463_v59, %v3200_v43  ;;  %v3567_v13 = vadd.f32 %v3463_v59, %v3206_v21  ;;  %v3571_v52 = vadd.f32 %v3463_v59, %v3212_v26  ;;  %v3579_v57 = vadd.f32 %v3463_v59, %v3224_v49 }
 0x233   :  { %v3583_v8 = vadd.f32 %v3463_v59, %v3230_v58  ;;  %v3587_v7 = vadd.f32 %v3463_v59, %v3236_v5  ;;  %v3591_v43 = vadd.f32 %v3463_v59, %v3242_v17  ;;  %v3595_v21 = vadd.f32 %v3463_v59, %v3248_v33 }
 0x234   :  { %v3599_v26 = vadd.f32 %v3463_v59, %v3254_v39  ;;  %v3603_v31 = vadd.f32 %v3463_v59, %v3260_v62  ;;  %v3607_v49 = vadd.f32 %v3463_v59, %v3266_v3  ;;  %v3611_v58 = vadd.f32 %v3463_v59, %v3272_v23 }
 0x235   :  { %v3615_v5 = vadd.f32 %v3463_v59, %v3278_v35  ;;  %v3619_v17 = vadd.f32 %v3463_v59, %v3284_v47  ;;  %v3623_v33 = vadd.f32 %v3463_v59, %v3290_v61  ;;  %v3627_v39 = vadd.f32 %v3463_v59, %v3296_v14 }
 0x236   :  { %v3631_v62 = vadd.f32 %v3463_v59, %v3302_v38  ;;  %v3635_v3 = vadd.f32 %v3463_v59, %v3308_v50  ;;  %v3639_v23 = vadd.f32 %v3463_v59, %v3314_v12  ;;  %v3643_v35 = vadd.f32 %v3463_v59, %v3320_v25 }
 0x237   :  { %v3647_v47 = vadd.f32 %v3463_v59, %v3326_v42  ;;  %v3651_v61 = vadd.f32 %v3463_v59, %v3332_v51  ;;  %v3655_v14 = vadd.f32 %v3463_v59, %v3338_v40  ;;  %v3659_v38 = vadd.f32 %v3463_v59, %v3344_v45  ;;  %v4244_v40 = vld [vmem:[#allocation11_spill] sm:$0xff] }
 0x238   :  { %v3663_v50 = vadd.f32 %v3463_v59, %v3350_v56  ;;  %v3667_v12 = vadd.f32 %v3463_v59, %v3356_v1  ;;  %v3671_v25 = vadd.f32 %v3463_v59, %v3362_v9  ;;  %v3675_v42 = vadd.f32 %v3463_v59, %v3368_v18  ;;  %v4245_v56 = vld [vmem:[#allocation12_spill] sm:$0xff] }
 0x239   :  { %v3679_v51 = vadd.f32 %v3463_v59, %v3374_v27  ;;  %v3683_v45 = vadd.f32 %v3463_v59, %v4244_v40  ;;  %v3687_v1 = vadd.f32 %v3463_v59, %v4245_v56  ;;  %v3691_v9 = vadd.f32 %v3463_v59, %v4246_v22 }
 0x23a   :  { %4242 = vst [vmem:[#allocation5_spill] sm:$0xff] %v3675_v42  ;;  %v3695_v18 = vadd.f32 %v3463_v59, %v4248_v28  ;;  %v4250_v42 = vld [vmem:[#allocation18_spill] sm:$0xff]  ;;  %v3707_v56 = vadd.f32 %v3463_v59, %v3416_v24  ;;  %v3711_v22 = vadd.f32 %v3463_v59, %v3422_v2  ;;  %v3731_v2 = vadd.f32 %v3463_v59, %v3452_v48 }
 0x23b   :  { %4243 = vst [vmem:[#allocation6_spill] sm:$0xff] %v3679_v51  ;;  %4247 = vst [vmem:[#allocation7_spill] sm:$0xff] %v3691_v9  ;;  %v3699_v27 = vadd.f32 %v3463_v59, %v4250_v42  ;;  %v4251_v51 = vld [vmem:[#allocation19_spill] sm:$0xff]  ;;  %v4254_v9 = vld [vmem:[#allocation20_spill] sm:$0xff]  ;;  %v3751_v48 = vadd.f32 %v3463_v59, %v3487_v19  ;;  %v1693_v19 = vmax.f32 %v3519_v11, 0.0  ;;  %v1704_v11 = vmax.f32 %v3563_v10, 0.0 }
 0x23c   :  { %4249 = vst [vmem:[#allocation8_spill] sm:$0xff] %v3695_v18  ;;  %v3703_v40 = vadd.f32 %v3463_v59, %v4251_v51  ;;  %4253 = vst [vmem:[#allocation10_spill] sm:$0xff] %v3711_v22  ;;  %v3715_v28 = vadd.f32 %v3463_v59, %v4254_v9  ;;  %v4255_v18 = vld [vmem:[#allocation21_spill] sm:$0xff]  ;;  %v3723_v51 = vadd.f32 %v3463_v59, %v3440_v60  ;;  %v4257_v22 = vld [vmem:[#allocation4_spill] sm:$0xff]  ;;  %v1715_v10 = vmax.f32 %v3607_v49, 0.0 }
 0x23d   :  { %v3719_v42 = vadd.f32 %v3463_v59, %v4255_v18  ;;  %v3735_v9 = vadd.f32 %v3463_v59, %v4257_v22  ;;  %v3739_v18 = vadd.f32 %v3463_v59, %v3469_v36  ;;  %v3743_v60 = vadd.f32 %v3463_v59, %v3475_v15  ;;  %4259 = vst [vmem:[#allocation14_spill] sm:$0xff] %v3751_v48 }
 0x23e   :  { %4252 = vst [vmem:[#allocation9_spill] sm:$0xff] %v3703_v40  ;;  %v4256_v40 = vld [vmem:[#allocation3_spill] sm:$0xff]  ;;  %v3755_v22 = vadd.f32 %v3463_v59, %v3493_v41  ;;  %v3759_v36 = vadd.f32 %v3463_v59, %v3499_v63  ;;  %v3763_v15 = vadd.f32 %v3463_v59, %v3505_v4  ;;  %v1694_v48 = vmax.f32 %v3523_v29, 0.0  ;;  %1757 = vst.msk [vmem:[%s4093_s4 + $0x8] sm:$0xff] %vm22_vm0, %v1693_v19 }
 0x23f   :  { %v3727_v24 = vadd.f32 %v3463_v59, %v4256_v40  ;;  %v3747_v40 = vadd.f32 %v3463_v59, %v3481_v46  ;;  %v3767_v46 = vadd.f32 %v3463_v59, %v3511_v0  ;;  %v1695_v41 = vmax.f32 %v3527_v44, 0.0  ;;  %1768 = vst.msk [vmem:[%s4093_s4 + $0x60] sm:$0xff] %vm22_vm0, %v1704_v11  ;;  %1779 = vst.msk [vmem:[%s4093_s4 + $0xb8] sm:$0xff] %vm22_vm0, %v1715_v10 }
 0x240   :  { %4260 = vst [vmem:[#allocation15_spill] sm:$0xff] %v3755_v22  ;;  %4261 = vst [vmem:[#allocation11_spill] sm:$0xff] %v3759_v36  ;;  %v1696_v22 = vmax.f32 %v3531_v37, 0.0  ;;  %v1697_v63 = vmax.f32 %v3535_v55, 0.0  ;;  %v1698_v36 = vmax.f32 %v3539_v54, 0.0  ;;  %v1699_v4 = vmax.f32 %v3543_v30, 0.0 }
 0x241   :  { %4258 = vst [vmem:[#allocation13_spill] sm:$0xff] %v3747_v40  ;;  %4262 = vst [vmem:[#allocation12_spill] sm:$0xff] %v3763_v15  ;;  %v1692_v40 = vmax.f32 %v3515_v6, 0.0  ;;  %v1700_v15 = vmax.f32 %v3547_v34, 0.0  ;;  %v1701_v59 = vmax.f32 %v3551_v53, 0.0  ;;  %v1702_v0 = vmax.f32 %v3555_v32, 0.0 }
 0x242   :  { %v1703_v6 = vmax.f32 %v3559_v20, 0.0  ;;  %1758 = vst.msk [vmem:[%s4093_s4 + $0x10] sm:$0xff] %vm22_vm0, %v1694_v48  ;;  %1759 = vst.msk [vmem:[%s4093_s4 + $0x18] sm:$0xff] %vm22_vm0, %v1695_v41  ;;  %v1705_v29 = vmax.f32 %v3567_v13, 0.0  ;;  %v1706_v44 = vmax.f32 %v3571_v52, 0.0  ;;  %v1707_v37 = vmax.f32 %v3575_v16, 0.0 }
 0x243   :  { %1756 = vst.msk [vmem:[%s4093_s4] sm:$0xff] %vm22_vm0, %v1692_v40  ;;  %1760 = vst.msk [vmem:[%s4093_s4 + $0x20] sm:$0xff] %vm22_vm0, %v1696_v22  ;;  %v1708_v55 = vmax.f32 %v3579_v57, 0.0  ;;  %v1709_v54 = vmax.f32 %v3583_v8, 0.0  ;;  %v1710_v30 = vmax.f32 %v3587_v7, 0.0  ;;  %v1711_v34 = vmax.f32 %v3591_v43, 0.0 }
 0x244   :  { %1761 = vst.msk [vmem:[%s4093_s4 + $0x28] sm:$0xff] %vm22_vm0, %v1697_v63  ;;  %1762 = vst.msk [vmem:[%s4093_s4 + $0x30] sm:$0xff] %vm22_vm0, %v1698_v36  ;;  %v1712_v53 = vmax.f32 %v3595_v21, 0.0  ;;  %v1713_v32 = vmax.f32 %v3599_v26, 0.0  ;;  %v1714_v20 = vmax.f32 %v3603_v31, 0.0  ;;  %v1716_v13 = vmax.f32 %v3611_v58, 0.0 }
 0x245   :  { %1763 = vst.msk [vmem:[%s4093_s4 + $0x38] sm:$0xff] %vm22_vm0, %v1699_v4  ;;  %1764 = vst.msk [vmem:[%s4093_s4 + $0x40] sm:$0xff] %vm22_vm0, %v1700_v15  ;;  %v1717_v52 = vmax.f32 %v3615_v5, 0.0  ;;  %v1718_v16 = vmax.f32 %v3619_v17, 0.0  ;;  %v1719_v57 = vmax.f32 %v3623_v33, 0.0  ;;  %v1720_v8 = vmax.f32 %v3627_v39, 0.0 }
 0x246   :  { %1765 = vst.msk [vmem:[%s4093_s4 + $0x48] sm:$0xff] %vm22_vm0, %v1701_v59  ;;  %1766 = vst.msk [vmem:[%s4093_s4 + $0x50] sm:$0xff] %vm22_vm0, %v1702_v0  ;;  %v1721_v7 = vmax.f32 %v3631_v62, 0.0  ;;  %v1722_v43 = vmax.f32 %v3635_v3, 0.0  ;;  %v1723_v21 = vmax.f32 %v3639_v23, 0.0  ;;  %v1724_v26 = vmax.f32 %v3643_v35, 0.0 }
 0x247   :  { %1767 = vst.msk [vmem:[%s4093_s4 + $0x58] sm:$0xff] %vm22_vm0, %v1703_v6  ;;  %1769 = vst.msk [vmem:[%s4093_s4 + $0x68] sm:$0xff] %vm22_vm0, %v1705_v29  ;;  %v1725_v31 = vmax.f32 %v3647_v47, 0.0  ;;  %v1726_v49 = vmax.f32 %v3651_v61, 0.0  ;;  %v1727_v58 = vmax.f32 %v3655_v14, 0.0  ;;  %v1728_v5 = vmax.f32 %v3659_v38, 0.0 }
 0x248   :  { %1770 = vst.msk [vmem:[%s4093_s4 + $0x70] sm:$0xff] %vm22_vm0, %v1706_v44  ;;  %1771 = vst.msk [vmem:[%s4093_s4 + $0x78] sm:$0xff] %vm22_vm0, %v1707_v37  ;;  %v1729_v17 = vmax.f32 %v3663_v50, 0.0  ;;  %v1730_v33 = vmax.f32 %v3667_v12, 0.0  ;;  %v1731_v39 = vmax.f32 %v3671_v25, 0.0  ;;  %v4263_v62 = vld [vmem:[#allocation5_spill] sm:$0xff] }
 0x249   :  { %1772 = vst.msk [vmem:[%s4093_s4 + $0x80] sm:$0xff] %vm22_vm0, %v1708_v55  ;;  %1773 = vst.msk [vmem:[%s4093_s4 + $0x88] sm:$0xff] %vm22_vm0, %v1709_v54  ;;  %v1732_v3 = vmax.f32 %v4263_v62, 0.0  ;;  %v4264_v23 = vld [vmem:[#allocation6_spill] sm:$0xff]  ;;  %v1734_v47 = vmax.f32 %v3683_v45, 0.0  ;;  %v1735_v61 = vmax.f32 %v3687_v1, 0.0 }
 0x24a   :  { %1774 = vst.msk [vmem:[%s4093_s4 + $0x90] sm:$0xff] %vm22_vm0, %v1710_v30  ;;  %1775 = vst.msk [vmem:[%s4093_s4 + $0x98] sm:$0xff] %vm22_vm0, %v1711_v34  ;;  %v1733_v35 = vmax.f32 %v4264_v23, 0.0  ;;  %v4265_v14 = vld [vmem:[#allocation7_spill] sm:$0xff]  ;;  %v4266_v50 = vld [vmem:[#allocation8_spill] sm:$0xff]  ;;  %v1738_v25 = vmax.f32 %v3699_v27, 0.0 }
 0x24b   :  { %1776 = vst.msk [vmem:[%s4093_s4 + $0xa0] sm:$0xff] %vm22_vm0, %v1712_v53  ;;  %1777 = vst.msk [vmem:[%s4093_s4 + $0xa8] sm:$0xff] %vm22_vm0, %v1713_v32  ;;  %v1736_v38 = vmax.f32 %v4265_v14, 0.0  ;;  %v1737_v12 = vmax.f32 %v4266_v50, 0.0  ;;  %v4267_v45 = vld [vmem:[#allocation9_spill] sm:$0xff]  ;;  %v1740_v27 = vmax.f32 %v3707_v56, 0.0 }
 0x24c   :  { %1778 = vst.msk [vmem:[%s4093_s4 + $0xb0] sm:$0xff] %vm22_vm0, %v1714_v20  ;;  %1780 = vst.msk [vmem:[%s4093_s4 + $0xc0] sm:$0xff] %vm22_vm0, %v1716_v13  ;;  %v1739_v1 = vmax.f32 %v4267_v45, 0.0  ;;  %v4268_v40 = vld [vmem:[#allocation10_spill] sm:$0xff]  ;;  %v1742_v22 = vmax.f32 %v3715_v28, 0.0  ;;  %v1743_v36 = vmax.f32 %v3719_v42, 0.0 }
 0x24d   :  { %1781 = vst.msk [vmem:[%s4093_s4 + $0xc8] sm:$0xff] %vm22_vm0, %v1717_v52  ;;  %1782 = vst.msk [vmem:[%s4093_s4 + $0xd0] sm:$0xff] %vm22_vm0, %v1718_v16  ;;  %v1741_v48 = vmax.f32 %v4268_v40, 0.0  ;;  %v1744_v56 = vmax.f32 %v3723_v51, 0.0  ;;  %v1745_v28 = vmax.f32 %v3727_v24, 0.0  ;;  %v1746_v42 = vmax.f32 %v3731_v2, 0.0 }
 0x24e   :  { %1783 = vst.msk [vmem:[%s4093_s4 + $0xd8] sm:$0xff] %vm22_vm0, %v1719_v57  ;;  %1784 = vst.msk [vmem:[%s4093_s4 + $0xe0] sm:$0xff] %vm22_vm0, %v1720_v8  ;;  %v1747_v15 = vmax.f32 %v3735_v9, 0.0  ;;  %v1748_v51 = vmax.f32 %v3739_v18, 0.0  ;;  %v1749_v24 = vmax.f32 %v3743_v60, 0.0  ;;  %v4269_v2 = vld [vmem:[#allocation13_spill] sm:$0xff] }
 0x24f   :  { %1785 = vst.msk [vmem:[%s4093_s4 + $0xe8] sm:$0xff] %vm22_vm0, %v1721_v7  ;;  %1786 = vst.msk [vmem:[%s4093_s4 + $0xf0] sm:$0xff] %vm22_vm0, %v1722_v43  ;;  %v1750_v9 = vmax.f32 %v4269_v2, 0.0  ;;  %v4270_v19 = vld [vmem:[#allocation14_spill] sm:$0xff]  ;;  %v4271_v18 = vld [vmem:[#allocation15_spill] sm:$0xff]  ;;  %v1755_v6 = vmax.f32 %v3767_v46, 0.0 }
 0x250   :  { %1787 = vst.msk [vmem:[%s4093_s4 + $0xf8] sm:$0xff] %vm22_vm0, %v1723_v21  ;;  %1788 = vst.msk [vmem:[%s4093_s4 + $0x100] sm:$0xff] %vm22_vm0, %v1724_v26  ;;  %v1751_v41 = vmax.f32 %v4270_v19, 0.0  ;;  %v1752_v60 = vmax.f32 %v4271_v18, 0.0  ;;  %v4272_v63 = vld [vmem:[#allocation11_spill] sm:$0xff]  ;;  %v4273_v59 = vld [vmem:[#allocation12_spill] sm:$0xff] }
 0x251   :  { %1789 = vst.msk [vmem:[%s4093_s4 + $0x108] sm:$0xff] %vm22_vm0, %v1725_v31  ;;  %1790 = vst.msk [vmem:[%s4093_s4 + $0x110] sm:$0xff] %vm22_vm0, %v1726_v49  ;;  %v1753_v4 = vmax.f32 %v4272_v63, 0.0  ;;  %v1754_v0 = vmax.f32 %v4273_v59, 0.0 }
 0x252   :  { %1791 = vst.msk [vmem:[%s4093_s4 + $0x118] sm:$0xff] %vm22_vm0, %v1727_v58  ;;  %1792 = vst.msk [vmem:[%s4093_s4 + $0x120] sm:$0xff] %vm22_vm0, %v1728_v5 }
 0x253   :  { %1793 = vst.msk [vmem:[%s4093_s4 + $0x128] sm:$0xff] %vm22_vm0, %v1729_v17  ;;  %1794 = vst.msk [vmem:[%s4093_s4 + $0x130] sm:$0xff] %vm22_vm0, %v1730_v33 }
 0x254   :  { %1795 = vst.msk [vmem:[%s4093_s4 + $0x138] sm:$0xff] %vm22_vm0, %v1731_v39  ;;  %1796 = vst.msk [vmem:[%s4093_s4 + $0x140] sm:$0xff] %vm22_vm0, %v1732_v3 }
 0x255   :  { %1797 = vst.msk [vmem:[%s4093_s4 + $0x148] sm:$0xff] %vm22_vm0, %v1733_v35  ;;  %1798 = vst.msk [vmem:[%s4093_s4 + $0x150] sm:$0xff] %vm22_vm0, %v1734_v47 }
 0x256   :  { %1799 = vst.msk [vmem:[%s4093_s4 + $0x158] sm:$0xff] %vm22_vm0, %v1735_v61  ;;  %1800 = vst.msk [vmem:[%s4093_s4 + $0x160] sm:$0xff] %vm22_vm0, %v1736_v38 }
 0x257   :  { %1801 = vst.msk [vmem:[%s4093_s4 + $0x168] sm:$0xff] %vm22_vm0, %v1737_v12  ;;  %1802 = vst.msk [vmem:[%s4093_s4 + $0x170] sm:$0xff] %vm22_vm0, %v1738_v25 }
 0x258   :  { %1803 = vst.msk [vmem:[%s4093_s4 + $0x178] sm:$0xff] %vm22_vm0, %v1739_v1  ;;  %1804 = vst.msk [vmem:[%s4093_s4 + $0x180] sm:$0xff] %vm22_vm0, %v1740_v27 }
 0x259   :  { %1805 = vst.msk [vmem:[%s4093_s4 + $0x188] sm:$0xff] %vm22_vm0, %v1741_v48  ;;  %1806 = vst.msk [vmem:[%s4093_s4 + $0x190] sm:$0xff] %vm22_vm0, %v1742_v22 }
 0x25a   :  { %1807 = vst.msk [vmem:[%s4093_s4 + $0x198] sm:$0xff] %vm22_vm0, %v1743_v36  ;;  %1808 = vst.msk [vmem:[%s4093_s4 + $0x1a0] sm:$0xff] %vm22_vm0, %v1744_v56 }
 0x25b   :  { %1809 = vst.msk [vmem:[%s4093_s4 + $0x1a8] sm:$0xff] %vm22_vm0, %v1745_v28  ;;  %1810 = vst.msk [vmem:[%s4093_s4 + $0x1b0] sm:$0xff] %vm22_vm0, %v1746_v42 }
 0x25c   :  { %1811 = vst.msk [vmem:[%s4093_s4 + $0x1b8] sm:$0xff] %vm22_vm0, %v1747_v15  ;;  %1812 = vst.msk [vmem:[%s4093_s4 + $0x1c0] sm:$0xff] %vm22_vm0, %v1748_v51 }
 0x25d   :  { %1813 = vst.msk [vmem:[%s4093_s4 + $0x1c8] sm:$0xff] %vm22_vm0, %v1749_v24  ;;  %1814 = vst.msk [vmem:[%s4093_s4 + $0x1d0] sm:$0xff] %vm22_vm0, %v1750_v9 }
 0x25e   :  { %1815 = vst.msk [vmem:[%s4093_s4 + $0x1d8] sm:$0xff] %vm22_vm0, %v1751_v41  ;;  %1816 = vst.msk [vmem:[%s4093_s4 + $0x1e0] sm:$0xff] %vm22_vm0, %v1752_v60 }
 0x25f   :  { %1817 = vst.msk [vmem:[%s4093_s4 + $0x1e8] sm:$0xff] %vm22_vm0, %v1753_v4  ;;  %1818 = vst.msk [vmem:[%s4093_s4 + $0x1f0] sm:$0xff] %vm22_vm0, %v1754_v0 }
 0x260   :  { %1819 = vst.msk [vmem:[%s4093_s4 + $0x1f8] sm:$0xff] %vm22_vm0, %v1755_v6 }

// kernel: _lambda_.23
= control target key start
LH: loop header
LB: loop body
LE: loop exit
PB: predicated region body
PF: predicated region fallthrough
CT: control target
= control target key end

     0   :  { %s1301_s18 = smov 0   ;;  %s1303_s19 = smov 0   ;;  %s1740_s0 = inlined_call_operand.vmem [shape: bf16[128,640], index: 0, kind: input, shape index: {}]   ;;  %s1741_s1 = inlined_call_operand.vmem [shape: bf16[640,64], index: 1, kind: input, shape index: {}]   ;;  %s1742_s2 = inlined_call_operand.vmem [shape: f32[1,64], index: 2, kind: input, shape index: {}]   ;;  %s1743_s3 = inlined_call_operand.vmem [shape: f32[1,64], index: 3, kind: input, shape index: {}]   ;;  %s1744_s4 = inlined_call_operand.vmem [shape: f32[128,64], index: 4, kind: input, shape index: {}]   ;;  %s1745_s5 = inlined_call_operand.vmem [shape: f32[128,64], index: 5, kind: output, shape index: {}]  }
   0x1   :  { %s1305_s20 = smov 0   ;;  %s1307_s21 = smov 0  }
   0x2   :  { %s1309_s22 = smov 0  }
   0x3 LB: > { %s24_s23 = sadd.s32 1, %s1264_s21  ;;  %p41_p1 = scmp.ne.s32.totalorder %s1256_s19, %s1252_s18  ;;  %s1268_s22 = sphi %s1309_s22, %s15_s22   ;;  %s1264_s21 = sphi %s1307_s21, %s1749_s21   ;;  %s1260_s20 = sphi %s1305_s20, %s1748_s20   ;;  %s1256_s19 = sphi %s1303_s19, %s1747_s19   ;;  %s1252_s18 = sphi %s1301_s18, %s1746_s18  }
   0x4   : > { %p25_p0 = scmp.ge.s32.totalorder %s24_s23, 5  ;;  %p42_p2 = scmp.eq.s32.totalorder %s1268_s22, 0 }
   0x5   : > { %s34_s25 = sadd.s32 1, %s1256_s19  ;;  %p1078_p5 = scmp.ge.s32.totalorder %s1268_s22, 5 }
   0x6   : > { %s1751_s23 = smov (%p25_p0, %s24_s23), 0  ;;  %p43_p3 = por %p42_p2, %p41_p1 }
   0x7   : > { %s31_s24 = ssub.s32 %s1264_s21, %s1751_s23  ;;  %218 = sbr.rel (%p1078_p5) target bundleno = 28 (0x1c), region = 28 }
   0x8   : > { %p32_p4 = scmp.eq.s32.totalorder %s31_s24, 0 }
   0xa   : > { %s1336_s26 = scalar_select %p32_p4, %s1256_s19, %s34_s25  }
   0xe   : > { %221 = sbr.rel (!%p43_p3) target bundleno = 28 (0x1c), region = 32  ;;  %s223_s27 = sand.u32 (%p43_p3), 1, %s1256_s19  }
   0xf   : > { %s1080_s28 = sshll.u32 (%p43_p3), %s1264_s21, 2  ;;  %s1079_s29 = sshll.u32 (%p43_p3), %s223_s27, 6 }
  0x10   : > { %s1344_s7 = scalar_lea.vmem (%p43_p3), %s1740_s0, %s1080_s28  ;;  %s225_s8 = scalar_lea.vmem (%p43_p3), [#allocation3], %s1079_s29 }
  0x11   : > { %v243_v0 = vld [vmem:[%s1344_s7] sm:$0xf] (%p43_p3)  ;;  %v245_v1 = vld [vmem:[%s1344_s7 + $0x14] sm:$0xf] (%p43_p3)  ;;  %v247_v2 = vld [vmem:[%s1344_s7 + $0x28] sm:$0xf] (%p43_p3) }
  0x12   : > { %244 = vst [vmem:[%s225_s8] sm:$0xf] (%p43_p3), %v243_v0  ;;  %246 = vst [vmem:[%s225_s8 + $0x4] sm:$0xf] (%p43_p3), %v245_v1  ;;  %v249_v3 = vld [vmem:[%s1344_s7 + $0x3c] sm:$0xf] (%p43_p3) }
  0x13   : > { %v251_v4 = vld [vmem:[%s1344_s7 + $0x50] sm:$0xf] (%p43_p3)  ;;  %248 = vst [vmem:[%s225_s8 + $0x8] sm:$0xf] (%p43_p3), %v247_v2  ;;  %250 = vst [vmem:[%s225_s8 + $0xc] sm:$0xf] (%p43_p3), %v249_v3 }
  0x14   : > { %252 = vst [vmem:[%s225_s8 + $0x10] sm:$0xf] (%p43_p3), %v251_v4  ;;  %v253_v5 = vld [vmem:[%s1344_s7 + $0x64] sm:$0xf] (%p43_p3)  ;;  %v255_v6 = vld [vmem:[%s1344_s7 + $0x78] sm:$0xf] (%p43_p3) }
  0x15   : > { %v257_v7 = vld [vmem:[%s1344_s7 + $0x8c] sm:$0xf]  ;;  %254 = vst [vmem:[%s225_s8 + $0x14] sm:$0xf] %v253_v5  ;;  %256 = vst [vmem:[%s225_s8 + $0x18] sm:$0xf] %v255_v6 }
  0x16   : > { %258 = vst [vmem:[%s225_s8 + $0x1c] sm:$0xf] %v257_v7  ;;  %v259_v8 = vld [vmem:[%s1344_s7 + $0xa0] sm:$0xf]  ;;  %v261_v9 = vld [vmem:[%s1344_s7 + $0xb4] sm:$0xf] }
  0x17   : > { %v263_v10 = vld [vmem:[%s1344_s7 + $0xc8] sm:$0xf]  ;;  %260 = vst [vmem:[%s225_s8 + $0x20] sm:$0xf] %v259_v8  ;;  %262 = vst [vmem:[%s225_s8 + $0x24] sm:$0xf] %v261_v9 }
  0x18   : > { %264 = vst [vmem:[%s225_s8 + $0x28] sm:$0xf] %v263_v10  ;;  %v265_v11 = vld [vmem:[%s1344_s7 + $0xdc] sm:$0xf]  ;;  %v267_v12 = vld [vmem:[%s1344_s7 + $0xf0] sm:$0xf] }
  0x19   : > { %v269_v13 = vld [vmem:[%s1344_s7 + $0x104] sm:$0xf]  ;;  %266 = vst [vmem:[%s225_s8 + $0x2c] sm:$0xf] %v265_v11  ;;  %268 = vst [vmem:[%s225_s8 + $0x30] sm:$0xf] %v267_v12 }
  0x1a   : > { %270 = vst [vmem:[%s225_s8 + $0x34] sm:$0xf] %v269_v13  ;;  %v271_v14 = vld [vmem:[%s1344_s7 + $0x118] sm:$0xf]  ;;  %v273_v15 = vld [vmem:[%s1344_s7 + $0x12c] sm:$0xf] }
  0x1b   : > { %272 = vst [vmem:[%s225_s8 + $0x38] sm:$0xf] %v271_v14  ;;  %274 = vst [vmem:[%s225_s8 + $0x3c] sm:$0xf] %v273_v15 }
  0x1c PF: > { %p1081_p6 = scmp.ge.s32.totalorder %s1268_s22, 1  ;;  %p340_p7 = scmp.lt.s32.totalorder %s1268_s22, 6 }
  0x1e   : > { %p341_p8 = pnand %p1081_p6, %p340_p7 }
  0x1f   : > { %s347_s9 = sand.u32 (!%p341_p8), 1, %s1252_s18   ;;  %s1083_s10 = sshll.u32 (!%p341_p8), %s1260_s20, 4 }
  0x20   : > { %344 = sbr.rel (%p341_p8) target bundleno = 396 (0x18c), region = 77  ;;  %s1082_s11 = sshll.u32 (!%p341_p8), %s347_s9, 6 }
  0x21   : > { %p392_p9 = scmp.lt.s32.totalorder (!%p341_p8), %s1083_s10, 79  ;;  %s1371_s16 = scalar_lea.vmem (!%p341_p8), [#allocation3], %s1082_s11 }
  0x22   : > { %p1085_p10 = scmp.ne.s32.totalorder (!%p341_p8), %s1260_s20, 0 }
  0x27   : > { %s1753_s10 = smov (!%p392_p9, %s1083_s10), 79  ;;  %418 = sbr.rel (%p1085_p10) target bundleno = 49 (0x31), region = 85 }
  0x28   : > { %s1084_s12 = sshll.u32 %s1753_s10, 2  ;;  %vm419_vm0 = vcmask (!%p1085_p10), 523264   ;;  %v1270_v16 = vmov (!%p1085_p10), 0.0  }
  0x29   : > { %s1369_s15 = scalar_lea.vmem %s1741_s1, %s1084_s12  ;;  %420 = vst.msk [vmem:[#allocation2] sm:$0xff] (!%p1085_p10), %vm419_vm0, %v1270_v16  ;;  %421 = vst.msk [vmem:[#allocation2 + $0x8] sm:$0xff] (!%p1085_p10), %vm419_vm0, %v1270_v16 }
  0x2a   : > { %422 = vst.msk [vmem:[#allocation2 + $0x10] sm:$0xff] (!%p1085_p10), %vm419_vm0, %v1270_v16  ;;  %423 = vst.msk [vmem:[#allocation2 + $0x18] sm:$0xff] (!%p1085_p10), %vm419_vm0, %v1270_v16 }
  0x2b   : > { %424 = vst.msk [vmem:[#allocation2 + $0x20] sm:$0xff] (!%p1085_p10), %vm419_vm0, %v1270_v16  ;;  %425 = vst.msk [vmem:[#allocation2 + $0x28] sm:$0xff] (!%p1085_p10), %vm419_vm0, %v1270_v16 }
  0x2c   : > { %426 = vst.msk [vmem:[#allocation2 + $0x30] sm:$0xff] (!%p1085_p10), %vm419_vm0, %v1270_v16  ;;  %427 = vst.msk [vmem:[#allocation2 + $0x38] sm:$0xff] (!%p1085_p10), %vm419_vm0, %v1270_v16 }
  0x2d   : > { %428 = vst.msk [vmem:[#allocation2 + $0x40] sm:$0xff] (!%p1085_p10), %vm419_vm0, %v1270_v16  ;;  %429 = vst.msk [vmem:[#allocation2 + $0x48] sm:$0xff] (!%p1085_p10), %vm419_vm0, %v1270_v16 }
  0x2e   : > { %430 = vst.msk [vmem:[#allocation2 + $0x50] sm:$0xff] %vm419_vm0, %v1270_v16  ;;  %431 = vst.msk [vmem:[#allocation2 + $0x58] sm:$0xff] %vm419_vm0, %v1270_v16 }
  0x2f   : > { %432 = vst.msk [vmem:[#allocation2 + $0x60] sm:$0xff] %vm419_vm0, %v1270_v16  ;;  %433 = vst.msk [vmem:[#allocation2 + $0x68] sm:$0xff] %vm419_vm0, %v1270_v16 }
  0x30   : > { %434 = vst.msk [vmem:[#allocation2 + $0x70] sm:$0xff] %vm419_vm0, %v1270_v16  ;;  %435 = vst.msk [vmem:[#allocation2 + $0x78] sm:$0xff] %vm419_vm0, %v1270_v16 }
  0x31 PF: > { %v1212_v17 = vld [vmem:[%s1369_s15] sm:$0xff]   ;;  %v1213_v18 = vld [vmem:[%s1369_s15 + $0x8] sm:$0xff]   ;;  %v1214_v19 = vld [vmem:[%s1369_s15 + $0x10] sm:$0xff]   ;;  %vm693_vm1 = vcmask 523264   ;;  %p1102_p11 = scmp.ne.s32.totalorder %s1260_s20, 4 }
  0x32   : > { %1123 = vmatprep.subr.bf16.mxu0 %v1212_v17  ;;  %1155 = vmatprep.subr.bf16.mxu1 %v1212_v17  ;;  %v1215_v20 = vld [vmem:[%s1369_s15 + $0x18] sm:$0xff]   ;;  %v1220_v21 = vld [vmem:[%s1371_s16] sm:$0xff]   ;;  %v1217_v24 = vld [vmem:[%s1369_s15 + $0x28] sm:$0xff]  }
  0x33   : > { %1124 = vmatpush3.bf16.msra.mxu0 %v1212_v17  ;;  %1163 = vmatpush3.bf16.msra.mxu1 %v1212_v17  ;;  %v1221_v22 = vld [vmem:[%s1371_s16 + $0x20] sm:$0xff]   ;;  %v1218_v25 = vld [vmem:[%s1369_s15 + $0x30] sm:$0xff]   ;;  %v1219_v26 = vld [vmem:[%s1369_s15 + $0x38] sm:$0xff]  }
  0x34   : > { %1125 = vmatprep.subr.bf16.mxu0 %v1213_v18  ;;  %1156 = vmatprep.subr.bf16.mxu1 %v1213_v18  ;;  %v1216_v23 = vld [vmem:[%s1369_s15 + $0x20] sm:$0xff]   ;;  %v1222_v27 = vld [vmem:[%s1371_s16 + $0x8] sm:$0xff]   ;;  %v1224_v29 = vld [vmem:[%s1371_s16 + $0x10] sm:$0xff]  }
  0x35   : > { %1139 = vmatprep.mubr.bf16.mxu0 %v1220_v21  ;;  %1147 = vmatprep.mubr.bf16.mxu1 %v1221_v22  ;;  %v1223_v28 = vld [vmem:[%s1371_s16 + $0x28] sm:$0xff]   ;;  %v1225_v30 = vld [vmem:[%s1371_s16 + $0x30] sm:$0xff]   ;;  %v1226_v31 = vld [vmem:[%s1371_s16 + $0x18] sm:$0xff]  }
  0x36   : > { %v1227_v32 = vld [vmem:[%s1371_s16 + $0x38] sm:$0xff]   ;;  %v438_v33 = vld [vmem:[#allocation2 + $0x10] sm:$0xff]  ;;  %v436_v35 = vld [vmem:[#allocation2] sm:$0xff] }
  0x37   : > { %1126 = vmatpush3.bf16.msra.mxu0 %v1213_v18  ;;  %1164 = vmatpush3.bf16.msra.mxu1 %v1213_v18  ;;  %v446_v34 = vld [vmem:[#allocation2 + $0x50] sm:$0xff]  ;;  %v444_v36 = vld [vmem:[#allocation2 + $0x40] sm:$0xff]  ;;  %v439_v39 = vld [vmem:[#allocation2 + $0x18] sm:$0xff] }
  0x38   : > { %1127 = vmatprep.subr.bf16.mxu0 %v1214_v19  ;;  %1157 = vmatprep.subr.bf16.mxu1 %v1214_v19  ;;  %v447_v40 = vld [vmem:[#allocation2 + $0x58] sm:$0xff]  ;;  %v437_v45 = vld [vmem:[#allocation2 + $0x8] sm:$0xff]  ;;  %v442_v57 = vld [vmem:[#allocation2 + $0x30] sm:$0xff] }
  0x39   : > { %v445_v46 = vld [vmem:[#allocation2 + $0x48] sm:$0xff]  ;;  %v450_v58 = vld [vmem:[#allocation2 + $0x70] sm:$0xff]  ;;  %v440_v59 = vld [vmem:[#allocation2 + $0x20] sm:$0xff] }
  0x3a   : > { %v448_v60 = vld [vmem:[#allocation2 + $0x60] sm:$0xff]  ;;  %v443_v63 = vld [vmem:[#allocation2 + $0x38] sm:$0xff]  ;;  %v441_v5 = vld [vmem:[#allocation2 + $0x28] sm:$0xff] }
  0x3b   : > { %1128 = vmatpush3.bf16.msra.mxu0 %v1214_v19  ;;  %1165 = vmatpush3.bf16.msra.mxu1 %v1214_v19  ;;  %v451_v0 = vld [vmem:[#allocation2 + $0x78] sm:$0xff]  ;;  %v449_v6 = vld [vmem:[#allocation2 + $0x68] sm:$0xff] }
  0x3c   : > { %1129 = vmatprep.subr.bf16.mxu0 %v1215_v20  ;;  %1158 = vmatprep.subr.bf16.mxu1 %v1215_v20 }
  0x3f   : > { %1130 = vmatpush3.bf16.msra.mxu0 %v1215_v20  ;;  %1166 = vmatpush3.bf16.msra.mxu1 %v1215_v20 }
  0x40   : > { %1131 = vmatprep.subr.bf16.mxu0 %v1216_v23  ;;  %1159 = vmatprep.subr.bf16.mxu1 %v1216_v23 }
  0x43   : > { %1132 = vmatpush3.bf16.msra.mxu0 %v1216_v23  ;;  %1167 = vmatpush3.bf16.msra.mxu1 %v1216_v23 }
  0x44   : > { %1133 = vmatprep.subr.bf16.mxu0 %v1217_v24  ;;  %1160 = vmatprep.subr.bf16.mxu1 %v1217_v24 }
  0x47   : > { %1134 = vmatpush3.bf16.msra.mxu0 %v1217_v24  ;;  %1168 = vmatpush3.bf16.msra.mxu1 %v1217_v24 }
  0x48   : > { %1135 = vmatprep.subr.bf16.mxu0 %v1218_v25  ;;  %1161 = vmatprep.subr.bf16.mxu1 %v1218_v25 }
  0x4b   : > { %1136 = vmatpush3.bf16.msra.mxu0 %v1218_v25  ;;  %1169 = vmatpush3.bf16.msra.mxu1 %v1218_v25 }
  0x4c   : > { %1137 = vmatprep.subr.bf16.mxu0 %v1219_v26  ;;  %1162 = vmatprep.subr.bf16.mxu1 %v1219_v26 }
  0x4f   : > { %1138 = vmatpush3.bf16.msra.mxu0 %v1219_v26  ;;  %1170 = vmatpush3.bf16.msra.mxu1 %v1219_v26 }
  0x52   : > { %1140 = vmatmul.mubr.bf16.vlgmr.msra.gmra.mrb[0].mxu0 %v1222_v27  ;;  %1148 = vmatmul.mubr.bf16.vlgmr.msra.gmra.mrb[0].mxu1 %v1223_v28 }
  0x53   : > { %1143 = vmatprep.mubr.bf16.mxu0 %v1224_v29  ;;  %1151 = vmatprep.mubr.bf16.mxu1 %v1225_v30 }
  0x5a   : > { %1144 = vmatmul.mubr.bf16.gmra.mrb[4].mxu0 %v1226_v31  ;;  %1152 = vmatmul.mubr.bf16.gmra.mrb[4].mxu1 %v1227_v32 }
 0x125   : > { %v1141_v37 = vpop.f32.mrb[0].mxu0  ;;  %v1149_v38 = vpop.f32.mrb[0].mxu1 }
 0x126   : > { %v679_v41 = vadd.f32 %v1141_v37, %v438_v33  ;;  %v687_v42 = vadd.f32 %v1149_v38, %v446_v34  ;;  %v614_v43 = vpop.f32.mrb[1].mxu0  ;;  %v646_v44 = vpop.f32.mrb[1].mxu1 }
 0x127   : > { %v677_v47 = vadd.f32 %v614_v43, %v436_v35  ;;  %v685_v48 = vadd.f32 %v646_v44, %v444_v36  ;;  %v1142_v49 = vpop.f32.mrb[2].mxu0  ;;  %v1150_v50 = vpop.f32.mrb[2].mxu1 }
 0x128   : > { %696 = vst.msk [vmem:[#allocation2 + $0x10] sm:$0xff] %vm693_vm1, %v679_v41  ;;  %704 = vst.msk [vmem:[#allocation2 + $0x50] sm:$0xff] %vm693_vm1, %v687_v42  ;;  %v680_v51 = vadd.f32 %v1142_v49, %v439_v39  ;;  %v688_v52 = vadd.f32 %v1150_v50, %v447_v40  ;;  %v617_v53 = vpop.f32.mrb[3].mxu0  ;;  %v649_v54 = vpop.f32.mrb[3].mxu1 }
 0x129   : > { %694 = vst.msk [vmem:[#allocation2] sm:$0xff] %vm693_vm1, %v677_v47  ;;  %702 = vst.msk [vmem:[#allocation2 + $0x40] sm:$0xff] %vm693_vm1, %v685_v48  ;;  %v678_v55 = vadd.f32 %v617_v53, %v437_v45  ;;  %v686_v56 = vadd.f32 %v649_v54, %v445_v46 }
 0x12a   : > { %697 = vst.msk [vmem:[#allocation2 + $0x18] sm:$0xff] %vm693_vm1, %v680_v51  ;;  %705 = vst.msk [vmem:[#allocation2 + $0x58] sm:$0xff] %vm693_vm1, %v688_v52 }
 0x12b   : > { %695 = vst.msk [vmem:[#allocation2 + $0x8] sm:$0xff] %vm693_vm1, %v678_v55  ;;  %703 = vst.msk [vmem:[#allocation2 + $0x48] sm:$0xff] %vm693_vm1, %v686_v56 }
 0x12d   : > { %v1145_v61 = vpop.f32.mrb[4].mxu0  ;;  %v1153_v62 = vpop.f32.mrb[4].mxu1  ;;  %713 = sbr.rel (%p1102_p11) target bundleno = 396 (0x18c), region = 89 }
 0x12e   : > { %v683_v1 = vadd.f32 %v1145_v61, %v442_v57  ;;  %v691_v2 = vadd.f32 %v1153_v62, %v450_v58  ;;  %v630_v3 = vpop.f32.mrb[5].mxu0  ;;  %v662_v4 = vpop.f32.mrb[5].mxu1 }
 0x12f   : > { %v681_v7 = vadd.f32 %v630_v3, %v440_v59  ;;  %v689_v8 = vadd.f32 %v662_v4, %v448_v60  ;;  %v1146_v9 = vpop.f32.mrb[6].mxu0  ;;  %v1154_v10 = vpop.f32.mrb[6].mxu1  ;;  %v1427_v19 = vld [vmem:[#allocation2 + $0x10] sm:$0xff] (!%p1102_p11) }
 0x130   : > { %700 = vst.msk [vmem:[#allocation2 + $0x30] sm:$0xff] %vm693_vm1, %v683_v1  ;;  %708 = vst.msk [vmem:[#allocation2 + $0x70] sm:$0xff] %vm693_vm1, %v691_v2  ;;  %v684_v11 = vadd.f32 %v1146_v9, %v443_v63  ;;  %v692_v12 = vadd.f32 %v1154_v10, %v451_v0  ;;  %v633_v13 = vpop.f32.mrb[7].mxu0  ;;  %v665_v14 = vpop.f32.mrb[7].mxu1  ;;  %v1423_v17 = vld [vmem:[#allocation2] sm:$0xff] (!%p1102_p11)  ;;  %v733_v23 = vsel (!%p1102_p11), %vm693_vm1, %v1427_v19, 0.0  ;;  %v770_v34 = vmul.f32 (!%p1102_p11), %v1427_v19, %v1427_v19 }
 0x131   : > { %698 = vst.msk [vmem:[#allocation2 + $0x20] sm:$0xff] %vm693_vm1, %v681_v7  ;;  %706 = vst.msk [vmem:[#allocation2 + $0x60] sm:$0xff] %vm693_vm1, %v689_v8  ;;  %v682_v15 = vadd.f32 %v633_v13, %v441_v5  ;;  %v690_v16 = vadd.f32 %v665_v14, %v449_v6  ;;  %v1429_v20 = vld [vmem:[#allocation2 + $0x18] sm:$0xff] (!%p1102_p11)  ;;  %v730_v21 = vsel (!%p1102_p11), %vm693_vm1, %v1423_v17, 0.0  ;;  %v768_v32 = vmul.f32 (!%p1102_p11), %v1423_v17, %v1423_v17  ;;  %v1463_v41 = vld [vmem:[#allocation2 + $0x40] sm:$0xff] (!%p1102_p11) }
 0x132   : > { %701 = vst.msk [vmem:[#allocation2 + $0x38] sm:$0xff] %vm693_vm1, %v684_v11  ;;  %709 = vst.msk [vmem:[#allocation2 + $0x78] sm:$0xff] %vm693_vm1, %v692_v12  ;;  %v1425_v18 = vld [vmem:[#allocation2 + $0x8] sm:$0xff] (!%p1102_p11)  ;;  %v735_v26 = vsel (!%p1102_p11), %vm693_vm1, %v1429_v20, 0.0  ;;  %v771_v38 = vmul.f32 (!%p1102_p11), %v1429_v20, %v1429_v20  ;;  %v787_v45 = vsel (!%p1102_p11), %vm693_vm1, %v770_v34, 0.0  ;;  %v745_v52 = vsel (!%p1102_p11), %vm693_vm1, %v1463_v41, 0.0 }
 0x133   : > { %699 = vst.msk [vmem:[#allocation2 + $0x28] sm:$0xff] %vm693_vm1, %v682_v15  ;;  %707 = vst.msk [vmem:[#allocation2 + $0x68] sm:$0xff] %vm693_vm1, %v690_v16  ;;  %v731_v22 = vsel (!%p1102_p11), %vm693_vm1, %v1425_v18, 0.0  ;;  %v769_v33 = vmul.f32 (!%p1102_p11), %v1425_v18, %v1425_v18  ;;  %v784_v43 = vsel (!%p1102_p11), %vm693_vm1, %v768_v32, 0.0  ;;  %v1470_v48 = vld [vmem:[#allocation2 + $0x48] sm:$0xff] (!%p1102_p11)  ;;  %v1477_v54 = vld [vmem:[#allocation2 + $0x50] sm:$0xff] (!%p1102_p11)  ;;  %v776_v4 = vmul.f32 (!%p1102_p11), %v1463_v41, %v1463_v41 }
 0x134   : > { %v732_v25 = vadd.f32 %v731_v22, %v730_v21  ;;  %v789_v51 = vsel %vm693_vm1, %v771_v38, 0.0  ;;  %v747_v58 = vsel %vm693_vm1, %v1470_v48, 0.0  ;;  %v1484_v60 = vld [vmem:[#allocation2 + $0x58] sm:$0xff]  ;;  %v749_v0 = vsel %vm693_vm1, %v1477_v54, 0.0 }
 0x135   : > { %v785_v44 = vsel %vm693_vm1, %v769_v33, 0.0  ;;  %v751_v6 = vsel %vm693_vm1, %v1484_v60, 0.0  ;;  %v777_v10 = vmul.f32 %v1470_v48, %v1470_v48  ;;  %v778_v16 = vmul.f32 %v1477_v54, %v1477_v54 }
 0x136   : > { %v734_v28 = vadd.f32 %v733_v23, %v732_v25  ;;  %v786_v47 = vadd.f32 %v785_v44, %v784_v43  ;;  %v799_v21 = vsel %vm693_vm1, %v776_v4, 0.0 }
 0x137   : > { %v1445_v30 = vld [vmem:[#allocation2 + $0x30] sm:$0xff] }
 0x138   : > { %v1437_v24 = vld [vmem:[#allocation2 + $0x20] sm:$0xff]  ;;  %v736_v31 = vadd.f32 %v735_v26, %v734_v28  ;;  %v741_v39 = vsel %vm693_vm1, %v1445_v30, 0.0  ;;  %v788_v53 = vadd.f32 %v787_v45, %v786_v47  ;;  %v774_v56 = vmul.f32 %v1445_v30, %v1445_v30  ;;  %v1505_v14 = vld [vmem:[#allocation2 + $0x70] sm:$0xff] }
 0x139   : > { %v737_v29 = vsel %vm693_vm1, %v1437_v24, 0.0  ;;  %v1455_v36 = vld [vmem:[#allocation2 + $0x38] sm:$0xff]  ;;  %v772_v40 = vmul.f32 %v1437_v24, %v1437_v24  ;;  %v1491_v2 = vld [vmem:[#allocation2 + $0x60] sm:$0xff]  ;;  %v779_v28 = vmul.f32 %v1484_v60, %v1484_v60  ;;  %v782_v45 = vmul.f32 %v1505_v14, %v1505_v14 }
 0x13a   : > { %v1441_v27 = vld [vmem:[#allocation2 + $0x28] sm:$0xff]  ;;  %v738_v37 = vadd.f32 %v737_v29, %v736_v31  ;;  %v743_v46 = vsel %vm693_vm1, %v1455_v36, 0.0  ;;  %v790_v59 = vadd.f32 %v789_v51, %v788_v53  ;;  %v775_v62 = vmul.f32 %v1455_v36, %v1455_v36  ;;  %v1512_v25 = vld [vmem:[#allocation2 + $0x78] sm:$0xff] }
 0x13b   : > { %v739_v35 = vsel %vm693_vm1, %v1441_v27, 0.0  ;;  %v773_v50 = vmul.f32 %v1441_v27, %v1441_v27  ;;  %v791_v57 = vsel %vm693_vm1, %v772_v40, 0.0  ;;  %v795_v5 = vsel %vm693_vm1, %v774_v56, 0.0  ;;  %v1498_v8 = vld [vmem:[#allocation2 + $0x68] sm:$0xff] }
 0x13c   : > { %v740_v42 = vadd.f32 %v739_v35, %v738_v37  ;;  %v792_v1 = vadd.f32 %v791_v57, %v790_v59  ;;  %v797_v11 = vsel %vm693_vm1, %v775_v62, 0.0  ;;  %v753_v12 = vsel %vm693_vm1, %v1491_v2, 0.0 }
 0x13d   : > { %v793_v63 = vsel %vm693_vm1, %v773_v50, 0.0  ;;  %v755_v22 = vsel %vm693_vm1, %v1498_v8, 0.0  ;;  %v801_v29 = vsel %vm693_vm1, %v777_v10, 0.0  ;;  %v757_v31 = vsel %vm693_vm1, %v1505_v14, 0.0 }
 0x13e   : > { %v742_v49 = vadd.f32 %v741_v39, %v740_v42  ;;  %v794_v7 = vadd.f32 %v793_v63, %v792_v1  ;;  %v780_v34 = vmul.f32 %v1491_v2, %v1491_v2  ;;  %v803_v35 = vsel %vm693_vm1, %v778_v16, 0.0 }
 0x13f   : > { %v759_v37 = vsel %vm693_vm1, %v1512_v25, 0.0  ;;  %v781_v40 = vmul.f32 %v1498_v8, %v1498_v8  ;;  %v805_v42 = vsel %vm693_vm1, %v779_v28, 0.0  ;;  %v783_v50 = vmul.f32 %v1512_v25, %v1512_v25 }
 0x140   : > { %v744_v55 = vadd.f32 %v743_v46, %v742_v49  ;;  %v796_v13 = vadd.f32 %v795_v5, %v794_v7  ;;  %v807_v46 = vsel %vm693_vm1, %v780_v34, 0.0  ;;  %v846_v16 = vlaneseq }
 0x141   : > { %v809_v51 = vsel %vm693_vm1, %v781_v40, 0.0 }
 0x142   : > { %v746_v61 = vadd.f32 %v745_v52, %v744_v55  ;;  %v798_v23 = vadd.f32 %v797_v11, %v796_v13  ;;  %v811_v55 = vsel %vm693_vm1, %v782_v45, 0.0 }
 0x144   : > { %v748_v3 = vadd.f32 %v747_v58, %v746_v61  ;;  %v800_v32 = vadd.f32 %v799_v21, %v798_v23  ;;  %v813_v58 = vsel %vm693_vm1, %v783_v50, 0.0  ;;  %v847_v21 = vshrl.u32 %v846_v16, 7 }
 0x146   : > { %v750_v9 = vadd.f32 %v749_v0, %v748_v3  ;;  %v802_v38 = vadd.f32 %v801_v29, %v800_v32  ;;  %v848_v23 = vsub.s32 0, %v847_v21  ;;  %v898_v21 = vld [vmem:[%s1744_s4 + $0x40] sm:$0xff] }
 0x148   : > { %v752_v15 = vadd.f32 %v751_v6, %v750_v9  ;;  %v804_v43 = vadd.f32 %v803_v35, %v802_v38 }
 0x14a   : > { %v754_v26 = vadd.f32 %v753_v12, %v752_v15  ;;  %v806_v47 = vadd.f32 %v805_v42, %v804_v43  ;;  %v894_v43 = vld [vmem:[%s1744_s4 + $0x20] sm:$0xff] }
 0x14c   : > { %v756_v33 = vadd.f32 %v755_v22, %v754_v26  ;;  %v808_v52 = vadd.f32 %v807_v46, %v806_v47  ;;  %v841_v22 = vld [vmem:[%s1742_s2] sm:$0x1] }
 0x14e   : > { %v758_v39 = vadd.f32 %v757_v31, %v756_v33  ;;  %v810_v56 = vadd.f32 %v809_v51, %v808_v52  ;;  %v895_v52 = vld [vmem:[%s1744_s4 + $0x28] sm:$0xff] }
 0x150   : > { %v760_v44 = vadd.f32 %v759_v37, %v758_v39  ;;  %v812_v59 = vadd.f32 %v811_v55, %v810_v56  ;;  %v897_v55 = vld [vmem:[%s1744_s4 + $0x38] sm:$0xff] }
 0x152   : > { %v761_v49 = vrot.slane %v760_v44, 4  ;;  %v814_v62 = vadd.f32 %v813_v58, %v812_v59 }
 0x154   : > { %v762_v53 = vadd.f32 %v761_v49, %v760_v44  ;;  %v815_v0 = vrot.slane %v814_v62, 4 }
 0x156   : > { %v763_v57 = vrot.slane %v762_v53, 2  ;;  %v816_v3 = vadd.f32 %v815_v0, %v814_v62 }
 0x158   : > { %v764_v61 = vadd.f32 %v763_v57, %v762_v53  ;;  %v817_v4 = vrot.slane %v816_v3, 2  ;;  %v896_v53 = vld [vmem:[%s1744_s4 + $0x30] sm:$0xff] }
 0x15a   : > { %v765_v63 = vrot.slane %v764_v61, 1  ;;  %v818_v6 = vadd.f32 %v817_v4, %v816_v3 }
 0x15c   : > { %v766_v1 = vadd.f32 %v765_v63, %v764_v61  ;;  %v819_v7 = vrot.slane %v818_v6, 1 }
 0x15e   : > { %v1535_v5 = vmul.f32 0.0078125, %v766_v1  ;;  %v820_v9 = vadd.f32 %v819_v7, %v818_v6 }
 0x160   : > { %v822_v10 = vmul.f32 %v1535_v5, %v1535_v5  ;;  %v821_v11 = vmul.f32 0.0078125, %v820_v9  ;;  %v825_v28 = vsub.f32 %v1423_v17, %v1535_v5  ;;  %v826_v29 = vsub.f32 %v1425_v18, %v1535_v5 }
 0x161   : > { %v827_v32 = vsub.f32 %v1427_v19, %v1535_v5  ;;  %v828_v33 = vsub.f32 %v1429_v20, %v1535_v5  ;;  %v829_v34 = vsub.f32 %v1437_v24, %v1535_v5  ;;  %v830_v35 = vsub.f32 %v1441_v27, %v1535_v5  ;;  %v1571_v27 = vld [vmem:[%s1743_s3] ss:$0 sm:$0xff] }
 0x162   : > { %v823_v12 = vsub.f32 %v821_v11, %v822_v10  ;;  %v831_v37 = vsub.f32 %v1445_v30, %v1535_v5  ;;  %v832_v17 = vsub.f32 %v1455_v36, %v1535_v5  ;;  %v833_v18 = vsub.f32 %v1463_v41, %v1535_v5 }
 0x163   : > { %v834_v19 = vsub.f32 %v1470_v48, %v1535_v5  ;;  %v835_v20 = vsub.f32 %v1477_v54, %v1535_v5  ;;  %v836_v24 = vsub.f32 %v1484_v60, %v1535_v5  ;;  %v837_v30 = vsub.f32 %v1491_v2, %v1535_v5  ;;  %v890_v60 = vld [vmem:[%s1744_s4] sm:$0xff]  ;;  %v891_v2 = vld [vmem:[%s1744_s4 + $0x8] sm:$0xff] }
 0x164   : > { %v824_v13 = vmax.f32 %v823_v12, 0.0  ;;  %v838_v36 = vsub.f32 %v1498_v8, %v1535_v5  ;;  %v839_v41 = vsub.f32 %v1505_v14, %v1535_v5  ;;  %v840_v48 = vsub.f32 %v1512_v25, %v1535_v5  ;;  %v892_v14 = vld [vmem:[%s1744_s4 + $0x10] sm:$0xff]  ;;  %v893_v25 = vld [vmem:[%s1744_s4 + $0x18] sm:$0xff] }
 0x166   : > { %v842_v15 = vadd.f32 1e-05, %v824_v13 }
 0x168   : > { %1228 = vrsqrt.f32 %v842_v15 }
 0x172   : > { %v1229_v26 = vpop.eup %1228 }
 0x173   : > { %v844_v31 = vmul.f32 %v1229_v26, %v841_v22 }
 0x175   : > { %v1560_v38 = vrot.slane %v844_v31, %v848_v23  ;;  %v899_v23 = vld [vmem:[%s1744_s4 + $0x48] sm:$0xff]  ;;  %v901_v31 = vld [vmem:[%s1744_s4 + $0x58] sm:$0xff] }
 0x177   : > { %v851_v54 = vmul.f32 %v1560_v38, %v825_v28  ;;  %v852_v39 = vmul.f32 %v1560_v38, %v826_v29  ;;  %v853_v8 = vmul.f32 %v1560_v38, %v827_v32  ;;  %v854_v40 = vmul.f32 %v1560_v38, %v828_v33  ;;  %v900_v29 = vld [vmem:[%s1744_s4 + $0x50] sm:$0xff]  ;;  %v902_v33 = vld [vmem:[%s1744_s4 + $0x60] sm:$0xff] }
 0x178   : > { %v855_v42 = vmul.f32 %v1560_v38, %v829_v34  ;;  %v856_v44 = vmul.f32 %v1560_v38, %v830_v35  ;;  %v857_v45 = vmul.f32 %v1560_v38, %v831_v37  ;;  %v858_v46 = vmul.f32 %v1560_v38, %v832_v17 }
 0x179   : > { %v874_v47 = vadd.f32 %v1571_v27, %v851_v54  ;;  %v875_v49 = vadd.f32 %v1571_v27, %v852_v39  ;;  %v876_v50 = vadd.f32 %v1571_v27, %v853_v8  ;;  %v877_v51 = vadd.f32 %v1571_v27, %v854_v40 }
 0x17a   : > { %v878_v56 = vadd.f32 %v1571_v27, %v855_v42  ;;  %v879_v57 = vadd.f32 %v1571_v27, %v856_v44  ;;  %v880_v58 = vadd.f32 %v1571_v27, %v857_v45  ;;  %v881_v59 = vadd.f32 %v1571_v27, %v858_v46 }
 0x17b   : > { %v906_v61 = vadd.f32 %v890_v60, %v874_v47  ;;  %v907_v62 = vadd.f32 %v891_v2, %v875_v49  ;;  %v908_v63 = vadd.f32 %v892_v14, %v876_v50  ;;  %v909_v0 = vadd.f32 %v893_v25, %v877_v51 }
 0x17c   : > { %v910_v1 = vadd.f32 %v894_v43, %v878_v56  ;;  %v911_v3 = vadd.f32 %v895_v52, %v879_v57  ;;  %v912_v4 = vadd.f32 %v896_v53, %v880_v58  ;;  %v913_v5 = vadd.f32 %v897_v55, %v881_v59 }
 0x17d   : > { %v922_v6 = vmax.f32 %v906_v61, 0.0  ;;  %v923_v7 = vmax.f32 %v907_v62, 0.0  ;;  %v924_v9 = vmax.f32 %v908_v63, 0.0  ;;  %v925_v10 = vmax.f32 %v909_v0, 0.0 }
 0x17e   : > { %v926_v11 = vmax.f32 %v910_v1, 0.0  ;;  %v927_v12 = vmax.f32 %v911_v3, 0.0  ;;  %v928_v13 = vmax.f32 %v912_v4, 0.0  ;;  %v929_v15 = vmax.f32 %v913_v5, 0.0 }
 0x17f   : > { %938 = vst.msk [vmem:[%s1745_s5] sm:$0xff] %vm693_vm1, %v922_v6  ;;  %939 = vst.msk [vmem:[%s1745_s5 + $0x8] sm:$0xff] %vm693_vm1, %v923_v7  ;;  %v859_v16 = vmul.f32 %v1560_v38, %v833_v18  ;;  %v860_v22 = vmul.f32 %v1560_v38, %v834_v19  ;;  %v861_v26 = vmul.f32 %v1560_v38, %v835_v20 }
 0x180   : > { %940 = vst.msk [vmem:[%s1745_s5 + $0x10] sm:$0xff] %vm693_vm1, %v924_v9  ;;  %941 = vst.msk [vmem:[%s1745_s5 + $0x18] sm:$0xff] %vm693_vm1, %v925_v10  ;;  %v862_v28 = vmul.f32 %v1560_v38, %v836_v24  ;;  %v863_v32 = vmul.f32 %v1560_v38, %v837_v30  ;;  %v864_v34 = vmul.f32 %v1560_v38, %v838_v36  ;;  %v903_v24 = vld [vmem:[%s1744_s4 + $0x68] sm:$0xff]  ;;  %v904_v30 = vld [vmem:[%s1744_s4 + $0x70] sm:$0xff] }
 0x181   : > { %942 = vst.msk [vmem:[%s1745_s5 + $0x20] sm:$0xff] %vm693_vm1, %v926_v11  ;;  %943 = vst.msk [vmem:[%s1745_s5 + $0x28] sm:$0xff] %vm693_vm1, %v927_v12  ;;  %v865_v35 = vmul.f32 %v1560_v38, %v839_v41  ;;  %v866_v37 = vmul.f32 %v1560_v38, %v840_v48  ;;  %v882_v17 = vadd.f32 %v1571_v27, %v859_v16  ;;  %v905_v38 = vld [vmem:[%s1744_s4 + $0x78] sm:$0xff] }
 0x182   : > { %944 = vst.msk [vmem:[%s1745_s5 + $0x30] sm:$0xff] %vm693_vm1, %v928_v13  ;;  %945 = vst.msk [vmem:[%s1745_s5 + $0x38] sm:$0xff] %vm693_vm1, %v929_v15  ;;  %v883_v18 = vadd.f32 %v1571_v27, %v860_v22  ;;  %v884_v19 = vadd.f32 %v1571_v27, %v861_v26  ;;  %v885_v20 = vadd.f32 %v1571_v27, %v862_v28 }
 0x183   : > { %v886_v36 = vadd.f32 %v1571_v27, %v863_v32  ;;  %v887_v41 = vadd.f32 %v1571_v27, %v864_v34  ;;  %v888_v48 = vadd.f32 %v1571_v27, %v865_v35  ;;  %v889_v54 = vadd.f32 %v1571_v27, %v866_v37 }
 0x184   : > { %v914_v60 = vadd.f32 %v898_v21, %v882_v17  ;;  %v915_v39 = vadd.f32 %v899_v23, %v883_v18  ;;  %v916_v2 = vadd.f32 %v900_v29, %v884_v19  ;;  %v917_v8 = vadd.f32 %v901_v31, %v885_v20 }
 0x185   : > { %v918_v40 = vadd.f32 %v902_v33, %v886_v36  ;;  %v919_v14 = vadd.f32 %v903_v24, %v887_v41  ;;  %v920_v25 = vadd.f32 %v904_v30, %v888_v48  ;;  %v921_v42 = vadd.f32 %v905_v38, %v889_v54 }
 0x186   : > { %v930_v43 = vmax.f32 %v914_v60, 0.0  ;;  %v931_v44 = vmax.f32 %v915_v39, 0.0  ;;  %v932_v45 = vmax.f32 %v916_v2, 0.0  ;;  %v933_v46 = vmax.f32 %v917_v8, 0.0 }
 0x187   : > { %v934_v47 = vmax.f32 %v918_v40, 0.0  ;;  %v935_v49 = vmax.f32 %v919_v14, 0.0  ;;  %v936_v50 = vmax.f32 %v920_v25, 0.0  ;;  %v937_v51 = vmax.f32 %v921_v42, 0.0 }
 0x188   : > { %946 = vst.msk [vmem:[%s1745_s5 + $0x40] sm:$0xff] %vm693_vm1, %v930_v43  ;;  %947 = vst.msk [vmem:[%s1745_s5 + $0x48] sm:$0xff] %vm693_vm1, %v931_v44 }
 0x189   : > { %948 = vst.msk [vmem:[%s1745_s5 + $0x50] sm:$0xff] %vm693_vm1, %v932_v45  ;;  %949 = vst.msk [vmem:[%s1745_s5 + $0x58] sm:$0xff] %vm693_vm1, %v933_v46 }
 0x18a   : > { %950 = vst.msk [vmem:[%s1745_s5 + $0x60] sm:$0xff] %vm693_vm1, %v934_v47  ;;  %951 = vst.msk [vmem:[%s1745_s5 + $0x68] sm:$0xff] %vm693_vm1, %v935_v49 }
 0x18b   : > { %952 = vst.msk [vmem:[%s1745_s5 + $0x70] sm:$0xff] %vm693_vm1, %v936_v50  ;;  %953 = vst.msk [vmem:[%s1745_s5 + $0x78] sm:$0xff] %vm693_vm1, %v937_v51 }
 0x18c PF: > { %s15_s22 = sadd.s32 1, %s1268_s22   ;;  %s1746_s18 = smov %s1256_s19 }
 0x18d   : > { %p12_p12 = scmp.ge.s32.totalorder %s15_s22, 7   ;;  %s1747_s19 = smov %s1336_s26 }
 0x18e   : > { %s1748_s20 = smov %s1264_s21  ;;  %s1749_s21 = smov %s1751_s23 }
 0x18f   :  { %14 = sbr.rel (!%p12_p12) target bundleno = 3 (0x3), region = 136 }

// kernel: _lambda_.26
= control target key start
LH: loop header
LB: loop body
LE: loop exit
PB: predicated region body
PF: predicated region fallthrough
CT: control target
= control target key end

     0   :  { %s824_s15 = smov 0   ;;  %s826_s16 = smov 0   ;;  %s926_s0 = inlined_call_operand.vmem [shape: bf16[32,640], index: 0, kind: input, shape index: {}]   ;;  %s927_s1 = inlined_call_operand.vmem [shape: bf16[640,128], index: 1, kind: input, shape index: {}]   ;;  %s928_s2 = inlined_call_operand.vmem [shape: f32[1,128], index: 2, kind: input, shape index: {}]   ;;  %s929_s3 = inlined_call_operand.vmem [shape: f32[1,128], index: 3, kind: input, shape index: {}]   ;;  %s930_s4 = inlined_call_operand.vmem [shape: f32[32,128], index: 4, kind: output, shape index: {}]  }
   0x1   :  { %s828_s17 = smov 0   ;;  %s830_s18 = smov 0  }
   0x2   :  { %s832_s19 = smov 0  }
   0x3 LB: > { %s23_s20 = sadd.s32 1, %s792_s18  ;;  %p40_p1 = scmp.ne.s32.totalorder %s784_s16, %s780_s15  ;;  %s796_s19 = sphi %s832_s19, %s14_s19   ;;  %s792_s18 = sphi %s830_s18, %s934_s18   ;;  %s788_s17 = sphi %s828_s17, %s933_s17   ;;  %s784_s16 = sphi %s826_s16, %s932_s16   ;;  %s780_s15 = sphi %s824_s15, %s931_s15  }
   0x4   : > { %p24_p0 = scmp.ge.s32.totalorder %s23_s20, 5  ;;  %p41_p2 = scmp.eq.s32.totalorder %s796_s19, 0 }
   0x5   : > { %s33_s22 = sadd.s32 1, %s784_s16  ;;  %p652_p5 = scmp.ge.s32.totalorder %s796_s19, 5 }
   0x6   : > { %s936_s20 = smov (%p24_p0, %s23_s20), 0  ;;  %p42_p3 = por %p41_p2, %p40_p1 }
   0x7   : > { %s30_s21 = ssub.s32 %s792_s18, %s936_s20  ;;  %184 = sbr.rel (%p652_p5) target bundleno = 21 (0x15), region = 24 }
   0x8   : > { %p31_p4 = scmp.eq.s32.totalorder %s30_s21, 0 }
   0xa   : > { %s859_s23 = scalar_select %p31_p4, %s784_s16, %s33_s22  }
   0xe   : > { %187 = sbr.rel (!%p42_p3) target bundleno = 21 (0x15), region = 28  ;;  %s189_s24 = sand.u32 (%p42_p3), 1, %s784_s16  }
   0xf   : > { %s654_s25 = sshll.u32 (%p42_p3), %s792_s18, 2  ;;  %s653_s26 = sshll.u32 (%p42_p3), %s189_s24, 4 }
  0x10   : > { %s193_s29 = scalar_lea.vmem (%p42_p3), %s926_s0, %s654_s25  ;;  %s191_s30 = scalar_lea.vmem (%p42_p3), [#allocation3], %s653_s26 }
  0x11   : > { %v209_v0 = vld [vmem:[%s193_s29] sm:$0xf] (%p42_p3)  ;;  %v211_v1 = vld [vmem:[%s193_s29 + $0x14] sm:$0xf] (%p42_p3)  ;;  %v213_v2 = vld [vmem:[%s193_s29 + $0x28] sm:$0xf] (%p42_p3) }
  0x12   : > { %210 = vst [vmem:[%s191_s30] sm:$0xf] (%p42_p3), %v209_v0  ;;  %212 = vst [vmem:[%s191_s30 + $0x4] sm:$0xf] (%p42_p3), %v211_v1  ;;  %v215_v3 = vld [vmem:[%s193_s29 + $0x3c] sm:$0xf] (%p42_p3) }
  0x13   : > { %214 = vst [vmem:[%s191_s30 + $0x8] sm:$0xf] (%p42_p3), %v213_v2  ;;  %216 = vst [vmem:[%s191_s30 + $0xc] sm:$0xf] (%p42_p3), %v215_v3 }
  0x15 PF: > { %p655_p6 = scmp.ge.s32.totalorder %s796_s19, 1  ;;  %p258_p7 = scmp.lt.s32.totalorder %s796_s19, 6 }
  0x17   : > { %p259_p8 = pnand %p655_p6, %p258_p7 }
  0x18   : > { %s265_s5 = sand.u32 (!%p259_p8), 1, %s780_s15   ;;  %s657_s6 = sshll.u32 (!%p259_p8), %s788_s17, 4 }
  0x19   : > { %262 = sbr.rel (%p259_p8) target bundleno = 348 (0x15c), region = 73  ;;  %s871_s7 = sshll.u32 (!%p259_p8), %s265_s5, 4 }
  0x1a   : > { %p304_p9 = scmp.lt.s32.totalorder (!%p259_p8), %s657_s6, 79  ;;  %s267_s12 = scalar_lea.vmem (!%p259_p8), [#allocation3], %s871_s7 }
  0x1b   : > { %p659_p10 = scmp.ne.s32.totalorder (!%p259_p8), %s788_s17, 0 }
  0x20   : > { %s938_s6 = smov (!%p304_p9, %s657_s6), 79  ;;  %326 = sbr.rel (%p659_p10) target bundleno = 39 (0x27), region = 81 }
  0x21   : > { %s658_s8 = sshll.u32 %s938_s6, 2  ;;  %v798_v4 = vmov (!%p659_p10), 0.0  }
  0x22   : > { %s876_s11 = scalar_lea.vmem %s927_s1, %s658_s8  ;;  %327 = vst [vmem:[#allocation2] sm:$0xff] (!%p659_p10), %v798_v4  ;;  %328 = vst [vmem:[#allocation2 + $0x8] sm:$0xff] (!%p659_p10), %v798_v4 }
  0x23   : > { %329 = vst [vmem:[#allocation2 + $0x10] sm:$0xff] (!%p659_p10), %v798_v4  ;;  %330 = vst [vmem:[#allocation2 + $0x18] sm:$0xff] (!%p659_p10), %v798_v4 }
  0x27 PF: > { %v746_v5 = vld [vmem:[%s876_s11] sm:$0xff]   ;;  %v747_v6 = vld [vmem:[%s876_s11 + $0x8] sm:$0xff]   ;;  %v748_v7 = vld [vmem:[%s876_s11 + $0x10] sm:$0xff]   ;;  %p670_p11 = scmp.ne.s32.totalorder %s788_s17, 4 }
  0x28   : > { %685 = vmatprep.subr.bf16.mxu0 %v746_v5  ;;  %v749_v8 = vld [vmem:[%s876_s11 + $0x18] sm:$0xff]   ;;  %v754_v9 = vld [vmem:[%s267_s12] sm:$0xff]   ;;  %v751_v11 = vld [vmem:[%s876_s11 + $0x28] sm:$0xff]   ;;  %v516_v59 = vlaneseq (!%p670_p11) }
  0x29   : > { %686 = vmatpush3.bf16.msra.mxu0 %v746_v5  ;;  %701 = vmatprep.mubr.bf16.mxu0 %v754_v9  ;;  %v750_v10 = vld [vmem:[%s876_s11 + $0x20] sm:$0xff]   ;;  %v752_v12 = vld [vmem:[%s876_s11 + $0x30] sm:$0xff]   ;;  %v753_v13 = vld [vmem:[%s876_s11 + $0x38] sm:$0xff]  }
  0x2a   : > { %687 = vmatprep.subr.bf16.mxu0 %v747_v6  ;;  %v755_v14 = vld [vmem:[%s267_s12 + $0x8] sm:$0xff]   ;;  %v333_v15 = vld [vmem:[#allocation2 + $0x10] sm:$0xff]  ;;  %v331_v16 = vld [vmem:[#allocation2] sm:$0xff]  ;;  %v517_v60 = vshrl.u32 (!%p670_p11), %v516_v59, 7 }
  0x2b   : > { %v334_v18 = vld [vmem:[#allocation2 + $0x18] sm:$0xff]  ;;  %v332_v21 = vld [vmem:[#allocation2 + $0x8] sm:$0xff]  ;;  %v511_v61 = vld [vmem:[%s928_s2] sm:$0x1] (!%p670_p11) }
  0x2c   : > { %v518_v62 = vsub.s32 (!%p670_p11), 0, %v517_v60 }
  0x2d   : > { %688 = vmatpush3.bf16.msra.mxu0 %v747_v6  ;;  %v671_v6 = vld [vmem:[%s929_s3] ss:$0 sm:$0xff] (!%p670_p11) }
  0x2e   : > { %689 = vmatprep.subr.bf16.mxu0 %v748_v7 }
  0x31   : > { %690 = vmatpush3.bf16.msra.mxu0 %v748_v7 }
  0x32   : > { %691 = vmatprep.subr.bf16.mxu0 %v749_v8 }
  0x35   : > { %692 = vmatpush3.bf16.msra.mxu0 %v749_v8 }
  0x36   : > { %693 = vmatprep.subr.bf16.mxu0 %v750_v10 }
  0x39   : > { %694 = vmatpush3.bf16.msra.mxu0 %v750_v10 }
  0x3a   : > { %695 = vmatprep.subr.bf16.mxu0 %v751_v11 }
  0x3d   : > { %696 = vmatpush3.bf16.msra.mxu0 %v751_v11 }
  0x3e   : > { %697 = vmatprep.subr.bf16.mxu0 %v752_v12 }
  0x41   : > { %698 = vmatpush3.bf16.msra.mxu0 %v752_v12 }
  0x42   : > { %699 = vmatprep.subr.bf16.mxu0 %v753_v13 }
  0x45   : > { %700 = vmatpush3.bf16.msra.mxu0 %v753_v13 }
  0x48   : > { %702 = vmatmul.mubr.bf16.vlgmr.msra.gmra.mrb[0].mxu0 %v755_v14 }
 0x11b   : > { %v703_v17 = vpop.f32.mrb[0].mxu0  ;;  %475 = sbr.rel (%p670_p11) target bundleno = 348 (0x15c), region = 85 }
 0x11c   : > { %v466_v19 = vadd.f32 %v703_v17, %v333_v15  ;;  %v449_v20 = vpop.f32.mrb[1].mxu0 }
 0x11d   : > { %v464_v22 = vadd.f32 %v449_v20, %v331_v16  ;;  %v704_v23 = vpop.f32.mrb[2].mxu0 }
 0x11e   : > { %470 = vst [vmem:[#allocation2 + $0x10] sm:$0xff] %v466_v19  ;;  %v467_v24 = vadd.f32 %v704_v23, %v334_v18  ;;  %v452_v25 = vpop.f32.mrb[3].mxu0 }
 0x11f   : > { %468 = vst [vmem:[#allocation2] sm:$0xff] %v464_v22  ;;  %v465_v26 = vadd.f32 %v452_v25, %v332_v21 }
 0x120   : > { %471 = vst [vmem:[#allocation2 + $0x18] sm:$0xff] %v467_v24 }
 0x121   : > { %469 = vst [vmem:[#allocation2 + $0x8] sm:$0xff] %v465_v26 }
 0x125   : > { %v478_v29 = vld [vmem:[#allocation2 + $0x10] sm:$0xff] }
 0x126   : > { %v476_v27 = vld [vmem:[#allocation2] sm:$0xff]  ;;  %v492_v34 = vmul.f32 %v478_v29, %v478_v29 }
 0x127   : > { %v479_v30 = vld [vmem:[#allocation2 + $0x18] sm:$0xff]  ;;  %v490_v32 = vmul.f32 %v476_v27, %v476_v27 }
 0x128   : > { %v477_v28 = vld [vmem:[#allocation2 + $0x8] sm:$0xff]  ;;  %v493_v36 = vmul.f32 %v479_v30, %v479_v30 }
 0x129   : > { %v480_v31 = vadd.f32 %v477_v28, %v476_v27  ;;  %v491_v33 = vmul.f32 %v477_v28, %v477_v28 }
 0x12b   : > { %v481_v35 = vadd.f32 %v480_v31, %v478_v29  ;;  %v494_v37 = vadd.f32 %v491_v33, %v490_v32 }
 0x12d   : > { %v482_v38 = vadd.f32 %v481_v35, %v479_v30  ;;  %v495_v39 = vadd.f32 %v494_v37, %v492_v34 }
 0x12f   : > { %v483_v40 = vrot.slane %v482_v38, 4  ;;  %v496_v41 = vadd.f32 %v495_v39, %v493_v36 }
 0x131   : > { %v484_v42 = vadd.f32 %v483_v40, %v482_v38  ;;  %v497_v43 = vrot.slane %v496_v41, 4 }
 0x133   : > { %v485_v44 = vrot.slane %v484_v42, 2  ;;  %v498_v45 = vadd.f32 %v497_v43, %v496_v41 }
 0x135   : > { %v486_v46 = vadd.f32 %v485_v44, %v484_v42  ;;  %v499_v47 = vrot.slane %v498_v45, 2 }
 0x137   : > { %v487_v48 = vrot.slane %v486_v46, 1  ;;  %v500_v49 = vadd.f32 %v499_v47, %v498_v45 }
 0x139   : > { %v488_v50 = vadd.f32 %v487_v48, %v486_v46  ;;  %v501_v51 = vrot.slane %v500_v49, 1 }
 0x13b   : > { %v489_v52 = vmul.f32 0.03125, %v488_v50  ;;  %v502_v53 = vadd.f32 %v501_v51, %v500_v49 }
 0x13d   : > { %v503_v54 = vmul.f32 0.03125, %v502_v53  ;;  %v504_v55 = vmul.f32 %v489_v52, %v489_v52  ;;  %v507_v0 = vsub.f32 %v476_v27, %v489_v52  ;;  %v508_v2 = vsub.f32 %v477_v28, %v489_v52 }
 0x13e   : > { %v509_v3 = vsub.f32 %v478_v29, %v489_v52  ;;  %v510_v4 = vsub.f32 %v479_v30, %v489_v52 }
 0x13f   : > { %v505_v56 = vsub.f32 %v503_v54, %v504_v55 }
 0x141   : > { %v506_v57 = vmax.f32 %v505_v56, 0.0 }
 0x143   : > { %v512_v58 = vadd.f32 1e-05, %v506_v57 }
 0x145   : > { %756 = vrsqrt.f32 %v512_v58 }
 0x14f   : > { %v757_v63 = vpop.eup %756 }
 0x150   : > { %v514_v1 = vmul.f32 %v757_v63, %v511_v61 }
 0x152   : > { %v519_v5 = vrot.slane %v514_v1, %v518_v62 }
 0x154   : > { %v521_v7 = vmul.f32 %v519_v5, %v507_v0  ;;  %v522_v8 = vmul.f32 %v519_v5, %v508_v2  ;;  %v523_v9 = vmul.f32 %v519_v5, %v509_v3  ;;  %v524_v10 = vmul.f32 %v519_v5, %v510_v4 }
 0x156   : > { %v532_v11 = vadd.f32 %v671_v6, %v521_v7  ;;  %v533_v12 = vadd.f32 %v671_v6, %v522_v8  ;;  %v534_v13 = vadd.f32 %v671_v6, %v523_v9  ;;  %v535_v14 = vadd.f32 %v671_v6, %v524_v10 }
 0x158   : > { %v536_v15 = vmax.f32 %v532_v11, 0.0  ;;  %v537_v16 = vmax.f32 %v533_v12, 0.0  ;;  %v538_v17 = vmax.f32 %v534_v13, 0.0  ;;  %v539_v18 = vmax.f32 %v535_v14, 0.0 }
 0x15a   : > { %540 = vst [vmem:[%s930_s4] sm:$0xff] %v536_v15  ;;  %541 = vst [vmem:[%s930_s4 + $0x8] sm:$0xff] %v537_v16 }
 0x15b   : > { %542 = vst [vmem:[%s930_s4 + $0x10] sm:$0xff] %v538_v17  ;;  %543 = vst [vmem:[%s930_s4 + $0x18] sm:$0xff] %v539_v18 }
 0x15c PF: > { %s14_s19 = sadd.s32 1, %s796_s19   ;;  %s931_s15 = smov %s784_s16 }
 0x15d   : > { %p11_p12 = scmp.ge.s32.totalorder %s14_s19, 7   ;;  %s932_s16 = smov %s859_s23 }
 0x15e   : > { %s933_s17 = smov %s792_s18  ;;  %s934_s18 = smov %s936_s20 }
 0x15f   :  { %13 = sbr.rel (!%p11_p12) target bundleno = 3 (0x3), region = 129 }

// kernel: _lambda_.27
= control target key start
LH: loop header
LB: loop body
LE: loop exit
PB: predicated region body
PF: predicated region fallthrough
CT: control target
= control target key end

     0   :  { %v210_v46 = vlaneseq  ;;  %s364_s1 = inlined_call_operand.vmem [shape: bf16[128,128], index: 1, kind: input, shape index: {}]   ;;  %s365_s0 = inlined_call_operand.vmem [shape: bf16[32,128], index: 0, kind: input, shape index: {}]   ;;  %s366_s2 = inlined_call_operand.vmem [shape: f32[1,128], index: 2, kind: input, shape index: {}]   ;;  %s367_s3 = inlined_call_operand.vmem [shape: f32[1,128], index: 3, kind: input, shape index: {}]   ;;  %s368_s4 = inlined_call_operand.vmem [shape: f32[32,128], index: 4, kind: output, shape index: {}]  }
   0x1   :  { %v279_v0 = vld [vmem:[%s364_s1] sm:$0xff]   ;;  %v280_v1 = vld [vmem:[%s364_s1 + $0x8] sm:$0xff]   ;;  %v281_v2 = vld [vmem:[%s364_s1 + $0x10] sm:$0xff]  }
   0x2   :  { %259 = vmatprep.subr.bf16.mxu0 %v279_v0  ;;  %v282_v3 = vld [vmem:[%s364_s1 + $0x18] sm:$0xff]   ;;  %v287_v4 = vld [vmem:[%s365_s0] sm:$0xff]   ;;  %v284_v6 = vld [vmem:[%s364_s1 + $0x28] sm:$0xff]   ;;  %v211_v47 = vshrl.u32 %v210_v46, 7 }
   0x3   :  { %260 = vmatpush3.bf16.msra.mxu0 %v279_v0  ;;  %275 = vmatprep.mubr.bf16.mxu0 %v287_v4  ;;  %v283_v5 = vld [vmem:[%s364_s1 + $0x20] sm:$0xff]   ;;  %v285_v7 = vld [vmem:[%s364_s1 + $0x30] sm:$0xff]   ;;  %v286_v8 = vld [vmem:[%s364_s1 + $0x38] sm:$0xff]  }
   0x4   :  { %261 = vmatprep.subr.bf16.mxu0 %v280_v1  ;;  %v288_v9 = vld [vmem:[%s365_s0 + $0x8] sm:$0xff]   ;;  %v205_v48 = vld [vmem:[%s366_s2] sm:$0x1]  ;;  %v212_v49 = vsub.s32 0, %v211_v47 }
   0x5   :  { %v248_v53 = vld [vmem:[%s367_s3] ss:$0 sm:$0xff] }
   0x7   :  { %262 = vmatpush3.bf16.msra.mxu0 %v280_v1 }
   0x8   :  { %263 = vmatprep.subr.bf16.mxu0 %v281_v2 }
   0xb   :  { %264 = vmatpush3.bf16.msra.mxu0 %v281_v2 }
   0xc   :  { %265 = vmatprep.subr.bf16.mxu0 %v282_v3 }
   0xf   :  { %266 = vmatpush3.bf16.msra.mxu0 %v282_v3 }
  0x10   :  { %267 = vmatprep.subr.bf16.mxu0 %v283_v5 }
  0x13   :  { %268 = vmatpush3.bf16.msra.mxu0 %v283_v5 }
  0x14   :  { %269 = vmatprep.subr.bf16.mxu0 %v284_v6 }
  0x17   :  { %270 = vmatpush3.bf16.msra.mxu0 %v284_v6 }
  0x18   :  { %271 = vmatprep.subr.bf16.mxu0 %v285_v7 }
  0x1b   :  { %272 = vmatpush3.bf16.msra.mxu0 %v285_v7 }
  0x1c   :  { %273 = vmatprep.subr.bf16.mxu0 %v286_v8 }
  0x1f   :  { %274 = vmatpush3.bf16.msra.mxu0 %v286_v8 }
  0x22   :  { %276 = vmatmul.mubr.bf16.vlgmr.msra.gmra.mrb[0].mxu0 %v288_v9 }
  0xf5   :  { %v277_v10 = vpop.f32.mrb[0].mxu0 }
  0xf6   :  { %v144_v11 = vpop.f32.mrb[1].mxu0  ;;  %v186_v17 = vmul.f32 %v277_v10, %v277_v10 }
  0xf7   :  { %v278_v12 = vpop.f32.mrb[2].mxu0  ;;  %v184_v14 = vmul.f32 %v144_v11, %v144_v11 }
  0xf8   :  { %v147_v13 = vpop.f32.mrb[3].mxu0  ;;  %v187_v20 = vmul.f32 %v278_v12, %v278_v12 }
  0xf9   :  { %v174_v15 = vadd.f32 %v147_v13, %v144_v11  ;;  %v185_v16 = vmul.f32 %v147_v13, %v147_v13 }
  0xfb   :  { %v175_v18 = vadd.f32 %v277_v10, %v174_v15  ;;  %v188_v19 = vadd.f32 %v185_v16, %v184_v14 }
  0xfd   :  { %v176_v21 = vadd.f32 %v278_v12, %v175_v18  ;;  %v189_v22 = vadd.f32 %v188_v19, %v186_v17 }
  0xff   :  { %v177_v23 = vrot.slane %v176_v21, 4  ;;  %v190_v24 = vadd.f32 %v189_v22, %v187_v20 }
 0x101   :  { %v178_v25 = vadd.f32 %v177_v23, %v176_v21  ;;  %v191_v26 = vrot.slane %v190_v24, 4 }
 0x103   :  { %v179_v27 = vrot.slane %v178_v25, 2  ;;  %v192_v28 = vadd.f32 %v191_v26, %v190_v24 }
 0x105   :  { %v180_v29 = vadd.f32 %v179_v27, %v178_v25  ;;  %v193_v30 = vrot.slane %v192_v28, 2 }
 0x107   :  { %v181_v31 = vrot.slane %v180_v29, 1  ;;  %v194_v32 = vadd.f32 %v193_v30, %v192_v28 }
 0x109   :  { %v182_v33 = vadd.f32 %v181_v31, %v180_v29  ;;  %v195_v34 = vrot.slane %v194_v32, 1 }
 0x10b   :  { %v183_v35 = vmul.f32 0.03125, %v182_v33  ;;  %v196_v36 = vadd.f32 %v195_v34, %v194_v32 }
 0x10d   :  { %v197_v37 = vmul.f32 0.03125, %v196_v36  ;;  %v198_v38 = vmul.f32 %v183_v35, %v183_v35  ;;  %v201_v39 = vsub.f32 %v144_v11, %v183_v35  ;;  %v202_v40 = vsub.f32 %v147_v13, %v183_v35 }
 0x10e   :  { %v203_v41 = vsub.f32 %v277_v10, %v183_v35  ;;  %v204_v42 = vsub.f32 %v278_v12, %v183_v35 }
 0x10f   :  { %v199_v43 = vsub.f32 %v197_v37, %v198_v38 }
 0x111   :  { %v200_v44 = vmax.f32 %v199_v43, 0.0 }
 0x113   :  { %v206_v45 = vadd.f32 1e-05, %v200_v44 }
 0x115   :  { %289 = vrsqrt.f32 %v206_v45 }
 0x11f   :  { %v290_v50 = vpop.eup %289 }
 0x120   :  { %v208_v51 = vmul.f32 %v290_v50, %v205_v48 }
 0x122   :  { %v213_v52 = vrot.slane %v208_v51, %v212_v49 }
 0x124   :  { %v215_v54 = vmul.f32 %v213_v52, %v201_v39  ;;  %v216_v55 = vmul.f32 %v213_v52, %v202_v40  ;;  %v217_v56 = vmul.f32 %v213_v52, %v203_v41  ;;  %v218_v57 = vmul.f32 %v213_v52, %v204_v42 }
 0x126   :  { %v226_v58 = vadd.f32 %v248_v53, %v215_v54  ;;  %v227_v59 = vadd.f32 %v248_v53, %v216_v55  ;;  %v228_v60 = vadd.f32 %v248_v53, %v217_v56  ;;  %v229_v61 = vadd.f32 %v248_v53, %v218_v57 }
 0x128   :  { %230 = vst [vmem:[%s368_s4] sm:$0xff] %v226_v58  ;;  %231 = vst [vmem:[%s368_s4 + $0x8] sm:$0xff] %v227_v59 }
 0x129   :  { %232 = vst [vmem:[%s368_s4 + $0x10] sm:$0xff] %v228_v60  ;;  %233 = vst [vmem:[%s368_s4 + $0x18] sm:$0xff] %v229_v61 }

// kernel: _lambda_.28
= control target key start
LH: loop header
LB: loop body
LE: loop exit
PB: predicated region body
PF: predicated region fallthrough
CT: control target
= control target key end

     0   :  { %s1171_s18 = smov 0   ;;  %s1173_s19 = smov 0   ;;  %s1302_s0 = inlined_call_operand.vmem [shape: bf16[32,1152], index: 0, kind: input, shape index: {}]   ;;  %s1303_s1 = inlined_call_operand.vmem [shape: bf16[1152,128], index: 1, kind: input, shape index: {}]   ;;  %s1304_s2 = inlined_call_operand.vmem [shape: f32[1,128], index: 2, kind: input, shape index: {}]   ;;  %s1305_s3 = inlined_call_operand.vmem [shape: f32[1,128], index: 3, kind: input, shape index: {}]   ;;  %s1306_s4 = inlined_call_operand.vmem [shape: f32[32,128], index: 4, kind: input, shape index: {}]   ;;  %s1307_s5 = inlined_call_operand.vmem [shape: f32[32,128], index: 5, kind: output, shape index: {}]  }
   0x1   :  { %s1175_s20 = smov 0   ;;  %s1177_s21 = smov 0  }
   0x2   :  { %s1179_s22 = smov 0  }
   0x3 LB: > { %s24_s23 = sadd.s32 1, %s1134_s21  ;;  %p41_p1 = scmp.ne.s32.totalorder %s1126_s19, %s1122_s18  ;;  %s1138_s22 = sphi %s1179_s22, %s15_s22   ;;  %s1134_s21 = sphi %s1177_s21, %s1311_s21   ;;  %s1130_s20 = sphi %s1175_s20, %s1310_s20   ;;  %s1126_s19 = sphi %s1173_s19, %s1309_s19   ;;  %s1122_s18 = sphi %s1171_s18, %s1308_s18  }
   0x4   : > { %p25_p0 = scmp.ge.s32.totalorder %s24_s23, 3  ;;  %p42_p2 = scmp.eq.s32.totalorder %s1138_s22, 0 }
   0x5   : > { %s34_s25 = sadd.s32 1, %s1126_s19  ;;  %p916_p5 = scmp.ge.s32.totalorder %s1138_s22, 3 }
   0x6   : > { %s1313_s23 = smov (%p25_p0, %s24_s23), 0  ;;  %p43_p3 = por %p42_p2, %p41_p1 }
   0x7   : > { %s31_s24 = ssub.s32 %s1134_s21, %s1313_s23  ;;  %218 = sbr.rel (%p916_p5) target bundleno = 23 (0x17), region = 28 }
   0x8   : > { %p32_p4 = scmp.eq.s32.totalorder %s31_s24, 0 }
   0xa   : > { %s1206_s26 = scalar_select %p32_p4, %s1126_s19, %s34_s25  }
   0xe   : > { %221 = sbr.rel (!%p43_p3) target bundleno = 23 (0x17), region = 32  ;;  %s223_s27 = sand.u32 (%p43_p3), 1, %s1126_s19  }
   0xf   : > { %s964_s28 = smul.u32 (%p43_p3), 12, %s1134_s21 }
  0x10   : > { %s1023_s29 = smul.u32 (%p43_p3), 48, %s223_s27 }
  0x11   : > { %s228_s7 = scalar_lea.vmem (%p43_p3), %s1302_s0, %s964_s28 }
  0x12   : > { %v243_v0 = vld [vmem:[%s228_s7] sm:$0xff] (%p43_p3)  ;;  %v247_v2 = vld [vmem:[%s228_s7 + $0x48] sm:$0xff] (%p43_p3)  ;;  %s225_s8 = scalar_lea.vmem (%p43_p3), [#allocation3], %s1023_s29  ;;  %v922_v6 = vld [vmem:[%s228_s7 + $0x50] sm:$0xf] (%p43_p3) }
  0x13   : > { %v245_v1 = vld [vmem:[%s228_s7 + $0x24] sm:$0xff] (%p43_p3)  ;;  %244 = vst [vmem:[%s225_s8] sm:$0xff] (%p43_p3), %v243_v0  ;;  %248 = vst [vmem:[%s225_s8 + $0x18] sm:$0xff] (%p43_p3), %v247_v2  ;;  %v249_v3 = vld [vmem:[%s228_s7 + $0x6c] sm:$0xff] (%p43_p3) }
  0x14   : > { %246 = vst [vmem:[%s225_s8 + $0xc] sm:$0xff] (%p43_p3), %v245_v1  ;;  %v918_v4 = vld [vmem:[%s228_s7 + $0x8] sm:$0xf] (%p43_p3)  ;;  %v920_v5 = vld [vmem:[%s228_s7 + $0x2c] sm:$0xf] (%p43_p3)  ;;  %250 = vst [vmem:[%s225_s8 + $0x24] sm:$0xff] (%p43_p3), %v249_v3 }
  0x15   : > { %919 = vst [vmem:[%s225_s8 + $0x8] sm:$0xf] %v918_v4  ;;  %921 = vst [vmem:[%s225_s8 + $0x14] sm:$0xf] %v920_v5  ;;  %v924_v7 = vld [vmem:[%s228_s7 + $0x74] sm:$0xf] }
  0x16   : > { %923 = vst [vmem:[%s225_s8 + $0x20] sm:$0xf] %v922_v6  ;;  %925 = vst [vmem:[%s225_s8 + $0x2c] sm:$0xf] %v924_v7 }
  0x17 PF: > { %p926_p6 = scmp.ge.s32.totalorder %s1138_s22, 1  ;;  %p282_p7 = scmp.lt.s32.totalorder %s1138_s22, 4 }
  0x19   : > { %p283_p8 = pnand %p926_p6, %p282_p7 }
  0x1a   : > { %s289_s9 = sand.u32 (!%p283_p8), 1, %s1122_s18   ;;  %s334_s10 = smul.u32 (!%p283_p8), 48, %s1130_s20 }
  0x1b   : > { %286 = sbr.rel (%p283_p8) target bundleno = 360 (0x168), region = 62  ;;  %p928_p10 = scmp.ne.s32.totalorder (!%p283_p8), %s1130_s20, 0 }
  0x1c   : > { %s1024_s11 = smul.u32 (!%p283_p8), 48, %s289_s9  ;;  %p335_p9 = scmp.lt.s32.totalorder (!%p283_p8), %s334_s10, 143 }
  0x1e   : > { %s1223_s16 = scalar_lea.vmem (!%p283_p8), [#allocation3], %s1024_s11 }
  0x22   : > { %s1315_s10 = smov (!%p335_p9, %s334_s10), 143  ;;  %361 = sbr.rel (%p928_p10) target bundleno = 41 (0x29), region = 70 }
  0x23   : > { %s927_s12 = sshll.u32 %s1315_s10, 2  ;;  %v1140_v8 = vmov (!%p928_p10), 0.0  }
  0x24   : > { %s1221_s15 = scalar_lea.vmem %s1303_s1, %s927_s12  ;;  %362 = vst [vmem:[#allocation2] sm:$0xff] (!%p928_p10), %v1140_v8  ;;  %363 = vst [vmem:[#allocation2 + $0x8] sm:$0xff] (!%p928_p10), %v1140_v8 }
  0x25   : > { %364 = vst [vmem:[#allocation2 + $0x10] sm:$0xff] (!%p928_p10), %v1140_v8  ;;  %365 = vst [vmem:[#allocation2 + $0x18] sm:$0xff] (!%p928_p10), %v1140_v8 }
  0x29 PF: > { %v1066_v9 = vld [vmem:[%s1221_s15 + $0x40] sm:$0xff]   ;;  %v1069_v12 = vld [vmem:[%s1221_s15 + $0x48] sm:$0xff]   ;;  %v1072_v15 = vld [vmem:[%s1221_s15 + $0x50] sm:$0xff]   ;;  %p959_p11 = scmp.ne.s32.totalorder %s1130_s20, 2 }
  0x2a   : > { %v1067_v10 = vld [vmem:[%s1221_s15] sm:$0xff]   ;;  %965 = vmatprep.subr.bf16.mxu0 %v1066_v9  ;;  %v1070_v13 = vld [vmem:[%s1221_s15 + $0x8] sm:$0xff]   ;;  %v1073_v16 = vld [vmem:[%s1221_s15 + $0x10] sm:$0xff]  }
  0x2b   : > { %v1068_v11 = vld [vmem:[%s1221_s15 + $0x80] sm:$0xff]   ;;  %966 = vmatpush3.bf16.msra.mxu0 %v1067_v10  ;;  %v1071_v14 = vld [vmem:[%s1221_s15 + $0x88] sm:$0xff]   ;;  %v1074_v17 = vld [vmem:[%s1221_s15 + $0x90] sm:$0xff]  }
  0x2c   : > { %1003 = vmatprep.subr.bf16.mxu1 %v1068_v11  ;;  %967 = vmatprep.subr.bf16.mxu0 %v1069_v12  ;;  %v1075_v18 = vld [vmem:[%s1221_s15 + $0x58] sm:$0xff]   ;;  %v1078_v21 = vld [vmem:[%s1221_s15 + $0x60] sm:$0xff]   ;;  %v1081_v24 = vld [vmem:[%s1221_s15 + $0x68] sm:$0xff]  }
  0x2d   : > { %1004 = vmatpush3.bf16.msra.mxu1 %v1068_v11  ;;  %v1076_v19 = vld [vmem:[%s1221_s15 + $0x18] sm:$0xff]   ;;  %v1080_v22 = vld [vmem:[%s1221_s15 + $0xa0] sm:$0xff]   ;;  %v1083_v25 = vld [vmem:[%s1221_s15 + $0xa8] sm:$0xff]  }
  0x2e   : > { %1005 = vmatprep.subr.bf16.mxu1 %v1071_v14  ;;  %v1077_v20 = vld [vmem:[%s1221_s15 + $0x98] sm:$0xff]   ;;  %v1079_v23 = vld [vmem:[%s1221_s15 + $0x20] sm:$0xff]   ;;  %v1082_v26 = vld [vmem:[%s1221_s15 + $0x28] sm:$0xff]  }
  0x2f   : > { %968 = vmatpush3.bf16.msra.mxu0 %v1070_v13  ;;  %v1084_v27 = vld [vmem:[%s1221_s15 + $0x70] sm:$0xff]   ;;  %v1087_v30 = vld [vmem:[%s1221_s15 + $0x78] sm:$0xff]   ;;  %v366_v45 = vld [vmem:[#allocation2] sm:$0xff] }
  0x30   : > { %969 = vmatprep.subr.bf16.mxu0 %v1072_v15  ;;  %v1085_v28 = vld [vmem:[%s1221_s15 + $0x30] sm:$0xff]   ;;  %v1089_v31 = vld [vmem:[%s1221_s15 + $0xb8] sm:$0xff]   ;;  %v367_v50 = vld [vmem:[#allocation2 + $0x8] sm:$0xff] }
  0x31   : > { %1006 = vmatpush3.bf16.msra.mxu1 %v1071_v14  ;;  %v1086_v29 = vld [vmem:[%s1221_s15 + $0xb0] sm:$0xff]   ;;  %v1088_v34 = vld [vmem:[%s1221_s15 + $0x38] sm:$0xff]  }
  0x32   : > { %1007 = vmatprep.subr.bf16.mxu1 %v1074_v17  ;;  %v1092_v32 = vld [vmem:[%s1223_s16 + $0x4] ss:$12 sps:$4 sm:$0xff]   ;;  %v1093_v33 = vld [vmem:[%s1223_s16 + $0x8] ss:$12 sps:$4 sm:$0xff]   ;;  %v1090_v35 = vld [vmem:[%s1223_s16] ss:$12 sps:$4 sm:$0xff]  }
  0x33   : > { %970 = vmatpush3.bf16.msra.mxu0 %v1073_v16  ;;  %634 = vmatprep.mubr.bf16.mxu0 %v1092_v32  ;;  %v1095_v36 = vld [vmem:[%s1223_s16 + $0x1c] ss:$12 sps:$4 sm:$0xff]   ;;  %v1094_v37 = vld [vmem:[%s1223_s16 + $0x20] ss:$12 sps:$4 sm:$0xff]   ;;  %v1097_v38 = vld [vmem:[%s1223_s16 + $0x18] ss:$12 sps:$4 sm:$0xff]  }
  0x34   : > { %971 = vmatprep.subr.bf16.mxu0 %v1075_v18  ;;  %1019 = vmatprep.mubr.bf16.mxu1 %v1093_v33  ;;  %v368_v59 = vld [vmem:[#allocation2 + $0x10] sm:$0xff]  ;;  %v369_v63 = vld [vmem:[#allocation2 + $0x18] sm:$0xff] }
  0x35   : > { %1008 = vmatpush3.bf16.msra.mxu1 %v1074_v17 }
  0x36   : > { %1009 = vmatprep.subr.bf16.mxu1 %v1077_v20 }
  0x37   : > { %972 = vmatpush3.bf16.msra.mxu0 %v1076_v19 }
  0x38   : > { %973 = vmatprep.subr.bf16.mxu0 %v1078_v21 }
  0x39   : > { %1010 = vmatpush3.bf16.msra.mxu1 %v1077_v20 }
  0x3a   : > { %1011 = vmatprep.subr.bf16.mxu1 %v1080_v22 }
  0x3b   : > { %974 = vmatpush3.bf16.msra.mxu0 %v1079_v23 }
  0x3c   : > { %975 = vmatprep.subr.bf16.mxu0 %v1081_v24 }
  0x3d   : > { %1012 = vmatpush3.bf16.msra.mxu1 %v1080_v22 }
  0x3e   : > { %1013 = vmatprep.subr.bf16.mxu1 %v1083_v25 }
  0x3f   : > { %976 = vmatpush3.bf16.msra.mxu0 %v1082_v26 }
  0x40   : > { %977 = vmatprep.subr.bf16.mxu0 %v1084_v27 }
  0x41   : > { %1014 = vmatpush3.bf16.msra.mxu1 %v1083_v25 }
  0x42   : > { %1015 = vmatprep.subr.bf16.mxu1 %v1086_v29 }
  0x43   : > { %978 = vmatpush3.bf16.msra.mxu0 %v1085_v28 }
  0x44   : > { %979 = vmatprep.subr.bf16.mxu0 %v1087_v30 }
  0x45   : > { %1016 = vmatpush3.bf16.msra.mxu1 %v1086_v29 }
  0x46   : > { %1017 = vmatprep.subr.bf16.mxu1 %v1089_v31 }
  0x47   : > { %980 = vmatpush3.bf16.msra.mxu0 %v1088_v34 }
  0x49   : > { %1018 = vmatpush3.bf16.msra.mxu1 %v1089_v31 }
  0x4a   : > { %635 = vmatmul.mubr.bf16.vlgmr.msra.gmra.mrb[0].mxu0 %v1090_v35  ;;  %v752_v35 = vlaneseq (!%p959_p11) }
  0x4b   : > { %642 = vmatprep.mubr.bf16.mxu0 %v1095_v36 }
  0x4c   : > { %1020 = vmatmul.mubr.bf16.vlgmr.msra.gmra.mrb[0].mxu1 %v1094_v37  ;;  %v753_v36 = vshrl.u32 (!%p959_p11), %v752_v35, 7  ;;  %v747_v37 = vld [vmem:[%s1304_s2] sm:$0x1] (!%p959_p11) }
  0x52   : > { %643 = vmatmul.mubr.bf16.gmra.mrb[4].mxu0 %v1097_v38  ;;  %v754_v38 = vsub.s32 (!%p959_p11), 0, %v753_v36 }
 0x11d   : > { %v981_v39 = vpop.f32.mrb[0].mxu0 }
 0x11e   : > { %v982_v40 = vpop.f32.mrb[1].mxu0 }
 0x11f   : > { %v983_v41 = vadd.f32 %v982_v40, %v981_v39  ;;  %v984_v42 = vpop.f32.mrb[2].mxu0  ;;  %v1021_v43 = vpop.f32.mrb[0].mxu1 }
 0x120   : > { %v985_v44 = vpop.f32.mrb[3].mxu0  ;;  %v685_v46 = vpop.f32.mrb[1].mxu1 }
 0x121   : > { %v986_v47 = vadd.f32 %v985_v44, %v984_v42  ;;  %v686_v48 = vadd.f32 %v983_v41, %v685_v46  ;;  %v1022_v49 = vpop.f32.mrb[2].mxu1  ;;  %v960_v46 = vld [vmem:[%s1305_s3] ss:$0 sm:$0xff] (!%p959_p11) }
 0x122   : > { %v688_v51 = vpop.f32.mrb[3].mxu1 }
 0x123   : > { %v700_v52 = vadd.f32 %v686_v48, %v366_v45  ;;  %v689_v53 = vadd.f32 %v986_v47, %v688_v51  ;;  %v772_v48 = vld [vmem:[%s1306_s4] sm:$0xff] (!%p959_p11) }
 0x125   : > { %704 = vst [vmem:[#allocation2] sm:$0xff] %v700_v52  ;;  %v701_v54 = vadd.f32 %v689_v53, %v367_v50  ;;  %v987_v55 = vpop.f32.mrb[4].mxu0  ;;  %v773_v52 = vld [vmem:[%s1306_s4 + $0x8] sm:$0xff] (!%p959_p11)  ;;  %v774_v53 = vld [vmem:[%s1306_s4 + $0x10] sm:$0xff] (!%p959_p11) }
 0x126   : > { %v988_v56 = vpop.f32.mrb[5].mxu0 }
 0x127   : > { %705 = vst [vmem:[#allocation2 + $0x8] sm:$0xff] %v701_v54  ;;  %v989_v57 = vadd.f32 %v988_v56, %v987_v55  ;;  %v990_v58 = vpop.f32.mrb[6].mxu0  ;;  %v775_v54 = vld [vmem:[%s1306_s4 + $0x18] sm:$0xff] (!%p959_p11) }
 0x128   : > { %v991_v60 = vpop.f32.mrb[7].mxu0 }
 0x129   : > { %v694_v61 = vadd.f32 %v1021_v43, %v989_v57  ;;  %v992_v62 = vadd.f32 %v991_v60, %v990_v58  ;;  %711 = sbr.rel (%p959_p11) target bundleno = 360 (0x168), region = 74 }
 0x12b   : > { %v702_v0 = vadd.f32 %v694_v61, %v368_v59  ;;  %v697_v1 = vadd.f32 %v1022_v49, %v992_v62 }
 0x12c   : > { %v712_v3 = vld [vmem:[#allocation2] sm:$0xff] (!%p959_p11) }
 0x12d   : > { %706 = vst [vmem:[#allocation2 + $0x10] sm:$0xff] %v702_v0  ;;  %v703_v2 = vadd.f32 %v697_v1, %v369_v63  ;;  %v726_v8 = vmul.f32 (!%p959_p11), %v712_v3, %v712_v3 }
 0x12e   : > { %v713_v4 = vld [vmem:[#allocation2 + $0x8] sm:$0xff] (!%p959_p11) }
 0x12f   : > { %707 = vst [vmem:[#allocation2 + $0x18] sm:$0xff] %v703_v2  ;;  %v716_v7 = vadd.f32 (!%p959_p11), %v713_v4, %v712_v3  ;;  %v727_v9 = vmul.f32 (!%p959_p11), %v713_v4, %v713_v4 }
 0x131   : > { %v730_v13 = vadd.f32 %v727_v9, %v726_v8 }
 0x134   : > { %v714_v5 = vld [vmem:[#allocation2 + $0x10] sm:$0xff] }
 0x135   : > { %v728_v10 = vmul.f32 %v714_v5, %v714_v5  ;;  %v717_v11 = vadd.f32 %v716_v7, %v714_v5 }
 0x136   : > { %v715_v6 = vld [vmem:[#allocation2 + $0x18] sm:$0xff] }
 0x137   : > { %v729_v12 = vmul.f32 %v715_v6, %v715_v6  ;;  %v718_v14 = vadd.f32 %v717_v11, %v715_v6  ;;  %v731_v15 = vadd.f32 %v730_v13, %v728_v10 }
 0x139   : > { %v719_v16 = vrot.slane %v718_v14, 4  ;;  %v732_v17 = vadd.f32 %v731_v15, %v729_v12 }
 0x13b   : > { %v720_v18 = vadd.f32 %v719_v16, %v718_v14  ;;  %v733_v19 = vrot.slane %v732_v17, 4 }
 0x13d   : > { %v721_v20 = vrot.slane %v720_v18, 2  ;;  %v734_v21 = vadd.f32 %v733_v19, %v732_v17 }
 0x13f   : > { %v722_v22 = vadd.f32 %v721_v20, %v720_v18  ;;  %v735_v23 = vrot.slane %v734_v21, 2 }
 0x141   : > { %v723_v24 = vrot.slane %v722_v22, 1  ;;  %v736_v25 = vadd.f32 %v735_v23, %v734_v21 }
 0x143   : > { %v724_v26 = vadd.f32 %v723_v24, %v722_v22  ;;  %v737_v27 = vrot.slane %v736_v25, 1 }
 0x145   : > { %v725_v28 = vmul.f32 0.03125, %v724_v26  ;;  %v738_v29 = vadd.f32 %v737_v27, %v736_v25 }
 0x147   : > { %v739_v30 = vmul.f32 0.03125, %v738_v29  ;;  %v740_v31 = vmul.f32 %v725_v28, %v725_v28  ;;  %v743_v40 = vsub.f32 %v712_v3, %v725_v28  ;;  %v744_v42 = vsub.f32 %v713_v4, %v725_v28 }
 0x148   : > { %v745_v43 = vsub.f32 %v714_v5, %v725_v28  ;;  %v746_v44 = vsub.f32 %v715_v6, %v725_v28 }
 0x149   : > { %v741_v32 = vsub.f32 %v739_v30, %v740_v31 }
 0x14b   : > { %v742_v33 = vmax.f32 %v741_v32, 0.0 }
 0x14d   : > { %v748_v34 = vadd.f32 1e-05, %v742_v33 }
 0x14f   : > { %1098 = vrsqrt.f32 %v748_v34 }
 0x159   : > { %v1099_v39 = vpop.eup %1098 }
 0x15a   : > { %v750_v41 = vmul.f32 %v1099_v39, %v747_v37 }
 0x15c   : > { %v755_v45 = vrot.slane %v750_v41, %v754_v38 }
 0x15e   : > { %v757_v47 = vmul.f32 %v755_v45, %v743_v40  ;;  %v758_v49 = vmul.f32 %v755_v45, %v744_v42  ;;  %v759_v50 = vmul.f32 %v755_v45, %v745_v43  ;;  %v760_v51 = vmul.f32 %v755_v45, %v746_v44 }
 0x160   : > { %v768_v55 = vadd.f32 %v960_v46, %v757_v47  ;;  %v769_v56 = vadd.f32 %v960_v46, %v758_v49  ;;  %v770_v57 = vadd.f32 %v960_v46, %v759_v50  ;;  %v771_v58 = vadd.f32 %v960_v46, %v760_v51 }
 0x162   : > { %v776_v59 = vadd.f32 %v772_v48, %v768_v55  ;;  %v777_v60 = vadd.f32 %v773_v52, %v769_v56  ;;  %v778_v61 = vadd.f32 %v774_v53, %v770_v57  ;;  %v779_v62 = vadd.f32 %v775_v54, %v771_v58 }
 0x164   : > { %v780_v63 = vmax.f32 %v776_v59, 0.0  ;;  %v781_v0 = vmax.f32 %v777_v60, 0.0  ;;  %v782_v1 = vmax.f32 %v778_v61, 0.0  ;;  %v783_v2 = vmax.f32 %v779_v62, 0.0 }
 0x166   : > { %784 = vst [vmem:[%s1307_s5] sm:$0xff] %v780_v63  ;;  %785 = vst [vmem:[%s1307_s5 + $0x8] sm:$0xff] %v781_v0 }
 0x167   : > { %786 = vst [vmem:[%s1307_s5 + $0x10] sm:$0xff] %v782_v1  ;;  %787 = vst [vmem:[%s1307_s5 + $0x18] sm:$0xff] %v783_v2 }
 0x168 PF: > { %s15_s22 = sadd.s32 1, %s1138_s22   ;;  %s1308_s18 = smov %s1126_s19 }
 0x169   : > { %p12_p12 = scmp.ge.s32.totalorder %s15_s22, 5   ;;  %s1309_s19 = smov %s1206_s26 }
 0x16a   : > { %s1310_s20 = smov %s1134_s21  ;;  %s1311_s21 = smov %s1313_s23 }
 0x16b   :  { %14 = sbr.rel (!%p12_p12) target bundleno = 3 (0x3), region = 127 }

// kernel: _lambda_.29
= control target key start
LH: loop header
LB: loop body
LE: loop exit
PB: predicated region body
PF: predicated region fallthrough
CT: control target
= control target key end

     0   :  { %s1098_s15 = smov 0   ;;  %s1100_s16 = smov 0   ;;  %s1217_s0 = inlined_call_operand.vmem [shape: bf16[32,1152], index: 0, kind: input, shape index: {}]   ;;  %s1218_s1 = inlined_call_operand.vmem [shape: bf16[1152,128], index: 1, kind: input, shape index: {}]   ;;  %s1219_s2 = inlined_call_operand.vmem [shape: f32[1,128], index: 2, kind: input, shape index: {}]   ;;  %s1220_s3 = inlined_call_operand.vmem [shape: f32[1,128], index: 3, kind: input, shape index: {}]   ;;  %s1221_s4 = inlined_call_operand.vmem [shape: f32[32,128], index: 4, kind: output, shape index: {}]  }
   0x1   :  { %s1102_s17 = smov 0   ;;  %s1104_s18 = smov 0  }
   0x2   :  { %s1106_s19 = smov 0  }
   0x3 LB: > { %s23_s20 = sadd.s32 1, %s1066_s18  ;;  %p40_p1 = scmp.ne.s32.totalorder %s1058_s16, %s1054_s15  ;;  %s1070_s19 = sphi %s1106_s19, %s14_s19   ;;  %s1066_s18 = sphi %s1104_s18, %s1225_s18   ;;  %s1062_s17 = sphi %s1102_s17, %s1224_s17   ;;  %s1058_s16 = sphi %s1100_s16, %s1223_s16   ;;  %s1054_s15 = sphi %s1098_s15, %s1222_s15  }
   0x4   : > { %p24_p0 = scmp.ge.s32.totalorder %s23_s20, 3  ;;  %p41_p2 = scmp.eq.s32.totalorder %s1070_s19, 0 }
   0x5   : > { %s33_s22 = sadd.s32 1, %s1058_s16  ;;  %p848_p5 = scmp.ge.s32.totalorder %s1070_s19, 3 }
   0x6   : > { %s1227_s20 = smov (%p24_p0, %s23_s20), 0  ;;  %p42_p3 = por %p41_p2, %p40_p1 }
   0x7   : > { %s30_s21 = ssub.s32 %s1066_s18, %s1227_s20  ;;  %184 = sbr.rel (%p848_p5) target bundleno = 23 (0x17), region = 24 }
   0x8   : > { %p31_p4 = scmp.eq.s32.totalorder %s30_s21, 0 }
   0xa   : > { %s1133_s23 = scalar_select %p31_p4, %s1058_s16, %s33_s22  }
   0xe   : > { %187 = sbr.rel (!%p42_p3) target bundleno = 23 (0x17), region = 28  ;;  %s189_s24 = sand.u32 (%p42_p3), 1, %s1058_s16  }
   0xf   : > { %s896_s25 = smul.u32 (%p42_p3), 12, %s1066_s18 }
  0x10   : > { %s955_s26 = smul.u32 (%p42_p3), 48, %s189_s24 }
  0x11   : > { %s194_s29 = scalar_lea.vmem (%p42_p3), %s1217_s0, %s896_s25 }
  0x12   : > { %v209_v0 = vld [vmem:[%s194_s29] sm:$0xff] (%p42_p3)  ;;  %v213_v2 = vld [vmem:[%s194_s29 + $0x48] sm:$0xff] (%p42_p3)  ;;  %s191_s30 = scalar_lea.vmem (%p42_p3), [#allocation3], %s955_s26  ;;  %v854_v6 = vld [vmem:[%s194_s29 + $0x50] sm:$0xf] (%p42_p3) }
  0x13   : > { %v211_v1 = vld [vmem:[%s194_s29 + $0x24] sm:$0xff] (%p42_p3)  ;;  %210 = vst [vmem:[%s191_s30] sm:$0xff] (%p42_p3), %v209_v0  ;;  %214 = vst [vmem:[%s191_s30 + $0x18] sm:$0xff] (%p42_p3), %v213_v2  ;;  %v215_v3 = vld [vmem:[%s194_s29 + $0x6c] sm:$0xff] (%p42_p3) }
  0x14   : > { %212 = vst [vmem:[%s191_s30 + $0xc] sm:$0xff] (%p42_p3), %v211_v1  ;;  %v850_v4 = vld [vmem:[%s194_s29 + $0x8] sm:$0xf] (%p42_p3)  ;;  %v852_v5 = vld [vmem:[%s194_s29 + $0x2c] sm:$0xf] (%p42_p3)  ;;  %216 = vst [vmem:[%s191_s30 + $0x24] sm:$0xff] (%p42_p3), %v215_v3 }
  0x15   : > { %851 = vst [vmem:[%s191_s30 + $0x8] sm:$0xf] %v850_v4  ;;  %853 = vst [vmem:[%s191_s30 + $0x14] sm:$0xf] %v852_v5  ;;  %v856_v7 = vld [vmem:[%s194_s29 + $0x74] sm:$0xf] }
  0x16   : > { %855 = vst [vmem:[%s191_s30 + $0x20] sm:$0xf] %v854_v6  ;;  %857 = vst [vmem:[%s191_s30 + $0x2c] sm:$0xf] %v856_v7 }
  0x17 PF: > { %p858_p6 = scmp.ge.s32.totalorder %s1070_s19, 1  ;;  %p248_p7 = scmp.lt.s32.totalorder %s1070_s19, 4 }
  0x19   : > { %p249_p8 = pnand %p858_p6, %p248_p7 }
  0x1a   : > { %s255_s5 = sand.u32 (!%p249_p8), 1, %s1054_s15   ;;  %s294_s6 = smul.u32 (!%p249_p8), 48, %s1062_s17 }
  0x1b   : > { %252 = sbr.rel (%p249_p8) target bundleno = 358 (0x166), region = 58  ;;  %p860_p10 = scmp.ne.s32.totalorder (!%p249_p8), %s1062_s17, 0 }
  0x1c   : > { %s956_s7 = smul.u32 (!%p249_p8), 48, %s255_s5  ;;  %p295_p9 = scmp.lt.s32.totalorder (!%p249_p8), %s294_s6, 143 }
  0x1e   : > { %s1150_s12 = scalar_lea.vmem (!%p249_p8), [#allocation3], %s956_s7 }
  0x22   : > { %s1229_s6 = smov (!%p295_p9, %s294_s6), 143  ;;  %317 = sbr.rel (%p860_p10) target bundleno = 41 (0x29), region = 66 }
  0x23   : > { %s859_s8 = sshll.u32 %s1229_s6, 2  ;;  %v1072_v8 = vmov (!%p860_p10), 0.0  }
  0x24   : > { %s1148_s11 = scalar_lea.vmem %s1218_s1, %s859_s8  ;;  %318 = vst [vmem:[#allocation2] sm:$0xff] (!%p860_p10), %v1072_v8  ;;  %319 = vst [vmem:[#allocation2 + $0x8] sm:$0xff] (!%p860_p10), %v1072_v8 }
  0x25   : > { %320 = vst [vmem:[#allocation2 + $0x10] sm:$0xff] (!%p860_p10), %v1072_v8  ;;  %321 = vst [vmem:[#allocation2 + $0x18] sm:$0xff] (!%p860_p10), %v1072_v8 }
  0x29 PF: > { %v998_v9 = vld [vmem:[%s1148_s11 + $0x40] sm:$0xff]   ;;  %v1001_v12 = vld [vmem:[%s1148_s11 + $0x48] sm:$0xff]   ;;  %v1004_v15 = vld [vmem:[%s1148_s11 + $0x50] sm:$0xff]   ;;  %p891_p11 = scmp.ne.s32.totalorder %s1062_s17, 2 }
  0x2a   : > { %v999_v10 = vld [vmem:[%s1148_s11] sm:$0xff]   ;;  %897 = vmatprep.subr.bf16.mxu0 %v998_v9  ;;  %v1002_v13 = vld [vmem:[%s1148_s11 + $0x8] sm:$0xff]   ;;  %v1005_v16 = vld [vmem:[%s1148_s11 + $0x10] sm:$0xff]  }
  0x2b   : > { %v1000_v11 = vld [vmem:[%s1148_s11 + $0x80] sm:$0xff]   ;;  %898 = vmatpush3.bf16.msra.mxu0 %v999_v10  ;;  %v1003_v14 = vld [vmem:[%s1148_s11 + $0x88] sm:$0xff]   ;;  %v1006_v17 = vld [vmem:[%s1148_s11 + $0x90] sm:$0xff]  }
  0x2c   : > { %935 = vmatprep.subr.bf16.mxu1 %v1000_v11  ;;  %899 = vmatprep.subr.bf16.mxu0 %v1001_v12  ;;  %v1007_v18 = vld [vmem:[%s1148_s11 + $0x58] sm:$0xff]   ;;  %v1010_v21 = vld [vmem:[%s1148_s11 + $0x60] sm:$0xff]   ;;  %v1013_v24 = vld [vmem:[%s1148_s11 + $0x68] sm:$0xff]  }
  0x2d   : > { %936 = vmatpush3.bf16.msra.mxu1 %v1000_v11  ;;  %v1008_v19 = vld [vmem:[%s1148_s11 + $0x18] sm:$0xff]   ;;  %v1012_v22 = vld [vmem:[%s1148_s11 + $0xa0] sm:$0xff]   ;;  %v1015_v25 = vld [vmem:[%s1148_s11 + $0xa8] sm:$0xff]  }
  0x2e   : > { %937 = vmatprep.subr.bf16.mxu1 %v1003_v14  ;;  %v1009_v20 = vld [vmem:[%s1148_s11 + $0x98] sm:$0xff]   ;;  %v1011_v23 = vld [vmem:[%s1148_s11 + $0x20] sm:$0xff]   ;;  %v1014_v26 = vld [vmem:[%s1148_s11 + $0x28] sm:$0xff]  }
  0x2f   : > { %900 = vmatpush3.bf16.msra.mxu0 %v1002_v13  ;;  %v1016_v27 = vld [vmem:[%s1148_s11 + $0x70] sm:$0xff]   ;;  %v1019_v30 = vld [vmem:[%s1148_s11 + $0x78] sm:$0xff]   ;;  %v322_v45 = vld [vmem:[#allocation2] sm:$0xff] }
  0x30   : > { %901 = vmatprep.subr.bf16.mxu0 %v1004_v15  ;;  %v1017_v28 = vld [vmem:[%s1148_s11 + $0x30] sm:$0xff]   ;;  %v1021_v31 = vld [vmem:[%s1148_s11 + $0xb8] sm:$0xff]   ;;  %v323_v50 = vld [vmem:[#allocation2 + $0x8] sm:$0xff] }
  0x31   : > { %938 = vmatpush3.bf16.msra.mxu1 %v1003_v14  ;;  %v1018_v29 = vld [vmem:[%s1148_s11 + $0xb0] sm:$0xff]   ;;  %v1020_v34 = vld [vmem:[%s1148_s11 + $0x38] sm:$0xff]  }
  0x32   : > { %939 = vmatprep.subr.bf16.mxu1 %v1006_v17  ;;  %v1024_v32 = vld [vmem:[%s1150_s12 + $0x4] ss:$12 sps:$4 sm:$0xff]   ;;  %v1025_v33 = vld [vmem:[%s1150_s12 + $0x8] ss:$12 sps:$4 sm:$0xff]   ;;  %v1022_v35 = vld [vmem:[%s1150_s12] ss:$12 sps:$4 sm:$0xff]  }
  0x33   : > { %902 = vmatpush3.bf16.msra.mxu0 %v1005_v16  ;;  %590 = vmatprep.mubr.bf16.mxu0 %v1024_v32  ;;  %v1027_v36 = vld [vmem:[%s1150_s12 + $0x1c] ss:$12 sps:$4 sm:$0xff]   ;;  %v1026_v37 = vld [vmem:[%s1150_s12 + $0x20] ss:$12 sps:$4 sm:$0xff]   ;;  %v1029_v38 = vld [vmem:[%s1150_s12 + $0x18] ss:$12 sps:$4 sm:$0xff]  }
  0x34   : > { %903 = vmatprep.subr.bf16.mxu0 %v1007_v18  ;;  %951 = vmatprep.mubr.bf16.mxu1 %v1025_v33  ;;  %v324_v59 = vld [vmem:[#allocation2 + $0x10] sm:$0xff]  ;;  %v325_v63 = vld [vmem:[#allocation2 + $0x18] sm:$0xff] }
  0x35   : > { %940 = vmatpush3.bf16.msra.mxu1 %v1006_v17 }
  0x36   : > { %941 = vmatprep.subr.bf16.mxu1 %v1009_v20 }
  0x37   : > { %904 = vmatpush3.bf16.msra.mxu0 %v1008_v19 }
  0x38   : > { %905 = vmatprep.subr.bf16.mxu0 %v1010_v21 }
  0x39   : > { %942 = vmatpush3.bf16.msra.mxu1 %v1009_v20 }
  0x3a   : > { %943 = vmatprep.subr.bf16.mxu1 %v1012_v22 }
  0x3b   : > { %906 = vmatpush3.bf16.msra.mxu0 %v1011_v23 }
  0x3c   : > { %907 = vmatprep.subr.bf16.mxu0 %v1013_v24 }
  0x3d   : > { %944 = vmatpush3.bf16.msra.mxu1 %v1012_v22 }
  0x3e   : > { %945 = vmatprep.subr.bf16.mxu1 %v1015_v25 }
  0x3f   : > { %908 = vmatpush3.bf16.msra.mxu0 %v1014_v26 }
  0x40   : > { %909 = vmatprep.subr.bf16.mxu0 %v1016_v27 }
  0x41   : > { %946 = vmatpush3.bf16.msra.mxu1 %v1015_v25 }
  0x42   : > { %947 = vmatprep.subr.bf16.mxu1 %v1018_v29 }
  0x43   : > { %910 = vmatpush3.bf16.msra.mxu0 %v1017_v28 }
  0x44   : > { %911 = vmatprep.subr.bf16.mxu0 %v1019_v30 }
  0x45   : > { %948 = vmatpush3.bf16.msra.mxu1 %v1018_v29 }
  0x46   : > { %949 = vmatprep.subr.bf16.mxu1 %v1021_v31 }
  0x47   : > { %912 = vmatpush3.bf16.msra.mxu0 %v1020_v34 }
  0x49   : > { %950 = vmatpush3.bf16.msra.mxu1 %v1021_v31 }
  0x4a   : > { %591 = vmatmul.mubr.bf16.vlgmr.msra.gmra.mrb[0].mxu0 %v1022_v35  ;;  %v708_v35 = vlaneseq (!%p891_p11) }
  0x4b   : > { %598 = vmatprep.mubr.bf16.mxu0 %v1027_v36 }
  0x4c   : > { %952 = vmatmul.mubr.bf16.vlgmr.msra.gmra.mrb[0].mxu1 %v1026_v37  ;;  %v709_v36 = vshrl.u32 (!%p891_p11), %v708_v35, 7  ;;  %v703_v37 = vld [vmem:[%s1219_s2] sm:$0x1] (!%p891_p11) }
  0x52   : > { %599 = vmatmul.mubr.bf16.gmra.mrb[4].mxu0 %v1029_v38  ;;  %v710_v38 = vsub.s32 (!%p891_p11), 0, %v709_v36 }
 0x11d   : > { %v913_v39 = vpop.f32.mrb[0].mxu0 }
 0x11e   : > { %v914_v40 = vpop.f32.mrb[1].mxu0 }
 0x11f   : > { %v915_v41 = vadd.f32 %v914_v40, %v913_v39  ;;  %v916_v42 = vpop.f32.mrb[2].mxu0  ;;  %v953_v43 = vpop.f32.mrb[0].mxu1 }
 0x120   : > { %v917_v44 = vpop.f32.mrb[3].mxu0  ;;  %v641_v46 = vpop.f32.mrb[1].mxu1 }
 0x121   : > { %v918_v47 = vadd.f32 %v917_v44, %v916_v42  ;;  %v642_v48 = vadd.f32 %v915_v41, %v641_v46  ;;  %v954_v49 = vpop.f32.mrb[2].mxu1  ;;  %v892_v46 = vld [vmem:[%s1220_s3] ss:$0 sm:$0xff] (!%p891_p11) }
 0x122   : > { %v644_v51 = vpop.f32.mrb[3].mxu1 }
 0x123   : > { %v656_v52 = vadd.f32 %v642_v48, %v322_v45  ;;  %v645_v53 = vadd.f32 %v918_v47, %v644_v51 }
 0x125   : > { %660 = vst [vmem:[#allocation2] sm:$0xff] %v656_v52  ;;  %v657_v54 = vadd.f32 %v645_v53, %v323_v50  ;;  %v919_v55 = vpop.f32.mrb[4].mxu0 }
 0x126   : > { %v920_v56 = vpop.f32.mrb[5].mxu0 }
 0x127   : > { %661 = vst [vmem:[#allocation2 + $0x8] sm:$0xff] %v657_v54  ;;  %v921_v57 = vadd.f32 %v920_v56, %v919_v55  ;;  %v922_v58 = vpop.f32.mrb[6].mxu0 }
 0x128   : > { %v923_v60 = vpop.f32.mrb[7].mxu0 }
 0x129   : > { %v650_v61 = vadd.f32 %v953_v43, %v921_v57  ;;  %v924_v62 = vadd.f32 %v923_v60, %v922_v58  ;;  %667 = sbr.rel (%p891_p11) target bundleno = 358 (0x166), region = 70 }
 0x12b   : > { %v658_v0 = vadd.f32 %v650_v61, %v324_v59  ;;  %v653_v1 = vadd.f32 %v954_v49, %v924_v62 }
 0x12c   : > { %v668_v3 = vld [vmem:[#allocation2] sm:$0xff] (!%p891_p11) }
 0x12d   : > { %662 = vst [vmem:[#allocation2 + $0x10] sm:$0xff] %v658_v0  ;;  %v659_v2 = vadd.f32 %v653_v1, %v325_v63  ;;  %v682_v8 = vmul.f32 (!%p891_p11), %v668_v3, %v668_v3 }
 0x12e   : > { %v669_v4 = vld [vmem:[#allocation2 + $0x8] sm:$0xff] (!%p891_p11) }
 0x12f   : > { %663 = vst [vmem:[#allocation2 + $0x18] sm:$0xff] %v659_v2  ;;  %v672_v7 = vadd.f32 (!%p891_p11), %v669_v4, %v668_v3  ;;  %v683_v9 = vmul.f32 (!%p891_p11), %v669_v4, %v669_v4 }
 0x131   : > { %v686_v13 = vadd.f32 %v683_v9, %v682_v8 }
 0x134   : > { %v670_v5 = vld [vmem:[#allocation2 + $0x10] sm:$0xff] }
 0x135   : > { %v684_v10 = vmul.f32 %v670_v5, %v670_v5  ;;  %v673_v11 = vadd.f32 %v672_v7, %v670_v5 }
 0x136   : > { %v671_v6 = vld [vmem:[#allocation2 + $0x18] sm:$0xff] }
 0x137   : > { %v685_v12 = vmul.f32 %v671_v6, %v671_v6  ;;  %v674_v14 = vadd.f32 %v673_v11, %v671_v6  ;;  %v687_v15 = vadd.f32 %v686_v13, %v684_v10 }
 0x139   : > { %v675_v16 = vrot.slane %v674_v14, 4  ;;  %v688_v17 = vadd.f32 %v687_v15, %v685_v12 }
 0x13b   : > { %v676_v18 = vadd.f32 %v675_v16, %v674_v14  ;;  %v689_v19 = vrot.slane %v688_v17, 4 }
 0x13d   : > { %v677_v20 = vrot.slane %v676_v18, 2  ;;  %v690_v21 = vadd.f32 %v689_v19, %v688_v17 }
 0x13f   : > { %v678_v22 = vadd.f32 %v677_v20, %v676_v18  ;;  %v691_v23 = vrot.slane %v690_v21, 2 }
 0x141   : > { %v679_v24 = vrot.slane %v678_v22, 1  ;;  %v692_v25 = vadd.f32 %v691_v23, %v690_v21 }
 0x143   : > { %v680_v26 = vadd.f32 %v679_v24, %v678_v22  ;;  %v693_v27 = vrot.slane %v692_v25, 1 }
 0x145   : > { %v681_v28 = vmul.f32 0.03125, %v680_v26  ;;  %v694_v29 = vadd.f32 %v693_v27, %v692_v25 }
 0x147   : > { %v695_v30 = vmul.f32 0.03125, %v694_v29  ;;  %v696_v31 = vmul.f32 %v681_v28, %v681_v28  ;;  %v699_v40 = vsub.f32 %v668_v3, %v681_v28  ;;  %v700_v42 = vsub.f32 %v669_v4, %v681_v28 }
 0x148   : > { %v701_v43 = vsub.f32 %v670_v5, %v681_v28  ;;  %v702_v44 = vsub.f32 %v671_v6, %v681_v28 }
 0x149   : > { %v697_v32 = vsub.f32 %v695_v30, %v696_v31 }
 0x14b   : > { %v698_v33 = vmax.f32 %v697_v32, 0.0 }
 0x14d   : > { %v704_v34 = vadd.f32 1e-05, %v698_v33 }
 0x14f   : > { %1030 = vrsqrt.f32 %v704_v34 }
 0x159   : > { %v1031_v39 = vpop.eup %1030 }
 0x15a   : > { %v706_v41 = vmul.f32 %v1031_v39, %v703_v37 }
 0x15c   : > { %v711_v45 = vrot.slane %v706_v41, %v710_v38 }
 0x15e   : > { %v713_v47 = vmul.f32 %v711_v45, %v699_v40  ;;  %v714_v48 = vmul.f32 %v711_v45, %v700_v42  ;;  %v715_v49 = vmul.f32 %v711_v45, %v701_v43  ;;  %v716_v50 = vmul.f32 %v711_v45, %v702_v44 }
 0x160   : > { %v724_v51 = vadd.f32 %v892_v46, %v713_v47  ;;  %v725_v52 = vadd.f32 %v892_v46, %v714_v48  ;;  %v726_v53 = vadd.f32 %v892_v46, %v715_v49  ;;  %v727_v54 = vadd.f32 %v892_v46, %v716_v50 }
 0x162   : > { %v728_v55 = vmax.f32 %v724_v51, 0.0  ;;  %v729_v56 = vmax.f32 %v725_v52, 0.0  ;;  %v730_v57 = vmax.f32 %v726_v53, 0.0  ;;  %v731_v58 = vmax.f32 %v727_v54, 0.0 }
 0x164   : > { %732 = vst [vmem:[%s1221_s4] sm:$0xff] %v728_v55  ;;  %733 = vst [vmem:[%s1221_s4 + $0x8] sm:$0xff] %v729_v56 }
 0x165   : > { %734 = vst [vmem:[%s1221_s4 + $0x10] sm:$0xff] %v730_v57  ;;  %735 = vst [vmem:[%s1221_s4 + $0x18] sm:$0xff] %v731_v58 }
 0x166 PF: > { %s14_s19 = sadd.s32 1, %s1070_s19   ;;  %s1222_s15 = smov %s1058_s16 }
 0x167   : > { %p11_p12 = scmp.ge.s32.totalorder %s14_s19, 5   ;;  %s1223_s16 = smov %s1133_s23 }
 0x168   : > { %s1224_s17 = smov %s1066_s18  ;;  %s1225_s18 = smov %s1227_s20 }
 0x169   :  { %13 = sbr.rel (!%p11_p12) target bundleno = 3 (0x3), region = 120 }

// kernel: _lambda_.31
= control target key start
LH: loop header
LB: loop body
LE: loop exit
PB: predicated region body
PF: predicated region fallthrough
CT: control target
= control target key end

     0   :  { %s1116_s15 = smov 0   ;;  %s1118_s16 = smov 0   ;;  %s1235_s0 = inlined_call_operand.vmem [shape: bf16[8,1152], index: 0, kind: input, shape index: {}]   ;;  %s1236_s1 = inlined_call_operand.vmem [shape: bf16[1152,256], index: 1, kind: input, shape index: {}]   ;;  %s1237_s2 = inlined_call_operand.vmem [shape: f32[1,256], index: 2, kind: input, shape index: {}]   ;;  %s1238_s3 = inlined_call_operand.vmem [shape: f32[1,256], index: 3, kind: input, shape index: {}]   ;;  %s1239_s4 = inlined_call_operand.vmem [shape: f32[8,256], index: 4, kind: output, shape index: {}]  }
   0x1   :  { %s1120_s17 = smov 0  }
   0x2 LB: > { %s23_s18 = sadd.s32 1, %s1082_s16  ;;  %p896_p0 = scmp.ge.s32.totalorder %s1086_s17, 1  ;;  %s1086_s17 = sphi %s1120_s17, %s14_s17   ;;  %s1082_s16 = sphi %s1118_s16, %s1241_s16   ;;  %s1078_s15 = sphi %s1116_s15, %s1240_s15  }
   0x3   : > { %p24_p1 = scmp.ge.s32.totalorder %s23_s18, 3  ;;  %p214_p2 = scmp.lt.s32.totalorder %s1086_s17, 4 }
   0x5   : > { %s1243_s18 = smov (%p24_p1, %s23_s18), 0  ;;  %p215_p3 = pnand %p896_p0, %p214_p2 }
   0x6   : > { %s258_s19 = smul.u32 (!%p215_p3), 3, %s1078_s15  ;;  %p900_p6 = scmp.ne.s32.totalorder (!%p215_p3), %s1078_s15, 0 }
   0x7   : > { %218 = sbr.rel (%p215_p3) target bundleno = 364 (0x16c), region = 36 }
   0x8   : > { %s264_s20 = smul.u32 (!%p215_p3), 48, %s1078_s15  ;;  %p259_p4 = scmp.lt.s32.totalorder (!%p215_p3), %s258_s19, 8 }
   0xa   : > { %p266_p5 = scmp.lt.s32.totalorder (!%p215_p3), %s264_s20, 143 }
   0xe   : > { %s1245_s19 = smov (!%p259_p4, %s258_s19), 8  ;;  %s1247_s20 = smov (!%p266_p5, %s264_s20), 143 }
   0xf   : > { %s897_s21 = sshll.u32 %s1245_s19, 2  ;;  %s957_s25 = sshll.u32 %s1247_s20, 3  ;;  %v1088_v0 = vmov (!%p900_p6), 0.0  }
  0x10   : > { %s1141_s24 = scalar_lea.vmem %s1235_s0, %s897_s21  ;;  %s1146_s28 = scalar_lea.vmem %s1236_s1, %s957_s25  ;;  %297 = vst [vmem:[#allocation2] sm:$0xff] (!%p900_p6), %v1088_v0  ;;  %298 = vst [vmem:[#allocation2 + $0x8] sm:$0xff] (!%p900_p6), %v1088_v0 }
  0x11   : > { %296 = sbr.rel (%p900_p6) target bundleno = 24 (0x18), region = 40 }
  0x18 PF: > { %v985_v1 = vld [vmem:[%s1146_s28 + $0x4] ss:$8 sps:$4 sm:$0xff]   ;;  %v987_v2 = vld [vmem:[%s1146_s28] ss:$8 sps:$4 sm:$0xff]   ;;  %v1089_v3 = vmov 0   ;;  %p952_p7 = scmp.ne.s32.totalorder %s1078_s15, 2 }
  0x19   : > { %675 = vmatprep.mubr.bf16.mxu1 %v1089_v3  ;;  %602 = vmatprep.subr.bf16.mxu0 %v985_v1  ;;  %v988_v4 = vld [vmem:[%s1146_s28 + $0x14] ss:$8 sps:$4 sm:$0xff]   ;;  %v990_v5 = vld [vmem:[%s1146_s28 + $0x10] ss:$8 sps:$4 sm:$0xff]   ;;  %v991_v6 = vld [vmem:[%s1146_s28 + $0x24] ss:$8 sps:$4 sm:$0xff]  }
  0x1a   : > { %603 = vmatpush1.bf16.msra.mxu0 %v987_v2  ;;  %v993_v7 = vld [vmem:[%s1146_s28 + $0x20] ss:$8 sps:$4 sm:$0xff]   ;;  %v994_v8 = vld [vmem:[%s1146_s28 + $0x34] ss:$8 sps:$4 sm:$0xff]   ;;  %v996_v9 = vld [vmem:[%s1146_s28 + $0x30] ss:$8 sps:$4 sm:$0xff]  }
  0x1b   : > { %604 = vmatprep.subr.bf16.mxu0 %v988_v4  ;;  %v1009_v10 = vld [vmem:[%s1146_s28 + $0x104] ss:$8 sps:$4 sm:$0xff]   ;;  %v1011_v11 = vld [vmem:[%s1146_s28 + $0x100] ss:$8 sps:$4 sm:$0xff]   ;;  %v1015_v13 = vld [vmem:[%s1146_s28 + $0x114] ss:$8 sps:$4 sm:$0xff]  }
  0x1c   : > { %v997_v12 = vld [vmem:[%s1146_s28 + $0x44] ss:$8 sps:$4 sm:$0xff]   ;;  %643 = vmatprep.subr.bf16.mxu1 %v1009_v10  ;;  %v1017_v14 = vld [vmem:[%s1146_s28 + $0x110] ss:$8 sps:$4 sm:$0xff]   ;;  %v999_v15 = vld [vmem:[%s1146_s28 + $0x40] ss:$8 sps:$4 sm:$0xff]  }
  0x1d   : > { %644 = vmatpush1.bf16.msra.mxu1 %v1011_v11  ;;  %v1000_v16 = vld [vmem:[%s1146_s28 + $0x54] ss:$8 sps:$4 sm:$0xff]   ;;  %v1021_v17 = vld [vmem:[%s1146_s28 + $0x124] ss:$8 sps:$4 sm:$0xff]   ;;  %v1023_v18 = vld [vmem:[%s1146_s28 + $0x120] ss:$8 sps:$4 sm:$0xff]  }
  0x1e   : > { %605 = vmatpush1.bf16.msra.mxu0 %v990_v5  ;;  %645 = vmatprep.subr.bf16.mxu1 %v1015_v13  ;;  %v1002_v19 = vld [vmem:[%s1146_s28 + $0x50] ss:$8 sps:$4 sm:$0xff]   ;;  %v1027_v20 = vld [vmem:[%s1146_s28 + $0x134] ss:$8 sps:$4 sm:$0xff]   ;;  %v1003_v21 = vld [vmem:[%s1146_s28 + $0x64] ss:$8 sps:$4 sm:$0xff]  }
  0x1f   : > { %606 = vmatprep.subr.bf16.mxu0 %v991_v6  ;;  %v1029_v22 = vld [vmem:[%s1146_s28 + $0x130] ss:$8 sps:$4 sm:$0xff]   ;;  %v1005_v23 = vld [vmem:[%s1146_s28 + $0x60] ss:$8 sps:$4 sm:$0xff]   ;;  %v1033_v24 = vld [vmem:[%s1146_s28 + $0x144] ss:$8 sps:$4 sm:$0xff]  }
  0x20   : > { %v1006_v25 = vld [vmem:[%s1146_s28 + $0x74] ss:$8 sps:$4 sm:$0xff]   ;;  %v1035_v26 = vld [vmem:[%s1146_s28 + $0x140] ss:$8 sps:$4 sm:$0xff]   ;;  %v1008_v27 = vld [vmem:[%s1146_s28 + $0x70] ss:$8 sps:$4 sm:$0xff]  }
  0x21   : > { %646 = vmatpush1.bf16.msra.mxu1 %v1017_v14  ;;  %v1039_v28 = vld [vmem:[%s1146_s28 + $0x154] ss:$8 sps:$4 sm:$0xff]   ;;  %v1012_v29 = vld [vmem:[%s1146_s28 + $0x84] ss:$8 sps:$4 sm:$0xff]   ;;  %v1041_v30 = vld [vmem:[%s1146_s28 + $0x150] ss:$8 sps:$4 sm:$0xff]  }
  0x22   : > { %607 = vmatpush1.bf16.msra.mxu0 %v993_v7  ;;  %647 = vmatprep.subr.bf16.mxu1 %v1021_v17  ;;  %v1014_v31 = vld [vmem:[%s1146_s28 + $0x80] ss:$8 sps:$4 sm:$0xff]   ;;  %v1045_v32 = vld [vmem:[%s1146_s28 + $0x164] ss:$8 sps:$4 sm:$0xff]   ;;  %v1018_v33 = vld [vmem:[%s1146_s28 + $0x94] ss:$8 sps:$4 sm:$0xff]  }
  0x23   : > { %608 = vmatprep.subr.bf16.mxu0 %v994_v8  ;;  %v301_v34 = vld [vmem:[%s1141_s24] sm:$0xff]  ;;  %v1020_v37 = vld [vmem:[%s1146_s28 + $0x90] ss:$8 sps:$4 sm:$0xff]   ;;  %v1051_v38 = vld [vmem:[%s1146_s28 + $0x174] ss:$8 sps:$4 sm:$0xff]  }
  0x24   : > { %v902_v35 = vcombine.high %v301_v34, %v301_v34  ;;  %v1047_v36 = vld [vmem:[%s1146_s28 + $0x160] ss:$8 sps:$4 sm:$0xff]   ;;  %v1024_v39 = vld [vmem:[%s1146_s28 + $0xa4] ss:$8 sps:$4 sm:$0xff]   ;;  %v1053_v40 = vld [vmem:[%s1146_s28 + $0x170] ss:$8 sps:$4 sm:$0xff]   ;;  %v901_v53 = vcombine.low %v301_v34, %v301_v34 }
  0x25   : > { %648 = vmatpush1.bf16.msra.mxu1 %v1023_v18  ;;  %v1026_v41 = vld [vmem:[%s1146_s28 + $0xa0] ss:$8 sps:$4 sm:$0xff]   ;;  %v1030_v42 = vld [vmem:[%s1146_s28 + $0xb4] ss:$8 sps:$4 sm:$0xff]   ;;  %v1032_v44 = vld [vmem:[%s1146_s28 + $0xb0] ss:$8 sps:$4 sm:$0xff]  }
  0x26   : > { %609 = vmatpush1.bf16.msra.mxu0 %v996_v9  ;;  %649 = vmatprep.subr.bf16.mxu1 %v1027_v20  ;;  %v1057_v43 = vld [vmem:[%s1141_s24 + $0x8] ss:$0 sps:$4 sm:$0xff]   ;;  %v1036_v45 = vld [vmem:[%s1146_s28 + $0xc4] ss:$8 sps:$4 sm:$0xff]   ;;  %v1042_v47 = vld [vmem:[%s1146_s28 + $0xd4] ss:$8 sps:$4 sm:$0xff]  }
  0x27   : > { %610 = vmatprep.subr.bf16.mxu0 %v997_v12  ;;  %634 = vmatprep.mubr.bf16.mxu0 %v902_v35  ;;  %v1038_v46 = vld [vmem:[%s1146_s28 + $0xc0] ss:$8 sps:$4 sm:$0xff]   ;;  %v1044_v48 = vld [vmem:[%s1146_s28 + $0xd0] ss:$8 sps:$4 sm:$0xff]   ;;  %v1048_v49 = vld [vmem:[%s1146_s28 + $0xe4] ss:$8 sps:$4 sm:$0xff]  }
  0x28   : > { %v1050_v50 = vld [vmem:[%s1146_s28 + $0xe0] ss:$8 sps:$4 sm:$0xff]   ;;  %v1054_v51 = vld [vmem:[%s1146_s28 + $0xf4] ss:$8 sps:$4 sm:$0xff]   ;;  %v1056_v52 = vld [vmem:[%s1146_s28 + $0xf0] ss:$8 sps:$4 sm:$0xff]  }
  0x29   : > { %650 = vmatpush1.bf16.msra.mxu1 %v1029_v22  ;;  %v299_v58 = vld [vmem:[#allocation2] sm:$0xff]  ;;  %v300_v61 = vld [vmem:[#allocation2 + $0x8] sm:$0xff] }
  0x2a   : > { %611 = vmatpush1.bf16.msra.mxu0 %v999_v15  ;;  %651 = vmatprep.subr.bf16.mxu1 %v1033_v24 }
  0x2b   : > { %612 = vmatprep.subr.bf16.mxu0 %v1000_v16 }
  0x2d   : > { %652 = vmatpush1.bf16.msra.mxu1 %v1035_v26 }
  0x2e   : > { %613 = vmatpush1.bf16.msra.mxu0 %v1002_v19  ;;  %653 = vmatprep.subr.bf16.mxu1 %v1039_v28 }
  0x2f   : > { %614 = vmatprep.subr.bf16.mxu0 %v1003_v21 }
  0x31   : > { %654 = vmatpush1.bf16.msra.mxu1 %v1041_v30 }
  0x32   : > { %615 = vmatpush1.bf16.msra.mxu0 %v1005_v23  ;;  %655 = vmatprep.subr.bf16.mxu1 %v1045_v32 }
  0x33   : > { %616 = vmatprep.subr.bf16.mxu0 %v1006_v25 }
  0x35   : > { %656 = vmatpush1.bf16.msra.mxu1 %v1047_v36 }
  0x36   : > { %617 = vmatpush1.bf16.msra.mxu0 %v1008_v27  ;;  %657 = vmatprep.subr.bf16.mxu1 %v1051_v38 }
  0x37   : > { %618 = vmatprep.subr.bf16.mxu0 %v1012_v29 }
  0x39   : > { %658 = vmatpush1.bf16.msra.mxu1 %v1053_v40 }
  0x3a   : > { %619 = vmatpush1.bf16.msra.mxu0 %v1014_v31 }
  0x3b   : > { %620 = vmatprep.subr.bf16.mxu0 %v1018_v33 }
  0x3c   : > { %676 = vmatmul.mubr.bf16.vlgmr.msra.gmra.mrb[0].mxu1 %v1057_v43 }
  0x3e   : > { %621 = vmatpush1.bf16.msra.mxu0 %v1020_v37 }
  0x3f   : > { %622 = vmatprep.subr.bf16.mxu0 %v1024_v39 }
  0x42   : > { %623 = vmatpush1.bf16.msra.mxu0 %v1026_v41 }
  0x43   : > { %624 = vmatprep.subr.bf16.mxu0 %v1030_v42 }
  0x46   : > { %625 = vmatpush1.bf16.msra.mxu0 %v1032_v44  ;;  %v1090_v44 = vmov (!%p952_p7), 1966171168  }
  0x47   : > { %626 = vmatprep.subr.bf16.mxu0 %v1036_v45  ;;  %v741_v45 = vunpack.c.l.s4 (!%p952_p7), %v1090_v44 }
  0x4a   : > { %627 = vmatpush1.bf16.msra.mxu0 %v1038_v46  ;;  %v743_v46 = vlaneseq (!%p952_p7) }
  0x4b   : > { %628 = vmatprep.subr.bf16.mxu0 %v1042_v47  ;;  %v742_v47 = vunpack.c.0.s8 (!%p952_p7), %v741_v45 }
  0x4e   : > { %629 = vmatpush1.bf16.msra.mxu0 %v1044_v48  ;;  %v744_v48 = vshrl.u32 (!%p952_p7), %v743_v46, 7 }
  0x4f   : > { %630 = vmatprep.subr.bf16.mxu0 %v1048_v49 }
  0x52   : > { %631 = vmatpush1.bf16.msra.mxu0 %v1050_v50  ;;  %v745_v50 = vsub.s32 (!%p952_p7), %v742_v47, %v744_v48 }
  0x53   : > { %632 = vmatprep.subr.bf16.mxu0 %v1054_v51 }
  0x56   : > { %633 = vmatpush1.bf16.msra.mxu0 %v1056_v52 }
  0x59   : > { %635 = vmatmul.mubr.bf16.vlgmr.msra.gmra.mrb[0].mxu0 %v901_v53 }
 0x10f   : > { %v677_v54 = vpop.f32.mrb[0].mxu1 }
 0x110   : > { %v679_v55 = vpop.f32.mrb[1].mxu1 }
 0x111   : > { %v681_v56 = vpop.f32.mrb[2].mxu1 }
 0x112   : > { %v682_v57 = vpop.f32.mrb[3].mxu1  ;;  %v759_v56 = vsub.s32 (!%p952_p7), 0, %v744_v48 }
 0x113   : > { %v763_v57 = vsub.s32 (!%p952_p7), 1, %v744_v48 }
 0x12c   : > { %v636_v59 = vpop.f32.mrb[0].mxu0  ;;  %691 = sbr.rel (%p952_p7) target bundleno = 364 (0x16c), region = 44 }
 0x12d   : > { %v678_v60 = vadd.f32 %v677_v54, %v636_v59  ;;  %v638_v62 = vpop.f32.mrb[1].mxu0  ;;  %v732_v54 = vld [vmem:[%s1237_s2] sm:$0x3] (!%p952_p7) }
 0x12e   : > { %v680_v63 = vadd.f32 %v679_v55, %v638_v62  ;;  %v640_v0 = vpop.f32.mrb[2].mxu0 }
 0x12f   : > { %v684_v1 = vadd.f32 %v678_v60, %v299_v58  ;;  %v641_v2 = vpop.f32.mrb[3].mxu0  ;;  %v769_v58 = vld [vmem:[%s1238_s3] sm:$0x3] (!%p952_p7) }
 0x130   : > { %v685_v3 = vadd.f32 %v680_v63, %v300_v61  ;;  %v774_v63 = vrot.slane (!%p952_p7), %v769_v58, %v759_v56 }
 0x131   : > { %686 = vst [vmem:[#allocation2] sm:$0xff] %v684_v1  ;;  %v778_v1 = vrot.slane (!%p952_p7), %v769_v58, %v763_v57 }
 0x132   : > { %687 = vst [vmem:[#allocation2 + $0x8] sm:$0xff] %v685_v3 }
 0x138   : > { %v1200_v4 = vld [vmem:[#allocation2] sm:$0xff] }
 0x139   : > { %v1202_v5 = vld [vmem:[#allocation2 + $0x8] sm:$0xff]  ;;  %v694_v6 = vrot.slane %v1200_v4, 4  ;;  %v708_v8 = vmul.f32 %v1200_v4, %v1200_v4 }
 0x13a   : > { %v700_v7 = vrot.slane %v1202_v5, 4  ;;  %v709_v9 = vmul.f32 %v1202_v5, %v1202_v5 }
 0x13b   : > { %v695_v10 = vadd.f32 %v694_v6, %v1200_v4  ;;  %v710_v12 = vrot.slane %v708_v8, 4 }
 0x13c   : > { %v701_v11 = vadd.f32 %v700_v7, %v1202_v5  ;;  %v716_v13 = vrot.slane %v709_v9, 4 }
 0x13d   : > { %v696_v14 = vrot.slane %v695_v10, 2  ;;  %v711_v16 = vadd.f32 %v710_v12, %v708_v8 }
 0x13e   : > { %v702_v15 = vrot.slane %v701_v11, 2  ;;  %v717_v17 = vadd.f32 %v716_v13, %v709_v9 }
 0x13f   : > { %v697_v18 = vadd.f32 %v696_v14, %v695_v10  ;;  %v712_v20 = vrot.slane %v711_v16, 2 }
 0x140   : > { %v703_v19 = vadd.f32 %v702_v15, %v701_v11  ;;  %v718_v21 = vrot.slane %v717_v17, 2 }
 0x141   : > { %v698_v22 = vrot.slane %v697_v18, 1  ;;  %v713_v24 = vadd.f32 %v712_v20, %v711_v16 }
 0x142   : > { %v704_v23 = vrot.slane %v703_v19, 1  ;;  %v719_v25 = vadd.f32 %v718_v21, %v717_v17 }
 0x143   : > { %v699_v26 = vadd.f32 %v698_v22, %v697_v18  ;;  %v714_v28 = vrot.slane %v713_v24, 1 }
 0x144   : > { %v705_v27 = vadd.f32 %v704_v23, %v703_v19  ;;  %v720_v29 = vrot.slane %v719_v25, 1 }
 0x145   : > { %v706_v30 = vmul.f32 0.125, %v699_v26  ;;  %v715_v32 = vadd.f32 %v714_v28, %v713_v24 }
 0x146   : > { %v707_v31 = vmul.f32 0.125, %v705_v27  ;;  %v721_v33 = vadd.f32 %v720_v29, %v719_v25 }
 0x147   : > { %v722_v34 = vmul.f32 0.125, %v715_v32  ;;  %v724_v36 = vmul.f32 %v706_v30, %v706_v30  ;;  %v730_v59 = vsub.f32 %v1200_v4, %v706_v30 }
 0x148   : > { %v723_v35 = vmul.f32 0.125, %v721_v33  ;;  %v725_v37 = vmul.f32 %v707_v31, %v707_v31  ;;  %v731_v61 = vsub.f32 %v1202_v5, %v707_v31 }
 0x149   : > { %v726_v38 = vsub.f32 %v722_v34, %v724_v36 }
 0x14a   : > { %v727_v39 = vsub.f32 %v723_v35, %v725_v37 }
 0x14b   : > { %v728_v40 = vmax.f32 %v726_v38, 0.0 }
 0x14c   : > { %v729_v41 = vmax.f32 %v727_v39, 0.0 }
 0x14d   : > { %v733_v42 = vadd.f32 1e-05, %v728_v40 }
 0x14e   : > { %v734_v43 = vadd.f32 1e-05, %v729_v41 }
 0x14f   : > { %1060 = vrsqrt.f32 %v733_v42 }
 0x150   : > { %1062 = vrsqrt.f32 %v734_v43 }
 0x159   : > { %v1061_v49 = vpop.eup %1060 }
 0x15a   : > { %v1063_v51 = vpop.eup %1062 }
 0x15b   : > { %v739_v52 = vcombine.low %v1061_v49, %v1063_v51 }
 0x15d   : > { %v746_v53 = vrot.slane %v739_v52, %v745_v50 }
 0x15f   : > { %v753_v55 = vrot.slane %v746_v53, %v745_v50 }
 0x161   : > { %v755_v60 = vmul.f32 %v753_v55, %v732_v54 }
 0x163   : > { %v760_v62 = vrot.slane %v755_v60, %v759_v56  ;;  %v764_v0 = vrot.slane %v755_v60, %v763_v57 }
 0x165   : > { %v767_v2 = vmul.f32 %v760_v62, %v730_v59  ;;  %v768_v3 = vmul.f32 %v764_v0, %v731_v61 }
 0x167   : > { %v781_v6 = vadd.f32 %v774_v63, %v767_v2  ;;  %v782_v7 = vadd.f32 %v778_v1, %v768_v3 }
 0x169   : > { %v783_v8 = vmax.f32 %v781_v6, 0.0  ;;  %v784_v9 = vmax.f32 %v782_v7, 0.0 }
 0x16b   : > { %785 = vst [vmem:[%s1239_s4] sm:$0xff] %v783_v8  ;;  %786 = vst [vmem:[%s1239_s4 + $0x8] sm:$0xff] %v784_v9 }
 0x16c PF: > { %s14_s17 = sadd.s32 1, %s1086_s17   ;;  %s1240_s15 = smov %s1082_s16 }
 0x16d   : > { %p11_p8 = scmp.ge.s32.totalorder %s14_s17, 5   ;;  %s1241_s16 = smov %s1243_s18 }
 0x16f   :  { %13 = sbr.rel (!%p11_p8) target bundleno = 2 (0x2), region = 83 }

// kernel: _lambda_.32
= control target key start
LH: loop header
LB: loop body
LE: loop exit
PB: predicated region body
PF: predicated region fallthrough
CT: control target
= control target key end

     0   :  { %v314_v1 = vmov 0   ;;  %v315_v60 = vmov 1966171168   ;;  %v222_v62 = vlaneseq  ;;  %s418_s1 = inlined_call_operand.vmem [shape: bf16[128,256], index: 1, kind: input, shape index: {}]   ;;  %s419_s0 = inlined_call_operand.vmem [shape: bf16[8,128], index: 0, kind: input, shape index: {}]   ;;  %s420_s2 = inlined_call_operand.vmem [shape: f32[1,256], index: 2, kind: input, shape index: {}]   ;;  %s421_s3 = inlined_call_operand.vmem [shape: f32[1,256], index: 3, kind: input, shape index: {}]   ;;  %s422_s4 = inlined_call_operand.vmem [shape: f32[8,256], index: 4, kind: output, shape index: {}]  }
   0x1   :  { %v286_v0 = vld [vmem:[%s418_s1 + $0x4] ss:$8 sps:$4 sm:$0xff]   ;;  %155 = vmatprep.mubr.bf16.mxu0 %v314_v1  ;;  %v288_v2 = vld [vmem:[%s418_s1] ss:$8 sps:$4 sm:$0xff]   ;;  %v289_v3 = vld [vmem:[%s418_s1 + $0x14] ss:$8 sps:$4 sm:$0xff]   ;;  %v220_v61 = vunpack.c.l.s4 %v315_v60 }
   0x2   :  { %123 = vmatprep.subr.bf16.mxu0 %v286_v0  ;;  %v291_v4 = vld [vmem:[%s418_s1 + $0x10] ss:$8 sps:$4 sm:$0xff]   ;;  %v292_v5 = vld [vmem:[%s418_s1 + $0x24] ss:$8 sps:$4 sm:$0xff]   ;;  %v294_v6 = vld [vmem:[%s418_s1 + $0x20] ss:$8 sps:$4 sm:$0xff]  }
   0x3   :  { %124 = vmatpush1.bf16.msra.mxu0 %v288_v2  ;;  %v295_v7 = vld [vmem:[%s418_s1 + $0x34] ss:$8 sps:$4 sm:$0xff]   ;;  %v297_v8 = vld [vmem:[%s418_s1 + $0x30] ss:$8 sps:$4 sm:$0xff]   ;;  %v298_v9 = vld [vmem:[%s418_s1 + $0x44] ss:$8 sps:$4 sm:$0xff]   ;;  %v221_v63 = vunpack.c.0.s8 %v220_v61 }
   0x4   :  { %125 = vmatprep.subr.bf16.mxu0 %v289_v3  ;;  %v300_v10 = vld [vmem:[%s418_s1 + $0x40] ss:$8 sps:$4 sm:$0xff]   ;;  %v301_v11 = vld [vmem:[%s418_s1 + $0x54] ss:$8 sps:$4 sm:$0xff]   ;;  %v303_v12 = vld [vmem:[%s418_s1 + $0x50] ss:$8 sps:$4 sm:$0xff]  }
   0x5   :  { %v304_v13 = vld [vmem:[%s418_s1 + $0x64] ss:$8 sps:$4 sm:$0xff]   ;;  %v306_v14 = vld [vmem:[%s418_s1 + $0x60] ss:$8 sps:$4 sm:$0xff]   ;;  %v307_v15 = vld [vmem:[%s418_s1 + $0x74] ss:$8 sps:$4 sm:$0xff]  }
   0x6   :  { %v309_v16 = vld [vmem:[%s418_s1 + $0x70] ss:$8 sps:$4 sm:$0xff]   ;;  %v26_v17 = vld [vmem:[%s419_s0] sm:$0xf]  ;;  %v223_v0 = vshrl.u32 %v222_v62, 7 }
   0x7   :  { %126 = vmatpush1.bf16.msra.mxu0 %v291_v4 }
   0x8   :  { %127 = vmatprep.subr.bf16.mxu0 %v292_v5  ;;  %v224_v2 = vsub.s32 %v221_v63, %v223_v0 }
   0xb   :  { %128 = vmatpush1.bf16.msra.mxu0 %v294_v6  ;;  %v211_v6 = vld [vmem:[%s420_s2] sm:$0x3] }
   0xc   :  { %129 = vmatprep.subr.bf16.mxu0 %v295_v7 }
   0xf   :  { %130 = vmatpush1.bf16.msra.mxu0 %v297_v8  ;;  %v238_v8 = vsub.s32 0, %v223_v0 }
  0x10   :  { %131 = vmatprep.subr.bf16.mxu0 %v298_v9  ;;  %v242_v9 = vsub.s32 1, %v223_v0 }
  0x13   :  { %132 = vmatpush1.bf16.msra.mxu0 %v300_v10  ;;  %v248_v10 = vld [vmem:[%s421_s3] sm:$0x3] }
  0x14   :  { %133 = vmatprep.subr.bf16.mxu0 %v301_v11 }
  0x17   :  { %134 = vmatpush1.bf16.msra.mxu0 %v303_v12  ;;  %v253_v12 = vrot.slane %v248_v10, %v238_v8 }
  0x18   :  { %135 = vmatprep.subr.bf16.mxu0 %v304_v13  ;;  %v257_v13 = vrot.slane %v248_v10, %v242_v9 }
  0x1b   :  { %136 = vmatpush1.bf16.msra.mxu0 %v306_v14 }
  0x1c   :  { %137 = vmatprep.subr.bf16.mxu0 %v307_v15 }
  0x1f   :  { %138 = vmatpush1.bf16.msra.mxu0 %v309_v16 }
  0x22   :  { %156 = vmatmul.mubr.bf16.vlgmr.msra.gmra.mrb[0].mxu0 %v26_v17 }
  0xf5   :  { %v392_v18 = vpop.f32.mrb[0].mxu0 }
  0xf6   :  { %v173_v19 = vrot.slane %v392_v18, 4  ;;  %v187_v20 = vmul.f32 %v392_v18, %v392_v18  ;;  %v397_v21 = vpop.f32.mrb[1].mxu0 }
  0xf7   :  { %v179_v22 = vrot.slane %v397_v21, 4  ;;  %v188_v23 = vmul.f32 %v397_v21, %v397_v21  ;;  %v161_v24 = vpop.f32.mrb[2].mxu0 }
  0xf8   :  { %v174_v25 = vadd.f32 %v173_v19, %v392_v18  ;;  %v189_v26 = vrot.slane %v187_v20, 4  ;;  %v162_v27 = vpop.f32.mrb[3].mxu0 }
  0xf9   :  { %v180_v28 = vadd.f32 %v179_v22, %v397_v21  ;;  %v195_v29 = vrot.slane %v188_v23, 4 }
  0xfa   :  { %v175_v30 = vrot.slane %v174_v25, 2  ;;  %v190_v31 = vadd.f32 %v189_v26, %v187_v20 }
  0xfb   :  { %v181_v32 = vrot.slane %v180_v28, 2  ;;  %v196_v33 = vadd.f32 %v195_v29, %v188_v23 }
  0xfc   :  { %v176_v34 = vadd.f32 %v175_v30, %v174_v25  ;;  %v191_v35 = vrot.slane %v190_v31, 2 }
  0xfd   :  { %v182_v36 = vadd.f32 %v181_v32, %v180_v28  ;;  %v197_v37 = vrot.slane %v196_v33, 2 }
  0xfe   :  { %v177_v38 = vrot.slane %v176_v34, 1  ;;  %v192_v39 = vadd.f32 %v191_v35, %v190_v31 }
  0xff   :  { %v183_v40 = vrot.slane %v182_v36, 1  ;;  %v198_v41 = vadd.f32 %v197_v37, %v196_v33 }
 0x100   :  { %v178_v42 = vadd.f32 %v177_v38, %v176_v34  ;;  %v193_v43 = vrot.slane %v192_v39, 1 }
 0x101   :  { %v184_v44 = vadd.f32 %v183_v40, %v182_v36  ;;  %v199_v45 = vrot.slane %v198_v41, 1 }
 0x102   :  { %v185_v46 = vmul.f32 0.125, %v178_v42  ;;  %v194_v47 = vadd.f32 %v193_v43, %v192_v39 }
 0x103   :  { %v186_v48 = vmul.f32 0.125, %v184_v44  ;;  %v200_v49 = vadd.f32 %v199_v45, %v198_v41 }
 0x104   :  { %v201_v50 = vmul.f32 0.125, %v194_v47  ;;  %v203_v51 = vmul.f32 %v185_v46, %v185_v46  ;;  %v209_v14 = vsub.f32 %v392_v18, %v185_v46 }
 0x105   :  { %v202_v52 = vmul.f32 0.125, %v200_v49  ;;  %v204_v53 = vmul.f32 %v186_v48, %v186_v48  ;;  %v210_v15 = vsub.f32 %v397_v21, %v186_v48 }
 0x106   :  { %v205_v54 = vsub.f32 %v201_v50, %v203_v51 }
 0x107   :  { %v206_v55 = vsub.f32 %v202_v52, %v204_v53 }
 0x108   :  { %v207_v56 = vmax.f32 %v205_v54, 0.0 }
 0x109   :  { %v208_v57 = vmax.f32 %v206_v55, 0.0 }
 0x10a   :  { %v212_v58 = vadd.f32 1e-05, %v207_v56 }
 0x10b   :  { %v213_v59 = vadd.f32 1e-05, %v208_v57 }
 0x10c   :  { %310 = vrsqrt.f32 %v212_v58 }
 0x10d   :  { %312 = vrsqrt.f32 %v213_v59 }
 0x116   :  { %v311_v1 = vpop.eup %310 }
 0x117   :  { %v313_v3 = vpop.eup %312 }
 0x118   :  { %v218_v4 = vcombine.low %v311_v1, %v313_v3 }
 0x11a   :  { %v225_v5 = vrot.slane %v218_v4, %v224_v2 }
 0x11c   :  { %v232_v7 = vrot.slane %v225_v5, %v224_v2 }
 0x11e   :  { %v234_v11 = vmul.f32 %v232_v7, %v211_v6 }
 0x120   :  { %v239_v16 = vrot.slane %v234_v11, %v238_v8  ;;  %v243_v17 = vrot.slane %v234_v11, %v242_v9 }
 0x122   :  { %v246_v19 = vmul.f32 %v239_v16, %v209_v14  ;;  %v247_v20 = vmul.f32 %v243_v17, %v210_v15 }
 0x124   :  { %v260_v22 = vadd.f32 %v253_v12, %v246_v19  ;;  %v261_v23 = vadd.f32 %v257_v13, %v247_v20 }
 0x126   :  { %262 = vst [vmem:[%s422_s4] sm:$0xff] %v260_v22  ;;  %263 = vst [vmem:[%s422_s4 + $0x8] sm:$0xff] %v261_v23 }

// kernel: _lambda_.33
= control target key start
LH: loop header
LB: loop body
LE: loop exit
PB: predicated region body
PF: predicated region fallthrough
CT: control target
= control target key end

     0   :  { %s1190_s18 = smov 0   ;;  %s1192_s19 = smov 0   ;;  %s1315_s0 = inlined_call_operand.vmem [shape: bf16[8,2304], index: 0, kind: input, shape index: {}]   ;;  %s1316_s1 = inlined_call_operand.vmem [shape: bf16[2304,256], index: 1, kind: input, shape index: {}]   ;;  %s1317_s2 = inlined_call_operand.vmem [shape: f32[1,256], index: 2, kind: input, shape index: {}]   ;;  %s1318_s3 = inlined_call_operand.vmem [shape: f32[1,256], index: 3, kind: input, shape index: {}]   ;;  %s1319_s4 = inlined_call_operand.vmem [shape: f32[8,256], index: 4, kind: input, shape index: {}]   ;;  %s1320_s5 = inlined_call_operand.vmem [shape: f32[8,256], index: 5, kind: output, shape index: {}]  }
   0x1   :  { %s1194_s20 = smov 0  }
   0x2 LB: > { %s24_s21 = sadd.s32 1, %s1151_s19  ;;  %p965_p0 = scmp.ge.s32.totalorder %s1155_s20, 1  ;;  %s1155_s20 = sphi %s1194_s20, %s15_s20   ;;  %s1151_s19 = sphi %s1192_s19, %s1322_s19   ;;  %s1147_s18 = sphi %s1190_s18, %s1321_s18  }
   0x3   : > { %p25_p1 = scmp.ge.s32.totalorder %s24_s21, 6  ;;  %p250_p2 = scmp.lt.s32.totalorder %s1155_s20, 7 }
   0x5   : > { %s1324_s21 = smov (%p25_p1, %s24_s21), 0  ;;  %p251_p3 = pnand %p965_p0, %p250_p2 }
   0x6   : > { %s301_s22 = smul.u32 (!%p251_p3), 3, %s1147_s18  ;;  %p969_p6 = scmp.ne.s32.totalorder (!%p251_p3), %s1147_s18, 0 }
   0x7   : > { %254 = sbr.rel (%p251_p3) target bundleno = 366 (0x16e), region = 40 }
   0x8   : > { %s307_s23 = smul.u32 (!%p251_p3), 48, %s1147_s18  ;;  %p302_p4 = scmp.lt.s32.totalorder (!%p251_p3), %s301_s22, 17 }
   0xa   : > { %p309_p5 = scmp.lt.s32.totalorder (!%p251_p3), %s307_s23, 287 }
   0xe   : > { %s1326_s22 = smov (!%p302_p4, %s301_s22), 17  ;;  %s1328_s23 = smov (!%p309_p5, %s307_s23), 287 }
   0xf   : > { %s966_s24 = sshll.u32 %s1326_s22, 2  ;;  %s1026_s28 = sshll.u32 %s1328_s23, 3  ;;  %v1157_v0 = vmov (!%p969_p6), 0.0  }
  0x10   : > { %s1215_s27 = scalar_lea.vmem %s1315_s0, %s966_s24  ;;  %s1220_s6 = scalar_lea.vmem %s1316_s1, %s1026_s28  ;;  %346 = vst [vmem:[#allocation2] sm:$0xff] (!%p969_p6), %v1157_v0  ;;  %347 = vst [vmem:[#allocation2 + $0x8] sm:$0xff] (!%p969_p6), %v1157_v0 }
  0x11   : > { %345 = sbr.rel (%p969_p6) target bundleno = 24 (0x18), region = 44 }
  0x18 PF: > { %v1054_v1 = vld [vmem:[%s1220_s6 + $0x4] ss:$8 sps:$4 sm:$0xff]   ;;  %v1056_v2 = vld [vmem:[%s1220_s6] ss:$8 sps:$4 sm:$0xff]   ;;  %v1158_v3 = vmov 0   ;;  %p1021_p7 = scmp.ne.s32.totalorder %s1147_s18, 5 }
  0x19   : > { %724 = vmatprep.mubr.bf16.mxu1 %v1158_v3  ;;  %651 = vmatprep.subr.bf16.mxu0 %v1054_v1  ;;  %v1057_v4 = vld [vmem:[%s1220_s6 + $0x14] ss:$8 sps:$4 sm:$0xff]   ;;  %v1059_v5 = vld [vmem:[%s1220_s6 + $0x10] ss:$8 sps:$4 sm:$0xff]   ;;  %v1060_v6 = vld [vmem:[%s1220_s6 + $0x24] ss:$8 sps:$4 sm:$0xff]  }
  0x1a   : > { %652 = vmatpush1.bf16.msra.mxu0 %v1056_v2  ;;  %v1062_v7 = vld [vmem:[%s1220_s6 + $0x20] ss:$8 sps:$4 sm:$0xff]   ;;  %v1063_v8 = vld [vmem:[%s1220_s6 + $0x34] ss:$8 sps:$4 sm:$0xff]   ;;  %v1065_v9 = vld [vmem:[%s1220_s6 + $0x30] ss:$8 sps:$4 sm:$0xff]  }
  0x1b   : > { %653 = vmatprep.subr.bf16.mxu0 %v1057_v4  ;;  %v1078_v10 = vld [vmem:[%s1220_s6 + $0x104] ss:$8 sps:$4 sm:$0xff]   ;;  %v1080_v11 = vld [vmem:[%s1220_s6 + $0x100] ss:$8 sps:$4 sm:$0xff]   ;;  %v1084_v13 = vld [vmem:[%s1220_s6 + $0x114] ss:$8 sps:$4 sm:$0xff]  }
  0x1c   : > { %v1066_v12 = vld [vmem:[%s1220_s6 + $0x44] ss:$8 sps:$4 sm:$0xff]   ;;  %692 = vmatprep.subr.bf16.mxu1 %v1078_v10  ;;  %v1086_v14 = vld [vmem:[%s1220_s6 + $0x110] ss:$8 sps:$4 sm:$0xff]   ;;  %v1068_v15 = vld [vmem:[%s1220_s6 + $0x40] ss:$8 sps:$4 sm:$0xff]  }
  0x1d   : > { %693 = vmatpush1.bf16.msra.mxu1 %v1080_v11  ;;  %v1069_v16 = vld [vmem:[%s1220_s6 + $0x54] ss:$8 sps:$4 sm:$0xff]   ;;  %v1090_v17 = vld [vmem:[%s1220_s6 + $0x124] ss:$8 sps:$4 sm:$0xff]   ;;  %v1092_v18 = vld [vmem:[%s1220_s6 + $0x120] ss:$8 sps:$4 sm:$0xff]  }
  0x1e   : > { %654 = vmatpush1.bf16.msra.mxu0 %v1059_v5  ;;  %694 = vmatprep.subr.bf16.mxu1 %v1084_v13  ;;  %v1071_v19 = vld [vmem:[%s1220_s6 + $0x50] ss:$8 sps:$4 sm:$0xff]   ;;  %v1096_v20 = vld [vmem:[%s1220_s6 + $0x134] ss:$8 sps:$4 sm:$0xff]   ;;  %v1072_v21 = vld [vmem:[%s1220_s6 + $0x64] ss:$8 sps:$4 sm:$0xff]  }
  0x1f   : > { %655 = vmatprep.subr.bf16.mxu0 %v1060_v6  ;;  %v1098_v22 = vld [vmem:[%s1220_s6 + $0x130] ss:$8 sps:$4 sm:$0xff]   ;;  %v1074_v23 = vld [vmem:[%s1220_s6 + $0x60] ss:$8 sps:$4 sm:$0xff]   ;;  %v1102_v24 = vld [vmem:[%s1220_s6 + $0x144] ss:$8 sps:$4 sm:$0xff]  }
  0x20   : > { %v1075_v25 = vld [vmem:[%s1220_s6 + $0x74] ss:$8 sps:$4 sm:$0xff]   ;;  %v1104_v26 = vld [vmem:[%s1220_s6 + $0x140] ss:$8 sps:$4 sm:$0xff]   ;;  %v1077_v27 = vld [vmem:[%s1220_s6 + $0x70] ss:$8 sps:$4 sm:$0xff]  }
  0x21   : > { %695 = vmatpush1.bf16.msra.mxu1 %v1086_v14  ;;  %v1108_v28 = vld [vmem:[%s1220_s6 + $0x154] ss:$8 sps:$4 sm:$0xff]   ;;  %v1081_v29 = vld [vmem:[%s1220_s6 + $0x84] ss:$8 sps:$4 sm:$0xff]   ;;  %v1110_v30 = vld [vmem:[%s1220_s6 + $0x150] ss:$8 sps:$4 sm:$0xff]  }
  0x22   : > { %656 = vmatpush1.bf16.msra.mxu0 %v1062_v7  ;;  %696 = vmatprep.subr.bf16.mxu1 %v1090_v17  ;;  %v1083_v31 = vld [vmem:[%s1220_s6 + $0x80] ss:$8 sps:$4 sm:$0xff]   ;;  %v1114_v32 = vld [vmem:[%s1220_s6 + $0x164] ss:$8 sps:$4 sm:$0xff]   ;;  %v1087_v33 = vld [vmem:[%s1220_s6 + $0x94] ss:$8 sps:$4 sm:$0xff]  }
  0x23   : > { %657 = vmatprep.subr.bf16.mxu0 %v1063_v8  ;;  %v350_v34 = vld [vmem:[%s1215_s27] sm:$0xff]  ;;  %v1089_v37 = vld [vmem:[%s1220_s6 + $0x90] ss:$8 sps:$4 sm:$0xff]   ;;  %v1120_v38 = vld [vmem:[%s1220_s6 + $0x174] ss:$8 sps:$4 sm:$0xff]  }
  0x24   : > { %v971_v35 = vcombine.high %v350_v34, %v350_v34  ;;  %v1116_v36 = vld [vmem:[%s1220_s6 + $0x160] ss:$8 sps:$4 sm:$0xff]   ;;  %v1093_v39 = vld [vmem:[%s1220_s6 + $0xa4] ss:$8 sps:$4 sm:$0xff]   ;;  %v1122_v40 = vld [vmem:[%s1220_s6 + $0x170] ss:$8 sps:$4 sm:$0xff]   ;;  %v970_v53 = vcombine.low %v350_v34, %v350_v34 }
  0x25   : > { %697 = vmatpush1.bf16.msra.mxu1 %v1092_v18  ;;  %v1095_v41 = vld [vmem:[%s1220_s6 + $0xa0] ss:$8 sps:$4 sm:$0xff]   ;;  %v1099_v42 = vld [vmem:[%s1220_s6 + $0xb4] ss:$8 sps:$4 sm:$0xff]   ;;  %v1101_v44 = vld [vmem:[%s1220_s6 + $0xb0] ss:$8 sps:$4 sm:$0xff]  }
  0x26   : > { %658 = vmatpush1.bf16.msra.mxu0 %v1065_v9  ;;  %698 = vmatprep.subr.bf16.mxu1 %v1096_v20  ;;  %v1126_v43 = vld [vmem:[%s1215_s27 + $0x8] ss:$0 sps:$4 sm:$0xff]   ;;  %v1105_v45 = vld [vmem:[%s1220_s6 + $0xc4] ss:$8 sps:$4 sm:$0xff]   ;;  %v1111_v47 = vld [vmem:[%s1220_s6 + $0xd4] ss:$8 sps:$4 sm:$0xff]  }
  0x27   : > { %659 = vmatprep.subr.bf16.mxu0 %v1066_v12  ;;  %683 = vmatprep.mubr.bf16.mxu0 %v971_v35  ;;  %v1107_v46 = vld [vmem:[%s1220_s6 + $0xc0] ss:$8 sps:$4 sm:$0xff]   ;;  %v1113_v48 = vld [vmem:[%s1220_s6 + $0xd0] ss:$8 sps:$4 sm:$0xff]   ;;  %v1117_v49 = vld [vmem:[%s1220_s6 + $0xe4] ss:$8 sps:$4 sm:$0xff]  }
  0x28   : > { %v1119_v50 = vld [vmem:[%s1220_s6 + $0xe0] ss:$8 sps:$4 sm:$0xff]   ;;  %v1123_v51 = vld [vmem:[%s1220_s6 + $0xf4] ss:$8 sps:$4 sm:$0xff]   ;;  %v1125_v52 = vld [vmem:[%s1220_s6 + $0xf0] ss:$8 sps:$4 sm:$0xff]  }
  0x29   : > { %699 = vmatpush1.bf16.msra.mxu1 %v1098_v22  ;;  %v348_v58 = vld [vmem:[#allocation2] sm:$0xff]  ;;  %v349_v61 = vld [vmem:[#allocation2 + $0x8] sm:$0xff] }
  0x2a   : > { %660 = vmatpush1.bf16.msra.mxu0 %v1068_v15  ;;  %700 = vmatprep.subr.bf16.mxu1 %v1102_v24 }
  0x2b   : > { %661 = vmatprep.subr.bf16.mxu0 %v1069_v16 }
  0x2d   : > { %701 = vmatpush1.bf16.msra.mxu1 %v1104_v26 }
  0x2e   : > { %662 = vmatpush1.bf16.msra.mxu0 %v1071_v19  ;;  %702 = vmatprep.subr.bf16.mxu1 %v1108_v28 }
  0x2f   : > { %663 = vmatprep.subr.bf16.mxu0 %v1072_v21 }
  0x31   : > { %703 = vmatpush1.bf16.msra.mxu1 %v1110_v30 }
  0x32   : > { %664 = vmatpush1.bf16.msra.mxu0 %v1074_v23  ;;  %704 = vmatprep.subr.bf16.mxu1 %v1114_v32 }
  0x33   : > { %665 = vmatprep.subr.bf16.mxu0 %v1075_v25 }
  0x35   : > { %705 = vmatpush1.bf16.msra.mxu1 %v1116_v36 }
  0x36   : > { %666 = vmatpush1.bf16.msra.mxu0 %v1077_v27  ;;  %706 = vmatprep.subr.bf16.mxu1 %v1120_v38 }
  0x37   : > { %667 = vmatprep.subr.bf16.mxu0 %v1081_v29 }
  0x39   : > { %707 = vmatpush1.bf16.msra.mxu1 %v1122_v40 }
  0x3a   : > { %668 = vmatpush1.bf16.msra.mxu0 %v1083_v31 }
  0x3b   : > { %669 = vmatprep.subr.bf16.mxu0 %v1087_v33 }
  0x3c   : > { %725 = vmatmul.mubr.bf16.vlgmr.msra.gmra.mrb[0].mxu1 %v1126_v43 }
  0x3e   : > { %670 = vmatpush1.bf16.msra.mxu0 %v1089_v37 }
  0x3f   : > { %671 = vmatprep.subr.bf16.mxu0 %v1093_v39 }
  0x42   : > { %672 = vmatpush1.bf16.msra.mxu0 %v1095_v41 }
  0x43   : > { %673 = vmatprep.subr.bf16.mxu0 %v1099_v42 }
  0x46   : > { %674 = vmatpush1.bf16.msra.mxu0 %v1101_v44  ;;  %v1159_v44 = vmov (!%p1021_p7), 1966171168  }
  0x47   : > { %675 = vmatprep.subr.bf16.mxu0 %v1105_v45  ;;  %v790_v45 = vunpack.c.l.s4 (!%p1021_p7), %v1159_v44 }
  0x4a   : > { %676 = vmatpush1.bf16.msra.mxu0 %v1107_v46  ;;  %v792_v46 = vlaneseq (!%p1021_p7) }
  0x4b   : > { %677 = vmatprep.subr.bf16.mxu0 %v1111_v47  ;;  %v791_v47 = vunpack.c.0.s8 (!%p1021_p7), %v790_v45 }
  0x4e   : > { %678 = vmatpush1.bf16.msra.mxu0 %v1113_v48  ;;  %v793_v48 = vshrl.u32 (!%p1021_p7), %v792_v46, 7 }
  0x4f   : > { %679 = vmatprep.subr.bf16.mxu0 %v1117_v49 }
  0x52   : > { %680 = vmatpush1.bf16.msra.mxu0 %v1119_v50  ;;  %v794_v50 = vsub.s32 (!%p1021_p7), %v791_v47, %v793_v48 }
  0x53   : > { %681 = vmatprep.subr.bf16.mxu0 %v1123_v51 }
  0x56   : > { %682 = vmatpush1.bf16.msra.mxu0 %v1125_v52 }
  0x59   : > { %684 = vmatmul.mubr.bf16.vlgmr.msra.gmra.mrb[0].mxu0 %v970_v53 }
 0x10f   : > { %v726_v54 = vpop.f32.mrb[0].mxu1 }
 0x110   : > { %v728_v55 = vpop.f32.mrb[1].mxu1 }
 0x111   : > { %v730_v56 = vpop.f32.mrb[2].mxu1 }
 0x112   : > { %v731_v57 = vpop.f32.mrb[3].mxu1  ;;  %v808_v56 = vsub.s32 (!%p1021_p7), 0, %v793_v48 }
 0x113   : > { %v812_v57 = vsub.s32 (!%p1021_p7), 1, %v793_v48 }
 0x12c   : > { %v685_v59 = vpop.f32.mrb[0].mxu0  ;;  %740 = sbr.rel (%p1021_p7) target bundleno = 366 (0x16e), region = 48 }
 0x12d   : > { %v727_v60 = vadd.f32 %v726_v54, %v685_v59  ;;  %v687_v62 = vpop.f32.mrb[1].mxu0  ;;  %v781_v54 = vld [vmem:[%s1317_s2] sm:$0x3] (!%p1021_p7) }
 0x12e   : > { %v729_v63 = vadd.f32 %v728_v55, %v687_v62  ;;  %v689_v0 = vpop.f32.mrb[2].mxu0 }
 0x12f   : > { %v733_v1 = vadd.f32 %v727_v60, %v348_v58  ;;  %v690_v2 = vpop.f32.mrb[3].mxu0  ;;  %v818_v58 = vld [vmem:[%s1318_s3] sm:$0x3] (!%p1021_p7) }
 0x130   : > { %v734_v3 = vadd.f32 %v729_v63, %v349_v61  ;;  %v823_v63 = vrot.slane (!%p1021_p7), %v818_v58, %v808_v56 }
 0x131   : > { %735 = vst [vmem:[#allocation2] sm:$0xff] %v733_v1  ;;  %v827_v1 = vrot.slane (!%p1021_p7), %v818_v58, %v812_v57 }
 0x132   : > { %736 = vst [vmem:[#allocation2 + $0x8] sm:$0xff] %v734_v3 }
 0x138   : > { %v1274_v4 = vld [vmem:[#allocation2] sm:$0xff] }
 0x139   : > { %v1276_v5 = vld [vmem:[#allocation2 + $0x8] sm:$0xff]  ;;  %v743_v6 = vrot.slane %v1274_v4, 4  ;;  %v757_v8 = vmul.f32 %v1274_v4, %v1274_v4 }
 0x13a   : > { %v749_v7 = vrot.slane %v1276_v5, 4  ;;  %v758_v9 = vmul.f32 %v1276_v5, %v1276_v5 }
 0x13b   : > { %v744_v10 = vadd.f32 %v743_v6, %v1274_v4  ;;  %v759_v12 = vrot.slane %v757_v8, 4  ;;  %v832_v6 = vld [vmem:[%s1319_s4] sm:$0xff] }
 0x13c   : > { %v750_v11 = vadd.f32 %v749_v7, %v1276_v5  ;;  %v765_v13 = vrot.slane %v758_v9, 4  ;;  %v833_v7 = vld [vmem:[%s1319_s4 + $0x8] sm:$0xff] }
 0x13d   : > { %v745_v14 = vrot.slane %v744_v10, 2  ;;  %v760_v16 = vadd.f32 %v759_v12, %v757_v8 }
 0x13e   : > { %v751_v15 = vrot.slane %v750_v11, 2  ;;  %v766_v17 = vadd.f32 %v765_v13, %v758_v9 }
 0x13f   : > { %v746_v18 = vadd.f32 %v745_v14, %v744_v10  ;;  %v761_v20 = vrot.slane %v760_v16, 2 }
 0x140   : > { %v752_v19 = vadd.f32 %v751_v15, %v750_v11  ;;  %v767_v21 = vrot.slane %v766_v17, 2 }
 0x141   : > { %v747_v22 = vrot.slane %v746_v18, 1  ;;  %v762_v24 = vadd.f32 %v761_v20, %v760_v16 }
 0x142   : > { %v753_v23 = vrot.slane %v752_v19, 1  ;;  %v768_v25 = vadd.f32 %v767_v21, %v766_v17 }
 0x143   : > { %v748_v26 = vadd.f32 %v747_v22, %v746_v18  ;;  %v763_v28 = vrot.slane %v762_v24, 1 }
 0x144   : > { %v754_v27 = vadd.f32 %v753_v23, %v752_v19  ;;  %v769_v29 = vrot.slane %v768_v25, 1 }
 0x145   : > { %v755_v30 = vmul.f32 0.125, %v748_v26  ;;  %v764_v32 = vadd.f32 %v763_v28, %v762_v24 }
 0x146   : > { %v756_v31 = vmul.f32 0.125, %v754_v27  ;;  %v770_v33 = vadd.f32 %v769_v29, %v768_v25 }
 0x147   : > { %v771_v34 = vmul.f32 0.125, %v764_v32  ;;  %v773_v36 = vmul.f32 %v755_v30, %v755_v30  ;;  %v779_v59 = vsub.f32 %v1274_v4, %v755_v30 }
 0x148   : > { %v772_v35 = vmul.f32 0.125, %v770_v33  ;;  %v774_v37 = vmul.f32 %v756_v31, %v756_v31  ;;  %v780_v61 = vsub.f32 %v1276_v5, %v756_v31 }
 0x149   : > { %v775_v38 = vsub.f32 %v771_v34, %v773_v36 }
 0x14a   : > { %v776_v39 = vsub.f32 %v772_v35, %v774_v37 }
 0x14b   : > { %v777_v40 = vmax.f32 %v775_v38, 0.0 }
 0x14c   : > { %v778_v41 = vmax.f32 %v776_v39, 0.0 }
 0x14d   : > { %v782_v42 = vadd.f32 1e-05, %v777_v40 }
 0x14e   : > { %v783_v43 = vadd.f32 1e-05, %v778_v41 }
 0x14f   : > { %1129 = vrsqrt.f32 %v782_v42 }
 0x150   : > { %1131 = vrsqrt.f32 %v783_v43 }
 0x159   : > { %v1130_v49 = vpop.eup %1129 }
 0x15a   : > { %v1132_v51 = vpop.eup %1131 }
 0x15b   : > { %v788_v52 = vcombine.low %v1130_v49, %v1132_v51 }
 0x15d   : > { %v795_v53 = vrot.slane %v788_v52, %v794_v50 }
 0x15f   : > { %v802_v55 = vrot.slane %v795_v53, %v794_v50 }
 0x161   : > { %v804_v60 = vmul.f32 %v802_v55, %v781_v54 }
 0x163   : > { %v809_v62 = vrot.slane %v804_v60, %v808_v56  ;;  %v813_v0 = vrot.slane %v804_v60, %v812_v57 }
 0x165   : > { %v816_v2 = vmul.f32 %v809_v62, %v779_v59  ;;  %v817_v3 = vmul.f32 %v813_v0, %v780_v61 }
 0x167   : > { %v830_v8 = vadd.f32 %v823_v63, %v816_v2  ;;  %v831_v9 = vadd.f32 %v827_v1, %v817_v3 }
 0x169   : > { %v834_v4 = vadd.f32 %v832_v6, %v830_v8  ;;  %v835_v10 = vadd.f32 %v833_v7, %v831_v9 }
 0x16b   : > { %v836_v11 = vmax.f32 %v834_v4, 0.0  ;;  %v837_v5 = vmax.f32 %v835_v10, 0.0 }
 0x16d   : > { %838 = vst [vmem:[%s1320_s5] sm:$0xff] %v836_v11  ;;  %839 = vst [vmem:[%s1320_s5 + $0x8] sm:$0xff] %v837_v5 }
 0x16e PF: > { %s15_s20 = sadd.s32 1, %s1155_s20   ;;  %s1321_s18 = smov %s1151_s19 }
 0x16f   : > { %p12_p8 = scmp.ge.s32.totalorder %s15_s20, 8   ;;  %s1322_s19 = smov %s1324_s21 }
 0x171   :  { %14 = sbr.rel (!%p12_p8) target bundleno = 2 (0x2), region = 90 }

// kernel: _lambda_.34
= control target key start
LH: loop header
LB: loop body
LE: loop exit
PB: predicated region body
PF: predicated region fallthrough
CT: control target
= control target key end

     0   :  { %s1116_s15 = smov 0   ;;  %s1118_s16 = smov 0   ;;  %s1235_s0 = inlined_call_operand.vmem [shape: bf16[8,2304], index: 0, kind: input, shape index: {}]   ;;  %s1236_s1 = inlined_call_operand.vmem [shape: bf16[2304,256], index: 1, kind: input, shape index: {}]   ;;  %s1237_s2 = inlined_call_operand.vmem [shape: f32[1,256], index: 2, kind: input, shape index: {}]   ;;  %s1238_s3 = inlined_call_operand.vmem [shape: f32[1,256], index: 3, kind: input, shape index: {}]   ;;  %s1239_s4 = inlined_call_operand.vmem [shape: f32[8,256], index: 4, kind: output, shape index: {}]  }
   0x1   :  { %s1120_s17 = smov 0  }
   0x2 LB: > { %s23_s18 = sadd.s32 1, %s1082_s16  ;;  %p896_p0 = scmp.ge.s32.totalorder %s1086_s17, 1  ;;  %s1086_s17 = sphi %s1120_s17, %s14_s17   ;;  %s1082_s16 = sphi %s1118_s16, %s1241_s16   ;;  %s1078_s15 = sphi %s1116_s15, %s1240_s15  }
   0x3   : > { %p24_p1 = scmp.ge.s32.totalorder %s23_s18, 6  ;;  %p214_p2 = scmp.lt.s32.totalorder %s1086_s17, 7 }
   0x5   : > { %s1243_s18 = smov (%p24_p1, %s23_s18), 0  ;;  %p215_p3 = pnand %p896_p0, %p214_p2 }
   0x6   : > { %s258_s19 = smul.u32 (!%p215_p3), 3, %s1078_s15  ;;  %p900_p6 = scmp.ne.s32.totalorder (!%p215_p3), %s1078_s15, 0 }
   0x7   : > { %218 = sbr.rel (%p215_p3) target bundleno = 364 (0x16c), region = 36 }
   0x8   : > { %s264_s20 = smul.u32 (!%p215_p3), 48, %s1078_s15  ;;  %p259_p4 = scmp.lt.s32.totalorder (!%p215_p3), %s258_s19, 17 }
   0xa   : > { %p266_p5 = scmp.lt.s32.totalorder (!%p215_p3), %s264_s20, 287 }
   0xe   : > { %s1245_s19 = smov (!%p259_p4, %s258_s19), 17  ;;  %s1247_s20 = smov (!%p266_p5, %s264_s20), 287 }
   0xf   : > { %s897_s21 = sshll.u32 %s1245_s19, 2  ;;  %s957_s25 = sshll.u32 %s1247_s20, 3  ;;  %v1088_v0 = vmov (!%p900_p6), 0.0  }
  0x10   : > { %s1141_s24 = scalar_lea.vmem %s1235_s0, %s897_s21  ;;  %s1146_s28 = scalar_lea.vmem %s1236_s1, %s957_s25  ;;  %297 = vst [vmem:[#allocation2] sm:$0xff] (!%p900_p6), %v1088_v0  ;;  %298 = vst [vmem:[#allocation2 + $0x8] sm:$0xff] (!%p900_p6), %v1088_v0 }
  0x11   : > { %296 = sbr.rel (%p900_p6) target bundleno = 24 (0x18), region = 40 }
  0x18 PF: > { %v985_v1 = vld [vmem:[%s1146_s28 + $0x4] ss:$8 sps:$4 sm:$0xff]   ;;  %v987_v2 = vld [vmem:[%s1146_s28] ss:$8 sps:$4 sm:$0xff]   ;;  %v1089_v3 = vmov 0   ;;  %p952_p7 = scmp.ne.s32.totalorder %s1078_s15, 5 }
  0x19   : > { %675 = vmatprep.mubr.bf16.mxu1 %v1089_v3  ;;  %602 = vmatprep.subr.bf16.mxu0 %v985_v1  ;;  %v988_v4 = vld [vmem:[%s1146_s28 + $0x14] ss:$8 sps:$4 sm:$0xff]   ;;  %v990_v5 = vld [vmem:[%s1146_s28 + $0x10] ss:$8 sps:$4 sm:$0xff]   ;;  %v991_v6 = vld [vmem:[%s1146_s28 + $0x24] ss:$8 sps:$4 sm:$0xff]  }
  0x1a   : > { %603 = vmatpush1.bf16.msra.mxu0 %v987_v2  ;;  %v993_v7 = vld [vmem:[%s1146_s28 + $0x20] ss:$8 sps:$4 sm:$0xff]   ;;  %v994_v8 = vld [vmem:[%s1146_s28 + $0x34] ss:$8 sps:$4 sm:$0xff]   ;;  %v996_v9 = vld [vmem:[%s1146_s28 + $0x30] ss:$8 sps:$4 sm:$0xff]  }
  0x1b   : > { %604 = vmatprep.subr.bf16.mxu0 %v988_v4  ;;  %v1009_v10 = vld [vmem:[%s1146_s28 + $0x104] ss:$8 sps:$4 sm:$0xff]   ;;  %v1011_v11 = vld [vmem:[%s1146_s28 + $0x100] ss:$8 sps:$4 sm:$0xff]   ;;  %v1015_v13 = vld [vmem:[%s1146_s28 + $0x114] ss:$8 sps:$4 sm:$0xff]  }
  0x1c   : > { %v997_v12 = vld [vmem:[%s1146_s28 + $0x44] ss:$8 sps:$4 sm:$0xff]   ;;  %643 = vmatprep.subr.bf16.mxu1 %v1009_v10  ;;  %v1017_v14 = vld [vmem:[%s1146_s28 + $0x110] ss:$8 sps:$4 sm:$0xff]   ;;  %v999_v15 = vld [vmem:[%s1146_s28 + $0x40] ss:$8 sps:$4 sm:$0xff]  }
  0x1d   : > { %644 = vmatpush1.bf16.msra.mxu1 %v1011_v11  ;;  %v1000_v16 = vld [vmem:[%s1146_s28 + $0x54] ss:$8 sps:$4 sm:$0xff]   ;;  %v1021_v17 = vld [vmem:[%s1146_s28 + $0x124] ss:$8 sps:$4 sm:$0xff]   ;;  %v1023_v18 = vld [vmem:[%s1146_s28 + $0x120] ss:$8 sps:$4 sm:$0xff]  }
  0x1e   : > { %605 = vmatpush1.bf16.msra.mxu0 %v990_v5  ;;  %645 = vmatprep.subr.bf16.mxu1 %v1015_v13  ;;  %v1002_v19 = vld [vmem:[%s1146_s28 + $0x50] ss:$8 sps:$4 sm:$0xff]   ;;  %v1027_v20 = vld [vmem:[%s1146_s28 + $0x134] ss:$8 sps:$4 sm:$0xff]   ;;  %v1003_v21 = vld [vmem:[%s1146_s28 + $0x64] ss:$8 sps:$4 sm:$0xff]  }
  0x1f   : > { %606 = vmatprep.subr.bf16.mxu0 %v991_v6  ;;  %v1029_v22 = vld [vmem:[%s1146_s28 + $0x130] ss:$8 sps:$4 sm:$0xff]   ;;  %v1005_v23 = vld [vmem:[%s1146_s28 + $0x60] ss:$8 sps:$4 sm:$0xff]   ;;  %v1033_v24 = vld [vmem:[%s1146_s28 + $0x144] ss:$8 sps:$4 sm:$0xff]  }
  0x20   : > { %v1006_v25 = vld [vmem:[%s1146_s28 + $0x74] ss:$8 sps:$4 sm:$0xff]   ;;  %v1035_v26 = vld [vmem:[%s1146_s28 + $0x140] ss:$8 sps:$4 sm:$0xff]   ;;  %v1008_v27 = vld [vmem:[%s1146_s28 + $0x70] ss:$8 sps:$4 sm:$0xff]  }
  0x21   : > { %646 = vmatpush1.bf16.msra.mxu1 %v1017_v14  ;;  %v1039_v28 = vld [vmem:[%s1146_s28 + $0x154] ss:$8 sps:$4 sm:$0xff]   ;;  %v1012_v29 = vld [vmem:[%s1146_s28 + $0x84] ss:$8 sps:$4 sm:$0xff]   ;;  %v1041_v30 = vld [vmem:[%s1146_s28 + $0x150] ss:$8 sps:$4 sm:$0xff]  }
  0x22   : > { %607 = vmatpush1.bf16.msra.mxu0 %v993_v7  ;;  %647 = vmatprep.subr.bf16.mxu1 %v1021_v17  ;;  %v1014_v31 = vld [vmem:[%s1146_s28 + $0x80] ss:$8 sps:$4 sm:$0xff]   ;;  %v1045_v32 = vld [vmem:[%s1146_s28 + $0x164] ss:$8 sps:$4 sm:$0xff]   ;;  %v1018_v33 = vld [vmem:[%s1146_s28 + $0x94] ss:$8 sps:$4 sm:$0xff]  }
  0x23   : > { %608 = vmatprep.subr.bf16.mxu0 %v994_v8  ;;  %v301_v34 = vld [vmem:[%s1141_s24] sm:$0xff]  ;;  %v1020_v37 = vld [vmem:[%s1146_s28 + $0x90] ss:$8 sps:$4 sm:$0xff]   ;;  %v1051_v38 = vld [vmem:[%s1146_s28 + $0x174] ss:$8 sps:$4 sm:$0xff]  }
  0x24   : > { %v902_v35 = vcombine.high %v301_v34, %v301_v34  ;;  %v1047_v36 = vld [vmem:[%s1146_s28 + $0x160] ss:$8 sps:$4 sm:$0xff]   ;;  %v1024_v39 = vld [vmem:[%s1146_s28 + $0xa4] ss:$8 sps:$4 sm:$0xff]   ;;  %v1053_v40 = vld [vmem:[%s1146_s28 + $0x170] ss:$8 sps:$4 sm:$0xff]   ;;  %v901_v53 = vcombine.low %v301_v34, %v301_v34 }
  0x25   : > { %648 = vmatpush1.bf16.msra.mxu1 %v1023_v18  ;;  %v1026_v41 = vld [vmem:[%s1146_s28 + $0xa0] ss:$8 sps:$4 sm:$0xff]   ;;  %v1030_v42 = vld [vmem:[%s1146_s28 + $0xb4] ss:$8 sps:$4 sm:$0xff]   ;;  %v1032_v44 = vld [vmem:[%s1146_s28 + $0xb0] ss:$8 sps:$4 sm:$0xff]  }
  0x26   : > { %609 = vmatpush1.bf16.msra.mxu0 %v996_v9  ;;  %649 = vmatprep.subr.bf16.mxu1 %v1027_v20  ;;  %v1057_v43 = vld [vmem:[%s1141_s24 + $0x8] ss:$0 sps:$4 sm:$0xff]   ;;  %v1036_v45 = vld [vmem:[%s1146_s28 + $0xc4] ss:$8 sps:$4 sm:$0xff]   ;;  %v1042_v47 = vld [vmem:[%s1146_s28 + $0xd4] ss:$8 sps:$4 sm:$0xff]  }
  0x27   : > { %610 = vmatprep.subr.bf16.mxu0 %v997_v12  ;;  %634 = vmatprep.mubr.bf16.mxu0 %v902_v35  ;;  %v1038_v46 = vld [vmem:[%s1146_s28 + $0xc0] ss:$8 sps:$4 sm:$0xff]   ;;  %v1044_v48 = vld [vmem:[%s1146_s28 + $0xd0] ss:$8 sps:$4 sm:$0xff]   ;;  %v1048_v49 = vld [vmem:[%s1146_s28 + $0xe4] ss:$8 sps:$4 sm:$0xff]  }
  0x28   : > { %v1050_v50 = vld [vmem:[%s1146_s28 + $0xe0] ss:$8 sps:$4 sm:$0xff]   ;;  %v1054_v51 = vld [vmem:[%s1146_s28 + $0xf4] ss:$8 sps:$4 sm:$0xff]   ;;  %v1056_v52 = vld [vmem:[%s1146_s28 + $0xf0] ss:$8 sps:$4 sm:$0xff]  }
  0x29   : > { %650 = vmatpush1.bf16.msra.mxu1 %v1029_v22  ;;  %v299_v58 = vld [vmem:[#allocation2] sm:$0xff]  ;;  %v300_v61 = vld [vmem:[#allocation2 + $0x8] sm:$0xff] }
  0x2a   : > { %611 = vmatpush1.bf16.msra.mxu0 %v999_v15  ;;  %651 = vmatprep.subr.bf16.mxu1 %v1033_v24 }
  0x2b   : > { %612 = vmatprep.subr.bf16.mxu0 %v1000_v16 }
  0x2d   : > { %652 = vmatpush1.bf16.msra.mxu1 %v1035_v26 }
  0x2e   : > { %613 = vmatpush1.bf16.msra.mxu0 %v1002_v19  ;;  %653 = vmatprep.subr.bf16.mxu1 %v1039_v28 }
  0x2f   : > { %614 = vmatprep.subr.bf16.mxu0 %v1003_v21 }
  0x31   : > { %654 = vmatpush1.bf16.msra.mxu1 %v1041_v30 }
  0x32   : > { %615 = vmatpush1.bf16.msra.mxu0 %v1005_v23  ;;  %655 = vmatprep.subr.bf16.mxu1 %v1045_v32 }
  0x33   : > { %616 = vmatprep.subr.bf16.mxu0 %v1006_v25 }
  0x35   : > { %656 = vmatpush1.bf16.msra.mxu1 %v1047_v36 }
  0x36   : > { %617 = vmatpush1.bf16.msra.mxu0 %v1008_v27  ;;  %657 = vmatprep.subr.bf16.mxu1 %v1051_v38 }
  0x37   : > { %618 = vmatprep.subr.bf16.mxu0 %v1012_v29 }
  0x39   : > { %658 = vmatpush1.bf16.msra.mxu1 %v1053_v40 }
  0x3a   : > { %619 = vmatpush1.bf16.msra.mxu0 %v1014_v31 }
  0x3b   : > { %620 = vmatprep.subr.bf16.mxu0 %v1018_v33 }
  0x3c   : > { %676 = vmatmul.mubr.bf16.vlgmr.msra.gmra.mrb[0].mxu1 %v1057_v43 }
  0x3e   : > { %621 = vmatpush1.bf16.msra.mxu0 %v1020_v37 }
  0x3f   : > { %622 = vmatprep.subr.bf16.mxu0 %v1024_v39 }
  0x42   : > { %623 = vmatpush1.bf16.msra.mxu0 %v1026_v41 }
  0x43   : > { %624 = vmatprep.subr.bf16.mxu0 %v1030_v42 }
  0x46   : > { %625 = vmatpush1.bf16.msra.mxu0 %v1032_v44  ;;  %v1090_v44 = vmov (!%p952_p7), 1966171168  }
  0x47   : > { %626 = vmatprep.subr.bf16.mxu0 %v1036_v45  ;;  %v741_v45 = vunpack.c.l.s4 (!%p952_p7), %v1090_v44 }
  0x4a   : > { %627 = vmatpush1.bf16.msra.mxu0 %v1038_v46  ;;  %v743_v46 = vlaneseq (!%p952_p7) }
  0x4b   : > { %628 = vmatprep.subr.bf16.mxu0 %v1042_v47  ;;  %v742_v47 = vunpack.c.0.s8 (!%p952_p7), %v741_v45 }
  0x4e   : > { %629 = vmatpush1.bf16.msra.mxu0 %v1044_v48  ;;  %v744_v48 = vshrl.u32 (!%p952_p7), %v743_v46, 7 }
  0x4f   : > { %630 = vmatprep.subr.bf16.mxu0 %v1048_v49 }
  0x52   : > { %631 = vmatpush1.bf16.msra.mxu0 %v1050_v50  ;;  %v745_v50 = vsub.s32 (!%p952_p7), %v742_v47, %v744_v48 }
  0x53   : > { %632 = vmatprep.subr.bf16.mxu0 %v1054_v51 }
  0x56   : > { %633 = vmatpush1.bf16.msra.mxu0 %v1056_v52 }
  0x59   : > { %635 = vmatmul.mubr.bf16.vlgmr.msra.gmra.mrb[0].mxu0 %v901_v53 }
 0x10f   : > { %v677_v54 = vpop.f32.mrb[0].mxu1 }
 0x110   : > { %v679_v55 = vpop.f32.mrb[1].mxu1 }
 0x111   : > { %v681_v56 = vpop.f32.mrb[2].mxu1 }
 0x112   : > { %v682_v57 = vpop.f32.mrb[3].mxu1  ;;  %v759_v56 = vsub.s32 (!%p952_p7), 0, %v744_v48 }
 0x113   : > { %v763_v57 = vsub.s32 (!%p952_p7), 1, %v744_v48 }
 0x12c   : > { %v636_v59 = vpop.f32.mrb[0].mxu0  ;;  %691 = sbr.rel (%p952_p7) target bundleno = 364 (0x16c), region = 44 }
 0x12d   : > { %v678_v60 = vadd.f32 %v677_v54, %v636_v59  ;;  %v638_v62 = vpop.f32.mrb[1].mxu0  ;;  %v732_v54 = vld [vmem:[%s1237_s2] sm:$0x3] (!%p952_p7) }
 0x12e   : > { %v680_v63 = vadd.f32 %v679_v55, %v638_v62  ;;  %v640_v0 = vpop.f32.mrb[2].mxu0 }
 0x12f   : > { %v684_v1 = vadd.f32 %v678_v60, %v299_v58  ;;  %v641_v2 = vpop.f32.mrb[3].mxu0  ;;  %v769_v58 = vld [vmem:[%s1238_s3] sm:$0x3] (!%p952_p7) }
 0x130   : > { %v685_v3 = vadd.f32 %v680_v63, %v300_v61  ;;  %v774_v63 = vrot.slane (!%p952_p7), %v769_v58, %v759_v56 }
 0x131   : > { %686 = vst [vmem:[#allocation2] sm:$0xff] %v684_v1  ;;  %v778_v1 = vrot.slane (!%p952_p7), %v769_v58, %v763_v57 }
 0x132   : > { %687 = vst [vmem:[#allocation2 + $0x8] sm:$0xff] %v685_v3 }
 0x138   : > { %v1200_v4 = vld [vmem:[#allocation2] sm:$0xff] }
 0x139   : > { %v1202_v5 = vld [vmem:[#allocation2 + $0x8] sm:$0xff]  ;;  %v694_v6 = vrot.slane %v1200_v4, 4  ;;  %v708_v8 = vmul.f32 %v1200_v4, %v1200_v4 }
 0x13a   : > { %v700_v7 = vrot.slane %v1202_v5, 4  ;;  %v709_v9 = vmul.f32 %v1202_v5, %v1202_v5 }
 0x13b   : > { %v695_v10 = vadd.f32 %v694_v6, %v1200_v4  ;;  %v710_v12 = vrot.slane %v708_v8, 4 }
 0x13c   : > { %v701_v11 = vadd.f32 %v700_v7, %v1202_v5  ;;  %v716_v13 = vrot.slane %v709_v9, 4 }
 0x13d   : > { %v696_v14 = vrot.slane %v695_v10, 2  ;;  %v711_v16 = vadd.f32 %v710_v12, %v708_v8 }
 0x13e   : > { %v702_v15 = vrot.slane %v701_v11, 2  ;;  %v717_v17 = vadd.f32 %v716_v13, %v709_v9 }
 0x13f   : > { %v697_v18 = vadd.f32 %v696_v14, %v695_v10  ;;  %v712_v20 = vrot.slane %v711_v16, 2 }
 0x140   : > { %v703_v19 = vadd.f32 %v702_v15, %v701_v11  ;;  %v718_v21 = vrot.slane %v717_v17, 2 }
 0x141   : > { %v698_v22 = vrot.slane %v697_v18, 1  ;;  %v713_v24 = vadd.f32 %v712_v20, %v711_v16 }
 0x142   : > { %v704_v23 = vrot.slane %v703_v19, 1  ;;  %v719_v25 = vadd.f32 %v718_v21, %v717_v17 }
 0x143   : > { %v699_v26 = vadd.f32 %v698_v22, %v697_v18  ;;  %v714_v28 = vrot.slane %v713_v24, 1 }
 0x144   : > { %v705_v27 = vadd.f32 %v704_v23, %v703_v19  ;;  %v720_v29 = vrot.slane %v719_v25, 1 }
 0x145   : > { %v706_v30 = vmul.f32 0.125, %v699_v26  ;;  %v715_v32 = vadd.f32 %v714_v28, %v713_v24 }
 0x146   : > { %v707_v31 = vmul.f32 0.125, %v705_v27  ;;  %v721_v33 = vadd.f32 %v720_v29, %v719_v25 }
 0x147   : > { %v722_v34 = vmul.f32 0.125, %v715_v32  ;;  %v724_v36 = vmul.f32 %v706_v30, %v706_v30  ;;  %v730_v59 = vsub.f32 %v1200_v4, %v706_v30 }
 0x148   : > { %v723_v35 = vmul.f32 0.125, %v721_v33  ;;  %v725_v37 = vmul.f32 %v707_v31, %v707_v31  ;;  %v731_v61 = vsub.f32 %v1202_v5, %v707_v31 }
 0x149   : > { %v726_v38 = vsub.f32 %v722_v34, %v724_v36 }
 0x14a   : > { %v727_v39 = vsub.f32 %v723_v35, %v725_v37 }
 0x14b   : > { %v728_v40 = vmax.f32 %v726_v38, 0.0 }
 0x14c   : > { %v729_v41 = vmax.f32 %v727_v39, 0.0 }
 0x14d   : > { %v733_v42 = vadd.f32 1e-05, %v728_v40 }
 0x14e   : > { %v734_v43 = vadd.f32 1e-05, %v729_v41 }
 0x14f   : > { %1060 = vrsqrt.f32 %v733_v42 }
 0x150   : > { %1062 = vrsqrt.f32 %v734_v43 }
 0x159   : > { %v1061_v49 = vpop.eup %1060 }
 0x15a   : > { %v1063_v51 = vpop.eup %1062 }
 0x15b   : > { %v739_v52 = vcombine.low %v1061_v49, %v1063_v51 }
 0x15d   : > { %v746_v53 = vrot.slane %v739_v52, %v745_v50 }
 0x15f   : > { %v753_v55 = vrot.slane %v746_v53, %v745_v50 }
 0x161   : > { %v755_v60 = vmul.f32 %v753_v55, %v732_v54 }
 0x163   : > { %v760_v62 = vrot.slane %v755_v60, %v759_v56  ;;  %v764_v0 = vrot.slane %v755_v60, %v763_v57 }
 0x165   : > { %v767_v2 = vmul.f32 %v760_v62, %v730_v59  ;;  %v768_v3 = vmul.f32 %v764_v0, %v731_v61 }
 0x167   : > { %v781_v6 = vadd.f32 %v774_v63, %v767_v2  ;;  %v782_v7 = vadd.f32 %v778_v1, %v768_v3 }
 0x169   : > { %v783_v8 = vmax.f32 %v781_v6, 0.0  ;;  %v784_v9 = vmax.f32 %v782_v7, 0.0 }
 0x16b   : > { %785 = vst [vmem:[%s1239_s4] sm:$0xff] %v783_v8  ;;  %786 = vst [vmem:[%s1239_s4 + $0x8] sm:$0xff] %v784_v9 }
 0x16c PF: > { %s14_s17 = sadd.s32 1, %s1086_s17   ;;  %s1240_s15 = smov %s1082_s16 }
 0x16d   : > { %p11_p8 = scmp.ge.s32.totalorder %s14_s17, 8   ;;  %s1241_s16 = smov %s1243_s18 }
 0x16f   :  { %13 = sbr.rel (!%p11_p8) target bundleno = 2 (0x2), region = 83 }

// kernel: _lambda_.36
= control target key start
LH: loop header
LB: loop body
LE: loop exit
PB: predicated region body
PF: predicated region fallthrough
CT: control target
= control target key end

     0   :  { %s1455_s15 = smov 0   ;;  %s1457_s16 = smov 0   ;;  %s1757_s0 = inlined_call_operand.vmem [shape: bf16[2,2304], index: 0, kind: input, shape index: {}]   ;;  %s1758_s1 = inlined_call_operand.vmem [shape: bf16[2304,512], index: 1, kind: input, shape index: {}]   ;;  %s1759_s2 = inlined_call_operand.vmem [shape: f32[1,512], index: 2, kind: input, shape index: {}]   ;;  %s1760_s3 = inlined_call_operand.vmem [shape: f32[1,512], index: 3, kind: input, shape index: {}]   ;;  %s1761_s4 = inlined_call_operand.vmem [shape: f32[2,512], index: 4, kind: output, shape index: {}]  }
   0x1   :  { %s1459_s17 = smov 0   ;;  %s1461_s18 = smov 0  }
   0x2   :  { %s1463_s19 = smov 0   ;;  %s1465_s20 = smov 0  }
   0x3   :  { %s1467_s21 = smov 0  }
   0x4 LB: > { %s23_s22 = sadd.s32 1, %s1416_s19  ;;  %s26_s23 = sadd.s32 1, %s1420_s20  ;;  %s1424_s21 = sphi %s1467_s21, %s14_s21   ;;  %s1420_s20 = sphi %s1465_s20, %s1767_s20   ;;  %s1416_s19 = sphi %s1463_s19, %s1766_s19   ;;  %s1412_s18 = sphi %s1461_s18, %s1765_s18   ;;  %s1408_s17 = sphi %s1459_s17, %s1764_s17   ;;  %s1404_s16 = sphi %s1457_s16, %s1763_s16   ;;  %s1400_s15 = sphi %s1455_s15, %s1762_s15  }
   0x5   : > { %p24_p0 = scmp.ge.s32.totalorder %s23_s22, 6  ;;  %p68_p1 = scmp.ne.s32.totalorder %s1404_s16, %s1400_s15 }
   0x6   : > { %p69_p2 = scmp.eq.s32.totalorder %s1424_s21, 0  ;;  %s61_s27 = sadd.s32 1, %s1404_s16 }
   0x7   : > { %s1769_s22 = smov (%p24_p0, %s23_s22), 0  ;;  %s1771_s23 = smov (!%p24_p0, %s26_s23), %s1420_s20 }
   0x8   : > { %p70_p3 = por %p69_p2, %p68_p1  ;;  %p28_p4 = scmp.ge.s32.totalorder %s1771_s23, 2 }
   0x9   : > { %s56_s24 = ssub.s32 %s1416_s19, %s1769_s22  ;;  %p1167_p6 = scmp.ge.s32.totalorder %s1424_s21, 12 }
   0xa   : > { %s1773_s23 = smov (%p28_p4, %s1771_s23), 0 }
   0xb   : > { %s57_s25 = ssub.s32 %s1420_s20, %s1773_s23  ;;  %172 = sbr.rel (%p1167_p6) target bundleno = 50 (0x32), region = 16 }
   0xc   : > { %s58_s26 = sor.u32 %s57_s25, %s56_s24 }
   0xd   : > { %p59_p5 = scmp.eq.s32.totalorder %s58_s26, 0 }
   0xf   : > { %s1506_s28 = scalar_select %p59_p5, %s1404_s16, %s61_s27  }
  0x12   : > { %183 = sbr.rel (!%p70_p3) target bundleno = 50 (0x32), region = 24  ;;  %s185_s29 = sand.u32 (%p70_p3), 1, %s1404_s16  }
  0x13   : > { %s1232_s30 = smul.u32 (%p70_p3), 384, %s185_s29  ;;  %s1168_s5 = sshll.u32 (%p70_p3), %s1420_s20, 1 }
  0x14   : > { %s1229_s6 = smul.u32 (%p70_p3), 192, %s1416_s19 }
  0x15   : > { %s1520_s12 = scalar_lea.vmem (%p70_p3), [#allocation3], %s1232_s30 }
  0x16   : > { %s191_s7 = sadd.s32 (%p70_p3), %s1229_s6, %s1168_s5 }
  0x17   : > { %s1170_s8 = sshll.u32 (%p70_p3), %s191_s7, 2 }
  0x18   : > { %s1515_s11 = scalar_lea.vmem (%p70_p3), %s1758_s1, %s1170_s8 }
  0x19   : > { %v315_v0 = vld [vmem:[%s1515_s11] sm:$0xff]  ;;  %v317_v1 = vld [vmem:[%s1515_s11 + $0x10] sm:$0xff] }
  0x1a   : > { %v319_v2 = vld [vmem:[%s1515_s11 + $0x20] sm:$0xff]  ;;  %316 = vst [vmem:[%s1520_s12] sm:$0xff] %v315_v0  ;;  %318 = vst [vmem:[%s1520_s12 + $0x8] sm:$0xff] %v317_v1  ;;  %v321_v3 = vld [vmem:[%s1515_s11 + $0x30] sm:$0xff] }
  0x1b   : > { %320 = vst [vmem:[%s1520_s12 + $0x10] sm:$0xff] %v319_v2  ;;  %v323_v4 = vld [vmem:[%s1515_s11 + $0x40] sm:$0xff]  ;;  %v325_v5 = vld [vmem:[%s1515_s11 + $0x50] sm:$0xff]  ;;  %322 = vst [vmem:[%s1520_s12 + $0x18] sm:$0xff] %v321_v3 }
  0x1c   : > { %324 = vst [vmem:[%s1520_s12 + $0x20] sm:$0xff] %v323_v4  ;;  %326 = vst [vmem:[%s1520_s12 + $0x28] sm:$0xff] %v325_v5  ;;  %v327_v6 = vld [vmem:[%s1515_s11 + $0x60] sm:$0xff]  ;;  %v329_v7 = vld [vmem:[%s1515_s11 + $0x70] sm:$0xff] }
  0x1d   : > { %v331_v8 = vld [vmem:[%s1515_s11 + $0x80] sm:$0xff]  ;;  %328 = vst [vmem:[%s1520_s12 + $0x30] sm:$0xff] %v327_v6  ;;  %330 = vst [vmem:[%s1520_s12 + $0x38] sm:$0xff] %v329_v7  ;;  %v333_v9 = vld [vmem:[%s1515_s11 + $0x90] sm:$0xff] }
  0x1e   : > { %332 = vst [vmem:[%s1520_s12 + $0x40] sm:$0xff] %v331_v8  ;;  %v335_v10 = vld [vmem:[%s1515_s11 + $0xa0] sm:$0xff]  ;;  %v337_v11 = vld [vmem:[%s1515_s11 + $0xb0] sm:$0xff]  ;;  %334 = vst [vmem:[%s1520_s12 + $0x48] sm:$0xff] %v333_v9 }
  0x1f   : > { %336 = vst [vmem:[%s1520_s12 + $0x50] sm:$0xff] %v335_v10  ;;  %338 = vst [vmem:[%s1520_s12 + $0x58] sm:$0xff] %v337_v11  ;;  %v339_v12 = vld [vmem:[%s1515_s11 + $0xc0] sm:$0xff]  ;;  %v341_v13 = vld [vmem:[%s1515_s11 + $0xd0] sm:$0xff] }
  0x20   : > { %v343_v14 = vld [vmem:[%s1515_s11 + $0xe0] sm:$0xff]  ;;  %340 = vst [vmem:[%s1520_s12 + $0x60] sm:$0xff] %v339_v12  ;;  %342 = vst [vmem:[%s1520_s12 + $0x68] sm:$0xff] %v341_v13  ;;  %v345_v15 = vld [vmem:[%s1515_s11 + $0xf0] sm:$0xff] }
  0x21   : > { %344 = vst [vmem:[%s1520_s12 + $0x70] sm:$0xff] %v343_v14  ;;  %v347_v16 = vld [vmem:[%s1515_s11 + $0x100] sm:$0xff]  ;;  %v349_v17 = vld [vmem:[%s1515_s11 + $0x110] sm:$0xff]  ;;  %346 = vst [vmem:[%s1520_s12 + $0x78] sm:$0xff] %v345_v15 }
  0x22   : > { %348 = vst [vmem:[%s1520_s12 + $0x80] sm:$0xff] %v347_v16  ;;  %350 = vst [vmem:[%s1520_s12 + $0x88] sm:$0xff] %v349_v17  ;;  %v351_v18 = vld [vmem:[%s1515_s11 + $0x120] sm:$0xff]  ;;  %v353_v19 = vld [vmem:[%s1515_s11 + $0x130] sm:$0xff] }
  0x23   : > { %v355_v20 = vld [vmem:[%s1515_s11 + $0x140] sm:$0xff]  ;;  %352 = vst [vmem:[%s1520_s12 + $0x90] sm:$0xff] %v351_v18  ;;  %354 = vst [vmem:[%s1520_s12 + $0x98] sm:$0xff] %v353_v19  ;;  %v357_v21 = vld [vmem:[%s1515_s11 + $0x150] sm:$0xff] }
  0x24   : > { %356 = vst [vmem:[%s1520_s12 + $0xa0] sm:$0xff] %v355_v20  ;;  %v359_v22 = vld [vmem:[%s1515_s11 + $0x160] sm:$0xff]  ;;  %v361_v23 = vld [vmem:[%s1515_s11 + $0x170] sm:$0xff]  ;;  %358 = vst [vmem:[%s1520_s12 + $0xa8] sm:$0xff] %v357_v21 }
  0x25   : > { %360 = vst [vmem:[%s1520_s12 + $0xb0] sm:$0xff] %v359_v22  ;;  %362 = vst [vmem:[%s1520_s12 + $0xb8] sm:$0xff] %v361_v23  ;;  %v363_v24 = vld [vmem:[%s1515_s11 + $0x180] sm:$0xff]  ;;  %v365_v25 = vld [vmem:[%s1515_s11 + $0x190] sm:$0xff] }
  0x26   : > { %v367_v26 = vld [vmem:[%s1515_s11 + $0x1a0] sm:$0xff]  ;;  %364 = vst [vmem:[%s1520_s12 + $0xc0] sm:$0xff] %v363_v24  ;;  %366 = vst [vmem:[%s1520_s12 + $0xc8] sm:$0xff] %v365_v25  ;;  %v369_v27 = vld [vmem:[%s1515_s11 + $0x1b0] sm:$0xff] }
  0x27   : > { %368 = vst [vmem:[%s1520_s12 + $0xd0] sm:$0xff] %v367_v26  ;;  %v371_v28 = vld [vmem:[%s1515_s11 + $0x1c0] sm:$0xff]  ;;  %v373_v29 = vld [vmem:[%s1515_s11 + $0x1d0] sm:$0xff]  ;;  %370 = vst [vmem:[%s1520_s12 + $0xd8] sm:$0xff] %v369_v27 }
  0x28   : > { %372 = vst [vmem:[%s1520_s12 + $0xe0] sm:$0xff] %v371_v28  ;;  %374 = vst [vmem:[%s1520_s12 + $0xe8] sm:$0xff] %v373_v29  ;;  %v375_v30 = vld [vmem:[%s1515_s11 + $0x1e0] sm:$0xff]  ;;  %v377_v31 = vld [vmem:[%s1515_s11 + $0x1f0] sm:$0xff] }
  0x29   : > { %v379_v32 = vld [vmem:[%s1515_s11 + $0x200] sm:$0xff]  ;;  %376 = vst [vmem:[%s1520_s12 + $0xf0] sm:$0xff] %v375_v30  ;;  %378 = vst [vmem:[%s1520_s12 + $0xf8] sm:$0xff] %v377_v31  ;;  %v381_v33 = vld [vmem:[%s1515_s11 + $0x210] sm:$0xff] }
  0x2a   : > { %380 = vst [vmem:[%s1520_s12 + $0x100] sm:$0xff] %v379_v32  ;;  %v383_v34 = vld [vmem:[%s1515_s11 + $0x220] sm:$0xff]  ;;  %v385_v35 = vld [vmem:[%s1515_s11 + $0x230] sm:$0xff]  ;;  %382 = vst [vmem:[%s1520_s12 + $0x108] sm:$0xff] %v381_v33 }
  0x2b   : > { %384 = vst [vmem:[%s1520_s12 + $0x110] sm:$0xff] %v383_v34  ;;  %386 = vst [vmem:[%s1520_s12 + $0x118] sm:$0xff] %v385_v35  ;;  %v387_v36 = vld [vmem:[%s1515_s11 + $0x240] sm:$0xff]  ;;  %v389_v37 = vld [vmem:[%s1515_s11 + $0x250] sm:$0xff] }
  0x2c   : > { %v391_v38 = vld [vmem:[%s1515_s11 + $0x260] sm:$0xff]  ;;  %388 = vst [vmem:[%s1520_s12 + $0x120] sm:$0xff] %v387_v36  ;;  %390 = vst [vmem:[%s1520_s12 + $0x128] sm:$0xff] %v389_v37  ;;  %v393_v39 = vld [vmem:[%s1515_s11 + $0x270] sm:$0xff] }
  0x2d   : > { %392 = vst [vmem:[%s1520_s12 + $0x130] sm:$0xff] %v391_v38  ;;  %v395_v40 = vld [vmem:[%s1515_s11 + $0x280] sm:$0xff]  ;;  %v397_v41 = vld [vmem:[%s1515_s11 + $0x290] sm:$0xff]  ;;  %394 = vst [vmem:[%s1520_s12 + $0x138] sm:$0xff] %v393_v39 }
  0x2e   : > { %396 = vst [vmem:[%s1520_s12 + $0x140] sm:$0xff] %v395_v40  ;;  %398 = vst [vmem:[%s1520_s12 + $0x148] sm:$0xff] %v397_v41  ;;  %v399_v42 = vld [vmem:[%s1515_s11 + $0x2a0] sm:$0xff]  ;;  %v401_v43 = vld [vmem:[%s1515_s11 + $0x2b0] sm:$0xff] }
  0x2f   : > { %v403_v44 = vld [vmem:[%s1515_s11 + $0x2c0] sm:$0xff]  ;;  %400 = vst [vmem:[%s1520_s12 + $0x150] sm:$0xff] %v399_v42  ;;  %402 = vst [vmem:[%s1520_s12 + $0x158] sm:$0xff] %v401_v43  ;;  %v405_v45 = vld [vmem:[%s1515_s11 + $0x2d0] sm:$0xff] }
  0x30   : > { %404 = vst [vmem:[%s1520_s12 + $0x160] sm:$0xff] %v403_v44  ;;  %v407_v46 = vld [vmem:[%s1515_s11 + $0x2e0] sm:$0xff]  ;;  %v409_v47 = vld [vmem:[%s1515_s11 + $0x2f0] sm:$0xff]  ;;  %406 = vst [vmem:[%s1520_s12 + $0x168] sm:$0xff] %v405_v45 }
  0x31   : > { %408 = vst [vmem:[%s1520_s12 + $0x170] sm:$0xff] %v407_v46  ;;  %410 = vst [vmem:[%s1520_s12 + $0x178] sm:$0xff] %v409_v47 }
  0x32 PF: > { %p1171_p7 = scmp.ge.s32.totalorder %s1424_s21, 1  ;;  %p431_p8 = scmp.lt.s32.totalorder %s1424_s21, 13 }
  0x34   : > { %p432_p9 = pnand %p1171_p7, %p431_p8 }
  0x35   : > { %s438_s13 = sand.u32 (!%p432_p9), 1, %s1400_s15   ;;  %s475_s14 = smul.u32 (!%p432_p9), 3, %s1408_s17 }
  0x36   : > { %435 = sbr.rel (%p432_p9) target bundleno = 424 (0x1a8), region = 70  ;;  %s1172_s25 = sshll.u32 (!%p432_p9), %s1412_s18, 1 }
  0x37   : > { %s1233_s24 = smul.u32 (!%p432_p9), 384, %s438_s13  ;;  %p476_p10 = scmp.lt.s32.totalorder (!%p432_p9), %s475_s14, 17 }
  0x38   : > { %p483_p11 = scmp.lt.s32.totalorder (!%p432_p9), %s1172_s25, 3  ;;  %p1176_p12 = scmp.ne.s32.totalorder (!%p432_p9), %s1408_s17, 0 }
  0x39   : > { %s1642_s12 = scalar_lea.vmem (!%p432_p9), [#allocation3], %s1233_s24 }
  0x3d   : > { %s1775_s14 = smov (!%p476_p10, %s475_s14), 17  ;;  %s1777_s25 = smov (!%p483_p11, %s1172_s25), 3 }
  0x3e   : > { %s478_s29 = scalar_lea.vmem %s1757_s0, %s1775_s14  ;;  %s485_s15 = scalar_lea.vmem %s1759_s2, %s1777_s25  ;;  %v1426_v48 = vmov (!%p1176_p12), 0.0  }
  0x3f   : > { %s490_s7 = scalar_lea.vmem %s1760_s3, %s1777_s25  ;;  %s1175_s8 = sshll.u32 %s1777_s25, 1  ;;  %503 = vst [vmem:[#allocation2] sm:$0xf] (!%p1176_p12), %v1426_v48 }
  0x40   : > { %s1640_s11 = scalar_lea.vmem %s1761_s4, %s1175_s8  ;;  %502 = sbr.rel (%p1176_p12) target bundleno = 71 (0x47), region = 78 }
  0x47 PF: > { %v1294_v49 = vld [vmem:[%s1642_s12 + $0x4] ss:$8 sps:$4 sm:$0xff]   ;;  %v1296_v50 = vld [vmem:[%s1642_s12] ss:$8 sps:$4 sm:$0xff]   ;;  %v1427_v51 = vmov 0   ;;  %v566_v12 = vlaneseq  ;;  %p1226_p13 = scmp.ne.s32.totalorder %s1408_s17, 5 }
  0x48   : > { %894 = vmatprep.mubr.bf16.mxu0 %v1427_v51  ;;  %821 = vmatprep.subr.bf16.mxu1 %v1294_v49  ;;  %v1297_v52 = vld [vmem:[%s1642_s12 + $0x14] ss:$8 sps:$4 sm:$0xff]   ;;  %v1299_v53 = vld [vmem:[%s1642_s12 + $0x10] ss:$8 sps:$4 sm:$0xff]   ;;  %v1300_v54 = vld [vmem:[%s1642_s12 + $0x24] ss:$8 sps:$4 sm:$0xff]  }
  0x49   : > { %822 = vmatpush1.bf16.msra.mxu1 %v1296_v50  ;;  %v1302_v55 = vld [vmem:[%s1642_s12 + $0x20] ss:$8 sps:$4 sm:$0xff]   ;;  %v1303_v56 = vld [vmem:[%s1642_s12 + $0x34] ss:$8 sps:$4 sm:$0xff]   ;;  %v1305_v57 = vld [vmem:[%s1642_s12 + $0x30] ss:$8 sps:$4 sm:$0xff]  }
  0x4a   : > { %823 = vmatprep.subr.bf16.mxu1 %v1297_v52  ;;  %v1318_v58 = vld [vmem:[%s1642_s12 + $0x104] ss:$8 sps:$4 sm:$0xff]   ;;  %v1320_v59 = vld [vmem:[%s1642_s12 + $0x100] ss:$8 sps:$4 sm:$0xff]   ;;  %v1324_v61 = vld [vmem:[%s1642_s12 + $0x114] ss:$8 sps:$4 sm:$0xff]  }
  0x4b   : > { %v1306_v60 = vld [vmem:[%s1642_s12 + $0x44] ss:$8 sps:$4 sm:$0xff]   ;;  %862 = vmatprep.subr.bf16.mxu0 %v1318_v58  ;;  %v1326_v62 = vld [vmem:[%s1642_s12 + $0x110] ss:$8 sps:$4 sm:$0xff]   ;;  %v1308_v63 = vld [vmem:[%s1642_s12 + $0x40] ss:$8 sps:$4 sm:$0xff]  }
  0x4c   : > { %863 = vmatpush1.bf16.msra.mxu0 %v1320_v59  ;;  %v1309_v0 = vld [vmem:[%s1642_s12 + $0x54] ss:$8 sps:$4 sm:$0xff]   ;;  %v1330_v1 = vld [vmem:[%s1642_s12 + $0x124] ss:$8 sps:$4 sm:$0xff]   ;;  %v1332_v2 = vld [vmem:[%s1642_s12 + $0x120] ss:$8 sps:$4 sm:$0xff]  }
  0x4d   : > { %824 = vmatpush1.bf16.msra.mxu1 %v1299_v53  ;;  %864 = vmatprep.subr.bf16.mxu0 %v1324_v61  ;;  %v1311_v3 = vld [vmem:[%s1642_s12 + $0x50] ss:$8 sps:$4 sm:$0xff]   ;;  %v1336_v4 = vld [vmem:[%s1642_s12 + $0x134] ss:$8 sps:$4 sm:$0xff]   ;;  %v1312_v5 = vld [vmem:[%s1642_s12 + $0x64] ss:$8 sps:$4 sm:$0xff]  }
  0x4e   : > { %825 = vmatprep.subr.bf16.mxu1 %v1300_v54  ;;  %v1338_v6 = vld [vmem:[%s1642_s12 + $0x130] ss:$8 sps:$4 sm:$0xff]   ;;  %v1314_v7 = vld [vmem:[%s1642_s12 + $0x60] ss:$8 sps:$4 sm:$0xff]   ;;  %v1342_v8 = vld [vmem:[%s1642_s12 + $0x144] ss:$8 sps:$4 sm:$0xff]  }
  0x4f   : > { %v1315_v9 = vld [vmem:[%s1642_s12 + $0x74] ss:$8 sps:$4 sm:$0xff]   ;;  %v1428_v10 = vmov 1966171168   ;;  %v1344_v13 = vld [vmem:[%s1642_s12 + $0x140] ss:$8 sps:$4 sm:$0xff]  }
  0x50   : > { %865 = vmatpush1.bf16.msra.mxu0 %v1326_v62  ;;  %v564_v11 = vunpack.c.l.s4 %v1428_v10  ;;  %v1317_v14 = vld [vmem:[%s1642_s12 + $0x70] ss:$8 sps:$4 sm:$0xff]   ;;  %v1348_v15 = vld [vmem:[%s1642_s12 + $0x154] ss:$8 sps:$4 sm:$0xff]   ;;  %v1321_v16 = vld [vmem:[%s1642_s12 + $0x84] ss:$8 sps:$4 sm:$0xff]  }
  0x51   : > { %826 = vmatpush1.bf16.msra.mxu1 %v1302_v55  ;;  %866 = vmatprep.subr.bf16.mxu0 %v1330_v1  ;;  %v1673_v18 = vshrl.u32 %v566_v12, 7  ;;  %v1350_v19 = vld [vmem:[%s1642_s12 + $0x150] ss:$8 sps:$4 sm:$0xff]   ;;  %v1323_v20 = vld [vmem:[%s1642_s12 + $0x80] ss:$8 sps:$4 sm:$0xff]   ;;  %vm932_vm0 = vcmask (!%p1226_p13), 1041408  }
  0x52   : > { %827 = vmatprep.subr.bf16.mxu1 %v1303_v56  ;;  %v565_v17 = vunpack.c.0.s8 %v564_v11  ;;  %v1354_v21 = vld [vmem:[%s1642_s12 + $0x164] ss:$8 sps:$4 sm:$0xff]   ;;  %v1327_v22 = vld [vmem:[%s1642_s12 + $0x94] ss:$8 sps:$4 sm:$0xff]   ;;  %v1356_v26 = vld [vmem:[%s1642_s12 + $0x160] ss:$8 sps:$4 sm:$0xff]  }
  0x53   : > { %v1177_v23 = vld.sshfl [vmem:[%s478_s29] sm:$0x13 pattern:$0x75316420]  ;;  %v1329_v27 = vld [vmem:[%s1642_s12 + $0x90] ss:$8 sps:$4 sm:$0xff]  }
  0x54   : > { %867 = vmatpush1.bf16.msra.mxu0 %v1332_v2  ;;  %v1685_v24 = vsub.s32 %v565_v17, %v1673_v18  ;;  %v562_v25 = vcombine.high %v1177_v23, %v1177_v23  ;;  %v1360_v28 = vld [vmem:[%s1642_s12 + $0x174] ss:$8 sps:$4 sm:$0xff]   ;;  %v1333_v30 = vld [vmem:[%s1642_s12 + $0xa4] ss:$8 sps:$4 sm:$0xff]   ;;  %v1362_v32 = vld [vmem:[%s1642_s12 + $0x170] ss:$8 sps:$4 sm:$0xff]  }
  0x55   : > { %828 = vmatpush1.bf16.msra.mxu1 %v1305_v57  ;;  %868 = vmatprep.subr.bf16.mxu0 %v1336_v4  ;;  %v1335_v33 = vld [vmem:[%s1642_s12 + $0xa0] ss:$8 sps:$4 sm:$0xff]   ;;  %v1339_v34 = vld [vmem:[%s1642_s12 + $0xb4] ss:$8 sps:$4 sm:$0xff]   ;;  %v1341_v36 = vld [vmem:[%s1642_s12 + $0xb0] ss:$8 sps:$4 sm:$0xff]  }
  0x56   : > { %829 = vmatprep.subr.bf16.mxu1 %v1306_v60  ;;  %v576_v29 = vrot.slane %v562_v25, %v1685_v24  ;;  %v569_v31 = vrot.slane %v1177_v23, %v1685_v24  ;;  %v1345_v37 = vld [vmem:[%s1642_s12 + $0xc4] ss:$8 sps:$4 sm:$0xff]   ;;  %v1347_v38 = vld [vmem:[%s1642_s12 + $0xc0] ss:$8 sps:$4 sm:$0xff]   ;;  %v1351_v39 = vld [vmem:[%s1642_s12 + $0xd4] ss:$8 sps:$4 sm:$0xff]  }
  0x57   : > { %v1353_v40 = vld [vmem:[%s1642_s12 + $0xd0] ss:$8 sps:$4 sm:$0xff]   ;;  %v1357_v41 = vld [vmem:[%s1642_s12 + $0xe4] ss:$8 sps:$4 sm:$0xff]   ;;  %v1359_v42 = vld [vmem:[%s1642_s12 + $0xe0] ss:$8 sps:$4 sm:$0xff]  }
  0x58   : > { %869 = vmatpush1.bf16.msra.mxu0 %v1338_v6  ;;  %853 = vmatprep.mubr.bf16.mxu1 %v576_v29  ;;  %v577_v35 = vcombine.high %v569_v31, %v569_v31  ;;  %v1363_v43 = vld [vmem:[%s1642_s12 + $0xf4] ss:$8 sps:$4 sm:$0xff]   ;;  %v1365_v44 = vld [vmem:[%s1642_s12 + $0xf0] ss:$8 sps:$4 sm:$0xff]   ;;  %v1429_v49 = vmov 1983009808  }
  0x59   : > { %830 = vmatpush1.bf16.msra.mxu1 %v1308_v63  ;;  %870 = vmatprep.subr.bf16.mxu0 %v1342_v8  ;;  %v907_v50 = vunpack.c.l.s4 %v1429_v49  ;;  %v504_v60 = vld [vmem:[#allocation2] sm:$0xf] }
  0x5a   : > { %831 = vmatprep.subr.bf16.mxu1 %v1309_v0 }
  0x5b   : > { %v908_v51 = vunpack.c.0.s8 %v907_v50  ;;  %v1038_v50 = vld [vmem:[%s490_s7] sm:$0x3] (!%p1226_p13) }
  0x5c   : > { %871 = vmatpush1.bf16.msra.mxu0 %v1344_v13 }
  0x5d   : > { %832 = vmatpush1.bf16.msra.mxu1 %v1311_v3  ;;  %872 = vmatprep.subr.bf16.mxu0 %v1348_v15  ;;  %v1706_v56 = vsub.s32 %v908_v51, %v1673_v18 }
  0x5e   : > { %833 = vmatprep.subr.bf16.mxu1 %v1312_v5 }
  0x60   : > { %873 = vmatpush1.bf16.msra.mxu0 %v1350_v19 }
  0x61   : > { %834 = vmatpush1.bf16.msra.mxu1 %v1314_v7  ;;  %874 = vmatprep.subr.bf16.mxu0 %v1354_v21 }
  0x62   : > { %835 = vmatprep.subr.bf16.mxu1 %v1315_v9 }
  0x64   : > { %875 = vmatpush1.bf16.msra.mxu0 %v1356_v26 }
  0x65   : > { %836 = vmatpush1.bf16.msra.mxu1 %v1317_v14  ;;  %876 = vmatprep.subr.bf16.mxu0 %v1360_v28 }
  0x66   : > { %837 = vmatprep.subr.bf16.mxu1 %v1321_v16 }
  0x68   : > { %877 = vmatpush1.bf16.msra.mxu0 %v1362_v32 }
  0x69   : > { %838 = vmatpush1.bf16.msra.mxu1 %v1323_v20 }
  0x6a   : > { %839 = vmatprep.subr.bf16.mxu1 %v1327_v22 }
  0x6b   : > { %895 = vmatmul.mubr.bf16.vlgmr.msra.gmra.mrb[0].mxu0 %v577_v35 }
  0x6d   : > { %840 = vmatpush1.bf16.msra.mxu1 %v1329_v27 }
  0x6e   : > { %841 = vmatprep.subr.bf16.mxu1 %v1333_v30 }
  0x71   : > { %842 = vmatpush1.bf16.msra.mxu1 %v1335_v33 }
  0x72   : > { %843 = vmatprep.subr.bf16.mxu1 %v1339_v34 }
  0x75   : > { %844 = vmatpush1.bf16.msra.mxu1 %v1341_v36 }
  0x76   : > { %845 = vmatprep.subr.bf16.mxu1 %v1345_v37 }
  0x79   : > { %846 = vmatpush1.bf16.msra.mxu1 %v1347_v38 }
  0x7a   : > { %847 = vmatprep.subr.bf16.mxu1 %v1351_v39 }
  0x7d   : > { %848 = vmatpush1.bf16.msra.mxu1 %v1353_v40 }
  0x7e   : > { %849 = vmatprep.subr.bf16.mxu1 %v1357_v41 }
  0x81   : > { %850 = vmatpush1.bf16.msra.mxu1 %v1359_v42 }
  0x82   : > { %851 = vmatprep.subr.bf16.mxu1 %v1363_v43 }
  0x85   : > { %852 = vmatpush1.bf16.msra.mxu1 %v1365_v44 }
  0x88   : > { %854 = vmatmul.mubr.bf16.vlgmr.msra.gmra.mrb[0].mxu1 %v569_v31 }
 0x13e   : > { %v896_v45 = vpop.f32.mrb[0].mxu0 }
 0x13f   : > { %v898_v46 = vpop.f32.mrb[1].mxu0 }
 0x140   : > { %v900_v47 = vpop.f32.mrb[2].mxu0 }
 0x141   : > { %v901_v48 = vpop.f32.mrb[3].mxu0 }
 0x15b   : > { %v855_v52 = vpop.f32.mrb[0].mxu1 }
 0x15c   : > { %v897_v53 = vadd.f32 %v896_v45, %v855_v52  ;;  %v857_v54 = vpop.f32.mrb[1].mxu1 }
 0x15d   : > { %v899_v55 = vadd.f32 %v898_v46, %v857_v54  ;;  %v859_v57 = vpop.f32.mrb[2].mxu1  ;;  %v1026_v54 = vsub.s32 (!%p1226_p13), 1, %v1673_v18 }
 0x15e   : > { %v860_v58 = vpop.f32.mrb[3].mxu1 }
 0x15f   : > { %v905_v59 = vcombine.low %v897_v53, %v899_v55  ;;  %919 = sbr.rel (%p1226_p13) target bundleno = 424 (0x1a8), region = 82  ;;  %v1022_v53 = vsub.s32 (!%p1226_p13), 0, %v1673_v18  ;;  %v995_v55 = vld [vmem:[%s485_s15] sm:$0x3] (!%p1226_p13) }
 0x161   : > { %v912_v61 = vrot.slane %v905_v59, %v1706_v56  ;;  %v1043_v58 = vrot.slane (!%p1226_p13), %v1038_v50, %v1022_v53  ;;  %v1047_v59 = vrot.slane (!%p1226_p13), %v1038_v50, %v1026_v54 }
 0x163   : > { %v914_v62 = vadd.f32 %v912_v61, %v504_v60 }
 0x165   : > { %915 = vst [vmem:[#allocation2] sm:$0xf] %v914_v62 }
 0x16c   : > { %v1710_v63 = vld [vmem:[#allocation2] sm:$0xf] }
 0x16d   : > { %v928_v0 = vrot.slane %v1710_v63, %v1706_v56  ;;  %v949_v1 = vmul.f32 %v1710_v63, %v1710_v63 }
 0x16f   : > { %v929_v2 = vcombine.high %v928_v0, %v928_v0  ;;  %v933_v3 = vsel %vm932_vm0, %v928_v0, 0.0  ;;  %v957_v4 = vrot.slane %v949_v1, %v1706_v56  ;;  %v1048_v1 = vcombine.low %v1043_v58, %v1047_v59 }
 0x170   : > { %v934_v5 = vrot.slane %v933_v3, 4 }
 0x171   : > { %v940_v6 = vsel %vm932_vm0, %v929_v2, 0.0  ;;  %v958_v7 = vcombine.high %v957_v4, %v957_v4  ;;  %v961_v8 = vsel %vm932_vm0, %v957_v4, 0.0  ;;  %v1055_v4 = vrot.slane %v1048_v1, %v1706_v56 }
 0x172   : > { %v935_v9 = vadd.f32 %v934_v5, %v933_v3  ;;  %v941_v10 = vrot.slane %v940_v6, 4  ;;  %v962_v11 = vrot.slane %v961_v8, 4 }
 0x173   : > { %v968_v12 = vsel %vm932_vm0, %v958_v7, 0.0 }
 0x174   : > { %v936_v13 = vrot.slane %v935_v9, 2  ;;  %v942_v14 = vadd.f32 %v941_v10, %v940_v6  ;;  %v963_v15 = vadd.f32 %v962_v11, %v961_v8  ;;  %v969_v16 = vrot.slane %v968_v12, 4 }
 0x176   : > { %v937_v17 = vadd.f32 %v936_v13, %v935_v9  ;;  %v943_v19 = vrot.slane %v942_v14, 2  ;;  %v964_v20 = vrot.slane %v963_v15, 2  ;;  %v970_v21 = vadd.f32 %v969_v16, %v968_v12 }
 0x178   : > { %v938_v22 = vrot.slane %v937_v17, 1  ;;  %v944_v23 = vadd.f32 %v943_v19, %v942_v14  ;;  %v965_v25 = vadd.f32 %v964_v20, %v963_v15  ;;  %v971_v26 = vrot.slane %v970_v21, 2 }
 0x17a   : > { %v939_v27 = vadd.f32 %v938_v22, %v937_v17  ;;  %v945_v28 = vrot.slane %v944_v23, 1  ;;  %v966_v29 = vrot.slane %v965_v25, 1  ;;  %v972_v30 = vadd.f32 %v971_v26, %v970_v21 }
 0x17c   : > { %v946_v31 = vadd.f32 %v945_v28, %v944_v23  ;;  %v947_v32 = vmul.f32 0.5, %v939_v27  ;;  %v967_v33 = vadd.f32 %v966_v29, %v965_v25  ;;  %v973_v34 = vrot.slane %v972_v30, 1 }
 0x17e   : > { %v948_v35 = vmul.f32 0.5, %v946_v31  ;;  %v974_v36 = vadd.f32 %v973_v34, %v972_v30  ;;  %v975_v37 = vmul.f32 0.5, %v967_v33  ;;  %v977_v38 = vmul.f32 %v947_v32, %v947_v32 }
 0x180   : > { %v976_v39 = vmul.f32 0.5, %v974_v36  ;;  %v978_v40 = vmul.f32 %v948_v35, %v948_v35  ;;  %v979_v41 = vsub.f32 %v975_v37, %v977_v38  ;;  %v985_v51 = vcombine.low %v947_v32, %v948_v35 }
 0x182   : > { %v980_v42 = vsub.f32 %v976_v39, %v978_v40  ;;  %v981_v43 = vmax.f32 %v979_v41, 0.0  ;;  %v992_v60 = vrot.slane %v985_v51, %v1706_v56 }
 0x184   : > { %v982_v44 = vmax.f32 %v980_v42, 0.0  ;;  %v996_v45 = vadd.f32 1e-05, %v981_v43  ;;  %v994_v2 = vsub.f32 %v1710_v63, %v992_v60 }
 0x186   : > { %v997_v46 = vadd.f32 1e-05, %v982_v44  ;;  %1366 = vrsqrt.f32 %v996_v45 }
 0x188   : > { %1368 = vrsqrt.f32 %v997_v46 }
 0x190   : > { %v1367_v47 = vpop.eup %1366 }
 0x192   : > { %v1369_v48 = vpop.eup %1368 }
 0x193   : > { %v1002_v49 = vcombine.low %v1367_v47, %v1369_v48 }
 0x195   : > { %v1009_v52 = vrot.slane %v1002_v49, %v1685_v24 }
 0x197   : > { %v1016_v57 = vrot.slane %v1009_v52, %v1685_v24 }
 0x199   : > { %v1018_v61 = vmul.f32 %v1016_v57, %v995_v55 }
 0x19b   : > { %v1023_v62 = vrot.slane %v1018_v61, %v1022_v53  ;;  %v1027_v0 = vrot.slane %v1018_v61, %v1026_v54 }
 0x19d   : > { %v1028_v3 = vcombine.low %v1023_v62, %v1027_v0 }
 0x19f   : > { %v1035_v18 = vrot.slane %v1028_v3, %v1706_v56 }
 0x1a1   : > { %v1037_v5 = vmul.f32 %v1035_v18, %v994_v2 }
 0x1a3   : > { %v1057_v6 = vadd.f32 %v1055_v4, %v1037_v5 }
 0x1a5   : > { %v1058_v7 = vmax.f32 %v1057_v6, 0.0 }
 0x1a7   : > { %1059 = vst [vmem:[%s1640_s11] sm:$0xf] %v1058_v7 }
 0x1a8 PF: > { %s14_s21 = sadd.s32 1, %s1424_s21   ;;  %s1762_s15 = smov %s1404_s16 }
 0x1a9   : > { %p11_p0 = scmp.ge.s32.totalorder %s14_s21, 14   ;;  %s1763_s16 = smov %s1506_s28 }
 0x1aa   : > { %s1764_s17 = smov %s1416_s19  ;;  %s1765_s18 = smov %s1420_s20 }
 0x1ab   : > { %s1766_s19 = smov %s1769_s22  ;;  %s1767_s20 = smov %s1773_s23 }
 0x1ac   :  { %13 = sbr.rel (!%p11_p0) target bundleno = 4 (0x4), region = 126 }

// kernel: _lambda_.37
= control target key start
LH: loop header
LB: loop body
LE: loop exit
PB: predicated region body
PF: predicated region fallthrough
CT: control target
= control target key end

     0   :  { %s1171_s15 = smov 0   ;;  %s1173_s16 = smov 0   ;;  %s1378_s0 = inlined_call_operand.vmem [shape: bf16[2,256], index: 0, kind: input, shape index: {}]   ;;  %s1379_s1 = inlined_call_operand.vmem [shape: bf16[256,512], index: 1, kind: input, shape index: {}]   ;;  %s1380_s2 = inlined_call_operand.vmem [shape: f32[1,512], index: 2, kind: input, shape index: {}]   ;;  %s1381_s3 = inlined_call_operand.vmem [shape: f32[1,512], index: 3, kind: input, shape index: {}]   ;;  %s1382_s4 = inlined_call_operand.vmem [shape: f32[2,512], index: 4, kind: output, shape index: {}]  }
   0x1   :  { %s1175_s17 = smov 0   ;;  %s1177_s18 = smov 0  }
   0x2   :  { %s1179_s19 = smov 0  }
   0x3 LB: > { %s26_s20 = sadd.s32 1, %s1137_s18  ;;  %p68_p1 = scmp.ne.s32.totalorder %s1129_s16, %s1125_s15  ;;  %s1141_s19 = sphi %s1179_s19, %s14_s19   ;;  %s1137_s18 = sphi %s1177_s18, %s1386_s18   ;;  %s1133_s17 = sphi %s1175_s17, %s1385_s17   ;;  %s1129_s16 = sphi %s1173_s16, %s1384_s16   ;;  %s1125_s15 = sphi %s1171_s15, %s1383_s15  }
   0x4   : > { %p28_p0 = scmp.ge.s32.totalorder %s26_s20, 2  ;;  %p69_p2 = scmp.eq.s32.totalorder %s1141_s19, 0 }
   0x5   : > { %s61_s22 = sadd.s32 1, %s1129_s16  ;;  %p962_p5 = scmp.ge.s32.totalorder %s1141_s19, 2 }
   0x6   : > { %s1388_s20 = smov (%p28_p0, %s26_s20), 0  ;;  %p70_p3 = por %p69_p2, %p68_p1 }
   0x7   : > { %s57_s21 = ssub.s32 %s1137_s18, %s1388_s20  ;;  %180 = sbr.rel (%p962_p5) target bundleno = 34 (0x22), region = 20 }
   0x8   : > { %p59_p4 = scmp.eq.s32.totalorder %s57_s21, 0 }
   0xa   : > { %s1206_s23 = scalar_select %p59_p4, %s1129_s16, %s61_s22  }
   0xe   : > { %183 = sbr.rel (!%p70_p3) target bundleno = 34 (0x22), region = 24  ;;  %s185_s24 = sand.u32 (%p70_p3), 1, %s1129_s16  }
   0xf   : > { %s1007_s25 = sshll.u32 (%p70_p3), %s1137_s18, 3  ;;  %s963_s26 = sshll.u32 (%p70_p3), %s185_s24, 8 }
  0x10   : > { %s1214_s29 = scalar_lea.vmem (%p70_p3), %s1379_s1, %s1007_s25  ;;  %s1219_s30 = scalar_lea.vmem (%p70_p3), [#allocation3], %s963_s26 }
  0x11   : > { %v283_v0 = vld [vmem:[%s1214_s29] sm:$0xff] (%p70_p3)  ;;  %v285_v1 = vld [vmem:[%s1214_s29 + $0x10] sm:$0xff] (%p70_p3) }
  0x12   : > { %v287_v2 = vld [vmem:[%s1214_s29 + $0x20] sm:$0xff] (%p70_p3)  ;;  %284 = vst [vmem:[%s1219_s30] sm:$0xff] (%p70_p3), %v283_v0  ;;  %286 = vst [vmem:[%s1219_s30 + $0x8] sm:$0xff] (%p70_p3), %v285_v1  ;;  %v289_v3 = vld [vmem:[%s1214_s29 + $0x30] sm:$0xff] (%p70_p3) }
  0x13   : > { %288 = vst [vmem:[%s1219_s30 + $0x10] sm:$0xff] (%p70_p3), %v287_v2  ;;  %v291_v4 = vld [vmem:[%s1214_s29 + $0x40] sm:$0xff] (%p70_p3)  ;;  %v293_v5 = vld [vmem:[%s1214_s29 + $0x50] sm:$0xff] (%p70_p3)  ;;  %290 = vst [vmem:[%s1219_s30 + $0x18] sm:$0xff] (%p70_p3), %v289_v3 }
  0x14   : > { %292 = vst [vmem:[%s1219_s30 + $0x20] sm:$0xff] (%p70_p3), %v291_v4  ;;  %294 = vst [vmem:[%s1219_s30 + $0x28] sm:$0xff] (%p70_p3), %v293_v5  ;;  %v295_v6 = vld [vmem:[%s1214_s29 + $0x60] sm:$0xff] (%p70_p3)  ;;  %v297_v7 = vld [vmem:[%s1214_s29 + $0x70] sm:$0xff] (%p70_p3) }
  0x15   : > { %v299_v8 = vld [vmem:[%s1214_s29 + $0x80] sm:$0xff]  ;;  %296 = vst [vmem:[%s1219_s30 + $0x30] sm:$0xff] %v295_v6  ;;  %298 = vst [vmem:[%s1219_s30 + $0x38] sm:$0xff] %v297_v7  ;;  %v301_v9 = vld [vmem:[%s1214_s29 + $0x90] sm:$0xff] }
  0x16   : > { %300 = vst [vmem:[%s1219_s30 + $0x40] sm:$0xff] %v299_v8  ;;  %v303_v10 = vld [vmem:[%s1214_s29 + $0xa0] sm:$0xff]  ;;  %v305_v11 = vld [vmem:[%s1214_s29 + $0xb0] sm:$0xff]  ;;  %302 = vst [vmem:[%s1219_s30 + $0x48] sm:$0xff] %v301_v9 }
  0x17   : > { %304 = vst [vmem:[%s1219_s30 + $0x50] sm:$0xff] %v303_v10  ;;  %306 = vst [vmem:[%s1219_s30 + $0x58] sm:$0xff] %v305_v11  ;;  %v307_v12 = vld [vmem:[%s1214_s29 + $0xc0] sm:$0xff]  ;;  %v309_v13 = vld [vmem:[%s1214_s29 + $0xd0] sm:$0xff] }
  0x18   : > { %v311_v14 = vld [vmem:[%s1214_s29 + $0xe0] sm:$0xff]  ;;  %308 = vst [vmem:[%s1219_s30 + $0x60] sm:$0xff] %v307_v12  ;;  %310 = vst [vmem:[%s1219_s30 + $0x68] sm:$0xff] %v309_v13  ;;  %v313_v15 = vld [vmem:[%s1214_s29 + $0xf0] sm:$0xff] }
  0x19   : > { %312 = vst [vmem:[%s1219_s30 + $0x70] sm:$0xff] %v311_v14  ;;  %v315_v16 = vld [vmem:[%s1214_s29 + $0x100] sm:$0xff]  ;;  %v317_v17 = vld [vmem:[%s1214_s29 + $0x110] sm:$0xff]  ;;  %314 = vst [vmem:[%s1219_s30 + $0x78] sm:$0xff] %v313_v15 }
  0x1a   : > { %316 = vst [vmem:[%s1219_s30 + $0x80] sm:$0xff] %v315_v16  ;;  %318 = vst [vmem:[%s1219_s30 + $0x88] sm:$0xff] %v317_v17  ;;  %v319_v18 = vld [vmem:[%s1214_s29 + $0x120] sm:$0xff]  ;;  %v321_v19 = vld [vmem:[%s1214_s29 + $0x130] sm:$0xff] }
  0x1b   : > { %v323_v20 = vld [vmem:[%s1214_s29 + $0x140] sm:$0xff]  ;;  %320 = vst [vmem:[%s1219_s30 + $0x90] sm:$0xff] %v319_v18  ;;  %322 = vst [vmem:[%s1219_s30 + $0x98] sm:$0xff] %v321_v19  ;;  %v325_v21 = vld [vmem:[%s1214_s29 + $0x150] sm:$0xff] }
  0x1c   : > { %324 = vst [vmem:[%s1219_s30 + $0xa0] sm:$0xff] %v323_v20  ;;  %v327_v22 = vld [vmem:[%s1214_s29 + $0x160] sm:$0xff]  ;;  %v329_v23 = vld [vmem:[%s1214_s29 + $0x170] sm:$0xff]  ;;  %326 = vst [vmem:[%s1219_s30 + $0xa8] sm:$0xff] %v325_v21 }
  0x1d   : > { %328 = vst [vmem:[%s1219_s30 + $0xb0] sm:$0xff] %v327_v22  ;;  %330 = vst [vmem:[%s1219_s30 + $0xb8] sm:$0xff] %v329_v23  ;;  %v331_v24 = vld [vmem:[%s1214_s29 + $0x180] sm:$0xff]  ;;  %v333_v25 = vld [vmem:[%s1214_s29 + $0x190] sm:$0xff] }
  0x1e   : > { %v335_v26 = vld [vmem:[%s1214_s29 + $0x1a0] sm:$0xff]  ;;  %332 = vst [vmem:[%s1219_s30 + $0xc0] sm:$0xff] %v331_v24  ;;  %334 = vst [vmem:[%s1219_s30 + $0xc8] sm:$0xff] %v333_v25  ;;  %v337_v27 = vld [vmem:[%s1214_s29 + $0x1b0] sm:$0xff] }
  0x1f   : > { %336 = vst [vmem:[%s1219_s30 + $0xd0] sm:$0xff] %v335_v26  ;;  %v339_v28 = vld [vmem:[%s1214_s29 + $0x1c0] sm:$0xff]  ;;  %v341_v29 = vld [vmem:[%s1214_s29 + $0x1d0] sm:$0xff]  ;;  %338 = vst [vmem:[%s1219_s30 + $0xd8] sm:$0xff] %v337_v27 }
  0x20   : > { %340 = vst [vmem:[%s1219_s30 + $0xe0] sm:$0xff] %v339_v28  ;;  %342 = vst [vmem:[%s1219_s30 + $0xe8] sm:$0xff] %v341_v29  ;;  %v343_v30 = vld [vmem:[%s1214_s29 + $0x1e0] sm:$0xff]  ;;  %v345_v31 = vld [vmem:[%s1214_s29 + $0x1f0] sm:$0xff] }
  0x21   : > { %344 = vst [vmem:[%s1219_s30 + $0xf0] sm:$0xff] %v343_v30  ;;  %346 = vst [vmem:[%s1219_s30 + $0xf8] sm:$0xff] %v345_v31 }
  0x22 PF: > { %p966_p6 = scmp.ge.s32.totalorder %s1141_s19, 1  ;;  %p367_p7 = scmp.lt.s32.totalorder %s1141_s19, 3 }
  0x24   : > { %p368_p8 = pnand %p966_p6, %p367_p7 }
  0x25   : > { %s374_s5 = sand.u32 (!%p368_p8), 1, %s1125_s15   ;;  %v1288_v32 = vld.sshfl [vmem:[%s1378_s0] sm:$0x11 pattern:$0x75316420] (!%p368_p8)  ;;  %v485_v33 = vlaneseq (!%p368_p8)  ;;  %v1144_v10 = vmov (!%p368_p8), 0.0  }
  0x26   : > { %371 = sbr.rel (%p368_p8) target bundleno = 389 (0x185), region = 70  ;;  %s967_s8 = sshll.u32 (!%p368_p8), %s374_s5, 8  ;;  %v1143_v34 = vmov (!%p368_p8), 1966171168   ;;  %v481_v39 = vcombine.high (!%p368_p8), %v1288_v32, %v1288_v32  ;;  %438 = vst [vmem:[#allocation2] sm:$0xf] (!%p368_p8), %v1144_v10 }
  0x27   : > { %v483_v35 = vunpack.c.l.s4 (!%p368_p8), %v1143_v34  ;;  %v1290_v36 = vshrl.u32 (!%p368_p8), %v485_v33, 7  ;;  %s1292_s9 = scalar_lea.vmem (!%p368_p8), [#allocation3], %s967_s8  ;;  %v1145_v11 = vmov (!%p368_p8), 1983009808   ;;  %vm727_vm0 = vcmask (!%p368_p8), 1041408   ;;  %s968_s10 = sshll.u32 (!%p368_p8), %s1133_s17, 1 }
  0x28   : > { %v1051_v37 = vld [vmem:[%s1292_s9 + $0x4] ss:$8 sps:$4 sm:$0xff] (!%p368_p8)   ;;  %v1053_v38 = vld [vmem:[%s1292_s9] ss:$8 sps:$4 sm:$0xff] (!%p368_p8)   ;;  %v1054_v41 = vld [vmem:[%s1292_s9 + $0x14] ss:$8 sps:$4 sm:$0xff] (!%p368_p8)   ;;  %v703_v12 = vunpack.c.l.s4 (!%p368_p8), %v1145_v11 }
  0x29   : > { %v484_v40 = vunpack.c.0.s8 (!%p368_p8), %v483_v35  ;;  %658 = vmatprep.subr.bf16.mxu0 (!%p368_p8), %v1051_v37  ;;  %v1056_v42 = vld [vmem:[%s1292_s9 + $0x10] ss:$8 sps:$4 sm:$0xff] (!%p368_p8)   ;;  %v1057_v44 = vld [vmem:[%s1292_s9 + $0x24] ss:$8 sps:$4 sm:$0xff] (!%p368_p8)   ;;  %v1059_v46 = vld [vmem:[%s1292_s9 + $0x20] ss:$8 sps:$4 sm:$0xff] (!%p368_p8)  }
  0x2a   : > { %659 = vmatpush1.bf16.msra.mxu0 (!%p368_p8), %v1053_v38  ;;  %v1060_v47 = vld [vmem:[%s1292_s9 + $0x34] ss:$8 sps:$4 sm:$0xff] (!%p368_p8)   ;;  %v1062_v48 = vld [vmem:[%s1292_s9 + $0x30] ss:$8 sps:$4 sm:$0xff] (!%p368_p8)   ;;  %v1063_v49 = vld [vmem:[%s1292_s9 + $0x44] ss:$8 sps:$4 sm:$0xff] (!%p368_p8)   ;;  %v704_v13 = vunpack.c.0.s8 (!%p368_p8), %v703_v12 }
  0x2b   : > { %v1301_v43 = vsub.s32 (!%p368_p8), %v484_v40, %v1290_v36  ;;  %660 = vmatprep.subr.bf16.mxu0 (!%p368_p8), %v1054_v41  ;;  %v1065_v50 = vld [vmem:[%s1292_s9 + $0x40] ss:$8 sps:$4 sm:$0xff] (!%p368_p8)   ;;  %v1066_v51 = vld [vmem:[%s1292_s9 + $0x54] ss:$8 sps:$4 sm:$0xff] (!%p368_p8)   ;;  %v1068_v52 = vld [vmem:[%s1292_s9 + $0x50] ss:$8 sps:$4 sm:$0xff] (!%p368_p8)  }
  0x2c   : > { %v1069_v53 = vld [vmem:[%s1292_s9 + $0x64] ss:$8 sps:$4 sm:$0xff] (!%p368_p8)   ;;  %v1071_v54 = vld [vmem:[%s1292_s9 + $0x60] ss:$8 sps:$4 sm:$0xff] (!%p368_p8)   ;;  %v1072_v55 = vld [vmem:[%s1292_s9 + $0x74] ss:$8 sps:$4 sm:$0xff] (!%p368_p8)   ;;  %v1335_v15 = vsub.s32 (!%p368_p8), %v704_v13, %v1290_v36 }
  0x2d   : > { %v495_v45 = vrot.slane %v481_v39, %v1301_v43  ;;  %v1074_v56 = vld [vmem:[%s1292_s9 + $0x70] ss:$8 sps:$4 sm:$0xff]   ;;  %v1075_v57 = vld [vmem:[%s1292_s9 + $0x84] ss:$8 sps:$4 sm:$0xff]   ;;  %v1077_v58 = vld [vmem:[%s1292_s9 + $0x80] ss:$8 sps:$4 sm:$0xff]   ;;  %v488_v9 = vrot.slane %v1288_v32, %v1301_v43 }
  0x2e   : > { %661 = vmatpush1.bf16.msra.mxu0 %v1056_v42  ;;  %v1078_v59 = vld [vmem:[%s1292_s9 + $0x94] ss:$8 sps:$4 sm:$0xff]   ;;  %v1080_v60 = vld [vmem:[%s1292_s9 + $0x90] ss:$8 sps:$4 sm:$0xff]   ;;  %v1081_v61 = vld [vmem:[%s1292_s9 + $0xa4] ss:$8 sps:$4 sm:$0xff]  }
  0x2f   : > { %690 = vmatprep.mubr.bf16.mxu0 %v495_v45  ;;  %662 = vmatprep.subr.bf16.mxu0 %v1057_v44  ;;  %v1083_v62 = vld [vmem:[%s1292_s9 + $0xa0] ss:$8 sps:$4 sm:$0xff]   ;;  %v1084_v63 = vld [vmem:[%s1292_s9 + $0xb4] ss:$8 sps:$4 sm:$0xff]   ;;  %v1086_v0 = vld [vmem:[%s1292_s9 + $0xb0] ss:$8 sps:$4 sm:$0xff]  }
  0x30   : > { %v1087_v1 = vld [vmem:[%s1292_s9 + $0xc4] ss:$8 sps:$4 sm:$0xff]   ;;  %v1089_v2 = vld [vmem:[%s1292_s9 + $0xc0] ss:$8 sps:$4 sm:$0xff]   ;;  %v1090_v3 = vld [vmem:[%s1292_s9 + $0xd4] ss:$8 sps:$4 sm:$0xff]  }
  0x31   : > { %v1092_v4 = vld [vmem:[%s1292_s9 + $0xd0] ss:$8 sps:$4 sm:$0xff]   ;;  %v1093_v5 = vld [vmem:[%s1292_s9 + $0xe4] ss:$8 sps:$4 sm:$0xff]   ;;  %v1095_v6 = vld [vmem:[%s1292_s9 + $0xe0] ss:$8 sps:$4 sm:$0xff]  }
  0x32   : > { %663 = vmatpush1.bf16.msra.mxu0 %v1059_v46  ;;  %v1096_v7 = vld [vmem:[%s1292_s9 + $0xf4] ss:$8 sps:$4 sm:$0xff]   ;;  %v1098_v8 = vld [vmem:[%s1292_s9 + $0xf0] ss:$8 sps:$4 sm:$0xff]   ;;  %p419_p9 = scmp.lt.s32.totalorder %s968_s10, 3  ;;  %v817_v11 = vsub.s32 0, %v1290_v36 }
  0x33   : > { %664 = vmatprep.subr.bf16.mxu0 %v1060_v47  ;;  %v439_v19 = vld [vmem:[#allocation2] sm:$0xf]  ;;  %v821_v12 = vsub.s32 1, %v1290_v36 }
  0x34   : > { %s1390_s10 = smov (!%p419_p9, %s968_s10), 3 }
  0x35   : > { %s426_s13 = scalar_lea.vmem %s1381_s3, %s1390_s10  ;;  %s421_s21 = scalar_lea.vmem %s1380_s2, %s1390_s10 }
  0x36   : > { %665 = vmatpush1.bf16.msra.mxu0 %v1062_v48  ;;  %v833_v10 = vld [vmem:[%s426_s13] sm:$0x3]  ;;  %s971_s17 = sshll.u32 %s1390_s10, 1 }
  0x37   : > { %666 = vmatprep.subr.bf16.mxu0 %v1063_v49  ;;  %s432_s25 = scalar_lea.vmem %s1382_s4, %s971_s17 }
  0x3a   : > { %667 = vmatpush1.bf16.msra.mxu0 %v1065_v50 }
  0x3b   : > { %668 = vmatprep.subr.bf16.mxu0 %v1066_v51 }
  0x3e   : > { %669 = vmatpush1.bf16.msra.mxu0 %v1068_v52 }
  0x3f   : > { %670 = vmatprep.subr.bf16.mxu0 %v1069_v53 }
  0x42   : > { %671 = vmatpush1.bf16.msra.mxu0 %v1071_v54 }
  0x43   : > { %672 = vmatprep.subr.bf16.mxu0 %v1072_v55 }
  0x46   : > { %673 = vmatpush1.bf16.msra.mxu0 %v1074_v56 }
  0x47   : > { %674 = vmatprep.subr.bf16.mxu0 %v1075_v57 }
  0x4a   : > { %675 = vmatpush1.bf16.msra.mxu0 %v1077_v58 }
  0x4b   : > { %676 = vmatprep.subr.bf16.mxu0 %v1078_v59 }
  0x4e   : > { %677 = vmatpush1.bf16.msra.mxu0 %v1080_v60 }
  0x4f   : > { %678 = vmatprep.subr.bf16.mxu0 %v1081_v61 }
  0x52   : > { %679 = vmatpush1.bf16.msra.mxu0 %v1083_v62 }
  0x53   : > { %680 = vmatprep.subr.bf16.mxu0 %v1084_v63 }
  0x56   : > { %681 = vmatpush1.bf16.msra.mxu0 %v1086_v0 }
  0x57   : > { %682 = vmatprep.subr.bf16.mxu0 %v1087_v1 }
  0x5a   : > { %683 = vmatpush1.bf16.msra.mxu0 %v1089_v2 }
  0x5b   : > { %684 = vmatprep.subr.bf16.mxu0 %v1090_v3 }
  0x5e   : > { %685 = vmatpush1.bf16.msra.mxu0 %v1092_v4 }
  0x5f   : > { %686 = vmatprep.subr.bf16.mxu0 %v1093_v5 }
  0x62   : > { %687 = vmatpush1.bf16.msra.mxu0 %v1095_v6 }
  0x63   : > { %688 = vmatprep.subr.bf16.mxu0 %v1096_v7 }
  0x66   : > { %689 = vmatpush1.bf16.msra.mxu0 %v1098_v8 }
  0x69   : > { %691 = vmatmul.mubr.bf16.vlgmr.msra.gmra.mrb[0].mxu0 %v488_v9 }
 0x13c   : > { %v692_v14 = vpop.f32.mrb[0].mxu0 }
 0x13d   : > { %v694_v16 = vpop.f32.mrb[1].mxu0 }
 0x13e   : > { %v701_v17 = vcombine.low %v692_v14, %v694_v16  ;;  %v696_v18 = vpop.f32.mrb[2].mxu0  ;;  %v790_v14 = vld [vmem:[%s421_s21] sm:$0x3]  ;;  %v838_v16 = vrot.slane %v833_v10, %v817_v11 }
 0x13f   : > { %v697_v20 = vpop.f32.mrb[3].mxu0 }
 0x140   : > { %v708_v21 = vrot.slane %v701_v17, %v1335_v15  ;;  %v842_v17 = vrot.slane %v833_v10, %v821_v12 }
 0x142   : > { %v710_v22 = vadd.f32 %v708_v21, %v439_v19  ;;  %v843_v21 = vcombine.low %v838_v16, %v842_v17 }
 0x144   : > { %711 = vst [vmem:[#allocation2] sm:$0xf] %v710_v22 }
 0x14b   : > { %v1338_v23 = vld [vmem:[#allocation2] sm:$0xf] }
 0x14c   : > { %v723_v24 = vrot.slane %v1338_v23, %v1335_v15  ;;  %v744_v25 = vmul.f32 %v1338_v23, %v1338_v23 }
 0x14e   : > { %v724_v26 = vcombine.high %v723_v24, %v723_v24  ;;  %v728_v27 = vsel %vm727_vm0, %v723_v24, 0.0  ;;  %v752_v28 = vrot.slane %v744_v25, %v1335_v15 }
 0x14f   : > { %v729_v29 = vrot.slane %v728_v27, 4 }
 0x150   : > { %v735_v30 = vsel %vm727_vm0, %v724_v26, 0.0  ;;  %v753_v31 = vcombine.high %v752_v28, %v752_v28  ;;  %v756_v32 = vsel %vm727_vm0, %v752_v28, 0.0  ;;  %v850_v28 = vrot.slane %v843_v21, %v1335_v15 }
 0x151   : > { %v730_v33 = vadd.f32 %v729_v29, %v728_v27  ;;  %v736_v34 = vrot.slane %v735_v30, 4  ;;  %v757_v35 = vrot.slane %v756_v32, 4 }
 0x152   : > { %v763_v37 = vsel %vm727_vm0, %v753_v31, 0.0 }
 0x153   : > { %v731_v38 = vrot.slane %v730_v33, 2  ;;  %v737_v39 = vadd.f32 %v736_v34, %v735_v30  ;;  %v758_v40 = vadd.f32 %v757_v35, %v756_v32  ;;  %v764_v41 = vrot.slane %v763_v37, 4 }
 0x155   : > { %v732_v42 = vadd.f32 %v731_v38, %v730_v33  ;;  %v738_v44 = vrot.slane %v737_v39, 2  ;;  %v759_v45 = vrot.slane %v758_v40, 2  ;;  %v765_v46 = vadd.f32 %v764_v41, %v763_v37 }
 0x157   : > { %v733_v47 = vrot.slane %v732_v42, 1  ;;  %v739_v48 = vadd.f32 %v738_v44, %v737_v39  ;;  %v760_v49 = vadd.f32 %v759_v45, %v758_v40  ;;  %v766_v50 = vrot.slane %v765_v46, 2 }
 0x159   : > { %v734_v51 = vadd.f32 %v733_v47, %v732_v42  ;;  %v740_v52 = vrot.slane %v739_v48, 1  ;;  %v761_v53 = vrot.slane %v760_v49, 1  ;;  %v767_v54 = vadd.f32 %v766_v50, %v765_v46 }
 0x15b   : > { %v741_v55 = vadd.f32 %v740_v52, %v739_v48  ;;  %v742_v56 = vmul.f32 0.5, %v734_v51  ;;  %v762_v57 = vadd.f32 %v761_v53, %v760_v49  ;;  %v768_v58 = vrot.slane %v767_v54, 1 }
 0x15d   : > { %v743_v59 = vmul.f32 0.5, %v741_v55  ;;  %v769_v60 = vadd.f32 %v768_v58, %v767_v54  ;;  %v770_v61 = vmul.f32 0.5, %v762_v57  ;;  %v772_v62 = vmul.f32 %v742_v56, %v742_v56 }
 0x15f   : > { %v771_v63 = vmul.f32 0.5, %v769_v60  ;;  %v773_v0 = vmul.f32 %v743_v59, %v743_v59  ;;  %v774_v1 = vsub.f32 %v770_v61, %v772_v62  ;;  %v780_v18 = vcombine.low %v742_v56, %v743_v59 }
 0x161   : > { %v775_v2 = vsub.f32 %v771_v63, %v773_v0  ;;  %v776_v3 = vmax.f32 %v774_v1, 0.0  ;;  %v787_v22 = vrot.slane %v780_v18, %v1335_v15 }
 0x163   : > { %v777_v4 = vmax.f32 %v775_v2, 0.0  ;;  %v791_v5 = vadd.f32 1e-05, %v776_v3  ;;  %v789_v27 = vsub.f32 %v1338_v23, %v787_v22 }
 0x165   : > { %v792_v6 = vadd.f32 1e-05, %v777_v4  ;;  %1099 = vrsqrt.f32 %v791_v5 }
 0x167   : > { %1101 = vrsqrt.f32 %v792_v6 }
 0x16f   : > { %v1100_v7 = vpop.eup %1099 }
 0x171   : > { %v1102_v8 = vpop.eup %1101 }
 0x172   : > { %v797_v9 = vcombine.low %v1100_v7, %v1102_v8 }
 0x174   : > { %v804_v13 = vrot.slane %v797_v9, %v1301_v43 }
 0x176   : > { %v811_v19 = vrot.slane %v804_v13, %v1301_v43 }
 0x178   : > { %v813_v20 = vmul.f32 %v811_v19, %v790_v14 }
 0x17a   : > { %v818_v24 = vrot.slane %v813_v20, %v817_v11  ;;  %v822_v25 = vrot.slane %v813_v20, %v821_v12 }
 0x17c   : > { %v823_v26 = vcombine.low %v818_v24, %v822_v25 }
 0x17e   : > { %v830_v36 = vrot.slane %v823_v26, %v1335_v15 }
 0x180   : > { %v832_v29 = vmul.f32 %v830_v36, %v789_v27 }
 0x182   : > { %v852_v43 = vadd.f32 %v850_v28, %v832_v29 }
 0x184   : > { %853 = vst [vmem:[%s432_s25] sm:$0xf] %v852_v43 }
 0x185 PF: > { %s14_s19 = sadd.s32 1, %s1141_s19   ;;  %s1383_s15 = smov %s1129_s16 }
 0x186   : > { %p11_p10 = scmp.ge.s32.totalorder %s14_s19, 4   ;;  %s1384_s16 = smov %s1206_s23 }
 0x187   : > { %s1385_s17 = smov %s1137_s18  ;;  %s1386_s18 = smov %s1388_s20 }
 0x188   :  { %13 = sbr.rel (!%p11_p10) target bundleno = 3 (0x3), region = 126 }

// kernel: _lambda_.39
= control target key start
LH: loop header
LB: loop body
LE: loop exit
PB: predicated region body
PF: predicated region fallthrough
CT: control target
= control target key end

     0   :  { %s1656_s15 = smov 0   ;;  %s1658_s16 = smov 0   ;;  %s2006_s0 = inlined_call_operand.vmem [shape: bf16[2,4608], index: 0, kind: input, shape index: {}]   ;;  %s2007_s1 = inlined_call_operand.vmem [shape: bf16[4608,512], index: 1, kind: input, shape index: {}]   ;;  %s2008_s2 = inlined_call_operand.vmem [shape: f32[1,512], index: 2, kind: input, shape index: {}]   ;;  %s2009_s3 = inlined_call_operand.vmem [shape: f32[1,512], index: 3, kind: input, shape index: {}]   ;;  %s2010_s4 = inlined_call_operand.vmem [shape: f32[2,512], index: 4, kind: output, shape index: {}]  }
   0x1   :  { %s1660_s17 = smov 0   ;;  %s1662_s18 = smov 0  }
   0x2   :  { %s1664_s19 = smov 0   ;;  %s1666_s20 = smov 0  }
   0x3   :  { %s1668_s21 = smov 0  }
   0x4 LB: > { %s23_s22 = sadd.s32 1, %s1618_s19  ;;  %s26_s23 = sadd.s32 1, %s1622_s20  ;;  %s1626_s21 = sphi %s1668_s21, %s14_s21   ;;  %s1622_s20 = sphi %s1666_s20, %s2016_s20   ;;  %s1618_s19 = sphi %s1664_s19, %s2015_s19   ;;  %s1614_s18 = sphi %s1662_s18, %s2014_s18   ;;  %s1610_s17 = sphi %s1660_s17, %s2013_s17   ;;  %s1606_s16 = sphi %s1658_s16, %s2012_s16   ;;  %s1602_s15 = sphi %s1656_s15, %s2011_s15  }
   0x5   : > { %p24_p0 = scmp.ge.s32.totalorder %s23_s22, 9  ;;  %p68_p1 = scmp.ne.s32.totalorder %s1606_s16, %s1602_s15 }
   0x6   : > { %p69_p2 = scmp.eq.s32.totalorder %s1626_s21, 0  ;;  %s61_s27 = sadd.s32 1, %s1606_s16 }
   0x7   : > { %s2018_s22 = smov (%p24_p0, %s23_s22), 0  ;;  %s2020_s23 = smov (!%p24_p0, %s26_s23), %s1622_s20 }
   0x8   : > { %p70_p3 = por %p69_p2, %p68_p1  ;;  %p28_p4 = scmp.ge.s32.totalorder %s2020_s23, 2 }
   0x9   : > { %s56_s24 = ssub.s32 %s1618_s19, %s2018_s22  ;;  %p1328_p6 = scmp.ge.s32.totalorder %s1626_s21, 18 }
   0xa   : > { %s2022_s23 = smov (%p28_p4, %s2020_s23), 0 }
   0xb   : > { %s57_s25 = ssub.s32 %s1622_s20, %s2022_s23  ;;  %172 = sbr.rel (%p1328_p6) target bundleno = 57 (0x39), region = 16 }
   0xc   : > { %s58_s26 = sor.u32 %s57_s25, %s56_s24 }
   0xd   : > { %p59_p5 = scmp.eq.s32.totalorder %s58_s26, 0 }
   0xf   : > { %s1707_s28 = scalar_select %p59_p5, %s1606_s16, %s61_s27  }
  0x12   : > { %183 = sbr.rel (!%p70_p3) target bundleno = 57 (0x39), region = 24  ;;  %s185_s29 = sand.u32 (%p70_p3), 1, %s1606_s16  }
  0x13   : > { %s1331_s30 = sshll.u32 (%p70_p3), %s1622_s20, 1  ;;  %s1329_s5 = sshll.u32 (%p70_p3), %s185_s29, 9 }
  0x14   : > { %s1410_s6 = sshll.u32 (%p70_p3), %s1618_s19, 8  ;;  %s1721_s12 = scalar_lea.vmem (%p70_p3), [#allocation3], %s1329_s5 }
  0x15   : > { %s191_s7 = sadd.s32 (%p70_p3), %s1410_s6, %s1331_s30 }
  0x16   : > { %s1333_s8 = sshll.u32 (%p70_p3), %s191_s7, 2 }
  0x17   : > { %s1716_s11 = scalar_lea.vmem (%p70_p3), %s2007_s1, %s1333_s8 }
  0x18   : > { %v347_v0 = vld [vmem:[%s1716_s11] sm:$0xff] (%p70_p3)  ;;  %v349_v1 = vld [vmem:[%s1716_s11 + $0x10] sm:$0xff] (%p70_p3) }
  0x19   : > { %v351_v2 = vld [vmem:[%s1716_s11 + $0x20] sm:$0xff]  ;;  %348 = vst [vmem:[%s1721_s12] sm:$0xff] %v347_v0  ;;  %350 = vst [vmem:[%s1721_s12 + $0x8] sm:$0xff] %v349_v1  ;;  %v353_v3 = vld [vmem:[%s1716_s11 + $0x30] sm:$0xff] }
  0x1a   : > { %352 = vst [vmem:[%s1721_s12 + $0x10] sm:$0xff] %v351_v2  ;;  %v355_v4 = vld [vmem:[%s1716_s11 + $0x40] sm:$0xff]  ;;  %v357_v5 = vld [vmem:[%s1716_s11 + $0x50] sm:$0xff]  ;;  %354 = vst [vmem:[%s1721_s12 + $0x18] sm:$0xff] %v353_v3 }
  0x1b   : > { %356 = vst [vmem:[%s1721_s12 + $0x20] sm:$0xff] %v355_v4  ;;  %358 = vst [vmem:[%s1721_s12 + $0x28] sm:$0xff] %v357_v5  ;;  %v359_v6 = vld [vmem:[%s1716_s11 + $0x60] sm:$0xff]  ;;  %v361_v7 = vld [vmem:[%s1716_s11 + $0x70] sm:$0xff] }
  0x1c   : > { %v363_v8 = vld [vmem:[%s1716_s11 + $0x80] sm:$0xff]  ;;  %360 = vst [vmem:[%s1721_s12 + $0x30] sm:$0xff] %v359_v6  ;;  %362 = vst [vmem:[%s1721_s12 + $0x38] sm:$0xff] %v361_v7  ;;  %v365_v9 = vld [vmem:[%s1716_s11 + $0x90] sm:$0xff] }
  0x1d   : > { %364 = vst [vmem:[%s1721_s12 + $0x40] sm:$0xff] %v363_v8  ;;  %v367_v10 = vld [vmem:[%s1716_s11 + $0xa0] sm:$0xff]  ;;  %v369_v11 = vld [vmem:[%s1716_s11 + $0xb0] sm:$0xff]  ;;  %366 = vst [vmem:[%s1721_s12 + $0x48] sm:$0xff] %v365_v9 }
  0x1e   : > { %368 = vst [vmem:[%s1721_s12 + $0x50] sm:$0xff] %v367_v10  ;;  %370 = vst [vmem:[%s1721_s12 + $0x58] sm:$0xff] %v369_v11  ;;  %v371_v12 = vld [vmem:[%s1716_s11 + $0xc0] sm:$0xff]  ;;  %v373_v13 = vld [vmem:[%s1716_s11 + $0xd0] sm:$0xff] }
  0x1f   : > { %v375_v14 = vld [vmem:[%s1716_s11 + $0xe0] sm:$0xff]  ;;  %372 = vst [vmem:[%s1721_s12 + $0x60] sm:$0xff] %v371_v12  ;;  %374 = vst [vmem:[%s1721_s12 + $0x68] sm:$0xff] %v373_v13  ;;  %v377_v15 = vld [vmem:[%s1716_s11 + $0xf0] sm:$0xff] }
  0x20   : > { %376 = vst [vmem:[%s1721_s12 + $0x70] sm:$0xff] %v375_v14  ;;  %v379_v16 = vld [vmem:[%s1716_s11 + $0x100] sm:$0xff]  ;;  %v381_v17 = vld [vmem:[%s1716_s11 + $0x110] sm:$0xff]  ;;  %378 = vst [vmem:[%s1721_s12 + $0x78] sm:$0xff] %v377_v15 }
  0x21   : > { %380 = vst [vmem:[%s1721_s12 + $0x80] sm:$0xff] %v379_v16  ;;  %382 = vst [vmem:[%s1721_s12 + $0x88] sm:$0xff] %v381_v17  ;;  %v383_v18 = vld [vmem:[%s1716_s11 + $0x120] sm:$0xff]  ;;  %v385_v19 = vld [vmem:[%s1716_s11 + $0x130] sm:$0xff] }
  0x22   : > { %v387_v20 = vld [vmem:[%s1716_s11 + $0x140] sm:$0xff]  ;;  %384 = vst [vmem:[%s1721_s12 + $0x90] sm:$0xff] %v383_v18  ;;  %386 = vst [vmem:[%s1721_s12 + $0x98] sm:$0xff] %v385_v19  ;;  %v389_v21 = vld [vmem:[%s1716_s11 + $0x150] sm:$0xff] }
  0x23   : > { %388 = vst [vmem:[%s1721_s12 + $0xa0] sm:$0xff] %v387_v20  ;;  %v391_v22 = vld [vmem:[%s1716_s11 + $0x160] sm:$0xff]  ;;  %v393_v23 = vld [vmem:[%s1716_s11 + $0x170] sm:$0xff]  ;;  %390 = vst [vmem:[%s1721_s12 + $0xa8] sm:$0xff] %v389_v21 }
  0x24   : > { %392 = vst [vmem:[%s1721_s12 + $0xb0] sm:$0xff] %v391_v22  ;;  %394 = vst [vmem:[%s1721_s12 + $0xb8] sm:$0xff] %v393_v23  ;;  %v395_v24 = vld [vmem:[%s1716_s11 + $0x180] sm:$0xff]  ;;  %v397_v25 = vld [vmem:[%s1716_s11 + $0x190] sm:$0xff] }
  0x25   : > { %v399_v26 = vld [vmem:[%s1716_s11 + $0x1a0] sm:$0xff]  ;;  %396 = vst [vmem:[%s1721_s12 + $0xc0] sm:$0xff] %v395_v24  ;;  %398 = vst [vmem:[%s1721_s12 + $0xc8] sm:$0xff] %v397_v25  ;;  %v401_v27 = vld [vmem:[%s1716_s11 + $0x1b0] sm:$0xff] }
  0x26   : > { %400 = vst [vmem:[%s1721_s12 + $0xd0] sm:$0xff] %v399_v26  ;;  %v403_v28 = vld [vmem:[%s1716_s11 + $0x1c0] sm:$0xff]  ;;  %v405_v29 = vld [vmem:[%s1716_s11 + $0x1d0] sm:$0xff]  ;;  %402 = vst [vmem:[%s1721_s12 + $0xd8] sm:$0xff] %v401_v27 }
  0x27   : > { %404 = vst [vmem:[%s1721_s12 + $0xe0] sm:$0xff] %v403_v28  ;;  %406 = vst [vmem:[%s1721_s12 + $0xe8] sm:$0xff] %v405_v29  ;;  %v407_v30 = vld [vmem:[%s1716_s11 + $0x1e0] sm:$0xff]  ;;  %v409_v31 = vld [vmem:[%s1716_s11 + $0x1f0] sm:$0xff] }
  0x28   : > { %v411_v32 = vld [vmem:[%s1716_s11 + $0x200] sm:$0xff]  ;;  %408 = vst [vmem:[%s1721_s12 + $0xf0] sm:$0xff] %v407_v30  ;;  %410 = vst [vmem:[%s1721_s12 + $0xf8] sm:$0xff] %v409_v31  ;;  %v413_v33 = vld [vmem:[%s1716_s11 + $0x210] sm:$0xff] }
  0x29   : > { %412 = vst [vmem:[%s1721_s12 + $0x100] sm:$0xff] %v411_v32  ;;  %v415_v34 = vld [vmem:[%s1716_s11 + $0x220] sm:$0xff]  ;;  %v417_v35 = vld [vmem:[%s1716_s11 + $0x230] sm:$0xff]  ;;  %414 = vst [vmem:[%s1721_s12 + $0x108] sm:$0xff] %v413_v33 }
  0x2a   : > { %416 = vst [vmem:[%s1721_s12 + $0x110] sm:$0xff] %v415_v34  ;;  %418 = vst [vmem:[%s1721_s12 + $0x118] sm:$0xff] %v417_v35  ;;  %v419_v36 = vld [vmem:[%s1716_s11 + $0x240] sm:$0xff]  ;;  %v421_v37 = vld [vmem:[%s1716_s11 + $0x250] sm:$0xff] }
  0x2b   : > { %v423_v38 = vld [vmem:[%s1716_s11 + $0x260] sm:$0xff]  ;;  %420 = vst [vmem:[%s1721_s12 + $0x120] sm:$0xff] %v419_v36  ;;  %422 = vst [vmem:[%s1721_s12 + $0x128] sm:$0xff] %v421_v37  ;;  %v425_v39 = vld [vmem:[%s1716_s11 + $0x270] sm:$0xff] }
  0x2c   : > { %424 = vst [vmem:[%s1721_s12 + $0x130] sm:$0xff] %v423_v38  ;;  %v427_v40 = vld [vmem:[%s1716_s11 + $0x280] sm:$0xff]  ;;  %v429_v41 = vld [vmem:[%s1716_s11 + $0x290] sm:$0xff]  ;;  %426 = vst [vmem:[%s1721_s12 + $0x138] sm:$0xff] %v425_v39 }
  0x2d   : > { %428 = vst [vmem:[%s1721_s12 + $0x140] sm:$0xff] %v427_v40  ;;  %430 = vst [vmem:[%s1721_s12 + $0x148] sm:$0xff] %v429_v41  ;;  %v431_v42 = vld [vmem:[%s1716_s11 + $0x2a0] sm:$0xff]  ;;  %v433_v43 = vld [vmem:[%s1716_s11 + $0x2b0] sm:$0xff] }
  0x2e   : > { %v435_v44 = vld [vmem:[%s1716_s11 + $0x2c0] sm:$0xff]  ;;  %432 = vst [vmem:[%s1721_s12 + $0x150] sm:$0xff] %v431_v42  ;;  %434 = vst [vmem:[%s1721_s12 + $0x158] sm:$0xff] %v433_v43  ;;  %v437_v45 = vld [vmem:[%s1716_s11 + $0x2d0] sm:$0xff] }
  0x2f   : > { %436 = vst [vmem:[%s1721_s12 + $0x160] sm:$0xff] %v435_v44  ;;  %v439_v46 = vld [vmem:[%s1716_s11 + $0x2e0] sm:$0xff]  ;;  %v441_v47 = vld [vmem:[%s1716_s11 + $0x2f0] sm:$0xff]  ;;  %438 = vst [vmem:[%s1721_s12 + $0x168] sm:$0xff] %v437_v45 }
  0x30   : > { %440 = vst [vmem:[%s1721_s12 + $0x170] sm:$0xff] %v439_v46  ;;  %442 = vst [vmem:[%s1721_s12 + $0x178] sm:$0xff] %v441_v47  ;;  %v443_v48 = vld [vmem:[%s1716_s11 + $0x300] sm:$0xff]  ;;  %v445_v49 = vld [vmem:[%s1716_s11 + $0x310] sm:$0xff] }
  0x31   : > { %v447_v50 = vld [vmem:[%s1716_s11 + $0x320] sm:$0xff]  ;;  %444 = vst [vmem:[%s1721_s12 + $0x180] sm:$0xff] %v443_v48  ;;  %446 = vst [vmem:[%s1721_s12 + $0x188] sm:$0xff] %v445_v49  ;;  %v449_v51 = vld [vmem:[%s1716_s11 + $0x330] sm:$0xff] }
  0x32   : > { %448 = vst [vmem:[%s1721_s12 + $0x190] sm:$0xff] %v447_v50  ;;  %v451_v52 = vld [vmem:[%s1716_s11 + $0x340] sm:$0xff]  ;;  %v453_v53 = vld [vmem:[%s1716_s11 + $0x350] sm:$0xff]  ;;  %450 = vst [vmem:[%s1721_s12 + $0x198] sm:$0xff] %v449_v51 }
  0x33   : > { %452 = vst [vmem:[%s1721_s12 + $0x1a0] sm:$0xff] %v451_v52  ;;  %454 = vst [vmem:[%s1721_s12 + $0x1a8] sm:$0xff] %v453_v53  ;;  %v455_v54 = vld [vmem:[%s1716_s11 + $0x360] sm:$0xff]  ;;  %v457_v55 = vld [vmem:[%s1716_s11 + $0x370] sm:$0xff] }
  0x34   : > { %v459_v56 = vld [vmem:[%s1716_s11 + $0x380] sm:$0xff]  ;;  %456 = vst [vmem:[%s1721_s12 + $0x1b0] sm:$0xff] %v455_v54  ;;  %458 = vst [vmem:[%s1721_s12 + $0x1b8] sm:$0xff] %v457_v55  ;;  %v461_v57 = vld [vmem:[%s1716_s11 + $0x390] sm:$0xff] }
  0x35   : > { %460 = vst [vmem:[%s1721_s12 + $0x1c0] sm:$0xff] %v459_v56  ;;  %v463_v58 = vld [vmem:[%s1716_s11 + $0x3a0] sm:$0xff]  ;;  %v465_v59 = vld [vmem:[%s1716_s11 + $0x3b0] sm:$0xff]  ;;  %462 = vst [vmem:[%s1721_s12 + $0x1c8] sm:$0xff] %v461_v57 }
  0x36   : > { %464 = vst [vmem:[%s1721_s12 + $0x1d0] sm:$0xff] %v463_v58  ;;  %466 = vst [vmem:[%s1721_s12 + $0x1d8] sm:$0xff] %v465_v59  ;;  %v467_v60 = vld [vmem:[%s1716_s11 + $0x3c0] sm:$0xff]  ;;  %v469_v61 = vld [vmem:[%s1716_s11 + $0x3d0] sm:$0xff] }
  0x37   : > { %v471_v62 = vld [vmem:[%s1716_s11 + $0x3e0] sm:$0xff]  ;;  %468 = vst [vmem:[%s1721_s12 + $0x1e0] sm:$0xff] %v467_v60  ;;  %470 = vst [vmem:[%s1721_s12 + $0x1e8] sm:$0xff] %v469_v61  ;;  %v473_v63 = vld [vmem:[%s1716_s11 + $0x3f0] sm:$0xff] }
  0x38   : > { %472 = vst [vmem:[%s1721_s12 + $0x1f0] sm:$0xff] %v471_v62  ;;  %474 = vst [vmem:[%s1721_s12 + $0x1f8] sm:$0xff] %v473_v63 }
  0x39 PF: > { %p1334_p7 = scmp.ge.s32.totalorder %s1626_s21, 1  ;;  %p495_p8 = scmp.lt.s32.totalorder %s1626_s21, 19 }
  0x3b   : > { %p496_p9 = pnand %p1334_p7, %p495_p8 }
  0x3c   : > { %s502_s13 = sand.u32 (!%p496_p9), 1, %s1602_s15   ;;  %s1336_s14 = sshll.u32 (!%p496_p9), %s1610_s17, 2 }
  0x3d   : > { %499 = sbr.rel (%p496_p9) target bundleno = 432 (0x1b0), region = 70  ;;  %s1335_s24 = sshll.u32 (!%p496_p9), %s502_s13, 9 }
  0x3e   : > { %p540_p10 = scmp.lt.s32.totalorder (!%p496_p9), %s1336_s14, 35  ;;  %s1337_s25 = sshll.u32 (!%p496_p9), %s1614_s18, 1 }
  0x3f   : > { %p547_p11 = scmp.lt.s32.totalorder (!%p496_p9), %s1337_s25, 3  ;;  %s1875_s12 = scalar_lea.vmem (!%p496_p9), [#allocation3], %s1335_s24 }
  0x40   : > { %p1341_p12 = scmp.ne.s32.totalorder (!%p496_p9), %s1610_s17, 0 }
  0x44   : > { %s2024_s14 = smov (!%p540_p10, %s1336_s14), 35  ;;  %s2026_s25 = smov (!%p547_p11, %s1337_s25), 3 }
  0x45   : > { %s542_s29 = scalar_lea.vmem %s2006_s0, %s2024_s14  ;;  %s549_s15 = scalar_lea.vmem %s2008_s2, %s2026_s25  ;;  %v1628_v0 = vmov (!%p1341_p12), 0.0  }
  0x46   : > { %s554_s18 = scalar_lea.vmem %s2009_s3, %s2026_s25  ;;  %s1340_s8 = sshll.u32 %s2026_s25, 1  ;;  %566 = vst [vmem:[#allocation2] sm:$0xf] (!%p1341_p12), %v1628_v0 }
  0x47   : > { %s1873_s11 = scalar_lea.vmem %s2010_s4, %s1340_s8  ;;  %565 = sbr.rel (%p1341_p12) target bundleno = 78 (0x4e), region = 78 }
  0x4e PF: > { %v1472_v1 = vld [vmem:[%s1875_s12 + $0x4] ss:$8 sps:$4 sm:$0xff]   ;;  %v1476_v3 = vld [vmem:[%s1875_s12] ss:$8 sps:$4 sm:$0xff]   ;;  %v1478_v5 = vld [vmem:[%s1875_s12 + $0x14] ss:$8 sps:$4 sm:$0xff]   ;;  %v645_v41 = vlaneseq }
  0x4f   : > { %v1474_v2 = vld [vmem:[%s1875_s12 + $0x104] ss:$8 sps:$4 sm:$0xff]   ;;  %982 = vmatprep.subr.bf16.mxu1 %v1472_v1  ;;  %v1477_v4 = vld [vmem:[%s1875_s12 + $0x100] ss:$8 sps:$4 sm:$0xff]   ;;  %v1480_v6 = vld [vmem:[%s1875_s12 + $0x114] ss:$8 sps:$4 sm:$0xff]  }
  0x50   : > { %1023 = vmatprep.subr.bf16.mxu0 %v1474_v2  ;;  %983 = vmatpush1.bf16.msra.mxu1 %v1476_v3  ;;  %v1482_v7 = vld [vmem:[%s1875_s12 + $0x10] ss:$8 sps:$4 sm:$0xff]   ;;  %v1484_v9 = vld [vmem:[%s1875_s12 + $0x24] ss:$8 sps:$4 sm:$0xff]   ;;  %v1488_v11 = vld [vmem:[%s1875_s12 + $0x20] ss:$8 sps:$4 sm:$0xff]  }
  0x51   : > { %1024 = vmatpush1.bf16.msra.mxu0 %v1477_v4  ;;  %984 = vmatprep.subr.bf16.mxu1 %v1478_v5  ;;  %v1483_v8 = vld [vmem:[%s1875_s12 + $0x110] ss:$8 sps:$4 sm:$0xff]   ;;  %v1486_v10 = vld [vmem:[%s1875_s12 + $0x124] ss:$8 sps:$4 sm:$0xff]   ;;  %v1489_v12 = vld [vmem:[%s1875_s12 + $0x120] ss:$8 sps:$4 sm:$0xff]  }
  0x52   : > { %1025 = vmatprep.subr.bf16.mxu0 %v1480_v6  ;;  %v1490_v13 = vld [vmem:[%s1875_s12 + $0x34] ss:$8 sps:$4 sm:$0xff]   ;;  %v1494_v15 = vld [vmem:[%s1875_s12 + $0x30] ss:$8 sps:$4 sm:$0xff]   ;;  %v1496_v17 = vld [vmem:[%s1875_s12 + $0x44] ss:$8 sps:$4 sm:$0xff]  }
  0x53   : > { %v1492_v14 = vld [vmem:[%s1875_s12 + $0x134] ss:$8 sps:$4 sm:$0xff]   ;;  %v1495_v16 = vld [vmem:[%s1875_s12 + $0x130] ss:$8 sps:$4 sm:$0xff]   ;;  %v1498_v18 = vld [vmem:[%s1875_s12 + $0x144] ss:$8 sps:$4 sm:$0xff]  }
  0x54   : > { %985 = vmatpush1.bf16.msra.mxu1 %v1482_v7  ;;  %v1500_v19 = vld [vmem:[%s1875_s12 + $0x40] ss:$8 sps:$4 sm:$0xff]   ;;  %v1502_v21 = vld [vmem:[%s1875_s12 + $0x54] ss:$8 sps:$4 sm:$0xff]   ;;  %v1506_v23 = vld [vmem:[%s1875_s12 + $0x50] ss:$8 sps:$4 sm:$0xff]  }
  0x55   : > { %1026 = vmatpush1.bf16.msra.mxu0 %v1483_v8  ;;  %986 = vmatprep.subr.bf16.mxu1 %v1484_v9  ;;  %v1501_v20 = vld [vmem:[%s1875_s12 + $0x140] ss:$8 sps:$4 sm:$0xff]   ;;  %v1504_v22 = vld [vmem:[%s1875_s12 + $0x154] ss:$8 sps:$4 sm:$0xff]   ;;  %v1507_v24 = vld [vmem:[%s1875_s12 + $0x150] ss:$8 sps:$4 sm:$0xff]  }
  0x56   : > { %1027 = vmatprep.subr.bf16.mxu0 %v1486_v10  ;;  %v1508_v25 = vld [vmem:[%s1875_s12 + $0x64] ss:$8 sps:$4 sm:$0xff]   ;;  %v1512_v27 = vld [vmem:[%s1875_s12 + $0x60] ss:$8 sps:$4 sm:$0xff]   ;;  %v1514_v29 = vld [vmem:[%s1875_s12 + $0x74] ss:$8 sps:$4 sm:$0xff]  }
  0x57   : > { %v1510_v26 = vld [vmem:[%s1875_s12 + $0x164] ss:$8 sps:$4 sm:$0xff]   ;;  %v1513_v28 = vld [vmem:[%s1875_s12 + $0x160] ss:$8 sps:$4 sm:$0xff]   ;;  %v1516_v30 = vld [vmem:[%s1875_s12 + $0x174] ss:$8 sps:$4 sm:$0xff]  }
  0x58   : > { %987 = vmatpush1.bf16.msra.mxu1 %v1488_v11  ;;  %v1518_v31 = vld [vmem:[%s1875_s12 + $0x70] ss:$8 sps:$4 sm:$0xff]   ;;  %v1520_v33 = vld [vmem:[%s1875_s12 + $0x84] ss:$8 sps:$4 sm:$0xff]   ;;  %v1524_v35 = vld [vmem:[%s1875_s12 + $0x80] ss:$8 sps:$4 sm:$0xff]  }
  0x59   : > { %1028 = vmatpush1.bf16.msra.mxu0 %v1489_v12  ;;  %988 = vmatprep.subr.bf16.mxu1 %v1490_v13  ;;  %v1519_v32 = vld [vmem:[%s1875_s12 + $0x170] ss:$8 sps:$4 sm:$0xff]   ;;  %v1522_v34 = vld [vmem:[%s1875_s12 + $0x184] ss:$8 sps:$4 sm:$0xff]   ;;  %v1525_v36 = vld [vmem:[%s1875_s12 + $0x180] ss:$8 sps:$4 sm:$0xff]  }
  0x5a   : > { %1029 = vmatprep.subr.bf16.mxu0 %v1492_v14  ;;  %v1526_v37 = vld [vmem:[%s1875_s12 + $0x94] ss:$8 sps:$4 sm:$0xff]   ;;  %v1629_v39 = vmov 1966171168   ;;  %v1530_v42 = vld [vmem:[%s1875_s12 + $0x90] ss:$8 sps:$4 sm:$0xff]  }
  0x5b   : > { %v1528_v38 = vld [vmem:[%s1875_s12 + $0x194] ss:$8 sps:$4 sm:$0xff]   ;;  %v643_v40 = vunpack.c.l.s4 %v1629_v39  ;;  %v1531_v43 = vld [vmem:[%s1875_s12 + $0x190] ss:$8 sps:$4 sm:$0xff]   ;;  %v1532_v44 = vld [vmem:[%s1875_s12 + $0xa4] ss:$8 sps:$4 sm:$0xff]  }
  0x5c   : > { %989 = vmatpush1.bf16.msra.mxu1 %v1494_v15  ;;  %v1534_v45 = vld [vmem:[%s1875_s12 + $0x1a4] ss:$8 sps:$4 sm:$0xff]   ;;  %v1920_v47 = vshrl.u32 %v645_v41, 7  ;;  %v1536_v48 = vld [vmem:[%s1875_s12 + $0xa0] ss:$8 sps:$4 sm:$0xff]   ;;  %p1407_p13 = scmp.ne.s32.totalorder %s1610_s17, 8 }
  0x5d   : > { %1030 = vmatpush1.bf16.msra.mxu0 %v1495_v16  ;;  %990 = vmatprep.subr.bf16.mxu1 %v1496_v17  ;;  %v644_v46 = vunpack.c.0.s8 %v643_v40  ;;  %v1537_v49 = vld [vmem:[%s1875_s12 + $0x1a0] ss:$8 sps:$4 sm:$0xff]   ;;  %v1538_v50 = vld [vmem:[%s1875_s12 + $0xb4] ss:$8 sps:$4 sm:$0xff]   ;;  %v1542_v54 = vld [vmem:[%s1875_s12 + $0xb0] ss:$8 sps:$4 sm:$0xff]  }
  0x5e   : > { %1031 = vmatprep.subr.bf16.mxu0 %v1498_v18  ;;  %v1540_v51 = vld [vmem:[%s1875_s12 + $0x1b4] ss:$8 sps:$4 sm:$0xff]   ;;  %v1543_v55 = vld [vmem:[%s1875_s12 + $0x1b0] ss:$8 sps:$4 sm:$0xff]   ;;  %v1544_v57 = vld [vmem:[%s1875_s12 + $0xc4] ss:$8 sps:$4 sm:$0xff]  }
  0x5f   : > { %v1927_v52 = vsub.s32 %v644_v46, %v1920_v47  ;;  %v1342_v53 = vld.sshfl [vmem:[%s542_s29] sm:$0x33 pattern:$0x75316420]  ;;  %v1546_v58 = vld [vmem:[%s1875_s12 + $0x1c4] ss:$8 sps:$4 sm:$0xff]  }
  0x60   : > { %991 = vmatpush1.bf16.msra.mxu1 %v1500_v19  ;;  %v641_v56 = vcombine.high %v1342_v53, %v1342_v53  ;;  %v1548_v60 = vld [vmem:[%s1875_s12 + $0xc0] ss:$8 sps:$4 sm:$0xff]   ;;  %v1550_v63 = vld [vmem:[%s1875_s12 + $0xd4] ss:$8 sps:$4 sm:$0xff]   ;;  %v1554_v1 = vld [vmem:[%s1875_s12 + $0xd0] ss:$8 sps:$4 sm:$0xff]  }
  0x61   : > { %1032 = vmatpush1.bf16.msra.mxu0 %v1501_v20  ;;  %992 = vmatprep.subr.bf16.mxu1 %v1502_v21  ;;  %v1549_v61 = vld [vmem:[%s1875_s12 + $0x1c0] ss:$8 sps:$4 sm:$0xff]   ;;  %v1552_v0 = vld [vmem:[%s1875_s12 + $0x1d4] ss:$8 sps:$4 sm:$0xff]   ;;  %v1555_v2 = vld [vmem:[%s1875_s12 + $0x1d0] ss:$8 sps:$4 sm:$0xff]   ;;  %v648_v9 = vrot.slane %v1342_v53, %v1927_v52 }
  0x62   : > { %1033 = vmatprep.subr.bf16.mxu0 %v1504_v22  ;;  %v655_v59 = vrot.slane %v641_v56, %v1927_v52  ;;  %v1556_v3 = vld [vmem:[%s1875_s12 + $0xe4] ss:$8 sps:$4 sm:$0xff]   ;;  %v1560_v5 = vld [vmem:[%s1875_s12 + $0xe0] ss:$8 sps:$4 sm:$0xff]   ;;  %v1562_v7 = vld [vmem:[%s1875_s12 + $0xf4] ss:$8 sps:$4 sm:$0xff]  }
  0x63   : > { %v1558_v4 = vld [vmem:[%s1875_s12 + $0x1e4] ss:$8 sps:$4 sm:$0xff]   ;;  %v1561_v6 = vld [vmem:[%s1875_s12 + $0x1e0] ss:$8 sps:$4 sm:$0xff]   ;;  %v1564_v8 = vld [vmem:[%s1875_s12 + $0x1f4] ss:$8 sps:$4 sm:$0xff]   ;;  %v656_v12 = vcombine.high %v648_v9, %v648_v9 }
  0x64   : > { %993 = vmatpush1.bf16.msra.mxu1 %v1506_v23  ;;  %v657_v62 = vcombine.high %v655_v59, %v655_v59  ;;  %1014 = vmatprep.mubr.bf16.mxu1 %v655_v59  ;;  %v1566_v10 = vld [vmem:[%s1875_s12 + $0xf0] ss:$8 sps:$4 sm:$0xff]   ;;  %v1630_v13 = vmov 1983009808   ;;  %vm1093_vm0 = vcmask (!%p1407_p13), 1041408  }
  0x65   : > { %1034 = vmatpush1.bf16.msra.mxu0 %v1507_v24  ;;  %994 = vmatprep.subr.bf16.mxu1 %v1508_v25  ;;  %v1567_v11 = vld [vmem:[%s1875_s12 + $0x1f0] ss:$8 sps:$4 sm:$0xff]   ;;  %v1068_v14 = vunpack.c.l.s4 %v1630_v13 }
  0x66   : > { %1035 = vmatprep.subr.bf16.mxu0 %v1510_v26  ;;  %1055 = vmatprep.mubr.bf16.mxu0 %v657_v62 }
  0x67   : > { %v1069_v15 = vunpack.c.0.s8 %v1068_v14 }
  0x68   : > { %995 = vmatpush1.bf16.msra.mxu1 %v1512_v27 }
  0x69   : > { %1036 = vmatpush1.bf16.msra.mxu0 %v1513_v28  ;;  %996 = vmatprep.subr.bf16.mxu1 %v1514_v29  ;;  %v1955_v22 = vsub.s32 %v1069_v15, %v1920_v47  ;;  %v567_v28 = vld [vmem:[#allocation2] sm:$0xf] }
  0x6a   : > { %1037 = vmatprep.subr.bf16.mxu0 %v1516_v30 }
  0x6c   : > { %997 = vmatpush1.bf16.msra.mxu1 %v1518_v31 }
  0x6d   : > { %1038 = vmatpush1.bf16.msra.mxu0 %v1519_v32  ;;  %998 = vmatprep.subr.bf16.mxu1 %v1520_v33 }
  0x6e   : > { %1039 = vmatprep.subr.bf16.mxu0 %v1522_v34 }
  0x70   : > { %999 = vmatpush1.bf16.msra.mxu1 %v1524_v35 }
  0x71   : > { %1040 = vmatpush1.bf16.msra.mxu0 %v1525_v36  ;;  %1000 = vmatprep.subr.bf16.mxu1 %v1526_v37 }
  0x72   : > { %1041 = vmatprep.subr.bf16.mxu0 %v1528_v38 }
  0x74   : > { %1001 = vmatpush1.bf16.msra.mxu1 %v1530_v42 }
  0x75   : > { %1042 = vmatpush1.bf16.msra.mxu0 %v1531_v43  ;;  %1002 = vmatprep.subr.bf16.mxu1 %v1532_v44 }
  0x76   : > { %1043 = vmatprep.subr.bf16.mxu0 %v1534_v45 }
  0x78   : > { %1003 = vmatpush1.bf16.msra.mxu1 %v1536_v48 }
  0x79   : > { %1044 = vmatpush1.bf16.msra.mxu0 %v1537_v49  ;;  %1004 = vmatprep.subr.bf16.mxu1 %v1538_v50 }
  0x7a   : > { %1045 = vmatprep.subr.bf16.mxu0 %v1540_v51 }
  0x7c   : > { %1005 = vmatpush1.bf16.msra.mxu1 %v1542_v54 }
  0x7d   : > { %1046 = vmatpush1.bf16.msra.mxu0 %v1543_v55  ;;  %1006 = vmatprep.subr.bf16.mxu1 %v1544_v57 }
  0x7e   : > { %1047 = vmatprep.subr.bf16.mxu0 %v1546_v58 }
  0x80   : > { %1007 = vmatpush1.bf16.msra.mxu1 %v1548_v60 }
  0x81   : > { %1048 = vmatpush1.bf16.msra.mxu0 %v1549_v61  ;;  %1008 = vmatprep.subr.bf16.mxu1 %v1550_v63 }
  0x82   : > { %1049 = vmatprep.subr.bf16.mxu0 %v1552_v0 }
  0x84   : > { %1009 = vmatpush1.bf16.msra.mxu1 %v1554_v1 }
  0x85   : > { %1050 = vmatpush1.bf16.msra.mxu0 %v1555_v2  ;;  %1010 = vmatprep.subr.bf16.mxu1 %v1556_v3 }
  0x86   : > { %1051 = vmatprep.subr.bf16.mxu0 %v1558_v4 }
  0x88   : > { %1011 = vmatpush1.bf16.msra.mxu1 %v1560_v5 }
  0x89   : > { %1052 = vmatpush1.bf16.msra.mxu0 %v1561_v6  ;;  %1012 = vmatprep.subr.bf16.mxu1 %v1562_v7 }
  0x8a   : > { %1053 = vmatprep.subr.bf16.mxu0 %v1564_v8 }
  0x8c   : > { %1013 = vmatpush1.bf16.msra.mxu1 %v1566_v10 }
  0x8d   : > { %1054 = vmatpush1.bf16.msra.mxu0 %v1567_v11 }
  0x8f   : > { %1015 = vmatmul.mubr.bf16.vlgmr.msra.gmra.mrb[0].mxu1 %v648_v9 }
  0x90   : > { %1056 = vmatmul.mubr.bf16.vlgmr.msra.gmra.mrb[0].mxu0 %v656_v12 }
 0x162   : > { %v1016_v16 = vpop.f32.mrb[0].mxu1 }
 0x163   : > { %v1057_v17 = vpop.f32.mrb[0].mxu0  ;;  %v1018_v19 = vpop.f32.mrb[1].mxu1 }
 0x164   : > { %v1058_v18 = vadd.f32 %v1057_v17, %v1016_v16  ;;  %v1059_v20 = vpop.f32.mrb[1].mxu0  ;;  %v1020_v23 = vpop.f32.mrb[2].mxu1 }
 0x165   : > { %v1060_v21 = vadd.f32 %v1059_v20, %v1018_v19  ;;  %v1061_v24 = vpop.f32.mrb[2].mxu0  ;;  %v1021_v25 = vpop.f32.mrb[3].mxu1  ;;  %v1187_v23 = vsub.s32 (!%p1407_p13), 1, %v1920_v47 }
 0x166   : > { %v1062_v26 = vpop.f32.mrb[3].mxu0  ;;  %v1156_v24 = vld [vmem:[%s549_s15] sm:$0x3] (!%p1407_p13) }
 0x167   : > { %v1066_v27 = vcombine.low %v1058_v18, %v1060_v21  ;;  %1080 = sbr.rel (%p1407_p13) target bundleno = 432 (0x1b0), region = 82  ;;  %v1199_v18 = vld [vmem:[%s554_s18] sm:$0x3] (!%p1407_p13)  ;;  %v1183_v21 = vsub.s32 (!%p1407_p13), 0, %v1920_v47 }
 0x169   : > { %v1073_v29 = vrot.slane %v1066_v27, %v1955_v22  ;;  %v1204_v26 = vrot.slane (!%p1407_p13), %v1199_v18, %v1183_v21  ;;  %v1208_v27 = vrot.slane (!%p1407_p13), %v1199_v18, %v1187_v23 }
 0x16b   : > { %v1075_v30 = vadd.f32 %v1073_v29, %v567_v28 }
 0x16d   : > { %1076 = vst [vmem:[#allocation2] sm:$0xf] %v1075_v30 }
 0x174   : > { %v1959_v31 = vld [vmem:[#allocation2] sm:$0xf] }
 0x175   : > { %v1089_v32 = vrot.slane %v1959_v31, %v1955_v22  ;;  %v1110_v33 = vmul.f32 %v1959_v31, %v1959_v31 }
 0x177   : > { %v1090_v34 = vcombine.high %v1089_v32, %v1089_v32  ;;  %v1094_v35 = vsel %vm1093_vm0, %v1089_v32, 0.0  ;;  %v1118_v36 = vrot.slane %v1110_v33, %v1955_v22  ;;  %v1209_v33 = vcombine.low %v1204_v26, %v1208_v27 }
 0x178   : > { %v1095_v37 = vrot.slane %v1094_v35, 4 }
 0x179   : > { %v1101_v38 = vsel %vm1093_vm0, %v1090_v34, 0.0  ;;  %v1119_v39 = vcombine.high %v1118_v36, %v1118_v36  ;;  %v1122_v40 = vsel %vm1093_vm0, %v1118_v36, 0.0  ;;  %v1216_v36 = vrot.slane %v1209_v33, %v1955_v22 }
 0x17a   : > { %v1096_v41 = vadd.f32 %v1095_v37, %v1094_v35  ;;  %v1102_v42 = vrot.slane %v1101_v38, 4  ;;  %v1123_v43 = vrot.slane %v1122_v40, 4 }
 0x17b   : > { %v1129_v44 = vsel %vm1093_vm0, %v1119_v39, 0.0 }
 0x17c   : > { %v1097_v45 = vrot.slane %v1096_v41, 2  ;;  %v1103_v46 = vadd.f32 %v1102_v42, %v1101_v38  ;;  %v1124_v48 = vadd.f32 %v1123_v43, %v1122_v40  ;;  %v1130_v49 = vrot.slane %v1129_v44, 4 }
 0x17e   : > { %v1098_v50 = vadd.f32 %v1097_v45, %v1096_v41  ;;  %v1104_v51 = vrot.slane %v1103_v46, 2  ;;  %v1125_v53 = vrot.slane %v1124_v48, 2  ;;  %v1131_v54 = vadd.f32 %v1130_v49, %v1129_v44 }
 0x180   : > { %v1099_v55 = vrot.slane %v1098_v50, 1  ;;  %v1105_v56 = vadd.f32 %v1104_v51, %v1103_v46  ;;  %v1126_v57 = vadd.f32 %v1125_v53, %v1124_v48  ;;  %v1132_v58 = vrot.slane %v1131_v54, 2 }
 0x182   : > { %v1100_v59 = vadd.f32 %v1099_v55, %v1098_v50  ;;  %v1106_v60 = vrot.slane %v1105_v56, 1  ;;  %v1127_v61 = vrot.slane %v1126_v57, 1  ;;  %v1133_v62 = vadd.f32 %v1132_v58, %v1131_v54 }
 0x184   : > { %v1107_v63 = vadd.f32 %v1106_v60, %v1105_v56  ;;  %v1108_v0 = vmul.f32 0.5, %v1100_v59  ;;  %v1128_v1 = vadd.f32 %v1127_v61, %v1126_v57  ;;  %v1134_v2 = vrot.slane %v1133_v62, 1 }
 0x186   : > { %v1109_v3 = vmul.f32 0.5, %v1107_v63  ;;  %v1135_v4 = vadd.f32 %v1134_v2, %v1133_v62  ;;  %v1136_v5 = vmul.f32 0.5, %v1128_v1  ;;  %v1138_v6 = vmul.f32 %v1108_v0, %v1108_v0 }
 0x188   : > { %v1137_v7 = vmul.f32 0.5, %v1135_v4  ;;  %v1139_v8 = vmul.f32 %v1109_v3, %v1109_v3  ;;  %v1140_v9 = vsub.f32 %v1136_v5, %v1138_v6  ;;  %v1146_v19 = vcombine.low %v1108_v0, %v1109_v3 }
 0x18a   : > { %v1141_v10 = vsub.f32 %v1137_v7, %v1139_v8  ;;  %v1142_v11 = vmax.f32 %v1140_v9, 0.0  ;;  %v1153_v28 = vrot.slane %v1146_v19, %v1955_v22 }
 0x18c   : > { %v1143_v12 = vmax.f32 %v1141_v10, 0.0  ;;  %v1157_v13 = vadd.f32 1e-05, %v1142_v11  ;;  %v1155_v34 = vsub.f32 %v1959_v31, %v1153_v28 }
 0x18e   : > { %v1158_v14 = vadd.f32 1e-05, %v1143_v12  ;;  %1568 = vrsqrt.f32 %v1157_v13 }
 0x190   : > { %1570 = vrsqrt.f32 %v1158_v14 }
 0x198   : > { %v1569_v15 = vpop.eup %1568 }
 0x19a   : > { %v1571_v16 = vpop.eup %1570 }
 0x19b   : > { %v1163_v17 = vcombine.low %v1569_v15, %v1571_v16 }
 0x19d   : > { %v1170_v20 = vrot.slane %v1163_v17, %v1927_v52 }
 0x19f   : > { %v1177_v25 = vrot.slane %v1170_v20, %v1927_v52 }
 0x1a1   : > { %v1179_v29 = vmul.f32 %v1177_v25, %v1156_v24 }
 0x1a3   : > { %v1184_v30 = vrot.slane %v1179_v29, %v1183_v21  ;;  %v1188_v32 = vrot.slane %v1179_v29, %v1187_v23 }
 0x1a5   : > { %v1189_v35 = vcombine.low %v1184_v30, %v1188_v32 }
 0x1a7   : > { %v1196_v47 = vrot.slane %v1189_v35, %v1955_v22 }
 0x1a9   : > { %v1198_v37 = vmul.f32 %v1196_v47, %v1155_v34 }
 0x1ab   : > { %v1218_v38 = vadd.f32 %v1216_v36, %v1198_v37 }
 0x1ad   : > { %v1219_v39 = vmax.f32 %v1218_v38, 0.0 }
 0x1af   : > { %1220 = vst [vmem:[%s1873_s11] sm:$0xf] %v1219_v39 }
 0x1b0 PF: > { %s14_s21 = sadd.s32 1, %s1626_s21   ;;  %s2011_s15 = smov %s1606_s16 }
 0x1b1   : > { %p11_p0 = scmp.ge.s32.totalorder %s14_s21, 20   ;;  %s2012_s16 = smov %s1707_s28 }
 0x1b2   : > { %s2013_s17 = smov %s1618_s19  ;;  %s2014_s18 = smov %s1622_s20 }
 0x1b3   : > { %s2015_s19 = smov %s2018_s22  ;;  %s2016_s20 = smov %s2022_s23 }
 0x1b4   :  { %13 = sbr.rel (!%p11_p0) target bundleno = 4 (0x4), region = 126 }

// kernel: _lambda_.38
= control target key start
LH: loop header
LB: loop body
LE: loop exit
PB: predicated region body
PF: predicated region fallthrough
CT: control target
= control target key end

     0   :  { %s1726_s18 = smov 0   ;;  %s1728_s19 = smov 0   ;;  %s2082_s0 = inlined_call_operand.vmem [shape: bf16[2,4608], index: 0, kind: input, shape index: {}]   ;;  %s2083_s1 = inlined_call_operand.vmem [shape: bf16[4608,512], index: 1, kind: input, shape index: {}]   ;;  %s2084_s2 = inlined_call_operand.vmem [shape: f32[1,512], index: 2, kind: input, shape index: {}]   ;;  %s2085_s3 = inlined_call_operand.vmem [shape: f32[1,512], index: 3, kind: input, shape index: {}]   ;;  %s2086_s4 = inlined_call_operand.vmem [shape: f32[2,512], index: 4, kind: input, shape index: {}]   ;;  %s2087_s5 = inlined_call_operand.vmem [shape: f32[2,512], index: 5, kind: output, shape index: {}]  }
   0x1   :  { %s1730_s20 = smov 0   ;;  %s1732_s21 = smov 0  }
   0x2   :  { %s1734_s22 = smov 0   ;;  %s1736_s23 = smov 0  }
   0x3   :  { %s1738_s24 = smov 0  }
   0x4 LB: > { %s24_s25 = sadd.s32 1, %s1683_s22  ;;  %s27_s26 = sadd.s32 1, %s1687_s23  ;;  %s1691_s24 = sphi %s1738_s24, %s15_s24   ;;  %s1687_s23 = sphi %s1736_s23, %s2094_s23   ;;  %s1683_s22 = sphi %s1734_s22, %s2093_s22   ;;  %s1679_s21 = sphi %s1732_s21, %s2092_s21   ;;  %s1675_s20 = sphi %s1730_s20, %s2091_s20   ;;  %s1671_s19 = sphi %s1728_s19, %s2090_s19   ;;  %s1667_s18 = sphi %s1726_s18, %s2089_s18  }
   0x5   : > { %p25_p0 = scmp.ge.s32.totalorder %s24_s25, 9  ;;  %p69_p1 = scmp.ne.s32.totalorder %s1671_s19, %s1667_s18 }
   0x6   : > { %p70_p2 = scmp.eq.s32.totalorder %s1691_s24, 0  ;;  %s62_s30 = sadd.s32 1, %s1671_s19 }
   0x7   : > { %s2096_s25 = smov (%p25_p0, %s24_s25), 0  ;;  %s2098_s26 = smov (!%p25_p0, %s27_s26), %s1687_s23 }
   0x8   : > { %p71_p3 = por %p70_p2, %p69_p1  ;;  %p29_p4 = scmp.ge.s32.totalorder %s2098_s26, 2 }
   0x9   : > { %s57_s27 = ssub.s32 %s1683_s22, %s2096_s25  ;;  %p1391_p6 = scmp.ge.s32.totalorder %s1691_s24, 18 }
   0xa   : > { %s2100_s26 = smov (%p29_p4, %s2098_s26), 0 }
   0xb   : > { %s58_s28 = ssub.s32 %s1687_s23, %s2100_s26  ;;  %199 = sbr.rel (%p1391_p6) target bundleno = 57 (0x39), region = 16 }
   0xc   : > { %s59_s29 = sor.u32 %s58_s28, %s57_s27 }
   0xd   : > { %p60_p5 = scmp.eq.s32.totalorder %s59_s29, 0 }
   0xf   : > { %s1777_s6 = scalar_select %p60_p5, %s1671_s19, %s62_s30  }
  0x12   : > { %210 = sbr.rel (!%p71_p3) target bundleno = 57 (0x39), region = 24  ;;  %s212_s7 = sand.u32 (%p71_p3), 1, %s1671_s19  }
  0x13   : > { %s1394_s8 = sshll.u32 (%p71_p3), %s1687_s23, 1  ;;  %s1392_s9 = sshll.u32 (%p71_p3), %s212_s7, 9 }
  0x14   : > { %s1475_s10 = sshll.u32 (%p71_p3), %s1683_s22, 8  ;;  %s1791_s16 = scalar_lea.vmem (%p71_p3), [#allocation3], %s1392_s9 }
  0x15   : > { %s218_s11 = sadd.s32 (%p71_p3), %s1475_s10, %s1394_s8 }
  0x16   : > { %s1396_s12 = sshll.u32 (%p71_p3), %s218_s11, 2 }
  0x17   : > { %s1786_s15 = scalar_lea.vmem (%p71_p3), %s2083_s1, %s1396_s12 }
  0x18   : > { %v374_v0 = vld [vmem:[%s1786_s15] sm:$0xff] (%p71_p3)  ;;  %v376_v1 = vld [vmem:[%s1786_s15 + $0x10] sm:$0xff] (%p71_p3) }
  0x19   : > { %v378_v2 = vld [vmem:[%s1786_s15 + $0x20] sm:$0xff]  ;;  %375 = vst [vmem:[%s1791_s16] sm:$0xff] %v374_v0  ;;  %377 = vst [vmem:[%s1791_s16 + $0x8] sm:$0xff] %v376_v1  ;;  %v380_v3 = vld [vmem:[%s1786_s15 + $0x30] sm:$0xff] }
  0x1a   : > { %379 = vst [vmem:[%s1791_s16 + $0x10] sm:$0xff] %v378_v2  ;;  %v382_v4 = vld [vmem:[%s1786_s15 + $0x40] sm:$0xff]  ;;  %v384_v5 = vld [vmem:[%s1786_s15 + $0x50] sm:$0xff]  ;;  %381 = vst [vmem:[%s1791_s16 + $0x18] sm:$0xff] %v380_v3 }
  0x1b   : > { %383 = vst [vmem:[%s1791_s16 + $0x20] sm:$0xff] %v382_v4  ;;  %385 = vst [vmem:[%s1791_s16 + $0x28] sm:$0xff] %v384_v5  ;;  %v386_v6 = vld [vmem:[%s1786_s15 + $0x60] sm:$0xff]  ;;  %v388_v7 = vld [vmem:[%s1786_s15 + $0x70] sm:$0xff] }
  0x1c   : > { %v390_v8 = vld [vmem:[%s1786_s15 + $0x80] sm:$0xff]  ;;  %387 = vst [vmem:[%s1791_s16 + $0x30] sm:$0xff] %v386_v6  ;;  %389 = vst [vmem:[%s1791_s16 + $0x38] sm:$0xff] %v388_v7  ;;  %v392_v9 = vld [vmem:[%s1786_s15 + $0x90] sm:$0xff] }
  0x1d   : > { %391 = vst [vmem:[%s1791_s16 + $0x40] sm:$0xff] %v390_v8  ;;  %v394_v10 = vld [vmem:[%s1786_s15 + $0xa0] sm:$0xff]  ;;  %v396_v11 = vld [vmem:[%s1786_s15 + $0xb0] sm:$0xff]  ;;  %393 = vst [vmem:[%s1791_s16 + $0x48] sm:$0xff] %v392_v9 }
  0x1e   : > { %395 = vst [vmem:[%s1791_s16 + $0x50] sm:$0xff] %v394_v10  ;;  %397 = vst [vmem:[%s1791_s16 + $0x58] sm:$0xff] %v396_v11  ;;  %v398_v12 = vld [vmem:[%s1786_s15 + $0xc0] sm:$0xff]  ;;  %v400_v13 = vld [vmem:[%s1786_s15 + $0xd0] sm:$0xff] }
  0x1f   : > { %v402_v14 = vld [vmem:[%s1786_s15 + $0xe0] sm:$0xff]  ;;  %399 = vst [vmem:[%s1791_s16 + $0x60] sm:$0xff] %v398_v12  ;;  %401 = vst [vmem:[%s1791_s16 + $0x68] sm:$0xff] %v400_v13  ;;  %v404_v15 = vld [vmem:[%s1786_s15 + $0xf0] sm:$0xff] }
  0x20   : > { %403 = vst [vmem:[%s1791_s16 + $0x70] sm:$0xff] %v402_v14  ;;  %v406_v16 = vld [vmem:[%s1786_s15 + $0x100] sm:$0xff]  ;;  %v408_v17 = vld [vmem:[%s1786_s15 + $0x110] sm:$0xff]  ;;  %405 = vst [vmem:[%s1791_s16 + $0x78] sm:$0xff] %v404_v15 }
  0x21   : > { %407 = vst [vmem:[%s1791_s16 + $0x80] sm:$0xff] %v406_v16  ;;  %409 = vst [vmem:[%s1791_s16 + $0x88] sm:$0xff] %v408_v17  ;;  %v410_v18 = vld [vmem:[%s1786_s15 + $0x120] sm:$0xff]  ;;  %v412_v19 = vld [vmem:[%s1786_s15 + $0x130] sm:$0xff] }
  0x22   : > { %v414_v20 = vld [vmem:[%s1786_s15 + $0x140] sm:$0xff]  ;;  %411 = vst [vmem:[%s1791_s16 + $0x90] sm:$0xff] %v410_v18  ;;  %413 = vst [vmem:[%s1791_s16 + $0x98] sm:$0xff] %v412_v19  ;;  %v416_v21 = vld [vmem:[%s1786_s15 + $0x150] sm:$0xff] }
  0x23   : > { %415 = vst [vmem:[%s1791_s16 + $0xa0] sm:$0xff] %v414_v20  ;;  %v418_v22 = vld [vmem:[%s1786_s15 + $0x160] sm:$0xff]  ;;  %v420_v23 = vld [vmem:[%s1786_s15 + $0x170] sm:$0xff]  ;;  %417 = vst [vmem:[%s1791_s16 + $0xa8] sm:$0xff] %v416_v21 }
  0x24   : > { %419 = vst [vmem:[%s1791_s16 + $0xb0] sm:$0xff] %v418_v22  ;;  %421 = vst [vmem:[%s1791_s16 + $0xb8] sm:$0xff] %v420_v23  ;;  %v422_v24 = vld [vmem:[%s1786_s15 + $0x180] sm:$0xff]  ;;  %v424_v25 = vld [vmem:[%s1786_s15 + $0x190] sm:$0xff] }
  0x25   : > { %v426_v26 = vld [vmem:[%s1786_s15 + $0x1a0] sm:$0xff]  ;;  %423 = vst [vmem:[%s1791_s16 + $0xc0] sm:$0xff] %v422_v24  ;;  %425 = vst [vmem:[%s1791_s16 + $0xc8] sm:$0xff] %v424_v25  ;;  %v428_v27 = vld [vmem:[%s1786_s15 + $0x1b0] sm:$0xff] }
  0x26   : > { %427 = vst [vmem:[%s1791_s16 + $0xd0] sm:$0xff] %v426_v26  ;;  %v430_v28 = vld [vmem:[%s1786_s15 + $0x1c0] sm:$0xff]  ;;  %v432_v29 = vld [vmem:[%s1786_s15 + $0x1d0] sm:$0xff]  ;;  %429 = vst [vmem:[%s1791_s16 + $0xd8] sm:$0xff] %v428_v27 }
  0x27   : > { %431 = vst [vmem:[%s1791_s16 + $0xe0] sm:$0xff] %v430_v28  ;;  %433 = vst [vmem:[%s1791_s16 + $0xe8] sm:$0xff] %v432_v29  ;;  %v434_v30 = vld [vmem:[%s1786_s15 + $0x1e0] sm:$0xff]  ;;  %v436_v31 = vld [vmem:[%s1786_s15 + $0x1f0] sm:$0xff] }
  0x28   : > { %v438_v32 = vld [vmem:[%s1786_s15 + $0x200] sm:$0xff]  ;;  %435 = vst [vmem:[%s1791_s16 + $0xf0] sm:$0xff] %v434_v30  ;;  %437 = vst [vmem:[%s1791_s16 + $0xf8] sm:$0xff] %v436_v31  ;;  %v440_v33 = vld [vmem:[%s1786_s15 + $0x210] sm:$0xff] }
  0x29   : > { %439 = vst [vmem:[%s1791_s16 + $0x100] sm:$0xff] %v438_v32  ;;  %v442_v34 = vld [vmem:[%s1786_s15 + $0x220] sm:$0xff]  ;;  %v444_v35 = vld [vmem:[%s1786_s15 + $0x230] sm:$0xff]  ;;  %441 = vst [vmem:[%s1791_s16 + $0x108] sm:$0xff] %v440_v33 }
  0x2a   : > { %443 = vst [vmem:[%s1791_s16 + $0x110] sm:$0xff] %v442_v34  ;;  %445 = vst [vmem:[%s1791_s16 + $0x118] sm:$0xff] %v444_v35  ;;  %v446_v36 = vld [vmem:[%s1786_s15 + $0x240] sm:$0xff]  ;;  %v448_v37 = vld [vmem:[%s1786_s15 + $0x250] sm:$0xff] }
  0x2b   : > { %v450_v38 = vld [vmem:[%s1786_s15 + $0x260] sm:$0xff]  ;;  %447 = vst [vmem:[%s1791_s16 + $0x120] sm:$0xff] %v446_v36  ;;  %449 = vst [vmem:[%s1791_s16 + $0x128] sm:$0xff] %v448_v37  ;;  %v452_v39 = vld [vmem:[%s1786_s15 + $0x270] sm:$0xff] }
  0x2c   : > { %451 = vst [vmem:[%s1791_s16 + $0x130] sm:$0xff] %v450_v38  ;;  %v454_v40 = vld [vmem:[%s1786_s15 + $0x280] sm:$0xff]  ;;  %v456_v41 = vld [vmem:[%s1786_s15 + $0x290] sm:$0xff]  ;;  %453 = vst [vmem:[%s1791_s16 + $0x138] sm:$0xff] %v452_v39 }
  0x2d   : > { %455 = vst [vmem:[%s1791_s16 + $0x140] sm:$0xff] %v454_v40  ;;  %457 = vst [vmem:[%s1791_s16 + $0x148] sm:$0xff] %v456_v41  ;;  %v458_v42 = vld [vmem:[%s1786_s15 + $0x2a0] sm:$0xff]  ;;  %v460_v43 = vld [vmem:[%s1786_s15 + $0x2b0] sm:$0xff] }
  0x2e   : > { %v462_v44 = vld [vmem:[%s1786_s15 + $0x2c0] sm:$0xff]  ;;  %459 = vst [vmem:[%s1791_s16 + $0x150] sm:$0xff] %v458_v42  ;;  %461 = vst [vmem:[%s1791_s16 + $0x158] sm:$0xff] %v460_v43  ;;  %v464_v45 = vld [vmem:[%s1786_s15 + $0x2d0] sm:$0xff] }
  0x2f   : > { %463 = vst [vmem:[%s1791_s16 + $0x160] sm:$0xff] %v462_v44  ;;  %v466_v46 = vld [vmem:[%s1786_s15 + $0x2e0] sm:$0xff]  ;;  %v468_v47 = vld [vmem:[%s1786_s15 + $0x2f0] sm:$0xff]  ;;  %465 = vst [vmem:[%s1791_s16 + $0x168] sm:$0xff] %v464_v45 }
  0x30   : > { %467 = vst [vmem:[%s1791_s16 + $0x170] sm:$0xff] %v466_v46  ;;  %469 = vst [vmem:[%s1791_s16 + $0x178] sm:$0xff] %v468_v47  ;;  %v470_v48 = vld [vmem:[%s1786_s15 + $0x300] sm:$0xff]  ;;  %v472_v49 = vld [vmem:[%s1786_s15 + $0x310] sm:$0xff] }
  0x31   : > { %v474_v50 = vld [vmem:[%s1786_s15 + $0x320] sm:$0xff]  ;;  %471 = vst [vmem:[%s1791_s16 + $0x180] sm:$0xff] %v470_v48  ;;  %473 = vst [vmem:[%s1791_s16 + $0x188] sm:$0xff] %v472_v49  ;;  %v476_v51 = vld [vmem:[%s1786_s15 + $0x330] sm:$0xff] }
  0x32   : > { %475 = vst [vmem:[%s1791_s16 + $0x190] sm:$0xff] %v474_v50  ;;  %v478_v52 = vld [vmem:[%s1786_s15 + $0x340] sm:$0xff]  ;;  %v480_v53 = vld [vmem:[%s1786_s15 + $0x350] sm:$0xff]  ;;  %477 = vst [vmem:[%s1791_s16 + $0x198] sm:$0xff] %v476_v51 }
  0x33   : > { %479 = vst [vmem:[%s1791_s16 + $0x1a0] sm:$0xff] %v478_v52  ;;  %481 = vst [vmem:[%s1791_s16 + $0x1a8] sm:$0xff] %v480_v53  ;;  %v482_v54 = vld [vmem:[%s1786_s15 + $0x360] sm:$0xff]  ;;  %v484_v55 = vld [vmem:[%s1786_s15 + $0x370] sm:$0xff] }
  0x34   : > { %v486_v56 = vld [vmem:[%s1786_s15 + $0x380] sm:$0xff]  ;;  %483 = vst [vmem:[%s1791_s16 + $0x1b0] sm:$0xff] %v482_v54  ;;  %485 = vst [vmem:[%s1791_s16 + $0x1b8] sm:$0xff] %v484_v55  ;;  %v488_v57 = vld [vmem:[%s1786_s15 + $0x390] sm:$0xff] }
  0x35   : > { %487 = vst [vmem:[%s1791_s16 + $0x1c0] sm:$0xff] %v486_v56  ;;  %v490_v58 = vld [vmem:[%s1786_s15 + $0x3a0] sm:$0xff]  ;;  %v492_v59 = vld [vmem:[%s1786_s15 + $0x3b0] sm:$0xff]  ;;  %489 = vst [vmem:[%s1791_s16 + $0x1c8] sm:$0xff] %v488_v57 }
  0x36   : > { %491 = vst [vmem:[%s1791_s16 + $0x1d0] sm:$0xff] %v490_v58  ;;  %493 = vst [vmem:[%s1791_s16 + $0x1d8] sm:$0xff] %v492_v59  ;;  %v494_v60 = vld [vmem:[%s1786_s15 + $0x3c0] sm:$0xff]  ;;  %v496_v61 = vld [vmem:[%s1786_s15 + $0x3d0] sm:$0xff] }
  0x37   : > { %v498_v62 = vld [vmem:[%s1786_s15 + $0x3e0] sm:$0xff]  ;;  %495 = vst [vmem:[%s1791_s16 + $0x1e0] sm:$0xff] %v494_v60  ;;  %497 = vst [vmem:[%s1791_s16 + $0x1e8] sm:$0xff] %v496_v61  ;;  %v500_v63 = vld [vmem:[%s1786_s15 + $0x3f0] sm:$0xff] }
  0x38   : > { %499 = vst [vmem:[%s1791_s16 + $0x1f0] sm:$0xff] %v498_v62  ;;  %501 = vst [vmem:[%s1791_s16 + $0x1f8] sm:$0xff] %v500_v63 }
  0x39 PF: > { %p1397_p7 = scmp.ge.s32.totalorder %s1691_s24, 1  ;;  %p531_p8 = scmp.lt.s32.totalorder %s1691_s24, 19 }
  0x3b   : > { %p532_p9 = pnand %p1397_p7, %p531_p8 }
  0x3c   : > { %s538_s17 = sand.u32 (!%p532_p9), 1, %s1667_s18   ;;  %s1399_s27 = sshll.u32 (!%p532_p9), %s1675_s20, 2 }
  0x3d   : > { %535 = sbr.rel (%p532_p9) target bundleno = 433 (0x1b1), region = 74  ;;  %s1398_s28 = sshll.u32 (!%p532_p9), %s538_s17, 9 }
  0x3e   : > { %p583_p10 = scmp.lt.s32.totalorder (!%p532_p9), %s1399_s27, 35  ;;  %s1400_s29 = sshll.u32 (!%p532_p9), %s1679_s21, 1 }
  0x3f   : > { %p590_p11 = scmp.lt.s32.totalorder (!%p532_p9), %s1400_s29, 3  ;;  %s1950_s8 = scalar_lea.vmem (!%p532_p9), [#allocation3], %s1398_s28 }
  0x40   : > { %p1406_p12 = scmp.ne.s32.totalorder (!%p532_p9), %s1675_s20, 0 }
  0x44   : > { %s2102_s27 = smov (!%p583_p10, %s1399_s27), 35  ;;  %s2104_s29 = smov (!%p590_p11, %s1400_s29), 3 }
  0x45   : > { %s592_s18 = scalar_lea.vmem %s2084_s2, %s2104_s29  ;;  %s597_s21 = scalar_lea.vmem %s2085_s3, %s2104_s29  ;;  %v1693_v0 = vmov (!%p1406_p12), 0.0  }
  0x46   : > { %s1403_s13 = sshll.u32 %s2104_s29, 1  ;;  %614 = sbr.rel (%p1406_p12) target bundleno = 77 (0x4d), region = 82  ;;  %615 = vst [vmem:[#allocation2] sm:$0xf] (!%p1406_p12), %v1693_v0 }
  0x47   : > { %s1943_s16 = scalar_lea.vmem %s2086_s4, %s1403_s13  ;;  %s1948_s7 = scalar_lea.vmem %s2087_s5, %s1403_s13 }
  0x4d PF: > { %v1537_v1 = vld [vmem:[%s1950_s8 + $0x4] ss:$8 sps:$4 sm:$0xff]   ;;  %v1541_v3 = vld [vmem:[%s1950_s8] ss:$8 sps:$4 sm:$0xff]   ;;  %v1543_v5 = vld [vmem:[%s1950_s8 + $0x14] ss:$8 sps:$4 sm:$0xff]   ;;  %v694_v41 = vlaneseq  ;;  %s2088_s10 = scalar_lea.vmem %s2082_s0, %s2102_s27 }
  0x4e   : > { %v1539_v2 = vld [vmem:[%s1950_s8 + $0x104] ss:$8 sps:$4 sm:$0xff]   ;;  %1031 = vmatprep.subr.bf16.mxu1 %v1537_v1  ;;  %v1542_v4 = vld [vmem:[%s1950_s8 + $0x100] ss:$8 sps:$4 sm:$0xff]   ;;  %v1545_v6 = vld [vmem:[%s1950_s8 + $0x114] ss:$8 sps:$4 sm:$0xff]  }
  0x4f   : > { %1072 = vmatprep.subr.bf16.mxu0 %v1539_v2  ;;  %1032 = vmatpush1.bf16.msra.mxu1 %v1541_v3  ;;  %v1547_v7 = vld [vmem:[%s1950_s8 + $0x10] ss:$8 sps:$4 sm:$0xff]   ;;  %v1549_v9 = vld [vmem:[%s1950_s8 + $0x24] ss:$8 sps:$4 sm:$0xff]   ;;  %v1553_v11 = vld [vmem:[%s1950_s8 + $0x20] ss:$8 sps:$4 sm:$0xff]  }
  0x50   : > { %1073 = vmatpush1.bf16.msra.mxu0 %v1542_v4  ;;  %1033 = vmatprep.subr.bf16.mxu1 %v1543_v5  ;;  %v1548_v8 = vld [vmem:[%s1950_s8 + $0x110] ss:$8 sps:$4 sm:$0xff]   ;;  %v1551_v10 = vld [vmem:[%s1950_s8 + $0x124] ss:$8 sps:$4 sm:$0xff]   ;;  %v1554_v12 = vld [vmem:[%s1950_s8 + $0x120] ss:$8 sps:$4 sm:$0xff]  }
  0x51   : > { %1074 = vmatprep.subr.bf16.mxu0 %v1545_v6  ;;  %v1555_v13 = vld [vmem:[%s1950_s8 + $0x34] ss:$8 sps:$4 sm:$0xff]   ;;  %v1559_v15 = vld [vmem:[%s1950_s8 + $0x30] ss:$8 sps:$4 sm:$0xff]   ;;  %v1561_v17 = vld [vmem:[%s1950_s8 + $0x44] ss:$8 sps:$4 sm:$0xff]  }
  0x52   : > { %v1557_v14 = vld [vmem:[%s1950_s8 + $0x134] ss:$8 sps:$4 sm:$0xff]   ;;  %v1560_v16 = vld [vmem:[%s1950_s8 + $0x130] ss:$8 sps:$4 sm:$0xff]   ;;  %v1563_v18 = vld [vmem:[%s1950_s8 + $0x144] ss:$8 sps:$4 sm:$0xff]  }
  0x53   : > { %1034 = vmatpush1.bf16.msra.mxu1 %v1547_v7  ;;  %v1565_v19 = vld [vmem:[%s1950_s8 + $0x40] ss:$8 sps:$4 sm:$0xff]   ;;  %v1567_v21 = vld [vmem:[%s1950_s8 + $0x54] ss:$8 sps:$4 sm:$0xff]   ;;  %v1571_v23 = vld [vmem:[%s1950_s8 + $0x50] ss:$8 sps:$4 sm:$0xff]  }
  0x54   : > { %1075 = vmatpush1.bf16.msra.mxu0 %v1548_v8  ;;  %1035 = vmatprep.subr.bf16.mxu1 %v1549_v9  ;;  %v1566_v20 = vld [vmem:[%s1950_s8 + $0x140] ss:$8 sps:$4 sm:$0xff]   ;;  %v1569_v22 = vld [vmem:[%s1950_s8 + $0x154] ss:$8 sps:$4 sm:$0xff]   ;;  %v1572_v24 = vld [vmem:[%s1950_s8 + $0x150] ss:$8 sps:$4 sm:$0xff]  }
  0x55   : > { %1076 = vmatprep.subr.bf16.mxu0 %v1551_v10  ;;  %v1573_v25 = vld [vmem:[%s1950_s8 + $0x64] ss:$8 sps:$4 sm:$0xff]   ;;  %v1577_v27 = vld [vmem:[%s1950_s8 + $0x60] ss:$8 sps:$4 sm:$0xff]   ;;  %v1579_v29 = vld [vmem:[%s1950_s8 + $0x74] ss:$8 sps:$4 sm:$0xff]  }
  0x56   : > { %v1575_v26 = vld [vmem:[%s1950_s8 + $0x164] ss:$8 sps:$4 sm:$0xff]   ;;  %v1578_v28 = vld [vmem:[%s1950_s8 + $0x160] ss:$8 sps:$4 sm:$0xff]   ;;  %v1581_v30 = vld [vmem:[%s1950_s8 + $0x174] ss:$8 sps:$4 sm:$0xff]  }
  0x57   : > { %1036 = vmatpush1.bf16.msra.mxu1 %v1553_v11  ;;  %v1583_v31 = vld [vmem:[%s1950_s8 + $0x70] ss:$8 sps:$4 sm:$0xff]   ;;  %v1585_v33 = vld [vmem:[%s1950_s8 + $0x84] ss:$8 sps:$4 sm:$0xff]   ;;  %v1589_v35 = vld [vmem:[%s1950_s8 + $0x80] ss:$8 sps:$4 sm:$0xff]  }
  0x58   : > { %1077 = vmatpush1.bf16.msra.mxu0 %v1554_v12  ;;  %1037 = vmatprep.subr.bf16.mxu1 %v1555_v13  ;;  %v1584_v32 = vld [vmem:[%s1950_s8 + $0x170] ss:$8 sps:$4 sm:$0xff]   ;;  %v1587_v34 = vld [vmem:[%s1950_s8 + $0x184] ss:$8 sps:$4 sm:$0xff]   ;;  %v1590_v36 = vld [vmem:[%s1950_s8 + $0x180] ss:$8 sps:$4 sm:$0xff]  }
  0x59   : > { %1078 = vmatprep.subr.bf16.mxu0 %v1557_v14  ;;  %v1591_v37 = vld [vmem:[%s1950_s8 + $0x94] ss:$8 sps:$4 sm:$0xff]   ;;  %v1694_v39 = vmov 1966171168   ;;  %v1595_v42 = vld [vmem:[%s1950_s8 + $0x90] ss:$8 sps:$4 sm:$0xff]  }
  0x5a   : > { %v1593_v38 = vld [vmem:[%s1950_s8 + $0x194] ss:$8 sps:$4 sm:$0xff]   ;;  %v692_v40 = vunpack.c.l.s4 %v1694_v39  ;;  %v1596_v43 = vld [vmem:[%s1950_s8 + $0x190] ss:$8 sps:$4 sm:$0xff]   ;;  %v1597_v44 = vld [vmem:[%s1950_s8 + $0xa4] ss:$8 sps:$4 sm:$0xff]  }
  0x5b   : > { %1038 = vmatpush1.bf16.msra.mxu1 %v1559_v15  ;;  %v1599_v45 = vld [vmem:[%s1950_s8 + $0x1a4] ss:$8 sps:$4 sm:$0xff]   ;;  %v1995_v47 = vshrl.u32 %v694_v41, 7  ;;  %v1601_v48 = vld [vmem:[%s1950_s8 + $0xa0] ss:$8 sps:$4 sm:$0xff]   ;;  %p1472_p13 = scmp.ne.s32.totalorder %s1675_s20, 8 }
  0x5c   : > { %1079 = vmatpush1.bf16.msra.mxu0 %v1560_v16  ;;  %1039 = vmatprep.subr.bf16.mxu1 %v1561_v17  ;;  %v693_v46 = vunpack.c.0.s8 %v692_v40  ;;  %v1602_v49 = vld [vmem:[%s1950_s8 + $0x1a0] ss:$8 sps:$4 sm:$0xff]   ;;  %v1603_v50 = vld [vmem:[%s1950_s8 + $0xb4] ss:$8 sps:$4 sm:$0xff]   ;;  %v1607_v54 = vld [vmem:[%s1950_s8 + $0xb0] ss:$8 sps:$4 sm:$0xff]  }
  0x5d   : > { %1080 = vmatprep.subr.bf16.mxu0 %v1563_v18  ;;  %v1605_v51 = vld [vmem:[%s1950_s8 + $0x1b4] ss:$8 sps:$4 sm:$0xff]   ;;  %v1608_v55 = vld [vmem:[%s1950_s8 + $0x1b0] ss:$8 sps:$4 sm:$0xff]   ;;  %v1609_v57 = vld [vmem:[%s1950_s8 + $0xc4] ss:$8 sps:$4 sm:$0xff]  }
  0x5e   : > { %v2002_v52 = vsub.s32 %v693_v46, %v1995_v47  ;;  %v1407_v53 = vld.sshfl [vmem:[%s2088_s10] sm:$0x33 pattern:$0x75316420]  ;;  %v1611_v58 = vld [vmem:[%s1950_s8 + $0x1c4] ss:$8 sps:$4 sm:$0xff]  }
  0x5f   : > { %1040 = vmatpush1.bf16.msra.mxu1 %v1565_v19  ;;  %v690_v56 = vcombine.high %v1407_v53, %v1407_v53  ;;  %v1613_v60 = vld [vmem:[%s1950_s8 + $0xc0] ss:$8 sps:$4 sm:$0xff]   ;;  %v1615_v63 = vld [vmem:[%s1950_s8 + $0xd4] ss:$8 sps:$4 sm:$0xff]   ;;  %v1619_v1 = vld [vmem:[%s1950_s8 + $0xd0] ss:$8 sps:$4 sm:$0xff]  }
  0x60   : > { %1081 = vmatpush1.bf16.msra.mxu0 %v1566_v20  ;;  %1041 = vmatprep.subr.bf16.mxu1 %v1567_v21  ;;  %v1614_v61 = vld [vmem:[%s1950_s8 + $0x1c0] ss:$8 sps:$4 sm:$0xff]   ;;  %v1617_v0 = vld [vmem:[%s1950_s8 + $0x1d4] ss:$8 sps:$4 sm:$0xff]   ;;  %v1620_v2 = vld [vmem:[%s1950_s8 + $0x1d0] ss:$8 sps:$4 sm:$0xff]   ;;  %v697_v9 = vrot.slane %v1407_v53, %v2002_v52 }
  0x61   : > { %1082 = vmatprep.subr.bf16.mxu0 %v1569_v22  ;;  %v704_v59 = vrot.slane %v690_v56, %v2002_v52  ;;  %v1621_v3 = vld [vmem:[%s1950_s8 + $0xe4] ss:$8 sps:$4 sm:$0xff]   ;;  %v1625_v5 = vld [vmem:[%s1950_s8 + $0xe0] ss:$8 sps:$4 sm:$0xff]   ;;  %v1627_v7 = vld [vmem:[%s1950_s8 + $0xf4] ss:$8 sps:$4 sm:$0xff]  }
  0x62   : > { %v1623_v4 = vld [vmem:[%s1950_s8 + $0x1e4] ss:$8 sps:$4 sm:$0xff]   ;;  %v1626_v6 = vld [vmem:[%s1950_s8 + $0x1e0] ss:$8 sps:$4 sm:$0xff]   ;;  %v1629_v8 = vld [vmem:[%s1950_s8 + $0x1f4] ss:$8 sps:$4 sm:$0xff]   ;;  %v705_v12 = vcombine.high %v697_v9, %v697_v9 }
  0x63   : > { %1042 = vmatpush1.bf16.msra.mxu1 %v1571_v23  ;;  %v706_v62 = vcombine.high %v704_v59, %v704_v59  ;;  %1063 = vmatprep.mubr.bf16.mxu1 %v704_v59  ;;  %v1631_v10 = vld [vmem:[%s1950_s8 + $0xf0] ss:$8 sps:$4 sm:$0xff]   ;;  %v1695_v13 = vmov 1983009808   ;;  %vm1142_vm0 = vcmask (!%p1472_p13), 1041408  }
  0x64   : > { %1083 = vmatpush1.bf16.msra.mxu0 %v1572_v24  ;;  %1043 = vmatprep.subr.bf16.mxu1 %v1573_v25  ;;  %v1632_v11 = vld [vmem:[%s1950_s8 + $0x1f0] ss:$8 sps:$4 sm:$0xff]   ;;  %v1117_v14 = vunpack.c.l.s4 %v1695_v13 }
  0x65   : > { %1084 = vmatprep.subr.bf16.mxu0 %v1575_v26  ;;  %1104 = vmatprep.mubr.bf16.mxu0 %v706_v62 }
  0x66   : > { %v1118_v15 = vunpack.c.0.s8 %v1117_v14 }
  0x67   : > { %1044 = vmatpush1.bf16.msra.mxu1 %v1577_v27 }
  0x68   : > { %1085 = vmatpush1.bf16.msra.mxu0 %v1578_v28  ;;  %1045 = vmatprep.subr.bf16.mxu1 %v1579_v29  ;;  %v2030_v22 = vsub.s32 %v1118_v15, %v1995_v47  ;;  %v616_v28 = vld [vmem:[#allocation2] sm:$0xf] }
  0x69   : > { %1086 = vmatprep.subr.bf16.mxu0 %v1581_v30 }
  0x6b   : > { %1046 = vmatpush1.bf16.msra.mxu1 %v1583_v31 }
  0x6c   : > { %1087 = vmatpush1.bf16.msra.mxu0 %v1584_v32  ;;  %1047 = vmatprep.subr.bf16.mxu1 %v1585_v33 }
  0x6d   : > { %1088 = vmatprep.subr.bf16.mxu0 %v1587_v34 }
  0x6f   : > { %1048 = vmatpush1.bf16.msra.mxu1 %v1589_v35 }
  0x70   : > { %1089 = vmatpush1.bf16.msra.mxu0 %v1590_v36  ;;  %1049 = vmatprep.subr.bf16.mxu1 %v1591_v37 }
  0x71   : > { %1090 = vmatprep.subr.bf16.mxu0 %v1593_v38 }
  0x73   : > { %1050 = vmatpush1.bf16.msra.mxu1 %v1595_v42 }
  0x74   : > { %1091 = vmatpush1.bf16.msra.mxu0 %v1596_v43  ;;  %1051 = vmatprep.subr.bf16.mxu1 %v1597_v44 }
  0x75   : > { %1092 = vmatprep.subr.bf16.mxu0 %v1599_v45 }
  0x77   : > { %1052 = vmatpush1.bf16.msra.mxu1 %v1601_v48 }
  0x78   : > { %1093 = vmatpush1.bf16.msra.mxu0 %v1602_v49  ;;  %1053 = vmatprep.subr.bf16.mxu1 %v1603_v50 }
  0x79   : > { %1094 = vmatprep.subr.bf16.mxu0 %v1605_v51 }
  0x7b   : > { %1054 = vmatpush1.bf16.msra.mxu1 %v1607_v54 }
  0x7c   : > { %1095 = vmatpush1.bf16.msra.mxu0 %v1608_v55  ;;  %1055 = vmatprep.subr.bf16.mxu1 %v1609_v57 }
  0x7d   : > { %1096 = vmatprep.subr.bf16.mxu0 %v1611_v58 }
  0x7f   : > { %1056 = vmatpush1.bf16.msra.mxu1 %v1613_v60 }
  0x80   : > { %1097 = vmatpush1.bf16.msra.mxu0 %v1614_v61  ;;  %1057 = vmatprep.subr.bf16.mxu1 %v1615_v63 }
  0x81   : > { %1098 = vmatprep.subr.bf16.mxu0 %v1617_v0 }
  0x83   : > { %1058 = vmatpush1.bf16.msra.mxu1 %v1619_v1 }
  0x84   : > { %1099 = vmatpush1.bf16.msra.mxu0 %v1620_v2  ;;  %1059 = vmatprep.subr.bf16.mxu1 %v1621_v3 }
  0x85   : > { %1100 = vmatprep.subr.bf16.mxu0 %v1623_v4 }
  0x87   : > { %1060 = vmatpush1.bf16.msra.mxu1 %v1625_v5 }
  0x88   : > { %1101 = vmatpush1.bf16.msra.mxu0 %v1626_v6  ;;  %1061 = vmatprep.subr.bf16.mxu1 %v1627_v7 }
  0x89   : > { %1102 = vmatprep.subr.bf16.mxu0 %v1629_v8 }
  0x8b   : > { %1062 = vmatpush1.bf16.msra.mxu1 %v1631_v10 }
  0x8c   : > { %1103 = vmatpush1.bf16.msra.mxu0 %v1632_v11 }
  0x8e   : > { %1064 = vmatmul.mubr.bf16.vlgmr.msra.gmra.mrb[0].mxu1 %v697_v9 }
  0x8f   : > { %1105 = vmatmul.mubr.bf16.vlgmr.msra.gmra.mrb[0].mxu0 %v705_v12 }
 0x161   : > { %v1065_v16 = vpop.f32.mrb[0].mxu1 }
 0x162   : > { %v1106_v17 = vpop.f32.mrb[0].mxu0  ;;  %v1067_v19 = vpop.f32.mrb[1].mxu1 }
 0x163   : > { %v1107_v18 = vadd.f32 %v1106_v17, %v1065_v16  ;;  %v1108_v20 = vpop.f32.mrb[1].mxu0  ;;  %v1069_v23 = vpop.f32.mrb[2].mxu1 }
 0x164   : > { %v1109_v21 = vadd.f32 %v1108_v20, %v1067_v19  ;;  %v1110_v24 = vpop.f32.mrb[2].mxu0  ;;  %v1070_v25 = vpop.f32.mrb[3].mxu1  ;;  %v1236_v23 = vsub.s32 (!%p1472_p13), 1, %v1995_v47 }
 0x165   : > { %v1111_v26 = vpop.f32.mrb[3].mxu0  ;;  %v1205_v24 = vld [vmem:[%s592_s18] sm:$0x3] (!%p1472_p13) }
 0x166   : > { %v1115_v27 = vcombine.low %v1107_v18, %v1109_v21  ;;  %1129 = sbr.rel (%p1472_p13) target bundleno = 433 (0x1b1), region = 86  ;;  %v1248_v18 = vld [vmem:[%s597_s21] sm:$0x3] (!%p1472_p13)  ;;  %v1232_v21 = vsub.s32 (!%p1472_p13), 0, %v1995_v47 }
 0x168   : > { %v1122_v29 = vrot.slane %v1115_v27, %v2030_v22  ;;  %v1253_v26 = vrot.slane (!%p1472_p13), %v1248_v18, %v1232_v21  ;;  %v1257_v27 = vrot.slane (!%p1472_p13), %v1248_v18, %v1236_v23 }
 0x16a   : > { %v1124_v30 = vadd.f32 %v1122_v29, %v616_v28 }
 0x16c   : > { %1125 = vst [vmem:[#allocation2] sm:$0xf] %v1124_v30 }
 0x173   : > { %v2034_v31 = vld [vmem:[#allocation2] sm:$0xf] }
 0x174   : > { %v1138_v32 = vrot.slane %v2034_v31, %v2030_v22  ;;  %v1159_v33 = vmul.f32 %v2034_v31, %v2034_v31 }
 0x176   : > { %v1139_v34 = vcombine.high %v1138_v32, %v1138_v32  ;;  %v1143_v35 = vsel %vm1142_vm0, %v1138_v32, 0.0  ;;  %v1167_v36 = vrot.slane %v1159_v33, %v2030_v22  ;;  %v1258_v33 = vcombine.low %v1253_v26, %v1257_v27 }
 0x177   : > { %v1144_v37 = vrot.slane %v1143_v35, 4 }
 0x178   : > { %v1150_v38 = vsel %vm1142_vm0, %v1139_v34, 0.0  ;;  %v1168_v39 = vcombine.high %v1167_v36, %v1167_v36  ;;  %v1171_v40 = vsel %vm1142_vm0, %v1167_v36, 0.0  ;;  %v1265_v36 = vrot.slane %v1258_v33, %v2030_v22 }
 0x179   : > { %v1145_v41 = vadd.f32 %v1144_v37, %v1143_v35  ;;  %v1151_v42 = vrot.slane %v1150_v38, 4  ;;  %v1172_v43 = vrot.slane %v1171_v40, 4 }
 0x17a   : > { %v1178_v44 = vsel %vm1142_vm0, %v1168_v39, 0.0 }
 0x17b   : > { %v1146_v45 = vrot.slane %v1145_v41, 2  ;;  %v1152_v46 = vadd.f32 %v1151_v42, %v1150_v38  ;;  %v1173_v48 = vadd.f32 %v1172_v43, %v1171_v40  ;;  %v1179_v49 = vrot.slane %v1178_v44, 4  ;;  %v1268_v38 = vld [vmem:[%s1943_s16] sm:$0xf] }
 0x17d   : > { %v1147_v50 = vadd.f32 %v1146_v45, %v1145_v41  ;;  %v1153_v51 = vrot.slane %v1152_v46, 2  ;;  %v1174_v53 = vrot.slane %v1173_v48, 2  ;;  %v1180_v54 = vadd.f32 %v1179_v49, %v1178_v44 }
 0x17f   : > { %v1148_v55 = vrot.slane %v1147_v50, 1  ;;  %v1154_v56 = vadd.f32 %v1153_v51, %v1152_v46  ;;  %v1175_v57 = vadd.f32 %v1174_v53, %v1173_v48  ;;  %v1181_v58 = vrot.slane %v1180_v54, 2 }
 0x181   : > { %v1149_v59 = vadd.f32 %v1148_v55, %v1147_v50  ;;  %v1155_v60 = vrot.slane %v1154_v56, 1  ;;  %v1176_v61 = vrot.slane %v1175_v57, 1  ;;  %v1182_v62 = vadd.f32 %v1181_v58, %v1180_v54 }
 0x183   : > { %v1156_v63 = vadd.f32 %v1155_v60, %v1154_v56  ;;  %v1157_v0 = vmul.f32 0.5, %v1149_v59  ;;  %v1177_v1 = vadd.f32 %v1176_v61, %v1175_v57  ;;  %v1183_v2 = vrot.slane %v1182_v62, 1 }
 0x185   : > { %v1158_v3 = vmul.f32 0.5, %v1156_v63  ;;  %v1184_v4 = vadd.f32 %v1183_v2, %v1182_v62  ;;  %v1185_v5 = vmul.f32 0.5, %v1177_v1  ;;  %v1187_v6 = vmul.f32 %v1157_v0, %v1157_v0 }
 0x187   : > { %v1186_v7 = vmul.f32 0.5, %v1184_v4  ;;  %v1188_v8 = vmul.f32 %v1158_v3, %v1158_v3  ;;  %v1189_v9 = vsub.f32 %v1185_v5, %v1187_v6  ;;  %v1195_v19 = vcombine.low %v1157_v0, %v1158_v3 }
 0x189   : > { %v1190_v10 = vsub.f32 %v1186_v7, %v1188_v8  ;;  %v1191_v11 = vmax.f32 %v1189_v9, 0.0  ;;  %v1202_v28 = vrot.slane %v1195_v19, %v2030_v22 }
 0x18b   : > { %v1192_v12 = vmax.f32 %v1190_v10, 0.0  ;;  %v1206_v13 = vadd.f32 1e-05, %v1191_v11  ;;  %v1204_v34 = vsub.f32 %v2034_v31, %v1202_v28 }
 0x18d   : > { %v1207_v14 = vadd.f32 1e-05, %v1192_v12  ;;  %1633 = vrsqrt.f32 %v1206_v13 }
 0x18f   : > { %1635 = vrsqrt.f32 %v1207_v14 }
 0x197   : > { %v1634_v15 = vpop.eup %1633 }
 0x199   : > { %v1636_v16 = vpop.eup %1635 }
 0x19a   : > { %v1212_v17 = vcombine.low %v1634_v15, %v1636_v16 }
 0x19c   : > { %v1219_v20 = vrot.slane %v1212_v17, %v2002_v52 }
 0x19e   : > { %v1226_v25 = vrot.slane %v1219_v20, %v2002_v52 }
 0x1a0   : > { %v1228_v29 = vmul.f32 %v1226_v25, %v1205_v24 }
 0x1a2   : > { %v1233_v30 = vrot.slane %v1228_v29, %v1232_v21  ;;  %v1237_v32 = vrot.slane %v1228_v29, %v1236_v23 }
 0x1a4   : > { %v1238_v35 = vcombine.low %v1233_v30, %v1237_v32 }
 0x1a6   : > { %v1245_v47 = vrot.slane %v1238_v35, %v2030_v22 }
 0x1a8   : > { %v1247_v37 = vmul.f32 %v1245_v47, %v1204_v34 }
 0x1aa   : > { %v1267_v39 = vadd.f32 %v1265_v36, %v1247_v37 }
 0x1ac   : > { %v1269_v52 = vadd.f32 %v1268_v38, %v1267_v39 }
 0x1ae   : > { %v1270_v40 = vmax.f32 %v1269_v52, 0.0 }
 0x1b0   : > { %1271 = vst [vmem:[%s1948_s7] sm:$0xf] %v1270_v40 }
 0x1b1 PF: > { %s15_s24 = sadd.s32 1, %s1691_s24   ;;  %s2089_s18 = smov %s1671_s19 }
 0x1b2   : > { %p12_p0 = scmp.ge.s32.totalorder %s15_s24, 20   ;;  %s2090_s19 = smov %s1777_s6 }
 0x1b3   : > { %s2091_s20 = smov %s1683_s22  ;;  %s2092_s21 = smov %s1687_s23 }
 0x1b4   : > { %s2093_s22 = smov %s2096_s25  ;;  %s2094_s23 = smov %s2100_s26 }
 0x1b5   :  { %14 = sbr.rel (!%p12_p0) target bundleno = 4 (0x4), region = 133 }

// kernel: _lambda_.41
= control target key start
LH: loop header
LB: loop body
LE: loop exit
PB: predicated region body
PF: predicated region fallthrough
CT: control target
= control target key end

     0   :  { %v595_v24 = vmov 1983009808   ;;  %v28_v26 = vlaneseq  ;;  %v596_v50 = vmov 0.0   ;;  %vm597_vm0 = vmmov 0   ;;  %s742_s1 = inlined_call_operand.vmem [shape: bf16[512,32], index: 1, kind: input, shape index: {}]   ;;  %s743_s0 = inlined_call_operand.vmem [shape: f32[2,512], index: 0, kind: input, shape index: {}]   ;;  %s744_s3 = inlined_call_operand.vmem [shape: bf16[32,128], index: 3, kind: input, shape index: {}]   ;;  %s745_s2 = inlined_call_operand.vmem [shape: f32[1,32], index: 2, kind: input, shape index: {}]   ;;  %s746_s4 = inlined_call_operand.vmem [shape: f32[1,128], index: 4, kind: input, shape index: {}]   ;;  %s747_s5 = inlined_call_operand.vmem [shape: f32[2,128], index: 5, kind: output, shape index: {}]  }
   0x1   :  { %v561_v0 = vld [vmem:[%s742_s1 + $0x40] sm:$0xff]   ;;  %v565_v4 = vld [vmem:[%s742_s1 + $0x48] sm:$0xff]   ;;  %v569_v8 = vld [vmem:[%s742_s1 + $0x50] sm:$0xff]   ;;  %v26_v25 = vunpack.c.l.s4 %v595_v24  ;;  %vm417_vm1 = vcmask 261120  }
   0x2   :  { %v562_v1 = vld [vmem:[%s742_s1 + $0xc0] sm:$0xff]   ;;  %503 = vmatprep.subr.bf16.mxu0 %v561_v0  ;;  %v566_v5 = vld [vmem:[%s742_s1 + $0xc8] sm:$0xff]   ;;  %v570_v9 = vld [vmem:[%s742_s1 + $0xd0] sm:$0xff]   ;;  %v29_v32 = vshrl.u32 %v28_v26, 7 }
   0x3   :  { %v563_v2 = vld [vmem:[%s742_s1] sm:$0xff]   ;;  %525 = vmatprep.subr.bf16.mxu1 %v562_v1  ;;  %v567_v6 = vld [vmem:[%s742_s1 + $0x8] sm:$0xff]   ;;  %v571_v10 = vld [vmem:[%s742_s1 + $0x10] sm:$0xff]   ;;  %v27_v31 = vunpack.c.0.s8 %v26_v25 }
   0x4   :  { %v564_v3 = vld [vmem:[%s742_s1 + $0x80] sm:$0xff]   ;;  %504 = vmatpush3.bf16.msra.mxu0 %v563_v2  ;;  %v568_v7 = vld [vmem:[%s742_s1 + $0x88] sm:$0xff]   ;;  %v572_v11 = vld [vmem:[%s742_s1 + $0x90] sm:$0xff]  }
   0x5   :  { %526 = vmatpush3.bf16.msra.mxu1 %v564_v3  ;;  %505 = vmatprep.subr.bf16.mxu0 %v565_v4  ;;  %v573_v12 = vld [vmem:[%s742_s1 + $0x58] sm:$0xff]   ;;  %v577_v16 = vld [vmem:[%s742_s1 + $0x60] sm:$0xff]   ;;  %v581_v20 = vld [vmem:[%s742_s1 + $0x68] sm:$0xff]   ;;  %v30_v37 = vsub.s32 %v27_v31, %v29_v32 }
   0x6   :  { %527 = vmatprep.subr.bf16.mxu1 %v566_v5  ;;  %v574_v13 = vld [vmem:[%s742_s1 + $0xd8] sm:$0xff]   ;;  %v578_v17 = vld [vmem:[%s742_s1 + $0xe0] sm:$0xff]   ;;  %v582_v21 = vld [vmem:[%s742_s1 + $0xe8] sm:$0xff]  }
   0x7   :  { %v575_v14 = vld [vmem:[%s742_s1 + $0x18] sm:$0xff]   ;;  %v579_v18 = vld [vmem:[%s742_s1 + $0x20] sm:$0xff]   ;;  %v583_v22 = vld [vmem:[%s742_s1 + $0x28] sm:$0xff]  }
   0x8   :  { %506 = vmatpush3.bf16.msra.mxu0 %v567_v6  ;;  %v576_v15 = vld [vmem:[%s742_s1 + $0x98] sm:$0xff]   ;;  %v580_v19 = vld [vmem:[%s742_s1 + $0xa0] sm:$0xff]   ;;  %v584_v23 = vld [vmem:[%s742_s1 + $0xa8] sm:$0xff]  }
   0x9   :  { %528 = vmatpush3.bf16.msra.mxu1 %v568_v7  ;;  %507 = vmatprep.subr.bf16.mxu0 %v569_v8  ;;  %v585_v27 = vld [vmem:[%s742_s1 + $0x70] sm:$0xff]   ;;  %v589_v33 = vld [vmem:[%s742_s1 + $0x78] sm:$0xff]   ;;  %v21_v38 = vld [vmem:[%s743_s0] sm:$0xff] }
   0xa   :  { %529 = vmatprep.subr.bf16.mxu1 %v570_v9  ;;  %v586_v28 = vld [vmem:[%s742_s1 + $0xf0] sm:$0xff]   ;;  %v590_v34 = vld [vmem:[%s742_s1 + $0xf8] sm:$0xff]   ;;  %v22_v39 = vmax.f32 %v21_v38, 0.0  ;;  %v593_v49 = vld [vmem:[%s744_s3] sm:$0xff]  }
   0xb   :  { %v587_v29 = vld [vmem:[%s742_s1 + $0x30] sm:$0xff]   ;;  %v591_v35 = vld [vmem:[%s742_s1 + $0x38] sm:$0xff]   ;;  %v594_v51 = vld [vmem:[%s744_s3 + $0x8] sm:$0xff]  }
   0xc   :  { %508 = vmatpush3.bf16.msra.mxu0 %v571_v10  ;;  %v588_v30 = vld [vmem:[%s742_s1 + $0xb0] sm:$0xff]   ;;  %v592_v36 = vld [vmem:[%s742_s1 + $0xb8] sm:$0xff]   ;;  %v31_v40 = vrot.slane %v22_v39, %v30_v37  ;;  %v24_v41 = vcombine.high %v22_v39, %v22_v39  ;;  %v466_v53 = vld [vmem:[%s745_s2] ss:$0 sm:$0xff] }
   0xd   :  { %530 = vmatpush3.bf16.msra.mxu1 %v572_v11  ;;  %509 = vmatprep.subr.bf16.mxu0 %v573_v12  ;;  %v499_v3 = vld [vmem:[%s746_s4] ss:$0 sm:$0xff] }
   0xe   :  { %531 = vmatprep.subr.bf16.mxu1 %v574_v13  ;;  %v39_v42 = vcombine.high %v31_v40, %v31_v40  ;;  %v38_v43 = vrot.slane %v24_v41, %v30_v37  ;;  %v45_v44 = vpack.c.bf16 %v31_v40, %v31_v40 }
  0x10   :  { %510 = vmatpush3.bf16.msra.mxu0 %v575_v14  ;;  %v46_v45 = vpack.c.bf16 %v39_v42, %v39_v42  ;;  %v40_v46 = vcombine.high %v38_v43, %v38_v43  ;;  %v47_v47 = vpack.c.bf16 %v38_v43, %v38_v43 }
  0x11   :  { %532 = vmatpush3.bf16.msra.mxu1 %v576_v15  ;;  %511 = vmatprep.subr.bf16.mxu0 %v577_v16 }
  0x12   :  { %533 = vmatprep.subr.bf16.mxu1 %v578_v17  ;;  %344 = vmatprep.mubr.bf16.mxu0 %v46_v45  ;;  %v48_v48 = vpack.c.bf16 %v40_v46, %v40_v46 }
  0x14   :  { %512 = vmatpush3.bf16.msra.mxu0 %v579_v18  ;;  %384 = vmatprep.mubr.bf16.mxu1 %v48_v48 }
  0x15   :  { %534 = vmatpush3.bf16.msra.mxu1 %v580_v19  ;;  %513 = vmatprep.subr.bf16.mxu0 %v581_v20 }
  0x16   :  { %535 = vmatprep.subr.bf16.mxu1 %v582_v21 }
  0x18   :  { %514 = vmatpush3.bf16.msra.mxu0 %v583_v22 }
  0x19   :  { %536 = vmatpush3.bf16.msra.mxu1 %v584_v23  ;;  %515 = vmatprep.subr.bf16.mxu0 %v585_v27 }
  0x1a   :  { %537 = vmatprep.subr.bf16.mxu1 %v586_v28 }
  0x1c   :  { %516 = vmatpush3.bf16.msra.mxu0 %v587_v29 }
  0x1d   :  { %538 = vmatpush3.bf16.msra.mxu1 %v588_v30  ;;  %517 = vmatprep.subr.bf16.mxu0 %v589_v33 }
  0x1e   :  { %539 = vmatprep.subr.bf16.mxu1 %v590_v34 }
  0x20   :  { %518 = vmatpush3.bf16.msra.mxu0 %v591_v35 }
  0x21   :  { %540 = vmatpush3.bf16.msra.mxu1 %v592_v36  ;;  %550 = vmatprep.subr.bf16.mxu0 %v596_v50 }
  0x23   :  { %345 = vmatmul.mubr.bf16.vlgmr.msra.gmra.mrb[0].mxu0 %v45_v44 }
  0x24   :  { %385 = vmatmul.mubr.bf16.vlgmr.msra.gmra.mrb[0].mxu1 %v47_v47  ;;  %551 = vmatpush3.bf16.msra.mxu0 %v593_v49 }
  0x25   :  { %552 = vmatprep.subr.bf16.mxu0 %v596_v50  ;;  %554 = vmatprep.mubr.msk.bf16.mxu0 %vm597_vm0, %v596_v50 }
  0x28   :  { %553 = vmatpush3.bf16.msra.mxu0 %v594_v51 }
  0xf6   :  { %v519_v52 = vpop.f32.mrb[0].mxu0 }
  0xf7   :  { %v520_v54 = vpop.f32.mrb[1].mxu0  ;;  %v541_v55 = vpop.f32.mrb[0].mxu1 }
  0xf8   :  { %v521_v56 = vadd.f32 %v520_v54, %v519_v52  ;;  %v522_v57 = vpop.f32.mrb[2].mxu0  ;;  %v542_v58 = vpop.f32.mrb[1].mxu1 }
  0xf9   :  { %v523_v59 = vpop.f32.mrb[3].mxu0  ;;  %v543_v61 = vadd.f32 %v542_v58, %v541_v55  ;;  %v544_v62 = vpop.f32.mrb[2].mxu1 }
  0xfa   :  { %v347_v60 = vadd.f32 %v521_v56, %v466_v53  ;;  %v545_v63 = vpop.f32.mrb[3].mxu1 }
  0xfc   :  { %v387_v0 = vadd.f32 %v543_v61, %v347_v60 }
  0xfe   :  { %v392_v1 = vmax.f32 %v387_v0, 0.0 }
 0x100   :  { %v393_v2 = vpack.c.bf16 %v392_v1, %v392_v1 }
 0x102   :  { %555 = vmatmul.mubr.msk.bf16.vlgmr.msra.gmra.mrb[4].mxu0 %vm417_vm1, %v393_v2 }
 0x1d5   :  { %v455_v4 = vpop.f32.mrb[4].mxu0 }
 0x1d6   :  { %v456_v5 = vadd.f32 %v499_v3, %v455_v4  ;;  %v556_v6 = vpop.f32.mrb[5].mxu0 }
 0x1d7   :  { %v458_v7 = vpop.f32.mrb[6].mxu0 }
 0x1d8   :  { %461 = vst [vmem:[%s747_s5] sm:$0x3] %v456_v5  ;;  %v557_v8 = vpop.f32.mrb[7].mxu0 }

</bundles_post_ra>
